<compile_context>
chip_gen: v6e
topology: v6e:2x2x1
jax: 0.10.0
libtpu: 0.0.40
codegen_flags: <defaults>
</compile_context>

<pallas_src>
import functools
import numpy as np
import jax
import jax.numpy as jnp
from jax import lax
from jax.experimental import pallas as pl
from jax.experimental.pallas import tpu as pltpu

NUM_HEADS = 2
HEAD_DIM = 4
C = NUM_HEADS * HEAD_DIM          # swin embedding dim (8)
MLP_HIDDEN = 4 * C                # mlp_ratio = 4.0
DEPTH = 2                         # BasicLayer depth
VEC_W = 64                        # packed bias-row width (largest bias is b1: 64)
N_VEC_ROWS = 3 + DEPTH * 7        # 3 conv biases + 7 small vectors per swin block


# ------------------------------------------------------------------
# The single fused kernel: grid = (1,), whole batch per step.
# ------------------------------------------------------------------
def fused_decoder_kernel(x_ref, w1_ref, w2_ref, w3_ref, vec_ref, prelu_ref,
                         wqkv_ref, wp_ref, wm1_ref, wm2_ref, relb_ref, wtT_ref,
                         o_ref, *, B, S):
    M = B * S

    def vrow(r, n):                       # packed (1, n) bias/gain row
        return vec_ref[r:r + 1, :n]

    # ---- conv1/conv2/conv3: 1x1x1 Conv (== matmul) + InstanceNorm (per batch element,
    #      over spatial, no affine) + PReLU, on all B*S tokens at once ----
    def conv_in_prelu(h, w, bias, alpha):
        y = jnp.dot(h, w, preferred_element_type=jnp.float32) + bias     # (M, Cout)
        parts = []
        for b in range(B):                                               # per-batch stats
            yb = y[b * S:(b + 1) * S]
            mu = jnp.mean(yb, axis=0, keepdims=True)
            var = jnp.mean((yb - mu) ** 2, axis=0, keepdims=True)
            parts.append((yb - mu) * lax.rsqrt(var + 1e-5))
        y = jnp.concatenate(parts, axis=0)
        return jnp.where(y >= 0.0, y, alpha * y)                         # PReLU (scalar slope)

    h = x_ref[...]                                                       # (M, 96)
    h = conv_in_prelu(h, w1_ref[...], vrow(0, 64), prelu_ref[0])
    h = conv_in_prelu(h, w2_ref[...], vrow(1, 32), prelu_ref[1])
    h = conv_in_prelu(h, w3_ref[...], vrow(2, C), prelu_ref[2])          # (M, 8)

    # ---- BasicLayer: 2 x SwinTransformerBlock.  One window == full volume per batch
    #      element (spatial <= 7), shift = 0, no attention mask. ----
    for blk in range(DEPTH):
        base = 3 + blk * 7
        g1, be1 = vrow(base + 0, C), vrow(base + 1, C)
        bp = vrow(base + 2, C)
        g2, be2 = vrow(base + 3, C), vrow(base + 4, C)
        bm1 = vrow(base + 5, MLP_HIDDEN)
        bm2 = vrow(base + 6, C)

        # LayerNorm 1 (over C) for all tokens
        mu = jnp.mean(h, axis=-1, keepdims=True)
        var = jnp.mean((h - mu) ** 2, axis=-1, keepdims=True)
        hn = (h - mu) * lax.rsqrt(var + 1e-5) * g1 + be1

        # qkv projection (qkv_bias=False); columns ordered [q|k|v], head-major within each.
        # The head_dim**-0.5 scale is pre-folded into the q columns of wqkv.
        qkv = jnp.dot(hn, wqkv_ref[blk], preferred_element_type=jnp.float32)   # (M, 3C)

        parts = []
        for b in range(B):
            qkv_b = qkv[b * S:(b + 1) * S]                               # (S, 3C)
            acc = None
            for hh in range(NUM_HEADS):
                q = qkv_b[:, hh * HEAD_DIM:(hh + 1) * HEAD_DIM]
                k = qkv_b[:, C + hh * HEAD_DIM:C + (hh + 1) * HEAD_DIM]
                v = qkv_b[:, 2 * C + hh * HEAD_DIM:2 * C + (hh + 1) * HEAD_DIM]
                s = lax.dot_general(q, k, (((1,), (1,)), ((), ())),
                                    preferred_element_type=jnp.float32)  # (S, S)
                s = s + relb_ref[blk, hh]                                # relative position bias
                s = s - jnp.max(s, axis=-1, keepdims=True)
                p = jnp.exp(s)
                p = p * pl.reciprocal(jnp.sum(p, axis=-1, keepdims=True), approx=True)
                av = jnp.dot(p, v, preferred_element_type=jnp.float32)   # (S, head_dim)
                # fold the output projection per head (avoids lane-concat of head outputs)
                contrib = jnp.dot(av, wp_ref[blk, hh],
                                  preferred_element_type=jnp.float32)    # (S, C)
                acc = contrib if acc is None else acc + contrib
            parts.append(acc)
        attn_out = jnp.concatenate(parts, axis=0) + bp                   # (M, C)
        h = h + attn_out                                                 # residual (drop_path=0)

        # LayerNorm 2 + MLP (C -> 4C -> C)
        mu2 = jnp.mean(h, axis=-1, keepdims=True)
        var2 = jnp.mean((h - mu2) ** 2, axis=-1, keepdims=True)
        hn2 = (h - mu2) * lax.rsqrt(var2 + 1e-5) * g2 + be2
        m = jnp.dot(hn2, wm1_ref[blk], preferred_element_type=jnp.float32) + bm1
        # TODO(synk): nn.GELU is exact (erf-based); tanh approximation used (erf lowering on Mosaic not guaranteed).
        m = 0.5 * m * (1.0 + jnp.tanh(0.7978845608028654 * (m + 0.044715 * m * m * m)))
        m = jnp.dot(m, wm2_ref[blk], preferred_element_type=jnp.float32) + bm2
        h = h + m

    # ---- ConvTranspose3d(8 -> 1, k=2, s=2, pad=0, bias=False): per-voxel 8x(8x8) matmul.
    #      Emitted transposed, (8, M): one fully lane-dense vreg store (no masked vst). ----
    o_ref[...] = lax.dot_general(wtT_ref[...], h, (((1,), (1,)), ((), ())),
                                 preferred_element_type=jnp.float32)


def pallas_decoder(x_tokens, packed, *, B, S):
    M = B * S
    kernel = functools.partial(fused_decoder_kernel, B=B, S=S)

    def full(a):
        return pl.BlockSpec(a.shape, lambda i: (0,) * a.ndim)

    return pl.pallas_call(
        kernel,
        out_shape=jax.ShapeDtypeStruct((C, M), jnp.float32),
        grid=(1,),                      # single step: whole problem is a few hundred KiB
        in_specs=[
            full(x_tokens),
            full(packed["w1"]), full(packed["w2"]), full(packed["w3"]),
            full(packed["vecs"]),
            pl.BlockSpec(memory_space=pltpu.MemorySpace.SMEM),   # PReLU slopes (3,)
            full(packed["wqkv"]), full(packed["wp"]),
            full(packed["wm1"]), full(packed["wm2"]),
            full(packed["relb"]), full(packed["wtT"]),
        ],
        out_specs=pl.BlockSpec((C, M), lambda i: (0, 0)),
        compiler_params=pltpu.CompilerParams(dimension_semantics=("arbitrary",)),
    )(x_tokens, packed["w1"], packed["w2"], packed["w3"], packed["vecs"],
      packed["prelu"], packed["wqkv"], packed["wp"], packed["wm1"],
      packed["wm2"], packed["relb"], packed["wtT"])


# ------------------------------------------------------------------
# Host-side (one-time) helpers
# ------------------------------------------------------------------
def relative_position_bias(table, n, num_heads, window_size=(7, 7, 7)):
    # MONAI builds the index for window (7,7,7) and slices [:n,:n]; valid here because the
    # window collapses to the full volume.
    wd, wh, ww = window_size
    coords = np.stack(np.meshgrid(np.arange(wd), np.arange(wh), np.arange(ww), indexing="ij"))
    coords = coords.reshape(3, -1)                                       # (3, 343)
    rel = (coords[:, :, None] - coords[:, None, :]).transpose(1, 2, 0).astype(np.int64)
    rel = rel + np.array([wd - 1, wh - 1, ww - 1])
    rel[:, :, 0] *= (2 * wh - 1) * (2 * ww - 1)
    rel[:, :, 1] *= (2 * ww - 1)
    idx = rel.sum(-1)[:n, :n]                                            # (n, n)
    bias = np.asarray(table, np.float32)[idx.reshape(-1)]                # (n*n, heads)
    return bias.reshape(n, n, num_heads).transpose(2, 0, 1)              # (heads, n, n)


def init_params(key):
    """Synthetic parameters mirroring the PyTorch module's shapes."""
    keys = iter(jax.random.split(key, 48))

    def rand(shape, scale=0.1):
        return scale * jax.random.normal(next(keys), shape, dtype=jnp.float32)

    params = {
        "w1": rand((96, 64)), "b1": rand((64,)),     # Conv3d(96->64, k=1) as (Cin, Cout)
        "w2": rand((64, 32)), "b2": rand((32,)),     # Conv3d(64->32, k=1)
        "w3": rand((32, 8)),  "b3": rand((8,)),      # Conv3d(32->8, k=1)
        "prelu": jnp.array([0.25, 0.25, 0.25], dtype=jnp.float32),  # nn.PReLU default
        "wt": rand((8, 8)),   # ConvTranspose3d(8->1,k=2,s=2): columns = flattened (kd,kh,kw)
        "swin": [],
    }
    for _ in range(DEPTH):
        params["swin"].append({
            "g1": 1.0 + rand((C,), 0.02), "be1": rand((C,), 0.02),
            "wqkv": rand((C, 3 * C)),                          # qkv_bias=False
            "rel_table": rand((13 * 13 * 13, NUM_HEADS), 0.02),
            "wp": rand((C, C)), "bp": rand((C,), 0.02),
            "g2": 1.0 + rand((C,), 0.02), "be2": rand((C,), 0.02),
            "wm1": rand((C, MLP_HIDDEN)), "bm1": rand((MLP_HIDDEN,), 0.02),
            "wm2": rand((MLP_HIDDEN, C)), "bm2": rand((C,), 0.02),
        })
    return params


def prepare_params(params, S):
    """One-time repack of parameters into the fused kernel's layout (runs once, host side)."""
    rows = np.zeros((N_VEC_ROWS, VEC_W), np.float32)

    def setrow(r, v):
        v = np.asarray(v, np.float32).reshape(-1)
        rows[r, :v.shape[0]] = v

    setrow(0, params["b1"]); setrow(1, params["b2"]); setrow(2, params["b3"])

    wqkv, wp, wm1, wm2, relb = [], [], [], [], []
    scale = float(HEAD_DIM) ** -0.5
    for i, blk in enumerate(params["swin"]):
        base = 3 + i * 7
        setrow(base + 0, blk["g1"]); setrow(base + 1, blk["be1"])
        setrow(base + 2, blk["bp"])
        setrow(base + 3, blk["g2"]); setrow(base + 4, blk["be2"])
        setrow(base + 5, blk["bm1"]); setrow(base + 6, blk["bm2"])
        wq = np.array(blk["wqkv"], np.float32)
        wq[:, :C] *= scale                                  # fold head_dim**-0.5 into q cols
        wqkv.append(wq)
        wp.append(np.array(blk["wp"], np.float32).reshape(NUM_HEADS, HEAD_DIM, C))
        wm1.append(np.array(blk["wm1"], np.float32))
        wm2.append(np.array(blk["wm2"], np.float32))
        relb.append(relative_position_bias(blk["rel_table"], S, NUM_HEADS))

    return {
        "w1": jnp.asarray(params["w1"]),
        "w2": jnp.asarray(params["w2"]),
        "w3": jnp.asarray(params["w3"]),
        "vecs": jnp.asarray(rows),                                   # (17, 64)
        "prelu": jnp.asarray(params["prelu"]),                       # (3,)  -> SMEM
        "wqkv": jnp.asarray(np.stack(wqkv)),                         # (2, 8, 24)
        "wp": jnp.asarray(np.stack(wp)),                             # (2, 2, 4, 8)
        "wm1": jnp.asarray(np.stack(wm1)),                           # (2, 8, 32)
        "wm2": jnp.asarray(np.stack(wm2)),                           # (2, 32, 8)
        "relb": jnp.asarray(np.stack(relb)),                         # (2, 2, S, S)
        "wtT": jnp.asarray(np.array(params["wt"], np.float32).T),    # (8 kpos, 8 Cin)
    }


# ------------------------------------------------------------------
# Full forward (Segmentation_Decoder, exp=0)
# ------------------------------------------------------------------
def segmentation_decoder_forward(x1, x2, packed):
    B, c1, D, H, W = x1.shape
    assert c1 + x2.shape[1] == 96
    # MONAI get_window_size collapses the (7,7,7) window to the spatial size (shift -> 0)
    # when every spatial dim <= 7; the shifted-window / attention-mask path is not implemented.
    assert D <= 7 and H <= 7 and W <= 7
    S = D * H * W

    def to_tokens(x):                    # NCDHW -> (B, S, C)
        return jnp.transpose(x, (0, 2, 3, 4, 1)).reshape(x.shape[0], S, x.shape[1])

    xcat = jnp.concatenate([to_tokens(x1), to_tokens(x2)], axis=-1)     # torch.cat(dim=1)
    xcat = xcat.reshape(B * S, 96)

    y = pallas_decoder(xcat, packed, B=B, S=S)                          # (8, B*S)
    y = jnp.transpose(y, (1, 0)).reshape(B, D, H, W, 2, 2, 2)           # per-voxel 2x2x2 block
    y = jnp.transpose(y, (0, 1, 4, 2, 5, 3, 6)).reshape(B, 1, 2 * D, 2 * H, 2 * W)
    return y


if __name__ == "__main__":
    B, D, H, W = 2, 4, 4, 4
    key = jax.random.PRNGKey(0)
    k1, k2, kp = jax.random.split(key, 3)
    x1 = jax.random.normal(k1, (B, 64, D, H, W), dtype=jnp.float32)
    x2 = jax.random.normal(k2, (B, 32, D, H, W), dtype=jnp.float32)

    params = init_params(kp)
    packed = prepare_params(params, S=D * H * W)

    fwd = jax.jit(segmentation_decoder_forward)
    out = jax.block_until_ready(fwd(x1, x2, packed))
    assert out.shape == (B, 1, 2 * D, 2 * H, 2 * W), out.shape
    assert bool(jnp.all(jnp.isfinite(out)))
    print("KERNEL_OK")
</pallas_src>

<mosaic_0001>
module attributes {stable_mosaic.version = 11 : i64} {
  func.func @fused_decoder_kernel(%arg0: i32, %arg1: memref<128x96xf32, #tpu.memory_space<vmem>>, %arg2: memref<96x64xf32, #tpu.memory_space<vmem>>, %arg3: memref<64x32xf32, #tpu.memory_space<vmem>>, %arg4: memref<32x8xf32, #tpu.memory_space<vmem>>, %arg5: memref<17x64xf32, #tpu.memory_space<vmem>>, %arg6: memref<3xf32, #tpu.memory_space<smem>>, %arg7: memref<2x8x24xf32, #tpu.memory_space<vmem>>, %arg8: memref<2x2x4x8xf32, #tpu.memory_space<vmem>>, %arg9: memref<2x8x32xf32, #tpu.memory_space<vmem>>, %arg10: memref<2x32x8xf32, #tpu.memory_space<vmem>>, %arg11: memref<2x2x64x64xf32, #tpu.memory_space<vmem>>, %arg12: memref<8x8xf32, #tpu.memory_space<vmem>>, %arg13: memref<8x128xf32, #tpu.memory_space<vmem>>) attributes {dimension_semantics = [#tpu.dimension_semantics<arbitrary>], iteration_bounds = array<i64: 1>, scalar_prefetch = 0 : i64, scratch_operands = 0 : i64, tpu.core_type = #tpu.core_type<tc>, window_params = [{pipeline_mode = #tpu.pipeline_mode<synchronous>, transform_indices = @transform_0, window_bounds = array<i64: 128, 96>}, {pipeline_mode = #tpu.pipeline_mode<synchronous>, transform_indices = @transform_1, window_bounds = array<i64: 96, 64>}, {pipeline_mode = #tpu.pipeline_mode<synchronous>, transform_indices = @transform_2, window_bounds = array<i64: 64, 32>}, {pipeline_mode = #tpu.pipeline_mode<synchronous>, transform_indices = @transform_3, window_bounds = array<i64: 32, 8>}, {pipeline_mode = #tpu.pipeline_mode<synchronous>, transform_indices = @transform_4, window_bounds = array<i64: 17, 64>}, {transform_indices = @transform_5, window_bounds = array<i64: 3>}, {pipeline_mode = #tpu.pipeline_mode<synchronous>, transform_indices = @transform_6, window_bounds = array<i64: 2, 8, 24>}, {pipeline_mode = #tpu.pipeline_mode<synchronous>, transform_indices = @transform_7, window_bounds = array<i64: 2, 2, 4, 8>}, {pipeline_mode = #tpu.pipeline_mode<synchronous>, transform_indices = @transform_8, window_bounds = array<i64: 2, 8, 32>}, {pipeline_mode = #tpu.pipeline_mode<synchronous>, transform_indices = @transform_9, window_bounds = array<i64: 2, 32, 8>}, {pipeline_mode = #tpu.pipeline_mode<synchronous>, transform_indices = @transform_10, window_bounds = array<i64: 2, 2, 64, 64>}, {pipeline_mode = #tpu.pipeline_mode<synchronous>, transform_indices = @transform_11, window_bounds = array<i64: 8, 8>}, {pipeline_mode = #tpu.pipeline_mode<synchronous>, transform_indices = @transform_12, window_bounds = array<i64: 8, 128>}]} {
    %c0 = arith.constant 0 : index
    %c0_0 = arith.constant 0 : index
    %0 = vector.load %arg1[%c0, %c0_0] : memref<128x96xf32, #tpu.memory_space<vmem>>, vector<128x96xf32>
    %c0_1 = arith.constant 0 : index
    %c0_2 = arith.constant 0 : index
    %1 = vector.load %arg2[%c0_1, %c0_2] : memref<96x64xf32, #tpu.memory_space<vmem>>, vector<96x64xf32>
    %c0_3 = arith.constant 0 : index
    %c0_4 = arith.constant 0 : index
    %2 = vector.load %arg5[%c0_3, %c0_4] : memref<17x64xf32, #tpu.memory_space<vmem>>, vector<1x64xf32>
    %c0_5 = arith.constant 0 : index
    %3 = memref.load %arg6[%c0_5] : memref<3xf32, #tpu.memory_space<smem>>
    %cst = arith.constant dense<0.000000e+00> : vector<128x64xf32>
    %4 = tpu.matmul %0, %1, %cst {dimension_numbers = #tpu.dot_dimension_numbers<[1], [0], [0], [1], [0, 0, 1, 1], [], []>} : vector<128x96xf32>, vector<96x64xf32>, vector<128x64xf32> -> vector<128x64xf32>
    %5 = vector.broadcast %2 : vector<1x64xf32> to vector<128x64xf32>
    %6 = arith.addf %4, %5 : vector<128x64xf32>
    %7 = vector.extract_strided_slice %6 {offsets = [0, 0], sizes = [64, 64], strides = [1, 1]} : vector<128x64xf32> to vector<64x64xf32>
    %cst_6 = arith.constant dense<0.000000e+00> : vector<64xf32>
    %8 = vector.multi_reduction <add>, %7, %cst_6 [0] : vector<64x64xf32> to vector<64xf32>
    %9 = vector.shape_cast %8 : vector<64xf32> to vector<1x64xf32>
    %cst_7 = arith.constant 6.400000e+01 : f32
    %10 = vector.broadcast %cst_7 : f32 to vector<1x64xf32>
    %11 = arith.divf %9, %10 : vector<1x64xf32>
    %12 = vector.broadcast %11 : vector<1x64xf32> to vector<64x64xf32>
    %13 = arith.subf %7, %12 : vector<64x64xf32>
    %14 = arith.mulf %13, %13 : vector<64x64xf32>
    %cst_8 = arith.constant dense<0.000000e+00> : vector<64xf32>
    %15 = vector.multi_reduction <add>, %14, %cst_8 [0] : vector<64x64xf32> to vector<64xf32>
    %16 = vector.shape_cast %15 : vector<64xf32> to vector<1x64xf32>
    %cst_9 = arith.constant 6.400000e+01 : f32
    %17 = vector.broadcast %cst_9 : f32 to vector<1x64xf32>
    %18 = arith.divf %16, %17 : vector<1x64xf32>
    %19 = vector.broadcast %11 : vector<1x64xf32> to vector<64x64xf32>
    %20 = arith.subf %7, %19 : vector<64x64xf32>
    %cst_10 = arith.constant 9.99999974E-6 : f32
    %21 = vector.broadcast %cst_10 : f32 to vector<1x64xf32>
    %22 = arith.addf %18, %21 : vector<1x64xf32>
    %23 = math.rsqrt %22 : vector<1x64xf32>
    %24 = vector.broadcast %23 : vector<1x64xf32> to vector<64x64xf32>
    %25 = arith.mulf %20, %24 : vector<64x64xf32>
    %26 = vector.extract_strided_slice %6 {offsets = [64, 0], sizes = [64, 64], strides = [1, 1]} : vector<128x64xf32> to vector<64x64xf32>
    %cst_11 = arith.constant dense<0.000000e+00> : vector<64xf32>
    %27 = vector.multi_reduction <add>, %26, %cst_11 [0] : vector<64x64xf32> to vector<64xf32>
    %28 = vector.shape_cast %27 : vector<64xf32> to vector<1x64xf32>
    %cst_12 = arith.constant 6.400000e+01 : f32
    %29 = vector.broadcast %cst_12 : f32 to vector<1x64xf32>
    %30 = arith.divf %28, %29 : vector<1x64xf32>
    %31 = vector.broadcast %30 : vector<1x64xf32> to vector<64x64xf32>
    %32 = arith.subf %26, %31 : vector<64x64xf32>
    %33 = arith.mulf %32, %32 : vector<64x64xf32>
    %cst_13 = arith.constant dense<0.000000e+00> : vector<64xf32>
    %34 = vector.multi_reduction <add>, %33, %cst_13 [0] : vector<64x64xf32> to vector<64xf32>
    %35 = vector.shape_cast %34 : vector<64xf32> to vector<1x64xf32>
    %cst_14 = arith.constant 6.400000e+01 : f32
    %36 = vector.broadcast %cst_14 : f32 to vector<1x64xf32>
    %37 = arith.divf %35, %36 : vector<1x64xf32>
    %38 = vector.broadcast %30 : vector<1x64xf32> to vector<64x64xf32>
    %39 = arith.subf %26, %38 : vector<64x64xf32>
    %cst_15 = arith.constant 9.99999974E-6 : f32
    %40 = vector.broadcast %cst_15 : f32 to vector<1x64xf32>
    %41 = arith.addf %37, %40 : vector<1x64xf32>
    %42 = math.rsqrt %41 : vector<1x64xf32>
    %43 = vector.broadcast %42 : vector<1x64xf32> to vector<64x64xf32>
    %44 = arith.mulf %39, %43 : vector<64x64xf32>
    %45 = tpu.concatenate %25, %44 in 0 : vector<64x64xf32>, vector<64x64xf32> -> vector<128x64xf32>
    %cst_16 = arith.constant 0.000000e+00 : f32
    %46 = vector.broadcast %cst_16 : f32 to vector<128x64xf32>
    %47 = arith.cmpf oge, %45, %46 : vector<128x64xf32>
    %48 = vector.broadcast %3 : f32 to vector<128x64xf32>
    %49 = arith.mulf %48, %45 : vector<128x64xf32>
    %50 = arith.select %47, %45, %49 : vector<128x64xi1>, vector<128x64xf32>
    %c0_17 = arith.constant 0 : index
    %c0_18 = arith.constant 0 : index
    %51 = vector.load %arg3[%c0_17, %c0_18] : memref<64x32xf32, #tpu.memory_space<vmem>>, vector<64x32xf32>
    %c1 = arith.constant 1 : index
    %c0_19 = arith.constant 0 : index
    %52 = vector.load %arg5[%c1, %c0_19] : memref<17x64xf32, #tpu.memory_space<vmem>>, vector<1x32xf32>
    %c1_20 = arith.constant 1 : index
    %53 = memref.load %arg6[%c1_20] : memref<3xf32, #tpu.memory_space<smem>>
    %cst_21 = arith.constant dense<0.000000e+00> : vector<128x32xf32>
    %54 = tpu.matmul %50, %51, %cst_21 {dimension_numbers = #tpu.dot_dimension_numbers<[1], [0], [0], [1], [0, 0, 1, 1], [], []>} : vector<128x64xf32>, vector<64x32xf32>, vector<128x32xf32> -> vector<128x32xf32>
    %55 = vector.broadcast %52 : vector<1x32xf32> to vector<128x32xf32>
    %56 = arith.addf %54, %55 : vector<128x32xf32>
    %57 = vector.extract_strided_slice %56 {offsets = [0, 0], sizes = [64, 32], strides = [1, 1]} : vector<128x32xf32> to vector<64x32xf32>
    %cst_22 = arith.constant dense<0.000000e+00> : vector<32xf32>
    %58 = vector.multi_reduction <add>, %57, %cst_22 [0] : vector<64x32xf32> to vector<32xf32>
    %59 = vector.shape_cast %58 : vector<32xf32> to vector<1x32xf32>
    %cst_23 = arith.constant 6.400000e+01 : f32
    %60 = vector.broadcast %cst_23 : f32 to vector<1x32xf32>
    %61 = arith.divf %59, %60 : vector<1x32xf32>
    %62 = vector.broadcast %61 : vector<1x32xf32> to vector<64x32xf32>
    %63 = arith.subf %57, %62 : vector<64x32xf32>
    %64 = arith.mulf %63, %63 : vector<64x32xf32>
    %cst_24 = arith.constant dense<0.000000e+00> : vector<32xf32>
    %65 = vector.multi_reduction <add>, %64, %cst_24 [0] : vector<64x32xf32> to vector<32xf32>
    %66 = vector.shape_cast %65 : vector<32xf32> to vector<1x32xf32>
    %cst_25 = arith.constant 6.400000e+01 : f32
    %67 = vector.broadcast %cst_25 : f32 to vector<1x32xf32>
    %68 = arith.divf %66, %67 : vector<1x32xf32>
    %69 = vector.broadcast %61 : vector<1x32xf32> to vector<64x32xf32>
    %70 = arith.subf %57, %69 : vector<64x32xf32>
    %cst_26 = arith.constant 9.99999974E-6 : f32
    %71 = vector.broadcast %cst_26 : f32 to vector<1x32xf32>
    %72 = arith.addf %68, %71 : vector<1x32xf32>
    %73 = math.rsqrt %72 : vector<1x32xf32>
    %74 = vector.broadcast %73 : vector<1x32xf32> to vector<64x32xf32>
    %75 = arith.mulf %70, %74 : vector<64x32xf32>
    %76 = vector.extract_strided_slice %56 {offsets = [64, 0], sizes = [64, 32], strides = [1, 1]} : vector<128x32xf32> to vector<64x32xf32>
    %cst_27 = arith.constant dense<0.000000e+00> : vector<32xf32>
    %77 = vector.multi_reduction <add>, %76, %cst_27 [0] : vector<64x32xf32> to vector<32xf32>
    %78 = vector.shape_cast %77 : vector<32xf32> to vector<1x32xf32>
    %cst_28 = arith.constant 6.400000e+01 : f32
    %79 = vector.broadcast %cst_28 : f32 to vector<1x32xf32>
    %80 = arith.divf %78, %79 : vector<1x32xf32>
    %81 = vector.broadcast %80 : vector<1x32xf32> to vector<64x32xf32>
    %82 = arith.subf %76, %81 : vector<64x32xf32>
    %83 = arith.mulf %82, %82 : vector<64x32xf32>
    %cst_29 = arith.constant dense<0.000000e+00> : vector<32xf32>
    %84 = vector.multi_reduction <add>, %83, %cst_29 [0] : vector<64x32xf32> to vector<32xf32>
    %85 = vector.shape_cast %84 : vector<32xf32> to vector<1x32xf32>
    %cst_30 = arith.constant 6.400000e+01 : f32
    %86 = vector.broadcast %cst_30 : f32 to vector<1x32xf32>
    %87 = arith.divf %85, %86 : vector<1x32xf32>
    %88 = vector.broadcast %80 : vector<1x32xf32> to vector<64x32xf32>
    %89 = arith.subf %76, %88 : vector<64x32xf32>
    %cst_31 = arith.constant 9.99999974E-6 : f32
    %90 = vector.broadcast %cst_31 : f32 to vector<1x32xf32>
    %91 = arith.addf %87, %90 : vector<1x32xf32>
    %92 = math.rsqrt %91 : vector<1x32xf32>
    %93 = vector.broadcast %92 : vector<1x32xf32> to vector<64x32xf32>
    %94 = arith.mulf %89, %93 : vector<64x32xf32>
    %95 = tpu.concatenate %75, %94 in 0 : vector<64x32xf32>, vector<64x32xf32> -> vector<128x32xf32>
    %cst_32 = arith.constant 0.000000e+00 : f32
    %96 = vector.broadcast %cst_32 : f32 to vector<128x32xf32>
    %97 = arith.cmpf oge, %95, %96 : vector<128x32xf32>
    %98 = vector.broadcast %53 : f32 to vector<128x32xf32>
    %99 = arith.mulf %98, %95 : vector<128x32xf32>
    %100 = arith.select %97, %95, %99 : vector<128x32xi1>, vector<128x32xf32>
    %c0_33 = arith.constant 0 : index
    %c0_34 = arith.constant 0 : index
    %101 = vector.load %arg4[%c0_33, %c0_34] : memref<32x8xf32, #tpu.memory_space<vmem>>, vector<32x8xf32>
    %c2 = arith.constant 2 : index
    %c0_35 = arith.constant 0 : index
    %102 = vector.load %arg5[%c2, %c0_35] : memref<17x64xf32, #tpu.memory_space<vmem>>, vector<1x8xf32>
    %c2_36 = arith.constant 2 : index
    %103 = memref.load %arg6[%c2_36] : memref<3xf32, #tpu.memory_space<smem>>
    %cst_37 = arith.constant dense<0.000000e+00> : vector<128x8xf32>
    %104 = tpu.matmul %100, %101, %cst_37 {dimension_numbers = #tpu.dot_dimension_numbers<[1], [0], [0], [1], [0, 0, 1, 1], [], []>} : vector<128x32xf32>, vector<32x8xf32>, vector<128x8xf32> -> vector<128x8xf32>
    %105 = vector.broadcast %102 : vector<1x8xf32> to vector<128x8xf32>
    %106 = arith.addf %104, %105 : vector<128x8xf32>
    %107 = vector.extract_strided_slice %106 {offsets = [0, 0], sizes = [64, 8], strides = [1, 1]} : vector<128x8xf32> to vector<64x8xf32>
    %cst_38 = arith.constant dense<0.000000e+00> : vector<8xf32>
    %108 = vector.multi_reduction <add>, %107, %cst_38 [0] : vector<64x8xf32> to vector<8xf32>
    %109 = vector.shape_cast %108 : vector<8xf32> to vector<1x8xf32>
    %cst_39 = arith.constant 6.400000e+01 : f32
    %110 = vector.broadcast %cst_39 : f32 to vector<1x8xf32>
    %111 = arith.divf %109, %110 : vector<1x8xf32>
    %112 = vector.broadcast %111 : vector<1x8xf32> to vector<64x8xf32>
    %113 = arith.subf %107, %112 : vector<64x8xf32>
    %114 = arith.mulf %113, %113 : vector<64x8xf32>
    %cst_40 = arith.constant dense<0.000000e+00> : vector<8xf32>
    %115 = vector.multi_reduction <add>, %114, %cst_40 [0] : vector<64x8xf32> to vector<8xf32>
    %116 = vector.shape_cast %115 : vector<8xf32> to vector<1x8xf32>
    %cst_41 = arith.constant 6.400000e+01 : f32
    %117 = vector.broadcast %cst_41 : f32 to vector<1x8xf32>
    %118 = arith.divf %116, %117 : vector<1x8xf32>
    %119 = vector.broadcast %111 : vector<1x8xf32> to vector<64x8xf32>
    %120 = arith.subf %107, %119 : vector<64x8xf32>
    %cst_42 = arith.constant 9.99999974E-6 : f32
    %121 = vector.broadcast %cst_42 : f32 to vector<1x8xf32>
    %122 = arith.addf %118, %121 : vector<1x8xf32>
    %123 = math.rsqrt %122 : vector<1x8xf32>
    %124 = vector.broadcast %123 : vector<1x8xf32> to vector<64x8xf32>
    %125 = arith.mulf %120, %124 : vector<64x8xf32>
    %126 = vector.extract_strided_slice %106 {offsets = [64, 0], sizes = [64, 8], strides = [1, 1]} : vector<128x8xf32> to vector<64x8xf32>
    %cst_43 = arith.constant dense<0.000000e+00> : vector<8xf32>
    %127 = vector.multi_reduction <add>, %126, %cst_43 [0] : vector<64x8xf32> to vector<8xf32>
    %128 = vector.shape_cast %127 : vector<8xf32> to vector<1x8xf32>
    %cst_44 = arith.constant 6.400000e+01 : f32
    %129 = vector.broadcast %cst_44 : f32 to vector<1x8xf32>
    %130 = arith.divf %128, %129 : vector<1x8xf32>
    %131 = vector.broadcast %130 : vector<1x8xf32> to vector<64x8xf32>
    %132 = arith.subf %126, %131 : vector<64x8xf32>
    %133 = arith.mulf %132, %132 : vector<64x8xf32>
    %cst_45 = arith.constant dense<0.000000e+00> : vector<8xf32>
    %134 = vector.multi_reduction <add>, %133, %cst_45 [0] : vector<64x8xf32> to vector<8xf32>
    %135 = vector.shape_cast %134 : vector<8xf32> to vector<1x8xf32>
    %cst_46 = arith.constant 6.400000e+01 : f32
    %136 = vector.broadcast %cst_46 : f32 to vector<1x8xf32>
    %137 = arith.divf %135, %136 : vector<1x8xf32>
    %138 = vector.broadcast %130 : vector<1x8xf32> to vector<64x8xf32>
    %139 = arith.subf %126, %138 : vector<64x8xf32>
    %cst_47 = arith.constant 9.99999974E-6 : f32
    %140 = vector.broadcast %cst_47 : f32 to vector<1x8xf32>
    %141 = arith.addf %137, %140 : vector<1x8xf32>
    %142 = math.rsqrt %141 : vector<1x8xf32>
    %143 = vector.broadcast %142 : vector<1x8xf32> to vector<64x8xf32>
    %144 = arith.mulf %139, %143 : vector<64x8xf32>
    %145 = tpu.concatenate %125, %144 in 0 : vector<64x8xf32>, vector<64x8xf32> -> vector<128x8xf32>
    %cst_48 = arith.constant 0.000000e+00 : f32
    %146 = vector.broadcast %cst_48 : f32 to vector<128x8xf32>
    %147 = arith.cmpf oge, %145, %146 : vector<128x8xf32>
    %148 = vector.broadcast %103 : f32 to vector<128x8xf32>
    %149 = arith.mulf %148, %145 : vector<128x8xf32>
    %150 = arith.select %147, %145, %149 : vector<128x8xi1>, vector<128x8xf32>
    %c3 = arith.constant 3 : index
    %c0_49 = arith.constant 0 : index
    %151 = vector.load %arg5[%c3, %c0_49] : memref<17x64xf32, #tpu.memory_space<vmem>>, vector<1x8xf32>
    %c4 = arith.constant 4 : index
    %c0_50 = arith.constant 0 : index
    %152 = vector.load %arg5[%c4, %c0_50] : memref<17x64xf32, #tpu.memory_space<vmem>>, vector<1x8xf32>
    %c5 = arith.constant 5 : index
    %c0_51 = arith.constant 0 : index
    %153 = vector.load %arg5[%c5, %c0_51] : memref<17x64xf32, #tpu.memory_space<vmem>>, vector<1x8xf32>
    %c6 = arith.constant 6 : index
    %c0_52 = arith.constant 0 : index
    %154 = vector.load %arg5[%c6, %c0_52] : memref<17x64xf32, #tpu.memory_space<vmem>>, vector<1x8xf32>
    %c7 = arith.constant 7 : index
    %c0_53 = arith.constant 0 : index
    %155 = vector.load %arg5[%c7, %c0_53] : memref<17x64xf32, #tpu.memory_space<vmem>>, vector<1x8xf32>
    %c8 = arith.constant 8 : index
    %c0_54 = arith.constant 0 : index
    %156 = vector.load %arg5[%c8, %c0_54] : memref<17x64xf32, #tpu.memory_space<vmem>>, vector<1x32xf32>
    %c9 = arith.constant 9 : index
    %c0_55 = arith.constant 0 : index
    %157 = vector.load %arg5[%c9, %c0_55] : memref<17x64xf32, #tpu.memory_space<vmem>>, vector<1x8xf32>
    %cst_56 = arith.constant dense<0.000000e+00> : vector<128xf32>
    %158 = vector.multi_reduction <add>, %150, %cst_56 [1] : vector<128x8xf32> to vector<128xf32>
    %159 = vector.shape_cast %158 : vector<128xf32> to vector<128x1xf32>
    %cst_57 = arith.constant 8.000000e+00 : f32
    %160 = vector.broadcast %cst_57 : f32 to vector<128x1xf32>
    %161 = arith.divf %159, %160 : vector<128x1xf32>
    %162 = vector.broadcast %161 : vector<128x1xf32> to vector<128x8xf32>
    %163 = arith.subf %150, %162 : vector<128x8xf32>
    %164 = arith.mulf %163, %163 : vector<128x8xf32>
    %cst_58 = arith.constant dense<0.000000e+00> : vector<128xf32>
    %165 = vector.multi_reduction <add>, %164, %cst_58 [1] : vector<128x8xf32> to vector<128xf32>
    %166 = vector.shape_cast %165 : vector<128xf32> to vector<128x1xf32>
    %cst_59 = arith.constant 8.000000e+00 : f32
    %167 = vector.broadcast %cst_59 : f32 to vector<128x1xf32>
    %168 = arith.divf %166, %167 : vector<128x1xf32>
    %169 = vector.broadcast %161 : vector<128x1xf32> to vector<128x8xf32>
    %170 = arith.subf %150, %169 : vector<128x8xf32>
    %cst_60 = arith.constant 9.99999974E-6 : f32
    %171 = vector.broadcast %cst_60 : f32 to vector<128x1xf32>
    %172 = arith.addf %168, %171 : vector<128x1xf32>
    %173 = math.rsqrt %172 : vector<128x1xf32>
    %174 = vector.broadcast %173 : vector<128x1xf32> to vector<128x8xf32>
    %175 = arith.mulf %170, %174 : vector<128x8xf32>
    %176 = vector.broadcast %151 : vector<1x8xf32> to vector<128x8xf32>
    %177 = arith.mulf %175, %176 : vector<128x8xf32>
    %178 = vector.broadcast %152 : vector<1x8xf32> to vector<128x8xf32>
    %179 = arith.addf %177, %178 : vector<128x8xf32>
    %c0_61 = arith.constant 0 : index
    %c0_62 = arith.constant 0 : index
    %c0_63 = arith.constant 0 : index
    %180 = vector.load %arg7[%c0_61, %c0_62, %c0_63] : memref<2x8x24xf32, #tpu.memory_space<vmem>>, vector<1x8x24xf32>
    %181 = vector.shape_cast %180 : vector<1x8x24xf32> to vector<8x24xf32>
    %cst_64 = arith.constant dense<0.000000e+00> : vector<128x24xf32>
    %182 = tpu.matmul %179, %181, %cst_64 {dimension_numbers = #tpu.dot_dimension_numbers<[1], [0], [0], [1], [0, 0, 1, 1], [], []>} : vector<128x8xf32>, vector<8x24xf32>, vector<128x24xf32> -> vector<128x24xf32>
    %183 = vector.extract_strided_slice %182 {offsets = [0, 0], sizes = [64, 24], strides = [1, 1]} : vector<128x24xf32> to vector<64x24xf32>
    %184 = vector.extract_strided_slice %183 {offsets = [0, 0], sizes = [64, 4], strides = [1, 1]} : vector<64x24xf32> to vector<64x4xf32>
    %185 = vector.extract_strided_slice %183 {offsets = [0, 8], sizes = [64, 4], strides = [1, 1]} : vector<64x24xf32> to vector<64x4xf32>
    %186 = vector.extract_strided_slice %183 {offsets = [0, 16], sizes = [64, 4], strides = [1, 1]} : vector<64x24xf32> to vector<64x4xf32>
    %cst_65 = arith.constant dense<0.000000e+00> : vector<64x64xf32>
    %187 = tpu.matmul %184, %185, %cst_65 {dimension_numbers = #tpu.dot_dimension_numbers<[1], [1], [0], [0], [0, 0, 1, 0], [], []>} : vector<64x4xf32>, vector<64x4xf32>, vector<64x64xf32> -> vector<64x64xf32>
    %c0_66 = arith.constant 0 : index
    %c0_67 = arith.constant 0 : index
    %c0_68 = arith.constant 0 : index
    %c0_69 = arith.constant 0 : index
    %188 = vector.load %arg11[%c0_66, %c0_67, %c0_68, %c0_69] : memref<2x2x64x64xf32, #tpu.memory_space<vmem>>, vector<1x1x64x64xf32>
    %189 = vector.shape_cast %188 : vector<1x1x64x64xf32> to vector<64x64xf32>
    %190 = arith.addf %187, %189 : vector<64x64xf32>
    %cst_70 = arith.constant dense<0xFF800000> : vector<64xf32>
    %191 = vector.multi_reduction <maximumf>, %190, %cst_70 [1] : vector<64x64xf32> to vector<64xf32>
    %192 = vector.shape_cast %191 : vector<64xf32> to vector<64x1xf32>
    %193 = vector.broadcast %192 : vector<64x1xf32> to vector<64x64xf32>
    %194 = arith.subf %190, %193 : vector<64x64xf32>
    %195 = math.exp %194 : vector<64x64xf32>
    %cst_71 = arith.constant dense<0.000000e+00> : vector<64xf32>
    %196 = vector.multi_reduction <add>, %195, %cst_71 [1] : vector<64x64xf32> to vector<64xf32>
    %197 = vector.shape_cast %196 : vector<64xf32> to vector<64x1xf32>
    %198 = tpu.reciprocal %197 {approx = true} : vector<64x1xf32> -> vector<64x1xf32>
    %199 = vector.broadcast %198 : vector<64x1xf32> to vector<64x64xf32>
    %200 = arith.mulf %195, %199 : vector<64x64xf32>
    %cst_72 = arith.constant dense<0.000000e+00> : vector<64x4xf32>
    %201 = tpu.matmul %200, %186, %cst_72 {dimension_numbers = #tpu.dot_dimension_numbers<[1], [0], [0], [1], [0, 0, 1, 1], [], []>} : vector<64x64xf32>, vector<64x4xf32>, vector<64x4xf32> -> vector<64x4xf32>
    %c0_73 = arith.constant 0 : index
    %c0_74 = arith.constant 0 : index
    %c0_75 = arith.constant 0 : index
    %c0_76 = arith.constant 0 : index
    %202 = vector.load %arg8[%c0_73, %c0_74, %c0_75, %c0_76] : memref<2x2x4x8xf32, #tpu.memory_space<vmem>>, vector<1x1x4x8xf32>
    %203 = vector.shape_cast %202 : vector<1x1x4x8xf32> to vector<4x8xf32>
    %cst_77 = arith.constant dense<0.000000e+00> : vector<64x8xf32>
    %204 = tpu.matmul %201, %203, %cst_77 {dimension_numbers = #tpu.dot_dimension_numbers<[1], [0], [0], [1], [0, 0, 1, 1], [], []>} : vector<64x4xf32>, vector<4x8xf32>, vector<64x8xf32> -> vector<64x8xf32>
    %205 = vector.extract_strided_slice %183 {offsets = [0, 4], sizes = [64, 4], strides = [1, 1]} : vector<64x24xf32> to vector<64x4xf32>
    %206 = vector.extract_strided_slice %183 {offsets = [0, 12], sizes = [64, 4], strides = [1, 1]} : vector<64x24xf32> to vector<64x4xf32>
    %207 = vector.extract_strided_slice %183 {offsets = [0, 20], sizes = [64, 4], strides = [1, 1]} : vector<64x24xf32> to vector<64x4xf32>
    %cst_78 = arith.constant dense<0.000000e+00> : vector<64x64xf32>
    %208 = tpu.matmul %205, %206, %cst_78 {dimension_numbers = #tpu.dot_dimension_numbers<[1], [1], [0], [0], [0, 0, 1, 0], [], []>} : vector<64x4xf32>, vector<64x4xf32>, vector<64x64xf32> -> vector<64x64xf32>
    %c0_79 = arith.constant 0 : index
    %c1_80 = arith.constant 1 : index
    %c0_81 = arith.constant 0 : index
    %c0_82 = arith.constant 0 : index
    %209 = vector.load %arg11[%c0_79, %c1_80, %c0_81, %c0_82] : memref<2x2x64x64xf32, #tpu.memory_space<vmem>>, vector<1x1x64x64xf32>
    %210 = vector.shape_cast %209 : vector<1x1x64x64xf32> to vector<64x64xf32>
    %211 = arith.addf %208, %210 : vector<64x64xf32>
    %cst_83 = arith.constant dense<0xFF800000> : vector<64xf32>
    %212 = vector.multi_reduction <maximumf>, %211, %cst_83 [1] : vector<64x64xf32> to vector<64xf32>
    %213 = vector.shape_cast %212 : vector<64xf32> to vector<64x1xf32>
    %214 = vector.broadcast %213 : vector<64x1xf32> to vector<64x64xf32>
    %215 = arith.subf %211, %214 : vector<64x64xf32>
    %216 = math.exp %215 : vector<64x64xf32>
    %cst_84 = arith.constant dense<0.000000e+00> : vector<64xf32>
    %217 = vector.multi_reduction <add>, %216, %cst_84 [1] : vector<64x64xf32> to vector<64xf32>
    %218 = vector.shape_cast %217 : vector<64xf32> to vector<64x1xf32>
    %219 = tpu.reciprocal %218 {approx = true} : vector<64x1xf32> -> vector<64x1xf32>
    %220 = vector.broadcast %219 : vector<64x1xf32> to vector<64x64xf32>
    %221 = arith.mulf %216, %220 : vector<64x64xf32>
    %cst_85 = arith.constant dense<0.000000e+00> : vector<64x4xf32>
    %222 = tpu.matmul %221, %207, %cst_85 {dimension_numbers = #tpu.dot_dimension_numbers<[1], [0], [0], [1], [0, 0, 1, 1], [], []>} : vector<64x64xf32>, vector<64x4xf32>, vector<64x4xf32> -> vector<64x4xf32>
    %c0_86 = arith.constant 0 : index
    %c1_87 = arith.constant 1 : index
    %c0_88 = arith.constant 0 : index
    %c0_89 = arith.constant 0 : index
    %223 = vector.load %arg8[%c0_86, %c1_87, %c0_88, %c0_89] : memref<2x2x4x8xf32, #tpu.memory_space<vmem>>, vector<1x1x4x8xf32>
    %224 = vector.shape_cast %223 : vector<1x1x4x8xf32> to vector<4x8xf32>
    %cst_90 = arith.constant dense<0.000000e+00> : vector<64x8xf32>
    %225 = tpu.matmul %222, %224, %cst_90 {dimension_numbers = #tpu.dot_dimension_numbers<[1], [0], [0], [1], [0, 0, 1, 1], [], []>} : vector<64x4xf32>, vector<4x8xf32>, vector<64x8xf32> -> vector<64x8xf32>
    %226 = arith.addf %204, %225 : vector<64x8xf32>
    %227 = vector.extract_strided_slice %182 {offsets = [64, 0], sizes = [64, 24], strides = [1, 1]} : vector<128x24xf32> to vector<64x24xf32>
    %228 = vector.extract_strided_slice %227 {offsets = [0, 0], sizes = [64, 4], strides = [1, 1]} : vector<64x24xf32> to vector<64x4xf32>
    %229 = vector.extract_strided_slice %227 {offsets = [0, 8], sizes = [64, 4], strides = [1, 1]} : vector<64x24xf32> to vector<64x4xf32>
    %230 = vector.extract_strided_slice %227 {offsets = [0, 16], sizes = [64, 4], strides = [1, 1]} : vector<64x24xf32> to vector<64x4xf32>
    %cst_91 = arith.constant dense<0.000000e+00> : vector<64x64xf32>
    %231 = tpu.matmul %228, %229, %cst_91 {dimension_numbers = #tpu.dot_dimension_numbers<[1], [1], [0], [0], [0, 0, 1, 0], [], []>} : vector<64x4xf32>, vector<64x4xf32>, vector<64x64xf32> -> vector<64x64xf32>
    %c0_92 = arith.constant 0 : index
    %c0_93 = arith.constant 0 : index
    %c0_94 = arith.constant 0 : index
    %c0_95 = arith.constant 0 : index
    %232 = vector.load %arg11[%c0_92, %c0_93, %c0_94, %c0_95] : memref<2x2x64x64xf32, #tpu.memory_space<vmem>>, vector<1x1x64x64xf32>
    %233 = vector.shape_cast %232 : vector<1x1x64x64xf32> to vector<64x64xf32>
    %234 = arith.addf %231, %233 : vector<64x64xf32>
    %cst_96 = arith.constant dense<0xFF800000> : vector<64xf32>
    %235 = vector.multi_reduction <maximumf>, %234, %cst_96 [1] : vector<64x64xf32> to vector<64xf32>
    %236 = vector.shape_cast %235 : vector<64xf32> to vector<64x1xf32>
    %237 = vector.broadcast %236 : vector<64x1xf32> to vector<64x64xf32>
    %238 = arith.subf %234, %237 : vector<64x64xf32>
    %239 = math.exp %238 : vector<64x64xf32>
    %cst_97 = arith.constant dense<0.000000e+00> : vector<64xf32>
    %240 = vector.multi_reduction <add>, %239, %cst_97 [1] : vector<64x64xf32> to vector<64xf32>
    %241 = vector.shape_cast %240 : vector<64xf32> to vector<64x1xf32>
    %242 = tpu.reciprocal %241 {approx = true} : vector<64x1xf32> -> vector<64x1xf32>
    %243 = vector.broadcast %242 : vector<64x1xf32> to vector<64x64xf32>
    %244 = arith.mulf %239, %243 : vector<64x64xf32>
    %cst_98 = arith.constant dense<0.000000e+00> : vector<64x4xf32>
    %245 = tpu.matmul %244, %230, %cst_98 {dimension_numbers = #tpu.dot_dimension_numbers<[1], [0], [0], [1], [0, 0, 1, 1], [], []>} : vector<64x64xf32>, vector<64x4xf32>, vector<64x4xf32> -> vector<64x4xf32>
    %c0_99 = arith.constant 0 : index
    %c0_100 = arith.constant 0 : index
    %c0_101 = arith.constant 0 : index
    %c0_102 = arith.constant 0 : index
    %246 = vector.load %arg8[%c0_99, %c0_100, %c0_101, %c0_102] : memref<2x2x4x8xf32, #tpu.memory_space<vmem>>, vector<1x1x4x8xf32>
    %247 = vector.shape_cast %246 : vector<1x1x4x8xf32> to vector<4x8xf32>
    %cst_103 = arith.constant dense<0.000000e+00> : vector<64x8xf32>
    %248 = tpu.matmul %245, %247, %cst_103 {dimension_numbers = #tpu.dot_dimension_numbers<[1], [0], [0], [1], [0, 0, 1, 1], [], []>} : vector<64x4xf32>, vector<4x8xf32>, vector<64x8xf32> -> vector<64x8xf32>
    %249 = vector.extract_strided_slice %227 {offsets = [0, 4], sizes = [64, 4], strides = [1, 1]} : vector<64x24xf32> to vector<64x4xf32>
    %250 = vector.extract_strided_slice %227 {offsets = [0, 12], sizes = [64, 4], strides = [1, 1]} : vector<64x24xf32> to vector<64x4xf32>
    %251 = vector.extract_strided_slice %227 {offsets = [0, 20], sizes = [64, 4], strides = [1, 1]} : vector<64x24xf32> to vector<64x4xf32>
    %cst_104 = arith.constant dense<0.000000e+00> : vector<64x64xf32>
    %252 = tpu.matmul %249, %250, %cst_104 {dimension_numbers = #tpu.dot_dimension_numbers<[1], [1], [0], [0], [0, 0, 1, 0], [], []>} : vector<64x4xf32>, vector<64x4xf32>, vector<64x64xf32> -> vector<64x64xf32>
    %c0_105 = arith.constant 0 : index
    %c1_106 = arith.constant 1 : index
    %c0_107 = arith.constant 0 : index
    %c0_108 = arith.constant 0 : index
    %253 = vector.load %arg11[%c0_105, %c1_106, %c0_107, %c0_108] : memref<2x2x64x64xf32, #tpu.memory_space<vmem>>, vector<1x1x64x64xf32>
    %254 = vector.shape_cast %253 : vector<1x1x64x64xf32> to vector<64x64xf32>
    %255 = arith.addf %252, %254 : vector<64x64xf32>
    %cst_109 = arith.constant dense<0xFF800000> : vector<64xf32>
    %256 = vector.multi_reduction <maximumf>, %255, %cst_109 [1] : vector<64x64xf32> to vector<64xf32>
    %257 = vector.shape_cast %256 : vector<64xf32> to vector<64x1xf32>
    %258 = vector.broadcast %257 : vector<64x1xf32> to vector<64x64xf32>
    %259 = arith.subf %255, %258 : vector<64x64xf32>
    %260 = math.exp %259 : vector<64x64xf32>
    %cst_110 = arith.constant dense<0.000000e+00> : vector<64xf32>
    %261 = vector.multi_reduction <add>, %260, %cst_110 [1] : vector<64x64xf32> to vector<64xf32>
    %262 = vector.shape_cast %261 : vector<64xf32> to vector<64x1xf32>
    %263 = tpu.reciprocal %262 {approx = true} : vector<64x1xf32> -> vector<64x1xf32>
    %264 = vector.broadcast %263 : vector<64x1xf32> to vector<64x64xf32>
    %265 = arith.mulf %260, %264 : vector<64x64xf32>
    %cst_111 = arith.constant dense<0.000000e+00> : vector<64x4xf32>
    %266 = tpu.matmul %265, %251, %cst_111 {dimension_numbers = #tpu.dot_dimension_numbers<[1], [0], [0], [1], [0, 0, 1, 1], [], []>} : vector<64x64xf32>, vector<64x4xf32>, vector<64x4xf32> -> vector<64x4xf32>
    %c0_112 = arith.constant 0 : index
    %c1_113 = arith.constant 1 : index
    %c0_114 = arith.constant 0 : index
    %c0_115 = arith.constant 0 : index
    %267 = vector.load %arg8[%c0_112, %c1_113, %c0_114, %c0_115] : memref<2x2x4x8xf32, #tpu.memory_space<vmem>>, vector<1x1x4x8xf32>
    %268 = vector.shape_cast %267 : vector<1x1x4x8xf32> to vector<4x8xf32>
    %cst_116 = arith.constant dense<0.000000e+00> : vector<64x8xf32>
    %269 = tpu.matmul %266, %268, %cst_116 {dimension_numbers = #tpu.dot_dimension_numbers<[1], [0], [0], [1], [0, 0, 1, 1], [], []>} : vector<64x4xf32>, vector<4x8xf32>, vector<64x8xf32> -> vector<64x8xf32>
    %270 = arith.addf %248, %269 : vector<64x8xf32>
    %271 = tpu.concatenate %226, %270 in 0 : vector<64x8xf32>, vector<64x8xf32> -> vector<128x8xf32>
    %272 = vector.broadcast %153 : vector<1x8xf32> to vector<128x8xf32>
    %273 = arith.addf %271, %272 : vector<128x8xf32>
    %274 = arith.addf %150, %273 : vector<128x8xf32>
    %cst_117 = arith.constant dense<0.000000e+00> : vector<128xf32>
    %275 = vector.multi_reduction <add>, %274, %cst_117 [1] : vector<128x8xf32> to vector<128xf32>
    %276 = vector.shape_cast %275 : vector<128xf32> to vector<128x1xf32>
    %cst_118 = arith.constant 8.000000e+00 : f32
    %277 = vector.broadcast %cst_118 : f32 to vector<128x1xf32>
    %278 = arith.divf %276, %277 : vector<128x1xf32>
    %279 = vector.broadcast %278 : vector<128x1xf32> to vector<128x8xf32>
    %280 = arith.subf %274, %279 : vector<128x8xf32>
    %281 = arith.mulf %280, %280 : vector<128x8xf32>
    %cst_119 = arith.constant dense<0.000000e+00> : vector<128xf32>
    %282 = vector.multi_reduction <add>, %281, %cst_119 [1] : vector<128x8xf32> to vector<128xf32>
    %283 = vector.shape_cast %282 : vector<128xf32> to vector<128x1xf32>
    %cst_120 = arith.constant 8.000000e+00 : f32
    %284 = vector.broadcast %cst_120 : f32 to vector<128x1xf32>
    %285 = arith.divf %283, %284 : vector<128x1xf32>
    %286 = vector.broadcast %278 : vector<128x1xf32> to vector<128x8xf32>
    %287 = arith.subf %274, %286 : vector<128x8xf32>
    %cst_121 = arith.constant 9.99999974E-6 : f32
    %288 = vector.broadcast %cst_121 : f32 to vector<128x1xf32>
    %289 = arith.addf %285, %288 : vector<128x1xf32>
    %290 = math.rsqrt %289 : vector<128x1xf32>
    %291 = vector.broadcast %290 : vector<128x1xf32> to vector<128x8xf32>
    %292 = arith.mulf %287, %291 : vector<128x8xf32>
    %293 = vector.broadcast %154 : vector<1x8xf32> to vector<128x8xf32>
    %294 = arith.mulf %292, %293 : vector<128x8xf32>
    %295 = vector.broadcast %155 : vector<1x8xf32> to vector<128x8xf32>
    %296 = arith.addf %294, %295 : vector<128x8xf32>
    %c0_122 = arith.constant 0 : index
    %c0_123 = arith.constant 0 : index
    %c0_124 = arith.constant 0 : index
    %297 = vector.load %arg9[%c0_122, %c0_123, %c0_124] : memref<2x8x32xf32, #tpu.memory_space<vmem>>, vector<1x8x32xf32>
    %298 = vector.shape_cast %297 : vector<1x8x32xf32> to vector<8x32xf32>
    %cst_125 = arith.constant dense<0.000000e+00> : vector<128x32xf32>
    %299 = tpu.matmul %296, %298, %cst_125 {dimension_numbers = #tpu.dot_dimension_numbers<[1], [0], [0], [1], [0, 0, 1, 1], [], []>} : vector<128x8xf32>, vector<8x32xf32>, vector<128x32xf32> -> vector<128x32xf32>
    %300 = vector.broadcast %156 : vector<1x32xf32> to vector<128x32xf32>
    %301 = arith.addf %299, %300 : vector<128x32xf32>
    %cst_126 = arith.constant 5.000000e-01 : f32
    %302 = vector.broadcast %cst_126 : f32 to vector<128x32xf32>
    %303 = arith.mulf %302, %301 : vector<128x32xf32>
    %cst_127 = arith.constant 4.471500e-02 : f32
    %304 = vector.broadcast %cst_127 : f32 to vector<128x32xf32>
    %305 = arith.mulf %304, %301 : vector<128x32xf32>
    %306 = arith.mulf %305, %301 : vector<128x32xf32>
    %307 = arith.mulf %306, %301 : vector<128x32xf32>
    %308 = arith.addf %301, %307 : vector<128x32xf32>
    %cst_128 = arith.constant 0.797884583 : f32
    %309 = vector.broadcast %cst_128 : f32 to vector<128x32xf32>
    %310 = arith.mulf %309, %308 : vector<128x32xf32>
    %311 = math.tanh %310 : vector<128x32xf32>
    %cst_129 = arith.constant 1.000000e+00 : f32
    %312 = vector.broadcast %cst_129 : f32 to vector<128x32xf32>
    %313 = arith.addf %312, %311 : vector<128x32xf32>
    %314 = arith.mulf %303, %313 : vector<128x32xf32>
    %c0_130 = arith.constant 0 : index
    %c0_131 = arith.constant 0 : index
    %c0_132 = arith.constant 0 : index
    %315 = vector.load %arg10[%c0_130, %c0_131, %c0_132] : memref<2x32x8xf32, #tpu.memory_space<vmem>>, vector<1x32x8xf32>
    %316 = vector.shape_cast %315 : vector<1x32x8xf32> to vector<32x8xf32>
    %cst_133 = arith.constant dense<0.000000e+00> : vector<128x8xf32>
    %317 = tpu.matmul %314, %316, %cst_133 {dimension_numbers = #tpu.dot_dimension_numbers<[1], [0], [0], [1], [0, 0, 1, 1], [], []>} : vector<128x32xf32>, vector<32x8xf32>, vector<128x8xf32> -> vector<128x8xf32>
    %318 = vector.broadcast %157 : vector<1x8xf32> to vector<128x8xf32>
    %319 = arith.addf %317, %318 : vector<128x8xf32>
    %320 = arith.addf %274, %319 : vector<128x8xf32>
    %c10 = arith.constant 10 : index
    %c0_134 = arith.constant 0 : index
    %321 = vector.load %arg5[%c10, %c0_134] : memref<17x64xf32, #tpu.memory_space<vmem>>, vector<1x8xf32>
    %c11 = arith.constant 11 : index
    %c0_135 = arith.constant 0 : index
    %322 = vector.load %arg5[%c11, %c0_135] : memref<17x64xf32, #tpu.memory_space<vmem>>, vector<1x8xf32>
    %c12 = arith.constant 12 : index
    %c0_136 = arith.constant 0 : index
    %323 = vector.load %arg5[%c12, %c0_136] : memref<17x64xf32, #tpu.memory_space<vmem>>, vector<1x8xf32>
    %c13 = arith.constant 13 : index
    %c0_137 = arith.constant 0 : index
    %324 = vector.load %arg5[%c13, %c0_137] : memref<17x64xf32, #tpu.memory_space<vmem>>, vector<1x8xf32>
    %c14 = arith.constant 14 : index
    %c0_138 = arith.constant 0 : index
    %325 = vector.load %arg5[%c14, %c0_138] : memref<17x64xf32, #tpu.memory_space<vmem>>, vector<1x8xf32>
    %c15 = arith.constant 15 : index
    %c0_139 = arith.constant 0 : index
    %326 = vector.load %arg5[%c15, %c0_139] : memref<17x64xf32, #tpu.memory_space<vmem>>, vector<1x32xf32>
    %c16 = arith.constant 16 : index
    %c0_140 = arith.constant 0 : index
    %327 = vector.load %arg5[%c16, %c0_140] : memref<17x64xf32, #tpu.memory_space<vmem>>, vector<1x8xf32>
    %cst_141 = arith.constant dense<0.000000e+00> : vector<128xf32>
    %328 = vector.multi_reduction <add>, %320, %cst_141 [1] : vector<128x8xf32> to vector<128xf32>
    %329 = vector.shape_cast %328 : vector<128xf32> to vector<128x1xf32>
    %cst_142 = arith.constant 8.000000e+00 : f32
    %330 = vector.broadcast %cst_142 : f32 to vector<128x1xf32>
    %331 = arith.divf %329, %330 : vector<128x1xf32>
    %332 = vector.broadcast %331 : vector<128x1xf32> to vector<128x8xf32>
    %333 = arith.subf %320, %332 : vector<128x8xf32>
    %334 = arith.mulf %333, %333 : vector<128x8xf32>
    %cst_143 = arith.constant dense<0.000000e+00> : vector<128xf32>
    %335 = vector.multi_reduction <add>, %334, %cst_143 [1] : vector<128x8xf32> to vector<128xf32>
    %336 = vector.shape_cast %335 : vector<128xf32> to vector<128x1xf32>
    %cst_144 = arith.constant 8.000000e+00 : f32
    %337 = vector.broadcast %cst_144 : f32 to vector<128x1xf32>
    %338 = arith.divf %336, %337 : vector<128x1xf32>
    %339 = vector.broadcast %331 : vector<128x1xf32> to vector<128x8xf32>
    %340 = arith.subf %320, %339 : vector<128x8xf32>
    %cst_145 = arith.constant 9.99999974E-6 : f32
    %341 = vector.broadcast %cst_145 : f32 to vector<128x1xf32>
    %342 = arith.addf %338, %341 : vector<128x1xf32>
    %343 = math.rsqrt %342 : vector<128x1xf32>
    %344 = vector.broadcast %343 : vector<128x1xf32> to vector<128x8xf32>
    %345 = arith.mulf %340, %344 : vector<128x8xf32>
    %346 = vector.broadcast %321 : vector<1x8xf32> to vector<128x8xf32>
    %347 = arith.mulf %345, %346 : vector<128x8xf32>
    %348 = vector.broadcast %322 : vector<1x8xf32> to vector<128x8xf32>
    %349 = arith.addf %347, %348 : vector<128x8xf32>
    %c1_146 = arith.constant 1 : index
    %c0_147 = arith.constant 0 : index
    %c0_148 = arith.constant 0 : index
    %350 = vector.load %arg7[%c1_146, %c0_147, %c0_148] : memref<2x8x24xf32, #tpu.memory_space<vmem>>, vector<1x8x24xf32>
    %351 = vector.shape_cast %350 : vector<1x8x24xf32> to vector<8x24xf32>
    %cst_149 = arith.constant dense<0.000000e+00> : vector<128x24xf32>
    %352 = tpu.matmul %349, %351, %cst_149 {dimension_numbers = #tpu.dot_dimension_numbers<[1], [0], [0], [1], [0, 0, 1, 1], [], []>} : vector<128x8xf32>, vector<8x24xf32>, vector<128x24xf32> -> vector<128x24xf32>
    %353 = vector.extract_strided_slice %352 {offsets = [0, 0], sizes = [64, 24], strides = [1, 1]} : vector<128x24xf32> to vector<64x24xf32>
    %354 = vector.extract_strided_slice %353 {offsets = [0, 0], sizes = [64, 4], strides = [1, 1]} : vector<64x24xf32> to vector<64x4xf32>
    %355 = vector.extract_strided_slice %353 {offsets = [0, 8], sizes = [64, 4], strides = [1, 1]} : vector<64x24xf32> to vector<64x4xf32>
    %356 = vector.extract_strided_slice %353 {offsets = [0, 16], sizes = [64, 4], strides = [1, 1]} : vector<64x24xf32> to vector<64x4xf32>
    %cst_150 = arith.constant dense<0.000000e+00> : vector<64x64xf32>
    %357 = tpu.matmul %354, %355, %cst_150 {dimension_numbers = #tpu.dot_dimension_numbers<[1], [1], [0], [0], [0, 0, 1, 0], [], []>} : vector<64x4xf32>, vector<64x4xf32>, vector<64x64xf32> -> vector<64x64xf32>
    %c1_151 = arith.constant 1 : index
    %c0_152 = arith.constant 0 : index
    %c0_153 = arith.constant 0 : index
    %c0_154 = arith.constant 0 : index
    %358 = vector.load %arg11[%c1_151, %c0_152, %c0_153, %c0_154] : memref<2x2x64x64xf32, #tpu.memory_space<vmem>>, vector<1x1x64x64xf32>
    %359 = vector.shape_cast %358 : vector<1x1x64x64xf32> to vector<64x64xf32>
    %360 = arith.addf %357, %359 : vector<64x64xf32>
    %cst_155 = arith.constant dense<0xFF800000> : vector<64xf32>
    %361 = vector.multi_reduction <maximumf>, %360, %cst_155 [1] : vector<64x64xf32> to vector<64xf32>
    %362 = vector.shape_cast %361 : vector<64xf32> to vector<64x1xf32>
    %363 = vector.broadcast %362 : vector<64x1xf32> to vector<64x64xf32>
    %364 = arith.subf %360, %363 : vector<64x64xf32>
    %365 = math.exp %364 : vector<64x64xf32>
    %cst_156 = arith.constant dense<0.000000e+00> : vector<64xf32>
    %366 = vector.multi_reduction <add>, %365, %cst_156 [1] : vector<64x64xf32> to vector<64xf32>
    %367 = vector.shape_cast %366 : vector<64xf32> to vector<64x1xf32>
    %368 = tpu.reciprocal %367 {approx = true} : vector<64x1xf32> -> vector<64x1xf32>
    %369 = vector.broadcast %368 : vector<64x1xf32> to vector<64x64xf32>
    %370 = arith.mulf %365, %369 : vector<64x64xf32>
    %cst_157 = arith.constant dense<0.000000e+00> : vector<64x4xf32>
    %371 = tpu.matmul %370, %356, %cst_157 {dimension_numbers = #tpu.dot_dimension_numbers<[1], [0], [0], [1], [0, 0, 1, 1], [], []>} : vector<64x64xf32>, vector<64x4xf32>, vector<64x4xf32> -> vector<64x4xf32>
    %c1_158 = arith.constant 1 : index
    %c0_159 = arith.constant 0 : index
    %c0_160 = arith.constant 0 : index
    %c0_161 = arith.constant 0 : index
    %372 = vector.load %arg8[%c1_158, %c0_159, %c0_160, %c0_161] : memref<2x2x4x8xf32, #tpu.memory_space<vmem>>, vector<1x1x4x8xf32>
    %373 = vector.shape_cast %372 : vector<1x1x4x8xf32> to vector<4x8xf32>
    %cst_162 = arith.constant dense<0.000000e+00> : vector<64x8xf32>
    %374 = tpu.matmul %371, %373, %cst_162 {dimension_numbers = #tpu.dot_dimension_numbers<[1], [0], [0], [1], [0, 0, 1, 1], [], []>} : vector<64x4xf32>, vector<4x8xf32>, vector<64x8xf32> -> vector<64x8xf32>
    %375 = vector.extract_strided_slice %353 {offsets = [0, 4], sizes = [64, 4], strides = [1, 1]} : vector<64x24xf32> to vector<64x4xf32>
    %376 = vector.extract_strided_slice %353 {offsets = [0, 12], sizes = [64, 4], strides = [1, 1]} : vector<64x24xf32> to vector<64x4xf32>
    %377 = vector.extract_strided_slice %353 {offsets = [0, 20], sizes = [64, 4], strides = [1, 1]} : vector<64x24xf32> to vector<64x4xf32>
    %cst_163 = arith.constant dense<0.000000e+00> : vector<64x64xf32>
    %378 = tpu.matmul %375, %376, %cst_163 {dimension_numbers = #tpu.dot_dimension_numbers<[1], [1], [0], [0], [0, 0, 1, 0], [], []>} : vector<64x4xf32>, vector<64x4xf32>, vector<64x64xf32> -> vector<64x64xf32>
    %c1_164 = arith.constant 1 : index
    %c1_165 = arith.constant 1 : index
    %c0_166 = arith.constant 0 : index
    %c0_167 = arith.constant 0 : index
    %379 = vector.load %arg11[%c1_164, %c1_165, %c0_166, %c0_167] : memref<2x2x64x64xf32, #tpu.memory_space<vmem>>, vector<1x1x64x64xf32>
    %380 = vector.shape_cast %379 : vector<1x1x64x64xf32> to vector<64x64xf32>
    %381 = arith.addf %378, %380 : vector<64x64xf32>
    %cst_168 = arith.constant dense<0xFF800000> : vector<64xf32>
    %382 = vector.multi_reduction <maximumf>, %381, %cst_168 [1] : vector<64x64xf32> to vector<64xf32>
    %383 = vector.shape_cast %382 : vector<64xf32> to vector<64x1xf32>
    %384 = vector.broadcast %383 : vector<64x1xf32> to vector<64x64xf32>
    %385 = arith.subf %381, %384 : vector<64x64xf32>
    %386 = math.exp %385 : vector<64x64xf32>
    %cst_169 = arith.constant dense<0.000000e+00> : vector<64xf32>
    %387 = vector.multi_reduction <add>, %386, %cst_169 [1] : vector<64x64xf32> to vector<64xf32>
    %388 = vector.shape_cast %387 : vector<64xf32> to vector<64x1xf32>
    %389 = tpu.reciprocal %388 {approx = true} : vector<64x1xf32> -> vector<64x1xf32>
    %390 = vector.broadcast %389 : vector<64x1xf32> to vector<64x64xf32>
    %391 = arith.mulf %386, %390 : vector<64x64xf32>
    %cst_170 = arith.constant dense<0.000000e+00> : vector<64x4xf32>
    %392 = tpu.matmul %391, %377, %cst_170 {dimension_numbers = #tpu.dot_dimension_numbers<[1], [0], [0], [1], [0, 0, 1, 1], [], []>} : vector<64x64xf32>, vector<64x4xf32>, vector<64x4xf32> -> vector<64x4xf32>
    %c1_171 = arith.constant 1 : index
    %c1_172 = arith.constant 1 : index
    %c0_173 = arith.constant 0 : index
    %c0_174 = arith.constant 0 : index
    %393 = vector.load %arg8[%c1_171, %c1_172, %c0_173, %c0_174] : memref<2x2x4x8xf32, #tpu.memory_space<vmem>>, vector<1x1x4x8xf32>
    %394 = vector.shape_cast %393 : vector<1x1x4x8xf32> to vector<4x8xf32>
    %cst_175 = arith.constant dense<0.000000e+00> : vector<64x8xf32>
    %395 = tpu.matmul %392, %394, %cst_175 {dimension_numbers = #tpu.dot_dimension_numbers<[1], [0], [0], [1], [0, 0, 1, 1], [], []>} : vector<64x4xf32>, vector<4x8xf32>, vector<64x8xf32> -> vector<64x8xf32>
    %396 = arith.addf %374, %395 : vector<64x8xf32>
    %397 = vector.extract_strided_slice %352 {offsets = [64, 0], sizes = [64, 24], strides = [1, 1]} : vector<128x24xf32> to vector<64x24xf32>
    %398 = vector.extract_strided_slice %397 {offsets = [0, 0], sizes = [64, 4], strides = [1, 1]} : vector<64x24xf32> to vector<64x4xf32>
    %399 = vector.extract_strided_slice %397 {offsets = [0, 8], sizes = [64, 4], strides = [1, 1]} : vector<64x24xf32> to vector<64x4xf32>
    %400 = vector.extract_strided_slice %397 {offsets = [0, 16], sizes = [64, 4], strides = [1, 1]} : vector<64x24xf32> to vector<64x4xf32>
    %cst_176 = arith.constant dense<0.000000e+00> : vector<64x64xf32>
    %401 = tpu.matmul %398, %399, %cst_176 {dimension_numbers = #tpu.dot_dimension_numbers<[1], [1], [0], [0], [0, 0, 1, 0], [], []>} : vector<64x4xf32>, vector<64x4xf32>, vector<64x64xf32> -> vector<64x64xf32>
    %c1_177 = arith.constant 1 : index
    %c0_178 = arith.constant 0 : index
    %c0_179 = arith.constant 0 : index
    %c0_180 = arith.constant 0 : index
    %402 = vector.load %arg11[%c1_177, %c0_178, %c0_179, %c0_180] : memref<2x2x64x64xf32, #tpu.memory_space<vmem>>, vector<1x1x64x64xf32>
    %403 = vector.shape_cast %402 : vector<1x1x64x64xf32> to vector<64x64xf32>
    %404 = arith.addf %401, %403 : vector<64x64xf32>
    %cst_181 = arith.constant dense<0xFF800000> : vector<64xf32>
    %405 = vector.multi_reduction <maximumf>, %404, %cst_181 [1] : vector<64x64xf32> to vector<64xf32>
    %406 = vector.shape_cast %405 : vector<64xf32> to vector<64x1xf32>
    %407 = vector.broadcast %406 : vector<64x1xf32> to vector<64x64xf32>
    %408 = arith.subf %404, %407 : vector<64x64xf32>
    %409 = math.exp %408 : vector<64x64xf32>
    %cst_182 = arith.constant dense<0.000000e+00> : vector<64xf32>
    %410 = vector.multi_reduction <add>, %409, %cst_182 [1] : vector<64x64xf32> to vector<64xf32>
    %411 = vector.shape_cast %410 : vector<64xf32> to vector<64x1xf32>
    %412 = tpu.reciprocal %411 {approx = true} : vector<64x1xf32> -> vector<64x1xf32>
    %413 = vector.broadcast %412 : vector<64x1xf32> to vector<64x64xf32>
    %414 = arith.mulf %409, %413 : vector<64x64xf32>
    %cst_183 = arith.constant dense<0.000000e+00> : vector<64x4xf32>
    %415 = tpu.matmul %414, %400, %cst_183 {dimension_numbers = #tpu.dot_dimension_numbers<[1], [0], [0], [1], [0, 0, 1, 1], [], []>} : vector<64x64xf32>, vector<64x4xf32>, vector<64x4xf32> -> vector<64x4xf32>
    %c1_184 = arith.constant 1 : index
    %c0_185 = arith.constant 0 : index
    %c0_186 = arith.constant 0 : index
    %c0_187 = arith.constant 0 : index
    %416 = vector.load %arg8[%c1_184, %c0_185, %c0_186, %c0_187] : memref<2x2x4x8xf32, #tpu.memory_space<vmem>>, vector<1x1x4x8xf32>
    %417 = vector.shape_cast %416 : vector<1x1x4x8xf32> to vector<4x8xf32>
    %cst_188 = arith.constant dense<0.000000e+00> : vector<64x8xf32>
    %418 = tpu.matmul %415, %417, %cst_188 {dimension_numbers = #tpu.dot_dimension_numbers<[1], [0], [0], [1], [0, 0, 1, 1], [], []>} : vector<64x4xf32>, vector<4x8xf32>, vector<64x8xf32> -> vector<64x8xf32>
    %419 = vector.extract_strided_slice %397 {offsets = [0, 4], sizes = [64, 4], strides = [1, 1]} : vector<64x24xf32> to vector<64x4xf32>
    %420 = vector.extract_strided_slice %397 {offsets = [0, 12], sizes = [64, 4], strides = [1, 1]} : vector<64x24xf32> to vector<64x4xf32>
    %421 = vector.extract_strided_slice %397 {offsets = [0, 20], sizes = [64, 4], strides = [1, 1]} : vector<64x24xf32> to vector<64x4xf32>
    %cst_189 = arith.constant dense<0.000000e+00> : vector<64x64xf32>
    %422 = tpu.matmul %419, %420, %cst_189 {dimension_numbers = #tpu.dot_dimension_numbers<[1], [1], [0], [0], [0, 0, 1, 0], [], []>} : vector<64x4xf32>, vector<64x4xf32>, vector<64x64xf32> -> vector<64x64xf32>
    %c1_190 = arith.constant 1 : index
    %c1_191 = arith.constant 1 : index
    %c0_192 = arith.constant 0 : index
    %c0_193 = arith.constant 0 : index
    %423 = vector.load %arg11[%c1_190, %c1_191, %c0_192, %c0_193] : memref<2x2x64x64xf32, #tpu.memory_space<vmem>>, vector<1x1x64x64xf32>
    %424 = vector.shape_cast %423 : vector<1x1x64x64xf32> to vector<64x64xf32>
    %425 = arith.addf %422, %424 : vector<64x64xf32>
    %cst_194 = arith.constant dense<0xFF800000> : vector<64xf32>
    %426 = vector.multi_reduction <maximumf>, %425, %cst_194 [1] : vector<64x64xf32> to vector<64xf32>
    %427 = vector.shape_cast %426 : vector<64xf32> to vector<64x1xf32>
    %428 = vector.broadcast %427 : vector<64x1xf32> to vector<64x64xf32>
    %429 = arith.subf %425, %428 : vector<64x64xf32>
    %430 = math.exp %429 : vector<64x64xf32>
    %cst_195 = arith.constant dense<0.000000e+00> : vector<64xf32>
    %431 = vector.multi_reduction <add>, %430, %cst_195 [1] : vector<64x64xf32> to vector<64xf32>
    %432 = vector.shape_cast %431 : vector<64xf32> to vector<64x1xf32>
    %433 = tpu.reciprocal %432 {approx = true} : vector<64x1xf32> -> vector<64x1xf32>
    %434 = vector.broadcast %433 : vector<64x1xf32> to vector<64x64xf32>
    %435 = arith.mulf %430, %434 : vector<64x64xf32>
    %cst_196 = arith.constant dense<0.000000e+00> : vector<64x4xf32>
    %436 = tpu.matmul %435, %421, %cst_196 {dimension_numbers = #tpu.dot_dimension_numbers<[1], [0], [0], [1], [0, 0, 1, 1], [], []>} : vector<64x64xf32>, vector<64x4xf32>, vector<64x4xf32> -> vector<64x4xf32>
    %c1_197 = arith.constant 1 : index
    %c1_198 = arith.constant 1 : index
    %c0_199 = arith.constant 0 : index
    %c0_200 = arith.constant 0 : index
    %437 = vector.load %arg8[%c1_197, %c1_198, %c0_199, %c0_200] : memref<2x2x4x8xf32, #tpu.memory_space<vmem>>, vector<1x1x4x8xf32>
    %438 = vector.shape_cast %437 : vector<1x1x4x8xf32> to vector<4x8xf32>
    %cst_201 = arith.constant dense<0.000000e+00> : vector<64x8xf32>
    %439 = tpu.matmul %436, %438, %cst_201 {dimension_numbers = #tpu.dot_dimension_numbers<[1], [0], [0], [1], [0, 0, 1, 1], [], []>} : vector<64x4xf32>, vector<4x8xf32>, vector<64x8xf32> -> vector<64x8xf32>
    %440 = arith.addf %418, %439 : vector<64x8xf32>
    %441 = tpu.concatenate %396, %440 in 0 : vector<64x8xf32>, vector<64x8xf32> -> vector<128x8xf32>
    %442 = vector.broadcast %323 : vector<1x8xf32> to vector<128x8xf32>
    %443 = arith.addf %441, %442 : vector<128x8xf32>
    %444 = arith.addf %320, %443 : vector<128x8xf32>
    %cst_202 = arith.constant dense<0.000000e+00> : vector<128xf32>
    %445 = vector.multi_reduction <add>, %444, %cst_202 [1] : vector<128x8xf32> to vector<128xf32>
    %446 = vector.shape_cast %445 : vector<128xf32> to vector<128x1xf32>
    %cst_203 = arith.constant 8.000000e+00 : f32
    %447 = vector.broadcast %cst_203 : f32 to vector<128x1xf32>
    %448 = arith.divf %446, %447 : vector<128x1xf32>
    %449 = vector.broadcast %448 : vector<128x1xf32> to vector<128x8xf32>
    %450 = arith.subf %444, %449 : vector<128x8xf32>
    %451 = arith.mulf %450, %450 : vector<128x8xf32>
    %cst_204 = arith.constant dense<0.000000e+00> : vector<128xf32>
    %452 = vector.multi_reduction <add>, %451, %cst_204 [1] : vector<128x8xf32> to vector<128xf32>
    %453 = vector.shape_cast %452 : vector<128xf32> to vector<128x1xf32>
    %cst_205 = arith.constant 8.000000e+00 : f32
    %454 = vector.broadcast %cst_205 : f32 to vector<128x1xf32>
    %455 = arith.divf %453, %454 : vector<128x1xf32>
    %456 = vector.broadcast %448 : vector<128x1xf32> to vector<128x8xf32>
    %457 = arith.subf %444, %456 : vector<128x8xf32>
    %cst_206 = arith.constant 9.99999974E-6 : f32
    %458 = vector.broadcast %cst_206 : f32 to vector<128x1xf32>
    %459 = arith.addf %455, %458 : vector<128x1xf32>
    %460 = math.rsqrt %459 : vector<128x1xf32>
    %461 = vector.broadcast %460 : vector<128x1xf32> to vector<128x8xf32>
    %462 = arith.mulf %457, %461 : vector<128x8xf32>
    %463 = vector.broadcast %324 : vector<1x8xf32> to vector<128x8xf32>
    %464 = arith.mulf %462, %463 : vector<128x8xf32>
    %465 = vector.broadcast %325 : vector<1x8xf32> to vector<128x8xf32>
    %466 = arith.addf %464, %465 : vector<128x8xf32>
    %c1_207 = arith.constant 1 : index
    %c0_208 = arith.constant 0 : index
    %c0_209 = arith.constant 0 : index
    %467 = vector.load %arg9[%c1_207, %c0_208, %c0_209] : memref<2x8x32xf32, #tpu.memory_space<vmem>>, vector<1x8x32xf32>
    %468 = vector.shape_cast %467 : vector<1x8x32xf32> to vector<8x32xf32>
    %cst_210 = arith.constant dense<0.000000e+00> : vector<128x32xf32>
    %469 = tpu.matmul %466, %468, %cst_210 {dimension_numbers = #tpu.dot_dimension_numbers<[1], [0], [0], [1], [0, 0, 1, 1], [], []>} : vector<128x8xf32>, vector<8x32xf32>, vector<128x32xf32> -> vector<128x32xf32>
    %470 = vector.broadcast %326 : vector<1x32xf32> to vector<128x32xf32>
    %471 = arith.addf %469, %470 : vector<128x32xf32>
    %cst_211 = arith.constant 5.000000e-01 : f32
    %472 = vector.broadcast %cst_211 : f32 to vector<128x32xf32>
    %473 = arith.mulf %472, %471 : vector<128x32xf32>
    %cst_212 = arith.constant 4.471500e-02 : f32
    %474 = vector.broadcast %cst_212 : f32 to vector<128x32xf32>
    %475 = arith.mulf %474, %471 : vector<128x32xf32>
    %476 = arith.mulf %475, %471 : vector<128x32xf32>
    %477 = arith.mulf %476, %471 : vector<128x32xf32>
    %478 = arith.addf %471, %477 : vector<128x32xf32>
    %cst_213 = arith.constant 0.797884583 : f32
    %479 = vector.broadcast %cst_213 : f32 to vector<128x32xf32>
    %480 = arith.mulf %479, %478 : vector<128x32xf32>
    %481 = math.tanh %480 : vector<128x32xf32>
    %cst_214 = arith.constant 1.000000e+00 : f32
    %482 = vector.broadcast %cst_214 : f32 to vector<128x32xf32>
    %483 = arith.addf %482, %481 : vector<128x32xf32>
    %484 = arith.mulf %473, %483 : vector<128x32xf32>
    %c1_215 = arith.constant 1 : index
    %c0_216 = arith.constant 0 : index
    %c0_217 = arith.constant 0 : index
    %485 = vector.load %arg10[%c1_215, %c0_216, %c0_217] : memref<2x32x8xf32, #tpu.memory_space<vmem>>, vector<1x32x8xf32>
    %486 = vector.shape_cast %485 : vector<1x32x8xf32> to vector<32x8xf32>
    %cst_218 = arith.constant dense<0.000000e+00> : vector<128x8xf32>
    %487 = tpu.matmul %484, %486, %cst_218 {dimension_numbers = #tpu.dot_dimension_numbers<[1], [0], [0], [1], [0, 0, 1, 1], [], []>} : vector<128x32xf32>, vector<32x8xf32>, vector<128x8xf32> -> vector<128x8xf32>
    %488 = vector.broadcast %327 : vector<1x8xf32> to vector<128x8xf32>
    %489 = arith.addf %487, %488 : vector<128x8xf32>
    %490 = arith.addf %444, %489 : vector<128x8xf32>
    %c0_219 = arith.constant 0 : index
    %c0_220 = arith.constant 0 : index
    %491 = vector.load %arg12[%c0_219, %c0_220] : memref<8x8xf32, #tpu.memory_space<vmem>>, vector<8x8xf32>
    %cst_221 = arith.constant dense<0.000000e+00> : vector<8x128xf32>
    %492 = tpu.matmul %491, %490, %cst_221 {dimension_numbers = #tpu.dot_dimension_numbers<[1], [1], [0], [0], [0, 0, 1, 0], [], []>} : vector<8x8xf32>, vector<128x8xf32>, vector<8x128xf32> -> vector<8x128xf32>
    %c0_222 = arith.constant 0 : index
    %c0_223 = arith.constant 0 : index
    %493 = vector.load %arg13[%c0_222, %c0_223] : memref<8x128xf32, #tpu.memory_space<vmem>>, vector<8x128xf32>
    tpu.vector_store %arg13[%c0_222, %c0_223], %492 {strides = array<i32>} : memref<8x128xf32, #tpu.memory_space<vmem>>, vector<8x128xf32>,
    return
  }
  func.func @transform_0(%arg0: i32) -> (i32, i32) {
    %c0_i32 = arith.constant 0 : i32
    %c0_i32_0 = arith.constant 0 : i32
    %c0_i32_1 = arith.constant 0 : i32
    return %c0_i32, %c0_i32_0 : i32, i32
  }
  func.func @transform_1(%arg0: i32) -> (i32, i32) {
    %c0_i32 = arith.constant 0 : i32
    %c0_i32_0 = arith.constant 0 : i32
    %c0_i32_1 = arith.constant 0 : i32
    return %c0_i32, %c0_i32_0 : i32, i32
  }
  func.func @transform_2(%arg0: i32) -> (i32, i32) {
    %c0_i32 = arith.constant 0 : i32
    %c0_i32_0 = arith.constant 0 : i32
    %c0_i32_1 = arith.constant 0 : i32
    return %c0_i32, %c0_i32_0 : i32, i32
  }
  func.func @transform_3(%arg0: i32) -> (i32, i32) {
    %c0_i32 = arith.constant 0 : i32
    %c0_i32_0 = arith.constant 0 : i32
    %c0_i32_1 = arith.constant 0 : i32
    return %c0_i32, %c0_i32_0 : i32, i32
  }
  func.func @transform_4(%arg0: i32) -> (i32, i32) {
    %c0_i32 = arith.constant 0 : i32
    %c0_i32_0 = arith.constant 0 : i32
    %c0_i32_1 = arith.constant 0 : i32
    return %c0_i32, %c0_i32_0 : i32, i32
  }
  func.func @transform_5(%arg0: i32) -> i32 {
    %c0_i32 = arith.constant 0 : i32
    %c0_i32_0 = arith.constant 0 : i32
    return %c0_i32 : i32
  }
  func.func @transform_6(%arg0: i32) -> (i32, i32, i32) {
    %c0_i32 = arith.constant 0 : i32
    %c0_i32_0 = arith.constant 0 : i32
    %c0_i32_1 = arith.constant 0 : i32
    %c0_i32_2 = arith.constant 0 : i32
    return %c0_i32, %c0_i32_0, %c0_i32_1 : i32, i32, i32
  }
  func.func @transform_7(%arg0: i32) -> (i32, i32, i32, i32) {
    %c0_i32 = arith.constant 0 : i32
    %c0_i32_0 = arith.constant 0 : i32
    %c0_i32_1 = arith.constant 0 : i32
    %c0_i32_2 = arith.constant 0 : i32
    %c0_i32_3 = arith.constant 0 : i32
    return %c0_i32, %c0_i32_0, %c0_i32_1, %c0_i32_2 : i32, i32, i32, i32
  }
  func.func @transform_8(%arg0: i32) -> (i32, i32, i32) {
    %c0_i32 = arith.constant 0 : i32
    %c0_i32_0 = arith.constant 0 : i32
    %c0_i32_1 = arith.constant 0 : i32
    %c0_i32_2 = arith.constant 0 : i32
    return %c0_i32, %c0_i32_0, %c0_i32_1 : i32, i32, i32
  }
  func.func @transform_9(%arg0: i32) -> (i32, i32, i32) {
    %c0_i32 = arith.constant 0 : i32
    %c0_i32_0 = arith.constant 0 : i32
    %c0_i32_1 = arith.constant 0 : i32
    %c0_i32_2 = arith.constant 0 : i32
    return %c0_i32, %c0_i32_0, %c0_i32_1 : i32, i32, i32
  }
  func.func @transform_10(%arg0: i32) -> (i32, i32, i32, i32) {
    %c0_i32 = arith.constant 0 : i32
    %c0_i32_0 = arith.constant 0 : i32
    %c0_i32_1 = arith.constant 0 : i32
    %c0_i32_2 = arith.constant 0 : i32
    %c0_i32_3 = arith.constant 0 : i32
    return %c0_i32, %c0_i32_0, %c0_i32_1, %c0_i32_2 : i32, i32, i32, i32
  }
  func.func @transform_11(%arg0: i32) -> (i32, i32) {
    %c0_i32 = arith.constant 0 : i32
    %c0_i32_0 = arith.constant 0 : i32
    %c0_i32_1 = arith.constant 0 : i32
    return %c0_i32, %c0_i32_0 : i32, i32
  }
  func.func @transform_12(%arg0: i32) -> (i32, i32) {
    %c0_i32 = arith.constant 0 : i32
    %c0_i32_0 = arith.constant 0 : i32
    %c0_i32_1 = arith.constant 0 : i32
    return %c0_i32, %c0_i32_0 : i32, i32
  }
}

</mosaic_0001>

<bundles_post_ra>
// kernel: segmentation_decoder_forward.1
= control target key start
LH: loop header
LB: loop body
LE: loop exit
PB: predicated region body
PF: predicated region fallthrough
CT: control target
= control target key end

     0   :  { %17 = vsyncpa [#allocation3], 0  ;;  %s14480_s0 = inlined_call_operand.vmem [shape: f32[128,96], index: 0, kind: input, shape index: {}]   ;;  %s14481_s1 = inlined_call_operand.vmem [shape: f32[96,64], index: 1, kind: input, shape index: {}]   ;;  %s14482_s2 = inlined_call_operand.vmem [shape: f32[64,32], index: 2, kind: input, shape index: {}]   ;;  %s14483_s3 = inlined_call_operand.vmem [shape: f32[32,8], index: 3, kind: input, shape index: {}]   ;;  %s14484_s4 = inlined_call_operand.vmem [shape: f32[17,64], index: 4, kind: input, shape index: {}]   ;;  %s14485_s5 = inlined_call_operand.vmem [shape: f32[3], index: 5, kind: input, shape index: {}]   ;;  %s14486_s6 = inlined_call_operand.vmem [shape: f32[2,8,24], index: 6, kind: input, shape index: {}]   ;;  %s14487_s7 = inlined_call_operand.vmem [shape: f32[2,2,4,8], index: 7, kind: input, shape index: {}]   ;;  %s14488_s8 = inlined_call_operand.vmem [shape: f32[2,8,32], index: 8, kind: input, shape index: {}]   ;;  %s14489_s9 = inlined_call_operand.vmem [shape: f32[2,32,8], index: 9, kind: input, shape index: {}]   ;;  %s14490_s10 = inlined_call_operand.vmem [shape: f32[2,2,64,64], index: 10, kind: input, shape index: {}]   ;;  %s14491_s11 = inlined_call_operand.vmem [shape: f32[8,8], index: 11, kind: input, shape index: {}]   ;;  %s14492_s12 = inlined_call_operand.vmem [shape: f32[8,128], index: 12, kind: output, shape index: {}]  }
   0x1   :  { %s34_s23 = sshll.u32 %s14485_s5, 4  ;;  %s35_s23 = int_to_ptr.vmem [resolvable:$true] %s34_s23 }
   0x2   :  { %s10695_s24 = scalar_lea.vmem %s35_s23, 16  ;;  %p10700_p1 = scmp.lt.s32.totalorder %s35_s23, %s35_s23 }
   0x3   :  { %p10696_p0 = scmp.ne.s32.totalorder %s35_s23, %s10695_s24  ;;  %p10701_p2 = scmp.lt.s32.totalorder %s10695_s24, %s10695_s24 }
   0x5   :  { %p10702_p3 = por %p10701_p2, %p10700_p1 }
   0x7   :  { %p10703_p4 = pnand %p10702_p3, %p10696_p0 }
   0x9   :  { %10706 = shalt.err (!%p10703_p4)
}
   0xa   :  { %s10709_s25 = smov [#allocation2]  }
   0xb   :  { %37 = dma.vmem_to_smem %s35_s23, 16, %s10709_s25, [#allocation3]  }
   0xc   :  { %10707 = dma.done.wait [#allocation3], 16  }
   0xd   :  { %10708 = vsyncadd [#allocation3], 4294967280 }
   0xe   :  { %53 = sfence }
   0xf   :  { %v81_v0 = vld [vmem:[%s14481_s1 + $0x58] sm:$0xff]  ;;  %v80_v1 = vld [vmem:[%s14481_s1 + $0x50] sm:$0xff]  ;;  %v79_v2 = vld [vmem:[%s14481_s1 + $0x48] sm:$0xff]  ;;  %vm88_vm0 = vcmask 785408   ;;  %vm282_vm1 = vcmask 523264   ;;  %s8350_s30 = sld [smem:[#allocation2 + $0x2]] }
  0x10   :  { %9317 = vmatprep.subr.mxu0 %v81_v0  ;;  %v78_v3 = vld [vmem:[%s14481_s1 + $0x40] sm:$0xff]  ;;  %v77_v5 = vld [vmem:[%s14481_s1 + $0x38] sm:$0xff]  ;;  %v76_v6 = vld [vmem:[%s14481_s1 + $0x30] sm:$0xff]  ;;  %s10710_s19 = smov 120   ;;  %s10713_s15 = smov 124  }
  0x11   :  { %9318 = vmatpush3.msra.mxu0 %v81_v0  ;;  %v54_v4 = vld [vmem:[%s14480_s0] sm:$0xff]  ;;  %v75_v7 = vld [vmem:[%s14481_s1 + $0x28] sm:$0xff]  ;;  %v73_v9 = vld [vmem:[%s14481_s1 + $0x18] sm:$0xff]  ;;  %s10714_s18 = smov 108  }
  0x12   :  { %9319 = vmatprep.subr.mxu0 %v80_v1  ;;  %9341 = vmatprep.mubr.msk.f32.mxu0 %vm88_vm0, %v54_v4  ;;  %v74_v8 = vld [vmem:[%s14481_s1 + $0x20] sm:$0xff]  ;;  %v72_v10 = vld [vmem:[%s14481_s1 + $0x10] sm:$0xff]  ;;  %v71_v11 = vld [vmem:[%s14481_s1 + $0x8] sm:$0xff] }
  0x13   :  { %9320 = vmatpush3.msra.mxu0 %v80_v1  ;;  %v70_v12 = vld [vmem:[%s14481_s1] sm:$0xff]  ;;  %v55_v13 = vld [vmem:[%s14480_s0 + $0x8] sm:$0xff]  ;;  %v56_v14 = vld [vmem:[%s14480_s0 + $0x10] sm:$0xff]  ;;  %s10711_s1 = smov 112  }
  0x14   :  { %9321 = vmatprep.subr.mxu0 %v79_v2  ;;  %v57_v15 = vld [vmem:[%s14480_s0 + $0x18] sm:$0xff]  ;;  %v58_v16 = vld [vmem:[%s14480_s0 + $0x20] sm:$0xff]  ;;  %v59_v17 = vld [vmem:[%s14480_s0 + $0x28] sm:$0xff] }
  0x15   :  { %9322 = vmatpush3.msra.mxu0 %v79_v2  ;;  %v60_v18 = vld [vmem:[%s14480_s0 + $0x30] sm:$0xff]  ;;  %v61_v19 = vld [vmem:[%s14480_s0 + $0x38] sm:$0xff]  ;;  %v62_v20 = vld [vmem:[%s14480_s0 + $0x40] sm:$0xff] }
  0x16   :  { %9323 = vmatprep.subr.mxu0 %v78_v3  ;;  %v63_v21 = vld [vmem:[%s14480_s0 + $0x48] sm:$0xff]  ;;  %v64_v22 = vld [vmem:[%s14480_s0 + $0x50] sm:$0xff]  ;;  %v65_v23 = vld [vmem:[%s14480_s0 + $0x58] sm:$0xff] }
  0x17   :  { %9324 = vmatpush3.msra.mxu0 %v78_v3  ;;  %v66_v24 = vld [vmem:[%s14480_s0 + $0x60] sm:$0xff]  ;;  %v67_v25 = vld [vmem:[%s14480_s0 + $0x68] sm:$0xff]  ;;  %v68_v26 = vld [vmem:[%s14480_s0 + $0x70] sm:$0xff] }
  0x18   :  { %9325 = vmatprep.subr.mxu0 %v77_v5  ;;  %v69_v27 = vld [vmem:[%s14480_s0 + $0x78] sm:$0xff]  ;;  %v479_v29 = vld [vmem:[%s14482_s2 + $0x30] sm:$0xff]  ;;  %v478_v30 = vld [vmem:[%s14482_s2 + $0x28] sm:$0xff] }
  0x19   :  { %9326 = vmatpush3.msra.mxu0 %v77_v5  ;;  %v480_v28 = vld [vmem:[%s14482_s2 + $0x38] sm:$0xff]  ;;  %v477_v31 = vld [vmem:[%s14482_s2 + $0x20] sm:$0xff]  ;;  %v475_v33 = vld [vmem:[%s14482_s2 + $0x10] sm:$0xff] }
  0x1a   :  { %9327 = vmatprep.subr.mxu0 %v76_v6  ;;  %9365 = vmatprep.subr.mxu1 %v480_v28  ;;  %v476_v32 = vld [vmem:[%s14482_s2 + $0x18] sm:$0xff]  ;;  %v474_v34 = vld [vmem:[%s14482_s2 + $0x8] sm:$0xff]  ;;  %v473_v35 = vld [vmem:[%s14482_s2] sm:$0xff]  ;;  %s83_s2 = sld [smem:[#allocation2]] }
  0x1b   :  { %9328 = vmatpush3.msra.mxu0 %v76_v6  ;;  %9366 = vmatpush3.msra.mxu1 %v480_v28  ;;  %v10912_v37 = vld [vmem:[%s14484_s4] ss:$0 sm:$0xff] }
  0x1c   :  { %9329 = vmatprep.subr.mxu0 %v75_v7  ;;  %9367 = vmatprep.subr.mxu1 %v479_v29 }
  0x1d   :  { %9330 = vmatpush3.msra.mxu0 %v75_v7  ;;  %9368 = vmatpush3.msra.mxu1 %v479_v29 }
  0x1e   :  { %9331 = vmatprep.subr.mxu0 %v74_v8  ;;  %9369 = vmatprep.subr.mxu1 %v478_v30 }
  0x1f   :  { %9332 = vmatpush3.msra.mxu0 %v74_v8  ;;  %9370 = vmatpush3.msra.mxu1 %v478_v30 }
  0x20   :  { %9333 = vmatprep.subr.mxu0 %v73_v9  ;;  %9371 = vmatprep.subr.mxu1 %v477_v31 }
  0x21   :  { %9334 = vmatpush3.msra.mxu0 %v73_v9  ;;  %9372 = vmatpush3.msra.mxu1 %v477_v31 }
  0x22   :  { %9335 = vmatprep.subr.mxu0 %v72_v10  ;;  %9373 = vmatprep.subr.mxu1 %v476_v32 }
  0x23   :  { %9336 = vmatpush3.msra.mxu0 %v72_v10  ;;  %9374 = vmatpush3.msra.mxu1 %v476_v32 }
  0x24   :  { %9337 = vmatprep.subr.mxu0 %v71_v11  ;;  %9375 = vmatprep.subr.mxu1 %v475_v33 }
  0x25   :  { %9338 = vmatpush3.msra.mxu0 %v71_v11  ;;  %9376 = vmatpush3.msra.mxu1 %v475_v33 }
  0x26   :  { %9339 = vmatprep.subr.mxu0 %v70_v12  ;;  %9377 = vmatprep.subr.mxu1 %v474_v34 }
  0x27   :  { %9340 = vmatpush3.msra.mxu0 %v70_v12  ;;  %9378 = vmatpush3.msra.mxu1 %v474_v34 }
  0x28   :  { %9342 = vmatmul.mubr.msk.f32.vlgmr.msra.gmra.mxu0 %vm88_vm0, %v55_v13  ;;  %9379 = vmatprep.subr.mxu1 %v473_v35 }
  0x29   :  { %9344 = vmatprep.mubr.msk.f32.mxu0 %vm88_vm0, %v56_v14  ;;  %9380 = vmatpush3.msra.mxu1 %v473_v35 }
  0x2c   :  { %9345 = vmatmul.mubr.msk.f32.gmra.mxu0 %vm88_vm0, %v57_v15 }
  0x2d   :  { %9347 = vmatprep.mubr.msk.f32.mxu0 %vm88_vm0, %v58_v16 }
  0x30   :  { %9348 = vmatmul.mubr.msk.f32.gmra.mxu0 %vm88_vm0, %v59_v17 }
  0x31   :  { %9350 = vmatprep.mubr.msk.f32.mxu0 %vm88_vm0, %v60_v18 }
  0x34   :  { %9351 = vmatmul.mubr.msk.f32.gmra.mxu0 %vm88_vm0, %v61_v19 }
  0x35   :  { %9353 = vmatprep.mubr.msk.f32.mxu0 %vm88_vm0, %v62_v20 }
  0x38   :  { %9354 = vmatmul.mubr.msk.f32.gmra.mxu0 %vm88_vm0, %v63_v21 }
  0x39   :  { %9356 = vmatprep.mubr.msk.f32.mxu0 %vm88_vm0, %v64_v22 }
  0x3c   :  { %9357 = vmatmul.mubr.msk.f32.gmra.mxu0 %vm88_vm0, %v65_v23 }
  0x3d   :  { %9359 = vmatprep.mubr.msk.f32.mxu0 %vm88_vm0, %v66_v24 }
  0x40   :  { %9360 = vmatmul.mubr.msk.f32.gmra.mxu0 %vm88_vm0, %v67_v25 }
  0x41   :  { %9362 = vmatprep.mubr.msk.f32.mxu0 %vm88_vm0, %v68_v26 }
  0x44   :  { %9363 = vmatmul.mubr.msk.f32.gmra.mxu0 %vm88_vm0, %v69_v27 }
  0xe8   :  { %v9343_v36 = vpop.f32.mrf.mxu0 }
  0xe9   :  { %v10915_v39 = vadd.f32 %v9343_v36, %v10912_v37 }
  0xea   :  { %v203_v38 = vpop.f32.mrf.mxu0 }
  0xeb   :  { %v10918_v40 = vadd.f32 %v10912_v37, %v203_v38  ;;  %v284_v44 = vsel %vm282_vm1, %v10915_v39, 0.0 }
  0xec   :  { %v9346_v41 = vpop.f32.mrf.mxu0 }
  0xed   :  { %v283_v42 = vsel %vm282_vm1, %v10918_v40, 0.0  ;;  %v219_v45 = vadd.f32 %v9346_v41, %v10912_v37 }
  0xee   :  { %v213_v43 = vpop.f32.mrf.mxu0  ;;  %v285_v47 = vadd.f32 %v284_v44, %v283_v42 }
  0xef   :  { %v214_v46 = vadd.f32 %v10912_v37, %v213_v43  ;;  %v288_v52 = vsel %vm282_vm1, %v219_v45, 0.0 }
  0xf0   :  { %v9349_v48 = vpop.f32.mrf.mxu0 }
  0xf1   :  { %v286_v49 = vsel %vm282_vm1, %v214_v46, 0.0  ;;  %v229_v53 = vadd.f32 %v9349_v48, %v10912_v37 }
  0xf2   :  { %v287_v50 = vadd.f32 %v286_v49, %v285_v47  ;;  %v223_v51 = vpop.f32.mrf.mxu0 }
  0xf3   :  { %v224_v54 = vadd.f32 %v10912_v37, %v223_v51  ;;  %v292_v60 = vsel %vm282_vm1, %v229_v53, 0.0 }
  0xf4   :  { %v289_v55 = vadd.f32 %v288_v52, %v287_v50  ;;  %v9352_v56 = vpop.f32.mrf.mxu0 }
  0xf5   :  { %v290_v57 = vsel %vm282_vm1, %v224_v54, 0.0  ;;  %v239_v61 = vadd.f32 %v9352_v56, %v10912_v37 }
  0xf6   :  { %v291_v58 = vadd.f32 %v290_v57, %v289_v55  ;;  %v233_v59 = vpop.f32.mrf.mxu0 }
  0xf7   :  { %v234_v62 = vadd.f32 %v10912_v37, %v233_v59  ;;  %v296_v5 = vsel %vm282_vm1, %v239_v61, 0.0 }
  0xf8   :  { %v293_v63 = vadd.f32 %v292_v60, %v291_v58  ;;  %v9355_v0 = vpop.f32.mrf.mxu0 }
  0xf9   :  { %v294_v1 = vsel %vm282_vm1, %v234_v62, 0.0  ;;  %v10936_v2 = vadd.f32 %v9355_v0, %v10912_v37 }
  0xfa   :  { %v295_v3 = vadd.f32 %v294_v1, %v293_v63  ;;  %v243_v4 = vpop.f32.mrf.mxu0 }
  0xfb   :  { %v355_v6 = vsel %vm282_vm1, %v10936_v2, 0.0  ;;  %v10942_v7 = vadd.f32 %v10912_v37, %v243_v4 }
  0xfc   :  { %v297_v8 = vadd.f32 %v296_v5, %v295_v3  ;;  %v9358_v9 = vpop.f32.mrf.mxu0 }
  0xfd   :  { %v354_v10 = vsel %vm282_vm1, %v10942_v7, 0.0  ;;  %v10947_v11 = vadd.f32 %v9358_v9, %v10912_v37 }
  0xfe   :  { %v298_v12 = vrot.slane %v297_v8, 4  ;;  %v356_v13 = vadd.f32 %v355_v6, %v354_v10  ;;  %v253_v14 = vpop.f32.mrf.mxu0 }
  0xff   :  { %v10950_v15 = vadd.f32 %v10912_v37, %v253_v14  ;;  %v359_v18 = vsel %vm282_vm1, %v10947_v11, 0.0 }
 0x100   :  { %v299_v16 = vadd.f32 %v298_v12, %v297_v8  ;;  %v9361_v17 = vpop.f32.mrf.mxu0 }
 0x101   :  { %v357_v19 = vsel %vm282_vm1, %v10950_v15, 0.0  ;;  %v10957_v22 = vadd.f32 %v9361_v17, %v10912_v37 }
 0x102   :  { %v300_v20 = vrot.slane %v299_v16, 2  ;;  %v358_v21 = vadd.f32 %v357_v19, %v356_v13  ;;  %v263_v23 = vpop.f32.mrf.mxu0 }
 0x103   :  { %v10960_v24 = vadd.f32 %v10912_v37, %v263_v23  ;;  %v363_v30 = vsel %vm282_vm1, %v10957_v22, 0.0 }
 0x104   :  { %v301_v25 = vadd.f32 %v300_v20, %v299_v16  ;;  %v360_v26 = vadd.f32 %v359_v18, %v358_v21  ;;  %v9364_v27 = vpop.f32.mrf.mxu0 }
 0x105   :  { %v361_v28 = vsel %vm282_vm1, %v10960_v24, 0.0  ;;  %v10969_v41 = vadd.f32 %v9364_v27, %v10912_v37 }
 0x106   :  { %v302_v29 = vrot.slane %v301_v25, 1  ;;  %v362_v31 = vadd.f32 %v361_v28, %v360_v26  ;;  %v273_v32 = vpop.f32.mrf.mxu0 }
 0x107   :  { %v274_v33 = vadd.f32 %v10912_v37, %v273_v32 }
 0x108   :  { %v303_v34 = vadd.f32 %v302_v29, %v301_v25  ;;  %v364_v35 = vadd.f32 %v363_v30, %v362_v31 }
 0x109   :  { %v365_v38 = vsel %vm282_vm1, %v274_v33, 0.0 }
 0x10a   :  { %v305_v36 = vmul.f32 0.015625, %v303_v34  ;;  %v366_v48 = vadd.f32 %v365_v38, %v364_v35 }
 0x10c   :  { %v10972_v42 = vsub.f32 %v10918_v40, %v305_v36  ;;  %v10975_v43 = vsub.f32 %v10915_v39, %v305_v36  ;;  %v10977_v44 = vsub.f32 %v214_v46, %v305_v36  ;;  %v10979_v47 = vsub.f32 %v219_v45, %v305_v36 }
 0x10d   :  { %v10981_v49 = vsub.f32 %v224_v54, %v305_v36  ;;  %v367_v39 = vsel %vm282_vm1, %v10969_v41, 0.0  ;;  %v10991_v51 = vsub.f32 %v229_v53, %v305_v36  ;;  %v10997_v55 = vsub.f32 %v234_v62, %v305_v36 }
 0x10e   :  { %v314_v50 = vmul.f32 %v10972_v42, %v10972_v42  ;;  %v315_v37 = vmul.f32 %v10975_v43, %v10975_v43  ;;  %v316_v40 = vmul.f32 %v10977_v44, %v10977_v44  ;;  %v317_v45 = vmul.f32 %v10979_v47, %v10979_v47 }
 0x10f   :  { %v318_v56 = vmul.f32 %v10981_v49, %v10981_v49  ;;  %v368_v58 = vadd.f32 %v367_v39, %v366_v48  ;;  %v11002_v60 = vsub.f32 %v239_v61, %v305_v36  ;;  %v319_v53 = vmul.f32 %v10991_v51, %v10991_v51 }
 0x110   :  { %v322_v46 = vsel %vm282_vm1, %v314_v50, 0.0  ;;  %v323_v52 = vsel %vm282_vm1, %v315_v37, 0.0  ;;  %v325_v57 = vsel %vm282_vm1, %v316_v40, 0.0  ;;  %v327_v63 = vsel %vm282_vm1, %v317_v45, 0.0 }
 0x111   :  { %v324_v54 = vadd.f32 %v323_v52, %v322_v46  ;;  %v369_v0 = vrot.slane %v368_v58, 4  ;;  %v320_v62 = vmul.f32 %v10997_v55, %v10997_v55  ;;  %v329_v3 = vsel %vm282_vm1, %v318_v56, 0.0 }
 0x112   :  { %v321_v6 = vmul.f32 %v11002_v60, %v11002_v60  ;;  %v331_v61 = vsel %vm282_vm1, %v319_v53, 0.0 }
 0x113   :  { %v326_v59 = vadd.f32 %v325_v57, %v324_v54  ;;  %v370_v4 = vadd.f32 %v369_v0, %v368_v58  ;;  %v333_v10 = vsel %vm282_vm1, %v320_v62, 0.0 }
 0x114   :  { %v335_v14 = vsel %vm282_vm1, %v321_v6, 0.0  ;;  %v11062_v6 = vstv %s83_s2  ;;  %s10712_s2 = smov 116  }
 0x115   :  { %v328_v1 = vadd.f32 %v327_v63, %v326_v59  ;;  %v371_v8 = vrot.slane %v370_v4, 2 }
 0x117   :  { %v330_v5 = vadd.f32 %v329_v3, %v328_v1  ;;  %v372_v12 = vadd.f32 %v371_v8, %v370_v4 }
 0x119   :  { %v332_v9 = vadd.f32 %v331_v61, %v330_v5  ;;  %v373_v16 = vrot.slane %v372_v12, 1 }
 0x11b   :  { %v334_v13 = vadd.f32 %v333_v10, %v332_v9  ;;  %v374_v18 = vadd.f32 %v373_v16, %v372_v12 }
 0x11d   :  { %v336_v17 = vadd.f32 %v335_v14, %v334_v13  ;;  %v375_v20 = vmul.f32 0.015625, %v374_v18 }
 0x11f   :  { %v337_v19 = vrot.slane %v336_v17, 4  ;;  %v11016_v23 = vsub.f32 %v10942_v7, %v375_v20  ;;  %v11019_v25 = vsub.f32 %v10936_v2, %v375_v20  ;;  %v11022_v26 = vsub.f32 %v10950_v15, %v375_v20 }
 0x120   :  { %v11025_v27 = vsub.f32 %v10947_v11, %v375_v20  ;;  %v11028_v29 = vsub.f32 %v10960_v24, %v375_v20  ;;  %v11031_v30 = vsub.f32 %v10957_v22, %v375_v20  ;;  %v11041_v32 = vsub.f32 %v274_v33, %v375_v20 }
 0x121   :  { %v338_v21 = vadd.f32 %v337_v19, %v336_v17  ;;  %v384_v7 = vmul.f32 %v11016_v23, %v11016_v23  ;;  %v385_v2 = vmul.f32 %v11019_v25, %v11019_v25  ;;  %v386_v15 = vmul.f32 %v11022_v26, %v11022_v26 }
 0x122   :  { %v387_v11 = vmul.f32 %v11025_v27, %v11025_v27  ;;  %v388_v24 = vmul.f32 %v11028_v29, %v11028_v29  ;;  %v11049_v48 = vsub.f32 %v10969_v41, %v375_v20  ;;  %v389_v50 = vmul.f32 %v11031_v30, %v11031_v30 }
 0x123   :  { %v339_v28 = vrot.slane %v338_v21, 2  ;;  %v392_v22 = vsel %vm282_vm1, %v384_v7, 0.0  ;;  %v393_v34 = vsel %vm282_vm1, %v385_v2, 0.0  ;;  %v395_v38 = vsel %vm282_vm1, %v386_v15, 0.0 }
 0x124   :  { %v394_v36 = vadd.f32 %v393_v34, %v392_v22  ;;  %v397_v33 = vsel %vm282_vm1, %v387_v11, 0.0  ;;  %v390_v39 = vmul.f32 %v11041_v32, %v11041_v32  ;;  %v399_v45 = vsel %vm282_vm1, %v388_v24, 0.0 }
 0x125   :  { %v340_v31 = vadd.f32 %v339_v28, %v338_v21  ;;  %v391_v54 = vmul.f32 %v11049_v48, %v11049_v48  ;;  %v401_v41 = vsel %vm282_vm1, %v389_v50, 0.0 }
 0x126   :  { %v396_v40 = vadd.f32 %v395_v38, %v394_v36  ;;  %v403_v58 = vsel %vm282_vm1, %v390_v39, 0.0 }
 0x127   :  { %v341_v35 = vrot.slane %v340_v31, 1  ;;  %v405_v53 = vsel %vm282_vm1, %v391_v54, 0.0 }
 0x128   :  { %v398_v52 = vadd.f32 %v397_v33, %v396_v40 }
 0x129   :  { %v342_v37 = vadd.f32 %v341_v35, %v340_v31 }
 0x12a   :  { %v400_v57 = vadd.f32 %v399_v45, %v398_v52 }
 0x12b   :  { %v343_v46 = vmul.f32 0.015625, %v342_v37 }
 0x12c   :  { %v402_v59 = vadd.f32 %v401_v41, %v400_v57 }
 0x12d   :  { %v344_v56 = vadd.f32 1e-05, %v343_v46 }
 0x12e   :  { %v404_v63 = vadd.f32 %v403_v58, %v402_v59  ;;  %v872_v59 = vld [vmem:[%s14483_s3 + $0x10] sm:$0xff] }
 0x12f   :  { %10208 = vrsqrt.f32 %v344_v56 }
 0x130   :  { %v406_v0 = vadd.f32 %v405_v53, %v404_v63  ;;  %v871_v53 = vld [vmem:[%s14483_s3 + $0x8] sm:$0xff]  ;;  %v870_v63 = vld [vmem:[%s14483_s3] sm:$0xff] }
 0x132   :  { %v407_v1 = vrot.slane %v406_v0, 4 }
 0x134   :  { %v408_v62 = vadd.f32 %v407_v1, %v406_v0  ;;  %v11127_v1 = vld [vmem:[%s14484_s4 + $0x1] ss:$0 sm:$0xff] }
 0x136   :  { %v409_v3 = vrot.slane %v408_v62, 2 }
 0x138   :  { %v410_v4 = vadd.f32 %v409_v3, %v408_v62 }
 0x13a   :  { %v411_v61 = vrot.slane %v410_v4, 1 }
 0x13c   :  { %v10209_v5 = vpop.eup %10208  ;;  %v412_v14 = vadd.f32 %v411_v61, %v410_v4 }
 0x13d   :  { %v346_v8 = vmul.f32 %v10209_v5, %v10972_v42  ;;  %v347_v9 = vmul.f32 %v10209_v5, %v10975_v43  ;;  %v348_v10 = vmul.f32 %v10209_v5, %v10977_v44  ;;  %v349_v12 = vmul.f32 %v10209_v5, %v10979_v47 }
 0x13e   :  { %v350_v13 = vmul.f32 %v10209_v5, %v10981_v49  ;;  %v413_v19 = vmul.f32 0.015625, %v412_v14  ;;  %v352_v43 = vmul.f32 %v10209_v5, %v10997_v55  ;;  %v351_v49 = vmul.f32 %v10209_v5, %v10991_v51 }
 0x13f   :  { %vm424_vm2 = vcmp.ge.f32.partialorder %v346_v8, 0.0  ;;  %v441_v16 = vmul.f32 %v11062_v6, %v346_v8  ;;  %vm425_vm3 = vcmp.ge.f32.partialorder %v347_v9, 0.0  ;;  %v442_v17 = vmul.f32 %v11062_v6, %v347_v9 }
 0x140   :  { %vm426_vm4 = vcmp.ge.f32.partialorder %v348_v10, 0.0  ;;  %v443_v18 = vmul.f32 %v11062_v6, %v348_v10  ;;  %v444_v47 = vmul.f32 %v11062_v6, %v349_v12  ;;  %v414_v20 = vadd.f32 1e-05, %v413_v19 }
 0x141   :  { %v457_v42 = vsel %vm424_vm2, %v346_v8, %v441_v16  ;;  %v458_v44 = vsel %vm425_vm3, %v347_v9, %v442_v17  ;;  %vm427_vm5 = vcmp.ge.f32.partialorder %v349_v12, 0.0  ;;  %v445_v28 = vmul.f32 %v11062_v6, %v350_v13 }
 0x142   :  { %9381 = vmatprep.mubr.msk.f32.mxu1 %vm282_vm1, %v457_v42  ;;  %v459_v21 = vsel %vm426_vm4, %v348_v10, %v443_v18  ;;  %vm428_vm6 = vcmp.ge.f32.partialorder %v350_v13, 0.0  ;;  %10210 = vrsqrt.f32 %v414_v20  ;;  %v460_v7 = vsel %vm427_vm5, %v349_v12, %v444_v47 }
 0x143   :  { %9382 = vmatmul.mubr.msk.f32.vlgmr.msra.gmra.mxu1 %vm282_vm1, %v458_v44  ;;  %v446_v55 = vmul.f32 %v11062_v6, %v351_v49  ;;  %v353_v2 = vmul.f32 %v10209_v5, %v11002_v60  ;;  %v461_v15 = vsel %vm428_vm6, %v350_v13, %v445_v28  ;;  %vm429_vm7 = vcmp.ge.f32.partialorder %v351_v49, 0.0 }
 0x144   :  { %9384 = vmatprep.mubr.msk.f32.mxu1 %vm282_vm1, %v459_v21  ;;  %v447_v51 = vmul.f32 %v11062_v6, %v352_v43  ;;  %vm430_vm8 = vcmp.ge.f32.partialorder %v352_v43, 0.0  ;;  %vm680_vm3 = vcmask 261120  }
 0x145   :  { %v462_v31 = vsel %vm429_vm7, %v351_v49, %v446_v55  ;;  %v448_v11 = vmul.f32 %v11062_v6, %v353_v2  ;;  %vm431_vm9 = vcmp.ge.f32.partialorder %v353_v2, 0.0 }
 0x146   :  { %v463_v24 = vsel %vm430_vm8, %v352_v43, %v447_v51 }
 0x147   :  { %9385 = vmatmul.mubr.msk.f32.gmra.mxu1 %vm282_vm1, %v460_v7  ;;  %v464_v22 = vsel %vm431_vm9, %v353_v2, %v448_v11 }
 0x148   :  { %9387 = vmatprep.mubr.msk.f32.mxu1 %vm282_vm1, %v461_v15 }
 0x14b   :  { %9388 = vmatmul.mubr.msk.f32.gmra.mxu1 %vm282_vm1, %v462_v31 }
 0x14c   :  { %9390 = vmatprep.mubr.msk.f32.mxu1 %vm282_vm1, %v463_v24 }
 0x14f   :  { %9391 = vmatmul.mubr.msk.f32.gmra.mxu1 %vm282_vm1, %v464_v22  ;;  %v10211_v60 = vpop.eup %10210 }
 0x150   :  { %v416_v34 = vmul.f32 %v10211_v60, %v11016_v23  ;;  %v417_v35 = vmul.f32 %v10211_v60, %v11019_v25  ;;  %v418_v36 = vmul.f32 %v10211_v60, %v11022_v26  ;;  %v422_v38 = vmul.f32 %v10211_v60, %v11041_v32 }
 0x151   :  { %v419_v50 = vmul.f32 %v10211_v60, %v11025_v27  ;;  %v420_v33 = vmul.f32 %v10211_v60, %v11028_v29  ;;  %v421_v25 = vmul.f32 %v10211_v60, %v11031_v30  ;;  %v423_v52 = vmul.f32 %v10211_v60, %v11049_v48  ;;  %v873_v48 = vld [vmem:[%s14483_s3 + $0x18] sm:$0xff]  ;;  %s8332_s3 = sld [smem:[#allocation2 + $0x1]] }
 0x152   :  { %vm432_vm10 = vcmp.ge.f32.partialorder %v416_v34, 0.0  ;;  %v449_v37 = vmul.f32 %v11062_v6, %v416_v34  ;;  %vm433_vm11 = vcmp.ge.f32.partialorder %v417_v35, 0.0  ;;  %v450_v40 = vmul.f32 %v11062_v6, %v417_v35  ;;  %9405 = vmatprep.subr.mxu1 %v873_v48 }
 0x153   :  { %vm434_vm12 = vcmp.ge.f32.partialorder %v418_v36, 0.0  ;;  %v451_v39 = vmul.f32 %v11062_v6, %v418_v36  ;;  %v452_v23 = vmul.f32 %v11062_v6, %v419_v50  ;;  %vm435_vm13 = vcmp.ge.f32.partialorder %v419_v50, 0.0  ;;  %9406 = vmatpush3.msra.mxu1 %v873_v48 }
 0x154   :  { %v465_v26 = vsel %vm432_vm10, %v416_v34, %v449_v37  ;;  %v466_v45 = vsel %vm433_vm11, %v417_v35, %v450_v40  ;;  %v453_v27 = vmul.f32 %v11062_v6, %v420_v33  ;;  %vm436_vm14 = vcmp.ge.f32.partialorder %v420_v33, 0.0  ;;  %9407 = vmatprep.subr.mxu1 %v872_v59 }
 0x155   :  { %9393 = vmatprep.mubr.msk.f32.mxu1 %vm282_vm1, %v465_v26  ;;  %v467_v29 = vsel %vm434_vm12, %v418_v36, %v451_v39  ;;  %v468_v32 = vsel %vm435_vm13, %v419_v50, %v452_v23  ;;  %v454_v46 = vmul.f32 %v11062_v6, %v421_v25  ;;  %vm437_vm15 = vcmp.ge.f32.partialorder %v421_v25, 0.0  ;;  %9408 = vmatpush3.msra.mxu1 %v872_v59 }
 0x156   :  { %9394 = vmatmul.mubr.msk.f32.gmra.mxu1 %vm282_vm1, %v466_v45  ;;  %v469_v54 = vsel %vm436_vm14, %v420_v33, %v453_v27  ;;  %v455_v30 = vmul.f32 %v11062_v6, %v422_v38  ;;  %vm438_vm0 = vcmp.ge.f32.partialorder %v422_v38, 0.0  ;;  %v456_v56 = vmul.f32 %v11062_v6, %v423_v52  ;;  %9409 = vmatprep.subr.mxu1 %v871_v53 }
 0x157   :  { %9396 = vmatprep.mubr.msk.f32.mxu1 %vm282_vm1, %v467_v29  ;;  %v470_v41 = vsel %vm437_vm15, %v421_v25, %v454_v46  ;;  %vm439_vm2 = vcmp.ge.f32.partialorder %v423_v52, 0.0  ;;  %9410 = vmatpush3.msra.mxu1 %v871_v53 }
 0x158   :  { %v471_v57 = vsel %vm438_vm0, %v422_v38, %v455_v30  ;;  %v472_v58 = vsel %vm439_vm2, %v423_v52, %v456_v56  ;;  %9411 = vmatprep.subr.mxu1 %v870_v63 }
 0x159   :  { %9412 = vmatpush3.msra.mxu1 %v870_v63 }
 0x15a   :  { %9397 = vmatmul.mubr.msk.f32.gmra.mxu1 %vm282_vm1, %v468_v32 }
 0x15b   :  { %9399 = vmatprep.mubr.msk.f32.mxu1 %vm282_vm1, %v469_v54 }
 0x15e   :  { %9400 = vmatmul.mubr.msk.f32.gmra.mxu1 %vm282_vm1, %v470_v41 }
 0x15f   :  { %9402 = vmatprep.mubr.msk.f32.mxu1 %vm282_vm1, %v471_v57 }
 0x162   :  { %9403 = vmatmul.mubr.msk.f32.gmra.mxu1 %vm282_vm1, %v472_v58 }
 0x203   :  { %v9383_v0 = vpop.f32.mrf.mxu1 }
 0x204   :  { %v607_v3 = vadd.f32 %v9383_v0, %v11127_v1 }
 0x205   :  { %v601_v62 = vpop.f32.mrf.mxu1 }
 0x206   :  { %v602_v4 = vadd.f32 %v11127_v1, %v601_v62  ;;  %v682_v8 = vsel %vm680_vm3, %v607_v3, 0.0 }
 0x207   :  { %v9386_v5 = vpop.f32.mrf.mxu1 }
 0x208   :  { %v681_v6 = vsel %vm680_vm3, %v602_v4, 0.0  ;;  %v617_v9 = vadd.f32 %v9386_v5, %v11127_v1 }
 0x209   :  { %v611_v61 = vpop.f32.mrf.mxu1  ;;  %v683_v12 = vadd.f32 %v682_v8, %v681_v6 }
 0x20a   :  { %v612_v10 = vadd.f32 %v11127_v1, %v611_v61  ;;  %v686_v18 = vsel %vm680_vm3, %v617_v9, 0.0 }
 0x20b   :  { %v9389_v13 = vpop.f32.mrf.mxu1 }
 0x20c   :  { %v684_v14 = vsel %vm680_vm3, %v612_v10, 0.0  ;;  %v627_v19 = vadd.f32 %v9389_v13, %v11127_v1 }
 0x20d   :  { %v685_v16 = vadd.f32 %v684_v14, %v683_v12  ;;  %v621_v17 = vpop.f32.mrf.mxu1 }
 0x20e   :  { %v622_v42 = vadd.f32 %v11127_v1, %v621_v17  ;;  %v690_v21 = vsel %vm680_vm3, %v627_v19, 0.0 }
 0x20f   :  { %v687_v43 = vadd.f32 %v686_v18, %v685_v16  ;;  %v9392_v44 = vpop.f32.mrf.mxu1 }
 0x210   :  { %v688_v47 = vsel %vm680_vm3, %v622_v42, 0.0  ;;  %v637_v28 = vadd.f32 %v9392_v44, %v11127_v1 }
 0x211   :  { %v689_v49 = vadd.f32 %v688_v47, %v687_v43  ;;  %v631_v20 = vpop.f32.mrf.mxu1 }
 0x212   :  { %v632_v7 = vadd.f32 %v11127_v1, %v631_v20  ;;  %v694_v51 = vsel %vm680_vm3, %v637_v28, 0.0 }
 0x213   :  { %v691_v55 = vadd.f32 %v690_v21, %v689_v49 }
 0x214   :  { %v692_v2 = vsel %vm680_vm3, %v632_v7, 0.0 }
 0x215   :  { %v693_v15 = vadd.f32 %v692_v2, %v691_v55 }
 0x216   :  { %v9395_v24 = vpop.f32.mrf.mxu1 }
 0x217   :  { %v695_v31 = vadd.f32 %v694_v51, %v693_v15  ;;  %v11146_v22 = vadd.f32 %v9395_v24, %v11127_v1 }
 0x218   :  { %v641_v34 = vpop.f32.mrf.mxu1 }
 0x219   :  { %v696_v11 = vrot.slane %v695_v31, 4  ;;  %v11149_v35 = vadd.f32 %v11127_v1, %v641_v34  ;;  %v752_v38 = vsel %vm680_vm3, %v11146_v22, 0.0 }
 0x21a   :  { %v9398_v50 = vpop.f32.mrf.mxu1 }
 0x21b   :  { %v697_v60 = vadd.f32 %v696_v11, %v695_v31  ;;  %v751_v33 = vsel %vm680_vm3, %v11149_v35, 0.0  ;;  %v11159_v26 = vadd.f32 %v9398_v50, %v11127_v1 }
 0x21c   :  { %v651_v40 = vpop.f32.mrf.mxu1  ;;  %v753_v39 = vadd.f32 %v752_v38, %v751_v33 }
 0x21d   :  { %v698_v36 = vrot.slane %v697_v60, 2  ;;  %v11156_v23 = vadd.f32 %v11127_v1, %v651_v40  ;;  %v756_v54 = vsel %vm680_vm3, %v11159_v26, 0.0 }
 0x21e   :  { %v9401_v45 = vpop.f32.mrf.mxu1 }
 0x21f   :  { %v699_v37 = vadd.f32 %v698_v36, %v697_v60  ;;  %v754_v27 = vsel %vm680_vm3, %v11156_v23, 0.0  ;;  %v667_v59 = vadd.f32 %v9401_v45, %v11127_v1 }
 0x220   :  { %v661_v32 = vpop.f32.mrf.mxu1  ;;  %v755_v46 = vadd.f32 %v754_v27, %v753_v39 }
 0x221   :  { %v700_v25 = vrot.slane %v699_v37, 1  ;;  %v11166_v30 = vadd.f32 %v11127_v1, %v661_v32  ;;  %v760_v13 = vsel %vm680_vm3, %v667_v59, 0.0 }
 0x222   :  { %v9404_v41 = vpop.f32.mrf.mxu1  ;;  %v757_v53 = vadd.f32 %v756_v54, %v755_v46 }
 0x223   :  { %v701_v29 = vadd.f32 %v700_v25, %v699_v37  ;;  %v677_v14 = vadd.f32 %v9404_v41, %v11127_v1 }
 0x224   :  { %v671_v5 = vpop.f32.mrf.mxu1 }
 0x225   :  { %v702_v52 = vmul.f32 0.015625, %v701_v29 }
 0x227   :  { %v11168_v56 = vsub.f32 %v602_v4, %v702_v52  ;;  %v11170_v57 = vsub.f32 %v607_v3, %v702_v52  ;;  %v11172_v58 = vsub.f32 %v612_v10, %v702_v52  ;;  %v11174_v48 = vsub.f32 %v617_v9, %v702_v52 }
 0x228   :  { %v11177_v63 = vsub.f32 %v622_v42, %v702_v52  ;;  %v758_v3 = vsel %vm680_vm3, %v11166_v30, 0.0  ;;  %v11187_v6 = vsub.f32 %v627_v19, %v702_v52  ;;  %v11193_v10 = vsub.f32 %v632_v7, %v702_v52 }
 0x229   :  { %v711_v0 = vmul.f32 %v11168_v56, %v11168_v56  ;;  %v712_v62 = vmul.f32 %v11170_v57, %v11170_v57  ;;  %v713_v4 = vmul.f32 %v11172_v58, %v11172_v58  ;;  %v714_v61 = vmul.f32 %v11174_v48, %v11174_v48 }
 0x22a   :  { %v715_v16 = vmul.f32 %v11177_v63, %v11177_v63  ;;  %v759_v18 = vadd.f32 %v758_v3, %v757_v53  ;;  %v672_v19 = vadd.f32 %v11127_v1, %v671_v5  ;;  %v11201_v42 = vsub.f32 %v637_v28, %v702_v52 }
 0x22b   :  { %v719_v8 = vsel %vm680_vm3, %v711_v0, 0.0  ;;  %v720_v9 = vsel %vm680_vm3, %v712_v62, 0.0  ;;  %v722_v17 = vsel %vm680_vm3, %v713_v4, 0.0  ;;  %v716_v44 = vmul.f32 %v11187_v6, %v11187_v6 }
 0x22c   :  { %v721_v12 = vadd.f32 %v720_v9, %v719_v8  ;;  %v724_v47 = vsel %vm680_vm3, %v714_v61, 0.0  ;;  %v761_v49 = vadd.f32 %v760_v13, %v759_v18  ;;  %v762_v20 = vsel %vm680_vm3, %v672_v19, 0.0 }
 0x22d   :  { %v764_v7 = vsel %vm680_vm3, %v677_v14, 0.0  ;;  %v717_v55 = vmul.f32 %v11193_v10, %v11193_v10  ;;  %v726_v2 = vsel %vm680_vm3, %v715_v16, 0.0  ;;  %v718_v15 = vmul.f32 %v11201_v42, %v11201_v42 }
 0x22e   :  { %v723_v43 = vadd.f32 %v722_v17, %v721_v12  ;;  %v763_v1 = vadd.f32 %v762_v20, %v761_v49  ;;  %v728_v51 = vsel %vm680_vm3, %v716_v44, 0.0 }
 0x22f   :  { %v730_v24 = vsel %vm680_vm3, %v717_v55, 0.0  ;;  %v732_v36 = vsel %vm680_vm3, %v718_v15, 0.0  ;;  %v11261_v15 = vstv %s8332_s3 }
 0x230   :  { %v725_v21 = vadd.f32 %v724_v47, %v723_v43  ;;  %v765_v31 = vadd.f32 %v764_v7, %v763_v1 }
 0x232   :  { %v727_v28 = vadd.f32 %v726_v2, %v725_v21  ;;  %v766_v60 = vrot.slane %v765_v31, 4 }
 0x234   :  { %v729_v11 = vadd.f32 %v728_v51, %v727_v28  ;;  %v767_v38 = vadd.f32 %v766_v60, %v765_v31 }
 0x236   :  { %v731_v34 = vadd.f32 %v730_v24, %v729_v11  ;;  %v768_v33 = vrot.slane %v767_v38, 2 }
 0x238   :  { %v733_v50 = vadd.f32 %v732_v36, %v731_v34  ;;  %v769_v40 = vadd.f32 %v768_v33, %v767_v38 }
 0x23a   :  { %v734_v37 = vrot.slane %v733_v50, 4  ;;  %v770_v25 = vrot.slane %v769_v40, 1 }
 0x23c   :  { %v735_v39 = vadd.f32 %v734_v37, %v733_v50  ;;  %v771_v27 = vadd.f32 %v770_v25, %v769_v40 }
 0x23e   :  { %v736_v45 = vrot.slane %v735_v39, 2  ;;  %v772_v32 = vmul.f32 0.015625, %v771_v27 }
 0x240   :  { %v737_v29 = vadd.f32 %v736_v45, %v735_v39  ;;  %v11217_v52 = vsub.f32 %v11149_v35, %v772_v32  ;;  %v11220_v54 = vsub.f32 %v11146_v22, %v772_v32  ;;  %v11223_v41 = vsub.f32 %v11156_v23, %v772_v32 }
 0x241   :  { %v11226_v53 = vsub.f32 %v11159_v26, %v772_v32  ;;  %v11229_v62 = vsub.f32 %v11166_v30, %v772_v32  ;;  %v11231_v4 = vsub.f32 %v667_v59, %v772_v32  ;;  %v11241_v5 = vsub.f32 %v672_v19, %v772_v32 }
 0x242   :  { %v738_v46 = vrot.slane %v737_v29, 1  ;;  %v781_v3 = vmul.f32 %v11217_v52, %v11217_v52  ;;  %v782_v35 = vmul.f32 %v11220_v54, %v11220_v54  ;;  %v783_v22 = vmul.f32 %v11223_v41, %v11223_v41 }
 0x243   :  { %v784_v26 = vmul.f32 %v11226_v53, %v11226_v53  ;;  %v785_v30 = vmul.f32 %v11229_v62, %v11229_v62  ;;  %v11248_v13 = vsub.f32 %v677_v14, %v772_v32  ;;  %v786_v16 = vmul.f32 %v11231_v4, %v11231_v4 }
 0x244   :  { %v739_v0 = vadd.f32 %v738_v46, %v737_v29  ;;  %v789_v59 = vsel %vm680_vm3, %v781_v3, 0.0  ;;  %v790_v61 = vsel %vm680_vm3, %v782_v35, 0.0  ;;  %v792_v12 = vsel %vm680_vm3, %v783_v22, 0.0 }
 0x245   :  { %v791_v9 = vadd.f32 %v790_v61, %v789_v59  ;;  %v794_v17 = vsel %vm680_vm3, %v784_v26, 0.0  ;;  %v787_v19 = vmul.f32 %v11241_v5, %v11241_v5  ;;  %v796_v43 = vsel %vm680_vm3, %v785_v30, 0.0 }
 0x246   :  { %v740_v23 = vmul.f32 0.015625, %v739_v0  ;;  %v788_v47 = vmul.f32 %v11248_v13, %v11248_v13  ;;  %v798_v49 = vsel %vm680_vm3, %v786_v16, 0.0 }
 0x247   :  { %v793_v18 = vadd.f32 %v792_v12, %v791_v9  ;;  %v800_v20 = vsel %vm680_vm3, %v787_v19, 0.0 }
 0x248   :  { %v741_v8 = vadd.f32 1e-05, %v740_v23  ;;  %v802_v7 = vsel %vm680_vm3, %v788_v47, 0.0 }
 0x249   :  { %v795_v44 = vadd.f32 %v794_v17, %v793_v18 }
 0x24a   :  { %10212 = vrsqrt.f32 %v741_v8 }
 0x24b   :  { %v797_v14 = vadd.f32 %v796_v43, %v795_v44 }
 0x24d   :  { %v799_v21 = vadd.f32 %v798_v49, %v797_v14 }
 0x24f   :  { %v801_v55 = vadd.f32 %v800_v20, %v799_v21  ;;  %v11314_v21 = vld [vmem:[%s14484_s4 + $0x2] ss:$0 sm:$0xff] }
 0x251   :  { %v803_v2 = vadd.f32 %v802_v7, %v801_v55 }
 0x253   :  { %v804_v1 = vrot.slane %v803_v2, 4 }
 0x255   :  { %v805_v51 = vadd.f32 %v804_v1, %v803_v2 }
 0x257   :  { %v10213_v28 = vpop.eup %10212  ;;  %v806_v36 = vrot.slane %v805_v51, 2 }
 0x258   :  { %v743_v31 = vmul.f32 %v10213_v28, %v11168_v56  ;;  %v744_v11 = vmul.f32 %v10213_v28, %v11170_v57  ;;  %v745_v24 = vmul.f32 %v10213_v28, %v11172_v58  ;;  %v746_v60 = vmul.f32 %v10213_v28, %v11174_v48 }
 0x259   :  { %v747_v34 = vmul.f32 %v10213_v28, %v11177_v63  ;;  %v807_v37 = vadd.f32 %v806_v36, %v805_v51  ;;  %v749_v57 = vmul.f32 %v10213_v28, %v11193_v10  ;;  %v748_v63 = vmul.f32 %v10213_v28, %v11187_v6 }
 0x25a   :  { %vm821_vm4 = vcmp.ge.f32.partialorder %v743_v31, 0.0  ;;  %v838_v38 = vmul.f32 %v11261_v15, %v743_v31  ;;  %vm822_vm5 = vcmp.ge.f32.partialorder %v744_v11, 0.0  ;;  %v839_v50 = vmul.f32 %v11261_v15, %v744_v11 }
 0x25b   :  { %vm823_vm6 = vcmp.ge.f32.partialorder %v745_v24, 0.0  ;;  %v840_v33 = vmul.f32 %v11261_v15, %v745_v24  ;;  %v841_v48 = vmul.f32 %v11261_v15, %v746_v60  ;;  %v808_v40 = vrot.slane %v807_v37, 1 }
 0x25c   :  { %v854_v56 = vsel %vm821_vm4, %v743_v31, %v838_v38  ;;  %v855_v58 = vsel %vm822_vm5, %v744_v11, %v839_v50  ;;  %vm824_vm7 = vcmp.ge.f32.partialorder %v746_v60, 0.0  ;;  %v842_v25 = vmul.f32 %v11261_v15, %v747_v34 }
 0x25d   :  { %9413 = vmatprep.mubr.msk.f32.mxu1 %vm680_vm3, %v854_v56  ;;  %v856_v39 = vsel %vm823_vm6, %v745_v24, %v840_v33  ;;  %vm825_vm8 = vcmp.ge.f32.partialorder %v747_v34, 0.0  ;;  %v809_v45 = vadd.f32 %v808_v40, %v807_v37  ;;  %v857_v27 = vsel %vm824_vm7, %v746_v60, %v841_v48 }
 0x25e   :  { %9414 = vmatmul.mubr.msk.f32.vlgmr.msra.gmra.mxu1 %vm680_vm3, %v855_v58  ;;  %v843_v10 = vmul.f32 %v11261_v15, %v748_v63  ;;  %v750_v29 = vmul.f32 %v10213_v28, %v11201_v42  ;;  %v858_v6 = vsel %vm825_vm8, %v747_v34, %v842_v25  ;;  %vm826_vm9 = vcmp.ge.f32.partialorder %v748_v63, 0.0 }
 0x25f   :  { %9416 = vmatprep.mubr.msk.f32.mxu1 %vm680_vm3, %v856_v39  ;;  %v810_v32 = vmul.f32 0.015625, %v809_v45  ;;  %v844_v46 = vmul.f32 %v11261_v15, %v749_v57  ;;  %vm827_vm10 = vcmp.ge.f32.partialorder %v749_v57, 0.0  ;;  %vm1073_vm6 = vcmask 64512  }
 0x260   :  { %v859_v3 = vsel %vm826_vm9, %v748_v63, %v843_v10  ;;  %v845_v35 = vmul.f32 %v11261_v15, %v750_v29  ;;  %vm828_vm11 = vcmp.ge.f32.partialorder %v750_v29, 0.0 }
 0x261   :  { %v811_v0 = vadd.f32 1e-05, %v810_v32  ;;  %v860_v22 = vsel %vm827_vm10, %v749_v57, %v844_v46 }
 0x262   :  { %9417 = vmatmul.mubr.msk.f32.gmra.mxu1 %vm680_vm3, %v857_v27  ;;  %v861_v42 = vsel %vm828_vm11, %v750_v29, %v845_v35 }
 0x263   :  { %9419 = vmatprep.mubr.msk.f32.mxu1 %vm680_vm3, %v858_v6  ;;  %10214 = vrsqrt.f32 %v811_v0 }
 0x266   :  { %9420 = vmatmul.mubr.msk.f32.gmra.mxu1 %vm680_vm3, %v859_v3 }
 0x267   :  { %9422 = vmatprep.mubr.msk.f32.mxu1 %vm680_vm3, %v860_v22 }
 0x26a   :  { %9423 = vmatmul.mubr.msk.f32.gmra.mxu1 %vm680_vm3, %v861_v42 }
 0x270   :  { %v10215_v23 = vpop.eup %10214 }
 0x271   :  { %v813_v26 = vmul.f32 %v10215_v23, %v11217_v52  ;;  %v814_v30 = vmul.f32 %v10215_v23, %v11220_v54  ;;  %v815_v59 = vmul.f32 %v10215_v23, %v11223_v41  ;;  %v819_v61 = vmul.f32 %v10215_v23, %v11241_v5 }
 0x272   :  { %v816_v8 = vmul.f32 %v10215_v23, %v11226_v53  ;;  %v817_v9 = vmul.f32 %v10215_v23, %v11229_v62  ;;  %v818_v54 = vmul.f32 %v10215_v23, %v11231_v4  ;;  %v820_v43 = vmul.f32 %v10215_v23, %v11248_v13 }
 0x273   :  { %vm829_vm12 = vcmp.ge.f32.partialorder %v813_v26, 0.0  ;;  %v846_v12 = vmul.f32 %v11261_v15, %v813_v26  ;;  %vm830_vm13 = vcmp.ge.f32.partialorder %v814_v30, 0.0  ;;  %v847_v16 = vmul.f32 %v11261_v15, %v814_v30 }
 0x274   :  { %vm831_vm14 = vcmp.ge.f32.partialorder %v815_v59, 0.0  ;;  %v848_v17 = vmul.f32 %v11261_v15, %v815_v59  ;;  %v849_v52 = vmul.f32 %v11261_v15, %v816_v8  ;;  %vm832_vm15 = vcmp.ge.f32.partialorder %v816_v8, 0.0 }
 0x275   :  { %v862_v41 = vsel %vm829_vm12, %v813_v26, %v846_v12  ;;  %v863_v18 = vsel %vm830_vm13, %v814_v30, %v847_v16  ;;  %v850_v53 = vmul.f32 %v11261_v15, %v817_v9  ;;  %vm833_vm0 = vcmp.ge.f32.partialorder %v817_v9, 0.0 }
 0x276   :  { %9425 = vmatprep.mubr.msk.f32.mxu1 %vm680_vm3, %v862_v41  ;;  %v864_v62 = vsel %vm831_vm14, %v815_v59, %v848_v17  ;;  %v865_v5 = vsel %vm832_vm15, %v816_v8, %v849_v52  ;;  %v851_v19 = vmul.f32 %v11261_v15, %v818_v54  ;;  %vm834_vm2 = vcmp.ge.f32.partialorder %v818_v54, 0.0 }
 0x277   :  { %9426 = vmatmul.mubr.msk.f32.gmra.mxu1 %vm680_vm3, %v863_v18  ;;  %v866_v44 = vsel %vm833_vm0, %v817_v9, %v850_v53  ;;  %v852_v4 = vmul.f32 %v11261_v15, %v819_v61  ;;  %vm835_vm4 = vcmp.ge.f32.partialorder %v819_v61, 0.0  ;;  %v853_v49 = vmul.f32 %v11261_v15, %v820_v43 }
 0x278   :  { %9428 = vmatprep.mubr.msk.f32.mxu1 %vm680_vm3, %v864_v62  ;;  %v867_v47 = vsel %vm834_vm2, %v818_v54, %v851_v19  ;;  %vm836_vm5 = vcmp.ge.f32.partialorder %v820_v43, 0.0 }
 0x279   :  { %v868_v14 = vsel %vm835_vm4, %v819_v61, %v852_v4  ;;  %v869_v20 = vsel %vm836_vm5, %v820_v43, %v853_v49 }
 0x27b   :  { %9429 = vmatmul.mubr.msk.f32.gmra.mxu1 %vm680_vm3, %v865_v5 }
 0x27c   :  { %9431 = vmatprep.mubr.msk.f32.mxu1 %vm680_vm3, %v866_v44 }
 0x27f   :  { %9432 = vmatmul.mubr.msk.f32.gmra.mxu1 %vm680_vm3, %v867_v47 }
 0x280   :  { %9434 = vmatprep.mubr.msk.f32.mxu1 %vm680_vm3, %v868_v14 }
 0x283   :  { %9435 = vmatmul.mubr.msk.f32.gmra.mxu1 %vm680_vm3, %v869_v20 }
 0x31e   :  { %v9415_v13 = vpop.f32.mrf.mxu1 }
 0x31f   :  { %v1000_v55 = vadd.f32 %v9415_v13, %v11314_v21 }
 0x320   :  { %v994_v7 = vpop.f32.mrf.mxu1 }
 0x321   :  { %v995_v2 = vadd.f32 %v11314_v21, %v994_v7  ;;  %v1075_v51 = vsel %vm1073_vm6, %v1000_v55, 0.0 }
 0x322   :  { %v9418_v1 = vpop.f32.mrf.mxu1 }
 0x323   :  { %v1074_v28 = vsel %vm1073_vm6, %v995_v2, 0.0  ;;  %v1010_v31 = vadd.f32 %v9418_v1, %v11314_v21 }
 0x324   :  { %v1004_v15 = vpop.f32.mrf.mxu1  ;;  %v1076_v24 = vadd.f32 %v1075_v51, %v1074_v28 }
 0x325   :  { %v1005_v11 = vadd.f32 %v11314_v21, %v1004_v15  ;;  %v1079_v50 = vsel %vm1073_vm6, %v1010_v31, 0.0 }
 0x326   :  { %v9421_v60 = vpop.f32.mrf.mxu1 }
 0x327   :  { %v1077_v34 = vsel %vm1073_vm6, %v1005_v11, 0.0  ;;  %v1020_v33 = vadd.f32 %v9421_v60, %v11314_v21 }
 0x328   :  { %v1078_v36 = vadd.f32 %v1077_v34, %v1076_v24  ;;  %v1014_v38 = vpop.f32.mrf.mxu1 }
 0x329   :  { %v1015_v37 = vadd.f32 %v11314_v21, %v1014_v38  ;;  %v1083_v40 = vsel %vm1073_vm6, %v1020_v33, 0.0 }
 0x32a   :  { %v1080_v56 = vadd.f32 %v1079_v50, %v1078_v36  ;;  %v9424_v57 = vpop.f32.mrf.mxu1 }
 0x32b   :  { %v1081_v58 = vsel %vm1073_vm6, %v1015_v37, 0.0  ;;  %v1030_v39 = vadd.f32 %v9424_v57, %v11314_v21 }
 0x32c   :  { %v1082_v48 = vadd.f32 %v1081_v58, %v1080_v56  ;;  %v1024_v63 = vpop.f32.mrf.mxu1 }
 0x32d   :  { %v1025_v25 = vadd.f32 %v11314_v21, %v1024_v63  ;;  %v1087_v29 = vsel %vm1073_vm6, %v1030_v39, 0.0 }
 0x32e   :  { %v1084_v45 = vadd.f32 %v1083_v40, %v1082_v48 }
 0x32f   :  { %v1085_v27 = vsel %vm1073_vm6, %v1025_v25, 0.0 }
 0x330   :  { %v1086_v10 = vadd.f32 %v1085_v27, %v1084_v45 }
 0x332   :  { %v1088_v32 = vadd.f32 %v1087_v29, %v1086_v10 }
 0x334   :  { %v1089_v6 = vrot.slane %v1088_v32, 4 }
 0x336   :  { %v1090_v46 = vadd.f32 %v1089_v6, %v1088_v32 }
 0x337   :  { %v9427_v35 = vpop.f32.mrf.mxu1 }
 0x338   :  { %v1091_v0 = vrot.slane %v1090_v46, 2  ;;  %v11333_v22 = vadd.f32 %v9427_v35, %v11314_v21 }
 0x339   :  { %v1034_v23 = vpop.f32.mrf.mxu1 }
 0x33a   :  { %v1092_v3 = vadd.f32 %v1091_v0, %v1090_v46  ;;  %v1145_v26 = vsel %vm1073_vm6, %v11333_v22, 0.0  ;;  %v11338_v30 = vadd.f32 %v11314_v21, %v1034_v23 }
 0x33b   :  { %v9430_v61 = vpop.f32.mrf.mxu1 }
 0x33c   :  { %v1093_v42 = vrot.slane %v1092_v3, 1  ;;  %v1144_v8 = vsel %vm1073_vm6, %v11338_v30, 0.0  ;;  %v11343_v9 = vadd.f32 %v9430_v61, %v11314_v21 }
 0x33d   :  { %v1146_v16 = vadd.f32 %v1145_v26, %v1144_v8  ;;  %v1044_v17 = vpop.f32.mrf.mxu1 }
 0x33e   :  { %v1094_v59 = vadd.f32 %v1093_v42, %v1092_v3  ;;  %v1045_v44 = vadd.f32 %v11314_v21, %v1044_v17  ;;  %v1149_v1 = vsel %vm1073_vm6, %v11343_v9, 0.0 }
 0x33f   :  { %v9433_v53 = vpop.f32.mrf.mxu1 }
 0x340   :  { %v1095_v12 = vmul.f32 0.015625, %v1094_v59  ;;  %v1147_v15 = vsel %vm1073_vm6, %v1045_v44, 0.0  ;;  %v1060_v51 = vadd.f32 %v9433_v53, %v11314_v21 }
 0x341   :  { %v1054_v4 = vpop.f32.mrf.mxu1  ;;  %v1148_v34 = vadd.f32 %v1147_v15, %v1146_v16 }
 0x342   :  { %v11345_v52 = vsub.f32 %v995_v2, %v1095_v12  ;;  %v11347_v54 = vsub.f32 %v1000_v55, %v1095_v12  ;;  %v11349_v41 = vsub.f32 %v1005_v11, %v1095_v12  ;;  %v11351_v18 = vsub.f32 %v1010_v31, %v1095_v12 }
 0x343   :  { %v11353_v62 = vsub.f32 %v1015_v37, %v1095_v12  ;;  %v11362_v47 = vsub.f32 %v1020_v33, %v1095_v12  ;;  %v9436_v13 = vpop.f32.mrf.mxu1  ;;  %v11368_v7 = vsub.f32 %v1025_v25, %v1095_v12  ;;  %v1055_v31 = vadd.f32 %v11314_v21, %v1054_v4 }
 0x344   :  { %v1104_v5 = vmul.f32 %v11345_v52, %v11345_v52  ;;  %v1105_v19 = vmul.f32 %v11347_v54, %v11347_v54  ;;  %v1106_v43 = vmul.f32 %v11349_v41, %v11349_v41  ;;  %v1107_v49 = vmul.f32 %v11351_v18, %v11351_v18 }
 0x345   :  { %v1108_v55 = vmul.f32 %v11353_v62, %v11353_v62  ;;  %v1064_v11 = vpop.f32.mrf.mxu1  ;;  %v11378_v24 = vsub.f32 %v1030_v39, %v1095_v12  ;;  %v1070_v36 = vadd.f32 %v9436_v13, %v11314_v21  ;;  %v1109_v38 = vmul.f32 %v11362_v47, %v11362_v47 }
 0x346   :  { %v1112_v14 = vsel %vm1073_vm6, %v1104_v5, 0.0  ;;  %v1113_v20 = vsel %vm1073_vm6, %v1105_v19, 0.0  ;;  %v1115_v28 = vsel %vm1073_vm6, %v1106_v43, 0.0  ;;  %v1117_v50 = vsel %vm1073_vm6, %v1107_v49, 0.0 }
 0x347   :  { %v1114_v2 = vadd.f32 %v1113_v20, %v1112_v14  ;;  %v1151_v33 = vsel %vm1073_vm6, %v1055_v31, 0.0  ;;  %v1065_v37 = vadd.f32 %v11314_v21, %v1064_v11  ;;  %v1150_v57 = vadd.f32 %v1149_v1, %v1148_v34 }
 0x348   :  { %v1110_v58 = vmul.f32 %v11368_v7, %v11368_v7  ;;  %v1119_v48 = vsel %vm1073_vm6, %v1108_v55, 0.0  ;;  %v1153_v63 = vsel %vm1073_vm6, %v1060_v51, 0.0  ;;  %v1111_v25 = vmul.f32 %v11378_v24, %v11378_v24 }
 0x349   :  { %v1116_v60 = vadd.f32 %v1115_v28, %v1114_v2  ;;  %v1152_v39 = vadd.f32 %v1151_v33, %v1150_v57  ;;  %v1121_v45 = vsel %vm1073_vm6, %v1109_v38, 0.0  ;;  %v1155_v27 = vsel %vm1073_vm6, %v1065_v37, 0.0 }
 0x34a   :  { %v1123_v29 = vsel %vm1073_vm6, %v1110_v58, 0.0  ;;  %v1157_v32 = vsel %vm1073_vm6, %v1070_v36, 0.0  ;;  %v1125_v0 = vsel %vm1073_vm6, %v1111_v25, 0.0 }
 0x34b   :  { %v1118_v56 = vadd.f32 %v1117_v50, %v1116_v60  ;;  %v1154_v21 = vadd.f32 %v1153_v63, %v1152_v39 }
 0x34d   :  { %v1120_v40 = vadd.f32 %v1119_v48, %v1118_v56  ;;  %v1156_v46 = vadd.f32 %v1155_v27, %v1154_v21  ;;  %v11440_v27 = vstv %s8350_s30 }
 0x34f   :  { %v1122_v10 = vadd.f32 %v1121_v45, %v1120_v40  ;;  %v1158_v35 = vadd.f32 %v1157_v32, %v1156_v46 }
 0x351   :  { %v1124_v6 = vadd.f32 %v1123_v29, %v1122_v10  ;;  %v1159_v23 = vrot.slane %v1158_v35, 4 }
 0x353   :  { %v1126_v3 = vadd.f32 %v1125_v0, %v1124_v6  ;;  %v1160_v59 = vadd.f32 %v1159_v23, %v1158_v35 }
 0x355   :  { %v1127_v42 = vrot.slane %v1126_v3, 4  ;;  %v1161_v8 = vrot.slane %v1160_v59, 2 }
 0x357   :  { %v1128_v26 = vadd.f32 %v1127_v42, %v1126_v3  ;;  %v1162_v16 = vadd.f32 %v1161_v8, %v1160_v59 }
 0x359   :  { %v1129_v61 = vrot.slane %v1128_v26, 2  ;;  %v1163_v53 = vrot.slane %v1162_v16, 1 }
 0x35b   :  { %v1130_v12 = vadd.f32 %v1129_v61, %v1128_v26  ;;  %v1164_v19 = vadd.f32 %v1163_v53, %v1162_v16 }
 0x35d   :  { %v1131_v17 = vrot.slane %v1130_v12, 1  ;;  %v1165_v4 = vmul.f32 0.015625, %v1164_v19 }
 0x35f   :  { %v1132_v5 = vadd.f32 %v1131_v17, %v1130_v12  ;;  %v11398_v14 = vsub.f32 %v11338_v30, %v1165_v4  ;;  %v11401_v20 = vsub.f32 %v11333_v22, %v1165_v4  ;;  %v11403_v13 = vsub.f32 %v1045_v44, %v1165_v4 }
 0x360   :  { %v11406_v55 = vsub.f32 %v11343_v9, %v1165_v4  ;;  %v11408_v2 = vsub.f32 %v1055_v31, %v1165_v4  ;;  %v11410_v1 = vsub.f32 %v1060_v51, %v1165_v4  ;;  %v11412_v28 = vsub.f32 %v1065_v37, %v1165_v4 }
 0x361   :  { %v1133_v43 = vmul.f32 0.015625, %v1132_v5  ;;  %v11414_v15 = vsub.f32 %v1070_v36, %v1165_v4  ;;  %v1174_v30 = vmul.f32 %v11398_v14, %v11398_v14  ;;  %v1175_v22 = vmul.f32 %v11401_v20, %v11401_v20 }
 0x362   :  { %v1176_v44 = vmul.f32 %v11403_v13, %v11403_v13  ;;  %v1177_v9 = vmul.f32 %v11406_v55, %v11406_v55  ;;  %v1178_v51 = vmul.f32 %v11408_v2, %v11408_v2  ;;  %v1179_v36 = vmul.f32 %v11410_v1, %v11410_v1 }
 0x363   :  { %v1134_v49 = vadd.f32 1e-05, %v1133_v43  ;;  %v1182_v31 = vsel %vm1073_vm6, %v1174_v30, 0.0  ;;  %v1183_v11 = vsel %vm1073_vm6, %v1175_v22, 0.0  ;;  %v1180_v33 = vmul.f32 %v11412_v28, %v11412_v28 }
 0x364   :  { %v1184_v60 = vadd.f32 %v1183_v11, %v1182_v31  ;;  %v1185_v34 = vsel %vm1073_vm6, %v1176_v44, 0.0  ;;  %v1187_v38 = vsel %vm1073_vm6, %v1177_v9, 0.0  ;;  %v1189_v37 = vsel %vm1073_vm6, %v1178_v51, 0.0 }
 0x365   :  { %10216 = vrsqrt.f32 %v1134_v49  ;;  %v1181_v57 = vmul.f32 %v11414_v15, %v11414_v15  ;;  %v1191_v58 = vsel %vm1073_vm6, %v1179_v36, 0.0  ;;  %v1193_v63 = vsel %vm1073_vm6, %v1180_v33, 0.0 }
 0x366   :  { %v1186_v50 = vadd.f32 %v1185_v34, %v1184_v60 }
 0x367   :  { %v1195_v39 = vsel %vm1073_vm6, %v1181_v57, 0.0 }
 0x368   :  { %v1188_v56 = vadd.f32 %v1187_v38, %v1186_v50 }
 0x36a   :  { %v1190_v48 = vadd.f32 %v1189_v37, %v1188_v56 }
 0x36c   :  { %v1192_v40 = vadd.f32 %v1191_v58, %v1190_v48 }
 0x36e   :  { %v1194_v45 = vadd.f32 %v1193_v63, %v1192_v40  ;;  %v1519_v40 = vld [vmem:[%s14486_s6] sm:$0xff] }
 0x36f   :  { %9437 = vmatprep.subr.mxu0 %v1519_v40 }
 0x370   :  { %v1196_v32 = vadd.f32 %v1195_v39, %v1194_v45  ;;  %9438 = vmatpush3.msra.mxu0 %v1519_v40 }
 0x372   :  { %v10217_v25 = vpop.eup %10216  ;;  %v1197_v42 = vrot.slane %v1196_v32, 4 }
 0x373   :  { %v1138_v10 = vmul.f32 %v10217_v25, %v11349_v41  ;;  %v1136_v21 = vmul.f32 %v10217_v25, %v11345_v52  ;;  %v1139_v29 = vmul.f32 %v10217_v25, %v11351_v18  ;;  %v1137_v6 = vmul.f32 %v10217_v25, %v11347_v54 }
 0x374   :  { %v1141_v46 = vmul.f32 %v10217_v25, %v11362_v47  ;;  %v1140_v0 = vmul.f32 %v10217_v25, %v11353_v62  ;;  %v1142_v47 = vmul.f32 %v10217_v25, %v11368_v7  ;;  %v1198_v62 = vadd.f32 %v1197_v42, %v1196_v32 }
 0x375   :  { %vm1216_vm7 = vcmp.ge.f32.partialorder %v1138_v10, 0.0  ;;  %v1233_v3 = vmul.f32 %v11440_v27, %v1138_v10  ;;  %vm1214_vm8 = vcmp.ge.f32.partialorder %v1136_v21, 0.0  ;;  %v1231_v35 = vmul.f32 %v11440_v27, %v1136_v21 }
 0x376   :  { %vm1217_vm9 = vcmp.ge.f32.partialorder %v1139_v29, 0.0  ;;  %v1234_v41 = vmul.f32 %v11440_v27, %v1139_v29  ;;  %vm1215_vm10 = vcmp.ge.f32.partialorder %v1137_v6, 0.0  ;;  %v1232_v54 = vmul.f32 %v11440_v27, %v1137_v6 }
 0x377   :  { %v11451_v52 = vsel %vm1216_vm7, %v1138_v10, %v1233_v3  ;;  %v11453_v18 = vsel %vm1214_vm8, %v1136_v21, %v1231_v35  ;;  %vm1219_vm11 = vcmp.ge.f32.partialorder %v1141_v46, 0.0  ;;  %v1236_v8 = vmul.f32 %v11440_v27, %v1141_v46 }
 0x378   :  { %v1276_v23 = vsel %vm1073_vm6, %v11451_v52, 0.0  ;;  %v1270_v26 = vsel %vm1073_vm6, %v11453_v18, 0.0  ;;  %v11461_v59 = vsel %vm1217_vm9, %v1139_v29, %v1234_v41  ;;  %v11463_v61 = vsel %vm1215_vm10, %v1137_v6, %v1232_v54 }
 0x379   :  { %1277 = vadd.xlane.f32.xlu1 %v1276_v23  ;;  %1271 = vadd.xlane.f32.xlu0 %v1270_v26  ;;  %v1199_v12 = vrot.slane %v1198_v62, 2  ;;  %vm1218_vm12 = vcmp.ge.f32.partialorder %v1140_v0, 0.0  ;;  %v1235_v7 = vmul.f32 %v11440_v27, %v1140_v0  ;;  %v1143_v16 = vmul.f32 %v10217_v25, %v11378_v24 }
 0x37a   :  { %v1279_v53 = vsel %vm1073_vm6, %v11461_v59, 0.0  ;;  %v1273_v5 = vsel %vm1073_vm6, %v11463_v61, 0.0  ;;  %v11472_v19 = vsel %vm1219_vm11, %v1141_v46, %v1236_v8  ;;  %v1237_v49 = vmul.f32 %v11440_v27, %v1142_v47 }
 0x37b   :  { %v1200_v17 = vadd.f32 %v1199_v12, %v1198_v62  ;;  %v11474_v43 = vsel %vm1218_vm12, %v1140_v0, %v1235_v7  ;;  %v1238_v4 = vmul.f32 %v11440_v27, %v1143_v16  ;;  %vm1221_vm13 = vcmp.ge.f32.partialorder %v1143_v16, 0.0 }
 0x37c   :  { %vm1220_vm14 = vcmp.ge.f32.partialorder %v1142_v47, 0.0  ;;  %v1285_v22 = vsel %vm1073_vm6, %v11472_v19, 0.0  ;;  %v1282_v44 = vsel %vm1073_vm6, %v11474_v43, 0.0  ;;  %vm1745_vm10 = vcmask 31744  }
 0x37d   :  { %1280 = vadd.xlane.f32.xlu1 %v1279_v53  ;;  %1274 = vadd.xlane.f32.xlu0 %v1273_v5  ;;  %v1201_v30 = vrot.slane %v1200_v17, 1  ;;  %v11482_v9 = vsel %vm1221_vm13, %v1143_v16, %v1238_v4  ;;  %v11484_v51 = vsel %vm1220_vm14, %v1142_v47, %v1237_v49  ;;  %vm2570_vm11 = vcmask 1043456  }
 0x37e   :  { %v1291_v60 = vsel %vm1073_vm6, %v11482_v9, 0.0  ;;  %v1288_v34 = vsel %vm1073_vm6, %v11484_v51, 0.0 }
 0x37f   :  { %v1202_v24 = vadd.f32 %v1201_v30, %v1200_v17 }
 0x381   :  { %1286 = vadd.xlane.f32.xlu1 %v1285_v22  ;;  %1283 = vadd.xlane.f32.xlu0 %v1282_v44  ;;  %v1203_v31 = vmul.f32 0.015625, %v1202_v24 }
 0x383   :  { %v1204_v11 = vadd.f32 1e-05, %v1203_v31 }
 0x385   :  { %1292 = vadd.xlane.f32.xlu1 %v1291_v60  ;;  %1289 = vadd.xlane.f32.xlu0 %v1288_v34  ;;  %10218 = vrsqrt.f32 %v1204_v11 }
 0x392   :  { %v10219_v36 = vpop.eup %10218 }
 0x393   :  { %v1212_v38 = vmul.f32 %v10219_v36, %v11412_v28  ;;  %v1207_v50 = vmul.f32 %v10219_v36, %v11401_v20  ;;  %v1206_v33 = vmul.f32 %v10219_v36, %v11398_v14  ;;  %v1211_v37 = vmul.f32 %v10219_v36, %v11410_v1 }
 0x394   :  { %v1208_v56 = vmul.f32 %v10219_v36, %v11403_v13  ;;  %v1213_v57 = vmul.f32 %v10219_v36, %v11414_v15  ;;  %v1209_v58 = vmul.f32 %v10219_v36, %v11406_v55  ;;  %v1210_v48 = vmul.f32 %v10219_v36, %v11408_v2 }
 0x395   :  { %vm1223_vm15 = vcmp.ge.f32.partialorder %v1207_v50, 0.0  ;;  %v1240_v63 = vmul.f32 %v11440_v27, %v1207_v50  ;;  %vm1222_vm0 = vcmp.ge.f32.partialorder %v1206_v33, 0.0  ;;  %v1239_v28 = vmul.f32 %v11440_v27, %v1206_v33 }
 0x396   :  { %vm1227_vm2 = vcmp.ge.f32.partialorder %v1211_v37, 0.0  ;;  %v1244_v20 = vmul.f32 %v11440_v27, %v1211_v37  ;;  %vm1224_vm4 = vcmp.ge.f32.partialorder %v1208_v56, 0.0  ;;  %v1241_v14 = vmul.f32 %v11440_v27, %v1208_v56 }
 0x397   :  { %v11502_v1 = vsel %vm1223_vm15, %v1207_v50, %v1240_v63  ;;  %v11504_v13 = vsel %vm1222_vm0, %v1206_v33, %v1239_v28  ;;  %vm1229_vm5 = vcmp.ge.f32.partialorder %v1213_v57, 0.0  ;;  %v1246_v55 = vmul.f32 %v11440_v27, %v1213_v57 }
 0x398   :  { %v11507_v2 = vsel %vm1227_vm2, %v1211_v37, %v1244_v20  ;;  %v11509_v15 = vsel %vm1224_vm4, %v1208_v56, %v1241_v14  ;;  %vm1225_vm7 = vcmp.ge.f32.partialorder %v1209_v58, 0.0  ;;  %v1242_v25 = vmul.f32 %v11440_v27, %v1209_v58 }
 0x399   :  { %v11514_v39 = vsel %vm1229_vm5, %v1213_v57, %v1246_v55  ;;  %vm1226_vm8 = vcmp.ge.f32.partialorder %v1210_v48, 0.0  ;;  %v1243_v45 = vmul.f32 %v11440_v27, %v1210_v48  ;;  %vm1228_vm9 = vcmp.ge.f32.partialorder %v1212_v38, 0.0 }
 0x39a   :  { %v1245_v10 = vmul.f32 %v11440_v27, %v1212_v38  ;;  %v11519_v21 = vsel %vm1225_vm7, %v1209_v58, %v1242_v25 }
 0x39b   :  { %v11521_v29 = vsel %vm1226_vm8, %v1210_v48, %v1243_v45 }
 0x39c   :  { %v11523_v32 = vsel %vm1228_vm9, %v1212_v38, %v1245_v10 }
 0x402   :  { %v1278_v6 = vpop.xlane.xlu1 %1277  ;;  %v1272_v46 = vpop.xlane.xlu0 %1271 }
 0x403   :  { %v1321_v0 = vmul.f32 0.125, %v1278_v6  ;;  %v1319_v3 = vmul.f32 0.125, %v1272_v46 }
 0x405   :  { %v11526_v35 = vsub.f32 %v11451_v52, %v1321_v0  ;;  %v11529_v42 = vsub.f32 %v11453_v18, %v1319_v3 }
 0x406   :  { %v1281_v41 = vpop.xlane.xlu1 %1280  ;;  %v1275_v54 = vpop.xlane.xlu0 %1274 }
 0x407   :  { %v1322_v47 = vmul.f32 0.125, %v1281_v41  ;;  %v1320_v27 = vmul.f32 0.125, %v1275_v54  ;;  %v1351_v62 = vmul.f32 %v11529_v42, %v11529_v42  ;;  %v1353_v12 = vmul.f32 %v11526_v35, %v11526_v35 }
 0x409   :  { %v11534_v23 = vsub.f32 %v11461_v59, %v1322_v47  ;;  %v11537_v26 = vsub.f32 %v11463_v61, %v1320_v27  ;;  %v1367_v8 = vsel %vm1073_vm6, %v1351_v62, 0.0  ;;  %v1373_v24 = vsel %vm1073_vm6, %v1353_v12, 0.0 }
 0x40a   :  { %v1287_v7 = vpop.xlane.xlu1 %1286  ;;  %1368 = vadd.xlane.f32.xlu0 %v1367_v8  ;;  %v1284_v16 = vpop.xlane.xlu0 %1283 }
 0x40b   :  { %v1324_v17 = vmul.f32 0.125, %v1287_v7  ;;  %v1323_v53 = vmul.f32 0.125, %v1284_v16  ;;  %v1352_v5 = vmul.f32 %v11537_v26, %v11537_v26  ;;  %v1354_v4 = vmul.f32 %v11534_v23, %v11534_v23 }
 0x40d   :  { %v11547_v49 = vsub.f32 %v11472_v19, %v1324_v17  ;;  %v11550_v30 = vsub.f32 %v11474_v43, %v1323_v53  ;;  %v1370_v22 = vsel %vm1073_vm6, %v1352_v5, 0.0  ;;  %v1376_v36 = vsel %vm1073_vm6, %v1354_v4, 0.0  ;;  %v11576_v4 = vld [vmem:[%s14484_s4 + $0x3] ss:$0 sm:$0xff] }
 0x40e   :  { %v1293_v44 = vpop.xlane.xlu1 %1292  ;;  %1374 = vadd.xlane.f32.xlu0 %v1373_v24  ;;  %1371 = vadd.xlane.f32.xlu1 %v1370_v22  ;;  %v1290_v31 = vpop.xlane.xlu0 %1289 }
 0x40f   :  { %v1326_v11 = vmul.f32 0.125, %v1293_v44  ;;  %v1325_v60 = vmul.f32 0.125, %v1290_v31  ;;  %v1355_v34 = vmul.f32 %v11550_v30, %v11550_v30  ;;  %v1356_v37 = vmul.f32 %v11547_v49, %v11547_v49  ;;  %v11582_v44 = vld [vmem:[%s14484_s4 + $0x4] ss:$0 sm:$0xff] }
 0x411   :  { %v11558_v38 = vsub.f32 %v11482_v9, %v1326_v11  ;;  %v11561_v50 = vsub.f32 %v11484_v51, %v1325_v60  ;;  %v1379_v33 = vsel %vm1073_vm6, %v1355_v34, 0.0  ;;  %v1382_v57 = vsel %vm1073_vm6, %v1356_v37, 0.0 }
 0x412   :  { %1377 = vadd.xlane.f32.xlu1 %v1376_v36  ;;  %1380 = vadd.xlane.f32.xlu0 %v1379_v33 }
 0x413   :  { %v1357_v56 = vmul.f32 %v11561_v50, %v11561_v50  ;;  %v1358_v48 = vmul.f32 %v11558_v38, %v11558_v38 }
 0x415   :  { %v1385_v58 = vsel %vm1073_vm6, %v1357_v56, 0.0  ;;  %v1388_v63 = vsel %vm1073_vm6, %v1358_v48, 0.0 }
 0x416   :  { %1383 = vadd.xlane.f32.xlu1 %v1382_v57  ;;  %1386 = vadd.xlane.f32.xlu0 %v1385_v58 }
 0x41a   :  { %1389 = vadd.xlane.f32.xlu1 %v1388_v63 }
 0x493   :  { %v1369_v28 = vpop.xlane.xlu0 %1368 }
 0x494   :  { %v1415_v20 = vmul.f32 0.125, %v1369_v28 }
 0x496   :  { %v1431_v14 = vadd.f32 1e-05, %v1415_v20 }
 0x497   :  { %v1372_v55 = vpop.xlane.xlu1 %1371  ;;  %v1375_v40 = vpop.xlane.xlu0 %1374 }
 0x498   :  { %10220 = vrsqrt.f32 %v1431_v14  ;;  %v1416_v25 = vmul.f32 0.125, %v1372_v55  ;;  %v1417_v45 = vmul.f32 0.125, %v1375_v40 }
 0x49a   :  { %v1432_v10 = vadd.f32 1e-05, %v1416_v25  ;;  %v1433_v6 = vadd.f32 1e-05, %v1417_v45 }
 0x49b   :  { %v1378_v46 = vpop.xlane.xlu1 %1377  ;;  %v1381_v0 = vpop.xlane.xlu0 %1380 }
 0x49c   :  { %10222 = vrsqrt.f32 %v1432_v10  ;;  %v1418_v3 = vmul.f32 0.125, %v1378_v46  ;;  %v1419_v41 = vmul.f32 0.125, %v1381_v0 }
 0x49d   :  { %10224 = vrsqrt.f32 %v1433_v6 }
 0x49e   :  { %v1434_v54 = vadd.f32 1e-05, %v1418_v3  ;;  %v1435_v47 = vadd.f32 1e-05, %v1419_v41 }
 0x49f   :  { %v1384_v27 = vpop.xlane.xlu1 %1383  ;;  %v1387_v62 = vpop.xlane.xlu0 %1386 }
 0x4a0   :  { %10226 = vrsqrt.f32 %v1434_v54  ;;  %v1420_v8 = vmul.f32 0.125, %v1384_v27  ;;  %v1421_v12 = vmul.f32 0.125, %v1387_v62 }
 0x4a1   :  { %10228 = vrsqrt.f32 %v1435_v47 }
 0x4a2   :  { %v1436_v7 = vadd.f32 1e-05, %v1420_v8  ;;  %v1437_v16 = vadd.f32 1e-05, %v1421_v12 }
 0x4a3   :  { %v1390_v17 = vpop.xlane.xlu1 %1389 }
 0x4a4   :  { %10230 = vrsqrt.f32 %v1436_v7  ;;  %v1422_v53 = vmul.f32 0.125, %v1390_v17 }
 0x4a5   :  { %v10221_v5 = vpop.eup %10220  ;;  %10232 = vrsqrt.f32 %v1437_v16 }
 0x4a6   :  { %v1438_v24 = vadd.f32 1e-05, %v1422_v53  ;;  %v1463_v22 = vmul.f32 %v10221_v5, %v11529_v42 }
 0x4a8   :  { %10234 = vrsqrt.f32 %v1438_v24  ;;  %v1483_v31 = vmul.f32 %v11576_v4, %v1463_v22 }
 0x4a9   :  { %v10223_v11 = vpop.eup %10222 }
 0x4aa   :  { %v10225_v60 = vpop.eup %10224  ;;  %v1464_v34 = vmul.f32 %v10223_v11, %v11537_v26  ;;  %v1503_v36 = vadd.f32 %v11582_v44, %v1483_v31 }
 0x4ab   :  { %v1465_v33 = vmul.f32 %v10225_v60, %v11526_v35 }
 0x4ac   :  { %v1484_v37 = vmul.f32 %v11576_v4, %v1464_v34  ;;  %9439 = vmatprep.mubr.msk.f32.mxu0 %vm1073_vm6, %v1503_v36 }
 0x4ad   :  { %v10227_v42 = vpop.eup %10226  ;;  %v1485_v56 = vmul.f32 %v11576_v4, %v1465_v33 }
 0x4ae   :  { %v10229_v57 = vpop.eup %10228  ;;  %v1504_v58 = vadd.f32 %v11582_v44, %v1484_v37  ;;  %v1466_v48 = vmul.f32 %v10227_v42, %v11534_v23 }
 0x4af   :  { %v1505_v63 = vadd.f32 %v11582_v44, %v1485_v56  ;;  %v1467_v26 = vmul.f32 %v10229_v57, %v11550_v30  ;;  %v1714_v57 = vld [vmem:[%s14490_s10 + $0x8] sm:$0xff] }
 0x4b0   :  { %9440 = vmatmul.mubr.msk.f32.vlgmr.msra.gmra.mxu0 %vm1073_vm6, %v1504_v58  ;;  %v1486_v35 = vmul.f32 %v11576_v4, %v1466_v48  ;;  %v1713_v48 = vld [vmem:[%s14490_s10] sm:$0xff] }
 0x4b1   :  { %v10231_v28 = vpop.eup %10230  ;;  %9442 = vmatprep.mubr.msk.f32.mxu0 %vm1073_vm6, %v1505_v63  ;;  %v1487_v20 = vmul.f32 %v11576_v4, %v1467_v26 }
 0x4b2   :  { %v10233_v14 = vpop.eup %10232  ;;  %v1506_v55 = vadd.f32 %v11582_v44, %v1486_v35  ;;  %v1468_v40 = vmul.f32 %v10231_v28, %v11547_v49  ;;  %v1716_v35 = vld [vmem:[%s14490_s10 + $0x18] sm:$0xff] }
 0x4b3   :  { %v1507_v23 = vadd.f32 %v11582_v44, %v1487_v20  ;;  %v1469_v25 = vmul.f32 %v10233_v14, %v11561_v50 }
 0x4b4   :  { %9443 = vmatmul.mubr.msk.f32.gmra.mxu0 %vm1073_vm6, %v1506_v55  ;;  %v1488_v30 = vmul.f32 %v11576_v4, %v1468_v40 }
 0x4b5   :  { %v10235_v45 = vpop.eup %10234  ;;  %9445 = vmatprep.mubr.msk.f32.mxu0 %vm1073_vm6, %v1507_v23  ;;  %v1489_v10 = vmul.f32 %v11576_v4, %v1469_v25  ;;  %v1715_v25 = vld [vmem:[%s14490_s10 + $0x10] sm:$0xff] }
 0x4b6   :  { %v1508_v6 = vadd.f32 %v11582_v44, %v1488_v30  ;;  %v1470_v46 = vmul.f32 %v10235_v45, %v11558_v38  ;;  %v1718_v30 = vld [vmem:[%s14490_s10 + $0x28] sm:$0xff] }
 0x4b7   :  { %v1509_v0 = vadd.f32 %v11582_v44, %v1489_v10 }
 0x4b8   :  { %9446 = vmatmul.mubr.msk.f32.gmra.mxu0 %vm1073_vm6, %v1508_v6  ;;  %v1490_v49 = vmul.f32 %v11576_v4, %v1470_v46 }
 0x4b9   :  { %9448 = vmatprep.mubr.msk.f32.mxu0 %vm1073_vm6, %v1509_v0 }
 0x4ba   :  { %v1510_v50 = vadd.f32 %v11582_v44, %v1490_v49  ;;  %v1717_v49 = vld [vmem:[%s14490_s10 + $0x20] sm:$0xff] }
 0x4bc   :  { %9449 = vmatmul.mubr.msk.f32.gmra.mxu0 %vm1073_vm6, %v1510_v50  ;;  %v1720_v50 = vld [vmem:[%s14490_s10 + $0x38] sm:$0xff] }
 0x570   :  { %v11615_v3 = vpop.f32.mrf.mxu0 }
 0x572   :  { %v11617_v41 = vpop.f32.mrf.mxu0 }
 0x573   :  { %9479 = vmatprep.mubr.msk.f32.mxu1 %vm1745_vm10, %v11617_v41 }
 0x574   :  { %v11621_v38 = vpop.f32.mrf.mxu0 }
 0x576   :  { %v11623_v54 = vpop.f32.mrf.mxu0 }
 0x578   :  { %v11625_v47 = vpop.f32.mrf.mxu0 }
 0x57a   :  { %v11627_v27 = vpop.f32.mrf.mxu0 }
 0x57c   :  { %v11629_v62 = vpop.f32.mrf.mxu0 }
 0x57d   :  { %1743 = vrot.lane.b32.xlu0 %v11629_v62, %s10710_s19 }
 0x57e   :  { %v11633_v8 = vpop.f32.mrf.mxu0 }
 0x57f   :  { %1741 = vrot.lane.b32.xlu1 %v11633_v8, %s10710_s19 }
 0x581   :  { %1735 = vrot.lane.b32.xlu0 %v11621_v38, %s10710_s19 }
 0x583   :  { %1739 = vrot.lane.b32.xlu1 %v11625_v47, %s10710_s19 }
 0x585   :  { %1731 = vrot.lane.b32.xlu0 %v11615_v3, %s10710_s19 }
 0x587   :  { %1737 = vrot.lane.b32.xlu1 %v11627_v27, %s10710_s19 }
 0x589   :  { %1985 = vrot.lane.b32.xlu0 %v11629_v62, %s10711_s1 }
 0x58b   :  { %1733 = vrot.lane.b32.xlu1 %v11623_v54, %s10710_s19 }
 0x58d   :  { %1977 = vrot.lane.b32.xlu0 %v11621_v38, %s10711_s1 }
 0x58f   :  { %1729 = vrot.lane.b32.xlu1 %v11617_v41, %s10710_s19 }
 0x591   :  { %1973 = vrot.lane.b32.xlu0 %v11615_v3, %s10711_s1 }
 0x593   :  { %1981 = vrot.lane.b32.xlu1 %v11625_v47, %s10711_s1 }
 0x595   :  { %2164 = vrot.lane.b32.xlu0 %v11629_v62, %s10712_s2 }
 0x597   :  { %1979 = vrot.lane.b32.xlu1 %v11627_v27, %s10711_s1 }
 0x59b   :  { %1975 = vrot.lane.b32.xlu1 %v11623_v54, %s10711_s1 }
 0x59f   :  { %1971 = vrot.lane.b32.xlu1 %v11617_v41, %s10711_s1 }
 0x5a3   :  { %1983 = vrot.lane.b32.xlu1 %v11633_v8, %s10711_s1 }
 0x5a7   :  { %2162 = vrot.lane.b32.xlu1 %v11633_v8, %s10712_s2 }
 0x5ef   :  { %v1744_v12 = vpop.permute.xlu0 %1743 }
 0x5f0   :  { %9463 = vmatprep.subr.msk.mxu1 %vm1745_vm10, %v1744_v12 }
 0x5f1   :  { %9464 = vmatpush3.xpose.msk.msra.mxu1 %vm1745_vm10, %v1744_v12  ;;  %v1742_v7 = vpop.permute.xlu1 %1741 }
 0x5f2   :  { %9465 = vmatprep.subr.msk.mxu1 %vm1745_vm10, %v1742_v7 }
 0x5f3   :  { %v1736_v53 = vpop.permute.xlu0 %1735 }
 0x5f5   :  { %9466 = vmatpush3.xpose.msk.msra.mxu1 %vm1745_vm10, %v1742_v7  ;;  %v1740_v16 = vpop.permute.xlu1 %1739 }
 0x5f6   :  { %9467 = vmatprep.subr.msk.mxu1 %vm1745_vm10, %v1740_v16 }
 0x5f7   :  { %v1732_v22 = vpop.permute.xlu0 %1731 }
 0x5f9   :  { %9468 = vmatpush3.xpose.msk.msra.mxu1 %vm1745_vm10, %v1740_v16  ;;  %v1738_v17 = vpop.permute.xlu1 %1737 }
 0x5fa   :  { %9469 = vmatprep.subr.msk.mxu1 %vm1745_vm10, %v1738_v17 }
 0x5fb   :  { %v1986_v60 = vpop.permute.xlu0 %1985 }
 0x5fd   :  { %9470 = vmatpush3.xpose.msk.msra.mxu1 %vm1745_vm10, %v1738_v17  ;;  %v1734_v5 = vpop.permute.xlu1 %1733 }
 0x5fe   :  { %9471 = vmatprep.subr.msk.mxu1 %vm1745_vm10, %v1736_v53 }
 0x5ff   :  { %v1978_v37 = vpop.permute.xlu0 %1977 }
 0x601   :  { %9472 = vmatpush3.xpose.msk.msra.mxu1 %vm1745_vm10, %v1736_v53  ;;  %v1730_v24 = vpop.permute.xlu1 %1729 }
 0x602   :  { %9473 = vmatprep.subr.msk.mxu1 %vm1745_vm10, %v1734_v5 }
 0x603   :  { %v1974_v42 = vpop.permute.xlu0 %1973 }
 0x605   :  { %9474 = vmatpush3.xpose.msk.msra.mxu1 %vm1745_vm10, %v1734_v5  ;;  %v1982_v31 = vpop.permute.xlu1 %1981 }
 0x606   :  { %9475 = vmatprep.subr.msk.mxu1 %vm1745_vm10, %v1732_v22 }
 0x607   :  { %v11699_v56 = vpop.permute.xlu0 %2164 }
 0x609   :  { %9476 = vmatpush3.xpose.msk.msra.mxu1 %vm1745_vm10, %v1732_v22  ;;  %v1980_v11 = vpop.permute.xlu1 %1979 }
 0x60a   :  { %9477 = vmatprep.subr.msk.mxu1 %vm1745_vm10, %v1730_v24 }
 0x60d   :  { %9478 = vmatpush3.xpose.msk.msra.mxu1 %vm1745_vm10, %v1730_v24  ;;  %v1976_v34 = vpop.permute.xlu1 %1975  ;;  %v1719_v24 = vld [vmem:[%s14490_s10 + $0x30] sm:$0xff] }
 0x60e   :  { %9491 = vmatprep.subr.mxu1 %v1986_v60 }
 0x610   :  { %9480 = vmatmul.mubr.msk.f32.vlgmr.msra.gmra.mxu1 %vm1745_vm10, %v11615_v3 }
 0x611   :  { %9482 = vmatprep.mubr.msk.f32.mxu1 %vm1745_vm10, %v11623_v54  ;;  %9492 = vmatpush3.msra.mxu1 %v1986_v60  ;;  %v1972_v36 = vpop.permute.xlu1 %1971 }
 0x614   :  { %9483 = vmatmul.mubr.msk.f32.gmra.mxu1 %vm1745_vm10, %v11621_v38 }
 0x615   :  { %9485 = vmatprep.mubr.msk.f32.mxu1 %vm1745_vm10, %v11627_v27  ;;  %v1984_v33 = vpop.permute.xlu1 %1983 }
 0x616   :  { %9493 = vmatprep.subr.mxu1 %v1984_v33 }
 0x617   :  { %9494 = vmatpush3.msra.mxu1 %v1984_v33 }
 0x618   :  { %9486 = vmatmul.mubr.msk.f32.gmra.mxu1 %vm1745_vm10, %v11625_v47  ;;  %9495 = vmatprep.subr.mxu1 %v1982_v31 }
 0x619   :  { %9488 = vmatprep.mubr.msk.f32.mxu1 %vm1745_vm10, %v11633_v8  ;;  %9496 = vmatpush3.msra.mxu1 %v1982_v31 }
 0x61a   :  { %9497 = vmatprep.subr.mxu1 %v1980_v11 }
 0x61b   :  { %9498 = vmatpush3.msra.mxu1 %v1980_v11 }
 0x61c   :  { %9489 = vmatmul.mubr.msk.f32.gmra.mxu1 %vm1745_vm10, %v11629_v62  ;;  %9499 = vmatprep.subr.mxu1 %v1978_v37 }
 0x61d   :  { %9500 = vmatpush3.msra.mxu1 %v1978_v37 }
 0x61e   :  { %9501 = vmatprep.subr.mxu1 %v1976_v34 }
 0x61f   :  { %9502 = vmatpush3.msra.mxu1 %v1976_v34  ;;  %v11739_v34 = vpop.permute.xlu1 %2162 }
 0x620   :  { %9503 = vmatprep.subr.mxu1 %v1974_v42 }
 0x621   :  { %9504 = vmatpush3.msra.mxu1 %v1974_v42 }
 0x622   :  { %9505 = vmatprep.subr.mxu1 %v1972_v36 }
 0x623   :  { %9506 = vmatpush3.msra.mxu1 %v1972_v36 }
 0x624   :  { %9519 = vmatprep.subr.msk.mxu1 %vm1745_vm10, %v11699_v56 }
 0x6d0   :  { %v9481_v58 = vpop.f32.mrf.mxu1 }
 0x6d1   :  { %v1850_v63 = vadd.f32 %v9481_v58, %v1714_v57 }
 0x6d2   :  { %v1844_v26 = vpop.f32.mrf.mxu1 }
 0x6d3   :  { %v1845_v28 = vadd.f32 %v1844_v26, %v1713_v48  ;;  %v1886_v20 = vsel %vm282_vm1, %v1850_v63, -inf }
 0x6d4   :  { %1887 = vmax.xlane.f32.xlu1 %v1886_v20  ;;  %v9484_v14 = vpop.f32.mrf.mxu1 }
 0x6d5   :  { %v1860_v55 = vadd.f32 %v9484_v14, %v1716_v35  ;;  %v1883_v40 = vsel %vm282_vm1, %v1845_v28, -inf }
 0x6d6   :  { %v1854_v23 = vpop.f32.mrf.mxu1  ;;  %1884 = vmax.xlane.f32.xlu0 %v1883_v40 }
 0x6d7   :  { %v1855_v10 = vadd.f32 %v1854_v23, %v1715_v25  ;;  %v1892_v46 = vsel %vm282_vm1, %v1860_v55, -inf }
 0x6d8   :  { %v9487_v45 = vpop.f32.mrf.mxu1 }
 0x6d9   :  { %v1870_v6 = vadd.f32 %v9487_v45, %v1718_v30  ;;  %v1889_v53 = vsel %vm282_vm1, %v1855_v10, -inf }
 0x6da   :  { %v1864_v0 = vpop.f32.mrf.mxu1  ;;  %1893 = vmax.xlane.f32.xlu0 %v1892_v46 }
 0x6db   :  { %v1898_v12 = vsel %vm282_vm1, %v1870_v6, -inf  ;;  %v1865_v16 = vadd.f32 %v1864_v0, %v1717_v49 }
 0x6dc   :  { %1899 = vmax.xlane.f32.xlu1 %v1898_v12  ;;  %v9490_v7 = vpop.f32.mrf.mxu1 }
 0x6dd   :  { %v1880_v17 = vadd.f32 %v9490_v7, %v1720_v50  ;;  %v1895_v11 = vsel %vm282_vm1, %v1865_v16, -inf }
 0x6de   :  { %v1874_v5 = vpop.f32.mrf.mxu1  ;;  %1890 = vmax.xlane.f32.xlu0 %v1889_v53 }
 0x6df   :  { %v1904_v22 = vsel %vm282_vm1, %v1880_v17, -inf  ;;  %v1875_v31 = vadd.f32 %v1874_v5, %v1719_v24 }
 0x6e0   :  { %1905 = vmax.xlane.f32.xlu1 %v1904_v22 }
 0x6e1   :  { %v1901_v60 = vsel %vm282_vm1, %v1875_v31, -inf }
 0x6e2   :  { %1896 = vmax.xlane.f32.xlu0 %v1895_v11 }
 0x6e6   :  { %1902 = vmax.xlane.f32.xlu0 %v1901_v60 }
 0x6f1   :  { %2158 = vrot.lane.b32.xlu1 %v11627_v27, %s10712_s2 }
 0x6fc   :  { %2160 = vrot.lane.b32.xlu0 %v11625_v47, %s10712_s2 }
 0x75d   :  { %v1888_v36 = vpop.xlane.xlu1 %1887 }
 0x75e   :  { %v1908_v33 = vsub.f32 %v1850_v63, %v1888_v36 }
 0x75f   :  { %v1885_v37 = vpop.xlane.xlu0 %1884 }
 0x760   :  { %v1917_v42 = vmul.f32 1.442695, %v1908_v33  ;;  %v1907_v57 = vsub.f32 %v1845_v28, %v1885_v37 }
 0x762   :  { %10236 = vpow2.f32 %v1917_v42  ;;  %v1915_v58 = vmul.f32 1.442695, %v1907_v57  ;;  %v1297_v57 = vsel %vm1073_vm6, %v11502_v1, 0.0 }
 0x763   :  { %v1894_v14 = vpop.xlane.xlu0 %1893 }
 0x764   :  { %10238 = vpow2.f32 %v1915_v58  ;;  %v1910_v40 = vsub.f32 %v1860_v55, %v1894_v14  ;;  %v1294_v58 = vsel %vm1073_vm6, %v11504_v13, 0.0 }
 0x765   :  { %v1900_v28 = vpop.xlane.xlu1 %1899 }
 0x766   :  { %v1921_v30 = vmul.f32 1.442695, %v1910_v40  ;;  %v1912_v45 = vsub.f32 %v1870_v6, %v1900_v28  ;;  %v1315_v40 = vsel %vm1073_vm6, %v11514_v39, 0.0 }
 0x767   :  { %v1891_v63 = vpop.xlane.xlu0 %1890 }
 0x768   :  { %v1909_v25 = vsub.f32 %v1855_v10, %v1891_v63  ;;  %10240 = vpow2.f32 %v1921_v30  ;;  %v1925_v12 = vmul.f32 1.442695, %v1912_v45  ;;  %v1300_v63 = vsel %vm1073_vm6, %v11509_v15, 0.0 }
 0x769   :  { %v1906_v46 = vpop.xlane.xlu1 %1905  ;;  %v1306_v30 = vsel %vm1073_vm6, %v11521_v29, 0.0  ;;  %v1312_v45 = vsel %vm1073_vm6, %v11523_v32, 0.0 }
 0x76a   :  { %v1919_v0 = vmul.f32 1.442695, %v1909_v25  ;;  %v1914_v7 = vsub.f32 %v1880_v17, %v1906_v46  ;;  %v1303_v25 = vsel %vm1073_vm6, %v11519_v21, 0.0 }
 0x76b   :  { %v1897_v23 = vpop.xlane.xlu0 %1896 }
 0x76c   :  { %v1911_v49 = vsub.f32 %v1865_v16, %v1897_v23  ;;  %10242 = vpow2.f32 %v1919_v0  ;;  %v1929_v24 = vmul.f32 1.442695, %v1914_v7 }
 0x76d   :  { %10244 = vpow2.f32 %v1925_v12 }
 0x76e   :  { %v1923_v53 = vmul.f32 1.442695, %v1911_v49 }
 0x76f   :  { %v11741_v48 = vpop.eup %10236  ;;  %v1903_v50 = vpop.xlane.xlu0 %1902 }
 0x770   :  { %v1934_v26 = vsel %vm282_vm1, %v11741_v48, 0.0  ;;  %v1913_v5 = vsub.f32 %v1875_v31, %v1903_v50  ;;  %10246 = vpow2.f32 %v1923_v53 }
 0x771   :  { %v11745_v35 = vpop.eup %10238  ;;  %1935 = vadd.xlane.f32.xlu1 %v1934_v26  ;;  %10248 = vpow2.f32 %v1929_v24  ;;  %v2159_v26 = vpop.permute.xlu1 %2158 }
 0x772   :  { %v1931_v20 = vsel %vm282_vm1, %v11745_v35, 0.0  ;;  %v1927_v22 = vmul.f32 1.442695, %v1913_v5 }
 0x773   :  { %1932 = vadd.xlane.f32.xlu0 %v1931_v20  ;;  %v1309_v20 = vsel %vm1073_vm6, %v11507_v2, 0.0  ;;  %v2161_v14 = vpop.permute.xlu0 %2160 }
 0x774   :  { %10250 = vpow2.f32 %v1927_v22 }
 0x775   :  { %v11753_v55 = vpop.eup %10240 }
 0x776   :  { %v1940_v6 = vsel %vm282_vm1, %v11753_v55, 0.0 }
 0x779   :  { %v11755_v10 = vpop.eup %10242 }
 0x77a   :  { %v11759_v16 = vpop.eup %10244  ;;  %v1937_v17 = vsel %vm282_vm1, %v11755_v10, 0.0 }
 0x77b   :  { %v1946_v11 = vsel %vm282_vm1, %v11759_v16, 0.0 }
 0x77d   :  { %v11763_v31 = vpop.eup %10246 }
 0x77e   :  { %v11767_v60 = vpop.eup %10248  ;;  %v1943_v36 = vsel %vm282_vm1, %v11763_v31, 0.0 }
 0x77f   :  { %v1952_v37 = vsel %vm282_vm1, %v11767_v60, 0.0 }
 0x781   :  { %v11771_v33 = vpop.eup %10250 }
 0x782   :  { %2154 = vrot.lane.b32.xlu1 %v11623_v54, %s10712_s2  ;;  %v1949_v42 = vsel %vm282_vm1, %v11771_v33, 0.0 }
 0x789   :  { %2156 = vrot.lane.b32.xlu0 %v11621_v38, %s10712_s2 }
 0x7a6   :  { %1941 = vadd.xlane.f32.xlu1 %v1940_v6 }
 0x7a8   :  { %1938 = vadd.xlane.f32.xlu0 %v1937_v17 }
 0x7aa   :  { %1947 = vadd.xlane.f32.xlu1 %v1946_v11 }
 0x7ac   :  { %1944 = vadd.xlane.f32.xlu0 %v1943_v36 }
 0x7ae   :  { %1953 = vadd.xlane.f32.xlu1 %v1952_v37 }
 0x7b0   :  { %1950 = vadd.xlane.f32.xlu0 %v1949_v42 }
 0x7bf   :  { %2150 = vrot.lane.b32.xlu1 %v11617_v41, %s10712_s2 }
 0x7c3   :  { %2136 = vrot.lane.b32.xlu1 %v11615_v3, %s10713_s15 }
 0x7c6   :  { %2152 = vrot.lane.b32.xlu0 %v11615_v3, %s10712_s2 }
 0x7c7   :  { %2140 = vrot.lane.b32.xlu1 %v11621_v38, %s10713_s15 }
 0x7ca   :  { %2134 = vrot.lane.b32.xlu0 %v11617_v41, %s10713_s15 }
 0x7cb   :  { %2144 = vrot.lane.b32.xlu1 %v11625_v47, %s10713_s15 }
 0x7ce   :  { %2138 = vrot.lane.b32.xlu0 %v11623_v54, %s10713_s15 }
 0x7cf   :  { %2148 = vrot.lane.b32.xlu1 %v11629_v62, %s10713_s15 }
 0x7d2   :  { %2142 = vrot.lane.b32.xlu0 %v11627_v27, %s10713_s15 }
 0x7d6   :  { %2146 = vrot.lane.b32.xlu0 %v11633_v8, %s10713_s15 }
 0x7f3   :  { %1298 = vadd.xlane.f32.xlu1 %v1297_v57 }
 0x7f5   :  { %1295 = vadd.xlane.f32.xlu0 %v1294_v58 }
 0x7f7   :  { %1310 = vadd.xlane.f32.xlu1 %v1309_v20 }
 0x7f9   :  { %1301 = vadd.xlane.f32.xlu0 %v1300_v63 }
 0x7fa   :  { %v1936_v28 = vpop.xlane.xlu1 %1935 }
 0x7fb   :  { %1316 = vadd.xlane.f32.xlu1 %v1315_v40  ;;  %10252 = vrcp.f32 %v1936_v28 }
 0x7fc   :  { %v1933_v23 = vpop.xlane.xlu0 %1932 }
 0x7fd   :  { %10254 = vrcp.f32 %v1933_v23  ;;  %1304 = vadd.xlane.f32.xlu0 %v1303_v25 }
 0x801   :  { %1307 = vadd.xlane.f32.xlu0 %v1306_v30 }
 0x805   :  { %1313 = vadd.xlane.f32.xlu0 %v1312_v45 }
 0x808   :  { %v10253_v46 = vpop.eup %10252 }
 0x809   :  { %v1964_v50 = vmul.f32 %v10253_v46, %v11741_v48  ;;  %v2157_v48 = vpop.permute.xlu0 %2156 }
 0x80a   :  { %v10255_v0 = vpop.eup %10254 }
 0x80b   :  { %v1963_v49 = vmul.f32 %v10255_v0, %v11745_v35  ;;  %v2155_v35 = vpop.permute.xlu1 %2154 }
 0x80d   :  { %9507 = vmatprep.mubr.msk.f32.mxu1 %vm282_vm1, %v1963_v49 }
 0x80e   :  { %9508 = vmatmul.mubr.msk.f32.vlgmr.msra.gmra.mxu1 %vm282_vm1, %v1964_v50 }
 0x80f   :  { %9520 = vmatpush3.xpose.msk.msra.mxu1 %vm1745_vm10, %v11699_v56 }
 0x810   :  { %9521 = vmatprep.subr.msk.mxu1 %vm1745_vm10, %v11739_v34 }
 0x813   :  { %9522 = vmatpush3.xpose.msk.msra.mxu1 %vm1745_vm10, %v11739_v34 }
 0x814   :  { %9523 = vmatprep.subr.msk.mxu1 %vm1745_vm10, %v2161_v14 }
 0x817   :  { %9524 = vmatpush3.xpose.msk.msra.mxu1 %vm1745_vm10, %v2161_v14 }
 0x818   :  { %9525 = vmatprep.subr.msk.mxu1 %vm1745_vm10, %v2159_v26 }
 0x81b   :  { %9526 = vmatpush3.xpose.msk.msra.mxu1 %vm1745_vm10, %v2159_v26 }
 0x81c   :  { %9527 = vmatprep.subr.msk.mxu1 %vm1745_vm10, %v2157_v48 }
 0x81f   :  { %9528 = vmatpush3.xpose.msk.msra.mxu1 %vm1745_vm10, %v2157_v48 }
 0x820   :  { %9529 = vmatprep.subr.msk.mxu1 %vm1745_vm10, %v2155_v35 }
 0x823   :  { %9530 = vmatpush3.xpose.msk.msra.mxu1 %vm1745_vm10, %v2155_v35 }
 0x82f   :  { %v1942_v56 = vpop.xlane.xlu1 %1941 }
 0x830   :  { %10256 = vrcp.f32 %v1942_v56 }
 0x831   :  { %v1939_v34 = vpop.xlane.xlu0 %1938 }
 0x832   :  { %10258 = vrcp.f32 %v1939_v34 }
 0x833   :  { %v1948_v12 = vpop.xlane.xlu1 %1947 }
 0x834   :  { %10260 = vrcp.f32 %v1948_v12 }
 0x835   :  { %v1945_v7 = vpop.xlane.xlu0 %1944 }
 0x836   :  { %10262 = vrcp.f32 %v1945_v7 }
 0x837   :  { %v1954_v53 = vpop.xlane.xlu1 %1953 }
 0x838   :  { %10264 = vrcp.f32 %v1954_v53 }
 0x839   :  { %v1951_v5 = vpop.xlane.xlu0 %1950 }
 0x83a   :  { %10266 = vrcp.f32 %v1951_v5 }
 0x83b   :  { %v2151_v17 = vpop.permute.xlu1 %2150 }
 0x83d   :  { %v2153_v24 = vpop.permute.xlu0 %2152  ;;  %v10257_v22 = vpop.eup %10256 }
 0x83e   :  { %9531 = vmatprep.subr.msk.mxu1 %vm1745_vm10, %v2153_v24  ;;  %v1966_v36 = vmul.f32 %v10257_v22, %v11753_v55 }
 0x83f   :  { %v10259_v6 = vpop.eup %10258  ;;  %9532 = vmatpush3.xpose.msk.msra.mxu1 %vm1745_vm10, %v2153_v24  ;;  %v2137_v55 = vpop.permute.xlu1 %2136 }
 0x840   :  { %9533 = vmatprep.subr.msk.mxu1 %vm1745_vm10, %v2151_v17  ;;  %v1965_v11 = vmul.f32 %v10259_v6, %v11755_v10 }
 0x841   :  { %v10261_v37 = vpop.eup %10260  ;;  %v2135_v58 = vpop.permute.xlu0 %2134 }
 0x842   :  { %9510 = vmatprep.mubr.msk.f32.mxu1 %vm282_vm1, %v1965_v11  ;;  %v1968_v26 = vmul.f32 %v10261_v37, %v11759_v16  ;;  %v2124_v16 = vld [vmem:[%s14487_s7] sm:$0xf] }
 0x843   :  { %v10263_v42 = vpop.eup %10262  ;;  %9511 = vmatmul.mubr.msk.f32.gmra.mxu1 %vm282_vm1, %v1966_v36 }
 0x844   :  { %9534 = vmatpush3.xpose.msk.msra.mxu1 %vm1745_vm10, %v2151_v17  ;;  %v1967_v57 = vmul.f32 %v10263_v42, %v11763_v31  ;;  %v2141_v31 = vpop.permute.xlu1 %2140 }
 0x845   :  { %v10265_v20 = vpop.eup %10264  ;;  %v2139_v28 = vpop.permute.xlu0 %2138  ;;  %9589 = vmatprep.subr.msk.mxu1 %vm2570_vm11, %v2124_v16 }
 0x846   :  { %9513 = vmatprep.mubr.msk.f32.mxu1 %vm282_vm1, %v1967_v57  ;;  %v1970_v63 = vmul.f32 %v10265_v20, %v11767_v60 }
 0x847   :  { %v10267_v14 = vpop.eup %10266  ;;  %9514 = vmatmul.mubr.msk.f32.gmra.mxu1 %vm282_vm1, %v1968_v26 }
 0x848   :  { %v1969_v10 = vmul.f32 %v10267_v14, %v11771_v33  ;;  %v2145_v60 = vpop.permute.xlu1 %2144 }
 0x849   :  { %v2143_v33 = vpop.permute.xlu0 %2142 }
 0x84a   :  { %9516 = vmatprep.mubr.msk.f32.mxu1 %vm282_vm1, %v1969_v10 }
 0x84b   :  { %9517 = vmatmul.mubr.msk.f32.gmra.mxu1 %vm282_vm1, %v1970_v63 }
 0x84c   :  { %9535 = vmatprep.mubr.msk.f32.mxu1 %vm1745_vm10, %v2135_v58  ;;  %v2149_v23 = vpop.permute.xlu1 %2148 }
 0x84d   :  { %v2147_v40 = vpop.permute.xlu0 %2146 }
 0x84f   :  { %9536 = vmatmul.mubr.msk.f32.vlgmr.msra.gmra.mxu1 %vm1745_vm10, %v2137_v55 }
 0x850   :  { %9538 = vmatprep.mubr.msk.f32.mxu1 %vm1745_vm10, %v2139_v28  ;;  %9590 = vmatpush3.msk.msra.mxu1 %vm2570_vm11, %v2124_v16 }
 0x853   :  { %9539 = vmatmul.mubr.msk.f32.gmra.mxu1 %vm1745_vm10, %v2141_v31 }
 0x854   :  { %9541 = vmatprep.mubr.msk.f32.mxu1 %vm1745_vm10, %v2143_v33 }
 0x857   :  { %9542 = vmatmul.mubr.msk.f32.gmra.mxu1 %vm1745_vm10, %v2145_v60 }
 0x858   :  { %9544 = vmatprep.mubr.msk.f32.mxu1 %vm1745_vm10, %v2147_v40 }
 0x85b   :  { %9545 = vmatmul.mubr.msk.f32.gmra.mxu1 %vm1745_vm10, %v2149_v23 }
 0x87c   :  { %v1299_v25 = vpop.xlane.xlu1 %1298 }
 0x87d   :  { %v1328_v30 = vmul.f32 0.125, %v1299_v25 }
 0x87e   :  { %v1296_v45 = vpop.xlane.xlu0 %1295 }
 0x87f   :  { %v11861_v46 = vsub.f32 %v11502_v1, %v1328_v30  ;;  %v1327_v0 = vmul.f32 0.125, %v1296_v45 }
 0x880   :  { %v1311_v49 = vpop.xlane.xlu1 %1310 }
 0x881   :  { %v11864_v50 = vsub.f32 %v11504_v13, %v1327_v0  ;;  %v1360_v48 = vmul.f32 %v11861_v46, %v11861_v46  ;;  %v1332_v7 = vmul.f32 0.125, %v1311_v49 }
 0x882   :  { %v1302_v35 = vpop.xlane.xlu0 %1301 }
 0x883   :  { %v1329_v56 = vmul.f32 0.125, %v1302_v35  ;;  %v1394_v34 = vsel %vm1073_vm6, %v1360_v48, 0.0  ;;  %v1359_v12 = vmul.f32 %v11864_v50, %v11864_v50  ;;  %v11878_v11 = vsub.f32 %v11507_v2, %v1332_v7 }
 0x884   :  { %1395 = vadd.xlane.f32.xlu1 %v1394_v34  ;;  %v1317_v24 = vpop.xlane.xlu1 %1316 }
 0x885   :  { %v11872_v53 = vsub.f32 %v11509_v15, %v1329_v56  ;;  %v1391_v5 = vsel %vm1073_vm6, %v1359_v12, 0.0  ;;  %v1334_v36 = vmul.f32 0.125, %v1317_v24  ;;  %v1364_v10 = vmul.f32 %v11878_v11, %v11878_v11  ;;  %v8411_v12 = vld [vmem:[%s14490_s10 + $0x48] sm:$0xff] }
 0x886   :  { %1392 = vadd.xlane.f32.xlu0 %v1391_v5  ;;  %v1305_v22 = vpop.xlane.xlu0 %1304 }
 0x887   :  { %v1330_v6 = vmul.f32 0.125, %v1305_v22  ;;  %v1361_v17 = vmul.f32 %v11872_v53, %v11872_v53  ;;  %v11887_v20 = vsub.f32 %v11514_v39, %v1334_v36  ;;  %v1406_v60 = vsel %vm1073_vm6, %v1364_v10, 0.0  ;;  %v8410_v22 = vld [vmem:[%s14490_s10 + $0x40] sm:$0xff] }
 0x889   :  { %v11881_v37 = vsub.f32 %v11519_v21, %v1330_v6  ;;  %v1397_v42 = vsel %vm1073_vm6, %v1361_v17, 0.0  ;;  %v1366_v40 = vmul.f32 %v11887_v20, %v11887_v20 }
 0x88a   :  { %1398 = vadd.xlane.f32.xlu0 %v1397_v42  ;;  %v1308_v57 = vpop.xlane.xlu0 %1307 }
 0x88b   :  { %v1331_v58 = vmul.f32 0.125, %v1308_v57  ;;  %v1362_v26 = vmul.f32 %v11881_v37, %v11881_v37  ;;  %v1412_v30 = vsel %vm1073_vm6, %v1366_v40, 0.0  ;;  %v8413_v57 = vld [vmem:[%s14490_s10 + $0x58] sm:$0xff] }
 0x88d   :  { %v11890_v14 = vsub.f32 %v11521_v29, %v1331_v58  ;;  %v1400_v55 = vsel %vm1073_vm6, %v1362_v26, 0.0 }
 0x88e   :  { %v1314_v63 = vpop.xlane.xlu0 %1313  ;;  %1401 = vadd.xlane.f32.xlu1 %v1400_v55 }
 0x88f   :  { %v1333_v28 = vmul.f32 0.125, %v1314_v63  ;;  %v1363_v31 = vmul.f32 %v11890_v14, %v11890_v14 }
 0x891   :  { %v11898_v16 = vsub.f32 %v11523_v32, %v1333_v28  ;;  %v1403_v33 = vsel %vm1073_vm6, %v1363_v31, 0.0  ;;  %v8412_v28 = vld [vmem:[%s14490_s10 + $0x50] sm:$0xff] }
 0x892   :  { %1404 = vadd.xlane.f32.xlu0 %v1403_v33  ;;  %1407 = vadd.xlane.f32.xlu1 %v1406_v60 }
 0x893   :  { %v1365_v23 = vmul.f32 %v11898_v16, %v11898_v16 }
 0x895   :  { %v1409_v25 = vsel %vm1073_vm6, %v1365_v23, 0.0  ;;  %v8415_v23 = vld [vmem:[%s14490_s10 + $0x68] sm:$0xff] }
 0x896   :  { %1410 = vadd.xlane.f32.xlu0 %v1409_v25  ;;  %1413 = vadd.xlane.f32.xlu1 %v1412_v30 }
 0x8a7   :  { %2403 = vrot.lane.b32.xlu1 %v11633_v8, %s10714_s18 }
 0x8ac   :  { %2405 = vrot.lane.b32.xlu0 %v11629_v62, %s10714_s18 }
 0x8ce   :  { %v9509_v45 = vpop.f32.mrf.mxu1 }
 0x8d0   :  { %v2085_v0 = vpop.f32.mrf.mxu1 }
 0x8d1   :  { %9591 = vmatprep.mubr.msk.f32.mxu1 %vm1745_vm10, %v2085_v0 }
 0x8d2   :  { %9592 = vmatmul.mubr.msk.f32.vlgmr.msra.gmra.mxu1 %vm1745_vm10, %v9509_v45 }
 0x903   :  { %v9512_v49 = vpop.f32.mrf.mxu1 }
 0x905   :  { %v2095_v48 = vpop.f32.mrf.mxu1 }
 0x906   :  { %9594 = vmatprep.mubr.msk.f32.mxu1 %vm1745_vm10, %v2095_v48  ;;  %v8414_v48 = vld [vmem:[%s14490_s10 + $0x60] sm:$0xff] }
 0x907   :  { %v9515_v35 = vpop.f32.mrf.mxu1  ;;  %9595 = vmatmul.mubr.msk.f32.gmra.mxu1 %vm1745_vm10, %v9512_v49 }
 0x909   :  { %v2105_v56 = vpop.f32.mrf.mxu1 }
 0x90a   :  { %9597 = vmatprep.mubr.msk.f32.mxu1 %vm1745_vm10, %v2105_v56 }
 0x90b   :  { %v9518_v8 = vpop.f32.mrf.mxu1  ;;  %9598 = vmatmul.mubr.msk.f32.gmra.mxu1 %vm1745_vm10, %v9515_v35 }
 0x90d   :  { %v2115_v62 = vpop.f32.mrf.mxu1  ;;  %v1396_v34 = vpop.xlane.xlu1 %1395 }
 0x90e   :  { %v1424_v7 = vmul.f32 0.125, %v1396_v34  ;;  %9600 = vmatprep.mubr.msk.f32.mxu1 %vm1745_vm10, %v2115_v62  ;;  %v8417_v34 = vld [vmem:[%s14490_s10 + $0x78] sm:$0xff] }
 0x90f   :  { %v1393_v5 = vpop.xlane.xlu0 %1392  ;;  %v9537_v24 = vpop.f32.mrf.mxu1  ;;  %9601 = vmatmul.mubr.msk.f32.gmra.mxu1 %vm1745_vm10, %v9518_v8 }
 0x910   :  { %v1440_v6 = vadd.f32 1e-05, %v1424_v7  ;;  %v1423_v17 = vmul.f32 0.125, %v1393_v5  ;;  %v11926_v36 = vadd.f32 %v9537_v24, %v8411_v12 }
 0x911   :  { %v2264_v42 = vpop.f32.mrf.mxu1 }
 0x912   :  { %10268 = vrsqrt.f32 %v1440_v6  ;;  %v1439_v58 = vadd.f32 1e-05, %v1423_v17  ;;  %v11931_v26 = vadd.f32 %v8410_v22, %v2264_v42  ;;  %v2306_v55 = vsel %vm282_vm1, %v11926_v36, -inf }
 0x913   :  { %v1399_v10 = vpop.xlane.xlu0 %1398  ;;  %v9540_v63 = vpop.f32.mrf.mxu1  ;;  %2307 = vmax.xlane.f32.xlu1 %v2306_v55 }
 0x914   :  { %10270 = vrsqrt.f32 %v1439_v58  ;;  %v1425_v31 = vmul.f32 0.125, %v1399_v10  ;;  %v11938_v33 = vadd.f32 %v9540_v63, %v8413_v57  ;;  %v2303_v60 = vsel %vm282_vm1, %v11931_v26, -inf }
 0x915   :  { %2304 = vmax.xlane.f32.xlu0 %v2303_v60  ;;  %v2274_v40 = vpop.f32.mrf.mxu1 }
 0x916   :  { %v1441_v25 = vadd.f32 1e-05, %v1425_v31  ;;  %v11945_v30 = vadd.f32 %v8412_v28, %v2274_v40  ;;  %v2312_v45 = vsel %vm282_vm1, %v11938_v33, -inf }
 0x917   :  { %v9543_v0 = vpop.f32.mrf.mxu1  ;;  %2313 = vmax.xlane.f32.xlu1 %v2312_v45  ;;  %v1402_v49 = vpop.xlane.xlu1 %1401 }
 0x918   :  { %10272 = vrsqrt.f32 %v1441_v25  ;;  %v11952_v35 = vadd.f32 %v9543_v0, %v8415_v23  ;;  %v1426_v56 = vmul.f32 0.125, %v1402_v49  ;;  %v2309_v8 = vsel %vm282_vm1, %v11945_v30, -inf }
 0x919   :  { %2310 = vmax.xlane.f32.xlu0 %v2309_v8  ;;  %v2284_v62 = vpop.f32.mrf.mxu1 }
 0x91a   :  { %v1442_v12 = vadd.f32 1e-05, %v1426_v56  ;;  %v11959_v7 = vadd.f32 %v8414_v48, %v2284_v62  ;;  %v2318_v5 = vsel %vm282_vm1, %v11952_v35, -inf }
 0x91b   :  { %v1405_v24 = vpop.xlane.xlu0 %1404  ;;  %v9546_v22 = vpop.f32.mrf.mxu1  ;;  %2319 = vmax.xlane.f32.xlu1 %v2318_v5 }
 0x91c   :  { %10274 = vrsqrt.f32 %v1442_v12  ;;  %v1427_v6 = vmul.f32 0.125, %v1405_v24  ;;  %v11963_v17 = vadd.f32 %v9546_v22, %v8417_v34  ;;  %v1408_v42 = vpop.xlane.xlu1 %1407  ;;  %v2315_v57 = vsel %vm282_vm1, %v11959_v7, -inf }
 0x91d   :  { %v1428_v58 = vmul.f32 0.125, %v1408_v42  ;;  %2316 = vmax.xlane.f32.xlu0 %v2315_v57 }
 0x91e   :  { %v1443_v55 = vadd.f32 1e-05, %v1427_v6  ;;  %v2324_v10 = vsel %vm282_vm1, %v11963_v17, -inf }
 0x91f   :  { %v10269_v63 = vpop.eup %10268  ;;  %v1444_v28 = vadd.f32 1e-05, %v1428_v58  ;;  %v1411_v31 = vpop.xlane.xlu0 %1410  ;;  %2325 = vmax.xlane.f32.xlu1 %v2324_v10 }
 0x920   :  { %10276 = vrsqrt.f32 %v1443_v55  ;;  %v1429_v60 = vmul.f32 0.125, %v1411_v31  ;;  %v1414_v40 = vpop.xlane.xlu1 %1413  ;;  %v1472_v23 = vmul.f32 %v10269_v63, %v11861_v46 }
 0x921   :  { %v10271_v25 = vpop.eup %10270  ;;  %10278 = vrsqrt.f32 %v1444_v28  ;;  %v1430_v45 = vmul.f32 0.125, %v1414_v40 }
 0x922   :  { %v1445_v0 = vadd.f32 1e-05, %v1429_v60  ;;  %v1471_v49 = vmul.f32 %v10271_v25, %v11864_v50  ;;  %v1492_v8 = vmul.f32 %v11576_v4, %v1472_v23 }
 0x923   :  { %v1446_v48 = vadd.f32 1e-05, %v1430_v45  ;;  %v2406_v56 = vpop.permute.xlu0 %2405 }
 0x924   :  { %10280 = vrsqrt.f32 %v1445_v0  ;;  %9547 = vmatprep.subr.mxu0 %v2406_v56  ;;  %v1491_v62 = vmul.f32 %v11576_v4, %v1471_v49  ;;  %v2404_v12 = vpop.permute.xlu1 %2403  ;;  %v1512_v50 = vadd.f32 %v11582_v44, %v1492_v8 }
 0x925   :  { %v10273_v34 = vpop.eup %10272  ;;  %10282 = vrsqrt.f32 %v1446_v48  ;;  %9548 = vmatpush3.msra.mxu0 %v2406_v56 }
 0x926   :  { %9549 = vmatprep.subr.mxu0 %v2404_v12  ;;  %v1511_v46 = vadd.f32 %v11582_v44, %v1491_v62  ;;  %v1473_v5 = vmul.f32 %v10273_v34, %v11872_v53 }
 0x927   :  { %9550 = vmatpush3.msra.mxu0 %v2404_v12 }
 0x928   :  { %9451 = vmatprep.mubr.msk.f32.mxu0 %vm1073_vm6, %v1511_v46  ;;  %v1493_v24 = vmul.f32 %v11576_v4, %v1473_v5 }
 0x929   :  { %v10275_v22 = vpop.eup %10274  ;;  %9452 = vmatmul.mubr.msk.f32.gmra.mxu0 %vm1073_vm6, %v1512_v50 }
 0x92a   :  { %v1513_v6 = vadd.f32 %v11582_v44, %v1493_v24  ;;  %v1474_v42 = vmul.f32 %v10275_v22, %v11881_v37 }
 0x92c   :  { %9454 = vmatprep.mubr.msk.f32.mxu0 %vm1073_vm6, %v1513_v6  ;;  %v1494_v57 = vmul.f32 %v11576_v4, %v1474_v42 }
 0x92d   :  { %v10277_v58 = vpop.eup %10276 }
 0x92e   :  { %v10279_v53 = vpop.eup %10278  ;;  %v1514_v55 = vadd.f32 %v11582_v44, %v1494_v57  ;;  %v1475_v10 = vmul.f32 %v10277_v58, %v11890_v14 }
 0x92f   :  { %v1476_v63 = vmul.f32 %v10279_v53, %v11878_v11 }
 0x930   :  { %2401 = vrot.lane.b32.xlu1 %v11625_v47, %s10714_s18  ;;  %9455 = vmatmul.mubr.msk.f32.gmra.mxu0 %vm1073_vm6, %v1514_v55  ;;  %v1495_v28 = vmul.f32 %v11576_v4, %v1475_v10  ;;  %v10668_v47 = vld [vmem:[%s14484_s4 + $0x3] ss:$0 sm:$0xff] }
 0x931   :  { %v10281_v37 = vpop.eup %10280  ;;  %v1496_v31 = vmul.f32 %v11576_v4, %v1476_v63 }
 0x932   :  { %v10283_v60 = vpop.eup %10282  ;;  %v1515_v40 = vadd.f32 %v11582_v44, %v1495_v28  ;;  %v1477_v23 = vmul.f32 %v10281_v37, %v11898_v16  ;;  %v10669_v16 = vld [vmem:[%s14484_s4 + $0x4] ss:$0 sm:$0xff] }
 0x933   :  { %2399 = vrot.lane.b32.xlu0 %v11627_v27, %s10714_s18  ;;  %v1516_v11 = vadd.f32 %v11582_v44, %v1496_v31  ;;  %v1478_v14 = vmul.f32 %v10283_v60, %v11887_v20  ;;  %v2294_v27 = vpop.f32.mrf.mxu1  ;;  %v12012_v20 = vld [vmem:[%s14490_s10 + $0x70] sm:$0xff] }
 0x934   :  { %9457 = vmatprep.mubr.msk.f32.mxu0 %vm1073_vm6, %v1515_v40  ;;  %v1497_v25 = vmul.f32 %v10668_v47, %v1477_v23  ;;  %v2295_v0 = vadd.f32 %v12012_v20, %v2294_v27 }
 0x935   :  { %9458 = vmatmul.mubr.msk.f32.gmra.mxu0 %vm1073_vm6, %v1516_v11  ;;  %v1498_v4 = vmul.f32 %v10668_v47, %v1478_v14 }
 0x936   :  { %v1517_v45 = vadd.f32 %v10669_v16, %v1497_v25  ;;  %v2321_v49 = vsel %vm282_vm1, %v2295_v0, -inf }
 0x937   :  { %2397 = vrot.lane.b32.xlu0 %v11621_v38, %s10714_s18  ;;  %v1518_v44 = vadd.f32 %v10669_v16, %v1498_v4 }
 0x938   :  { %9460 = vmatprep.mubr.msk.f32.mxu0 %vm1073_vm6, %v1517_v45 }
 0x939   :  { %9461 = vmatmul.mubr.msk.f32.gmra.mxu0 %vm1073_vm6, %v1518_v44 }
 0x956   :  { %2322 = vmax.xlane.f32.xlu0 %v2321_v49 }
 0x99c   :  { %v2308_v48 = vpop.xlane.xlu1 %2307 }
 0x99d   :  { %v2328_v56 = vsub.f32 %v11926_v36, %v2308_v48 }
 0x99e   :  { %v2305_v38 = vpop.xlane.xlu0 %2304 }
 0x99f   :  { %v2337_v8 = vmul.f32 1.442695, %v2328_v56  ;;  %v2327_v62 = vsub.f32 %v11931_v26, %v2305_v38 }
 0x9a0   :  { %v2314_v34 = vpop.xlane.xlu1 %2313 }
 0x9a1   :  { %10284 = vpow2.f32 %v2337_v8  ;;  %v2335_v12 = vmul.f32 1.442695, %v2327_v62  ;;  %v2330_v46 = vsub.f32 %v11938_v33, %v2314_v34 }
 0x9a2   :  { %v2311_v5 = vpop.xlane.xlu0 %2310 }
 0x9a3   :  { %10286 = vpow2.f32 %v2335_v12  ;;  %v2341_v50 = vmul.f32 1.442695, %v2330_v46  ;;  %v2329_v63 = vsub.f32 %v11945_v30, %v2311_v5 }
 0x9a4   :  { %v2320_v24 = vpop.xlane.xlu1 %2319 }
 0x9a5   :  { %10288 = vpow2.f32 %v2341_v50  ;;  %v2339_v28 = vmul.f32 1.442695, %v2329_v63  ;;  %v2332_v31 = vsub.f32 %v11952_v35, %v2320_v24 }
 0x9a6   :  { %v2317_v22 = vpop.xlane.xlu0 %2316 }
 0x9a7   :  { %v2331_v37 = vsub.f32 %v11959_v7, %v2317_v22  ;;  %10290 = vpow2.f32 %v2339_v28  ;;  %v2345_v40 = vmul.f32 1.442695, %v2332_v31 }
 0x9a8   :  { %v2326_v6 = vpop.xlane.xlu1 %2325 }
 0x9a9   :  { %v2343_v60 = vmul.f32 1.442695, %v2331_v37  ;;  %v2334_v23 = vsub.f32 %v11963_v17, %v2326_v6 }
 0x9aa   :  { %v2400_v42 = vpop.permute.xlu0 %2399 }
 0x9ab   :  { %10292 = vpow2.f32 %v2343_v60  ;;  %v2349_v11 = vmul.f32 1.442695, %v2334_v23 }
 0x9ac   :  { %v2402_v57 = vpop.permute.xlu1 %2401  ;;  %10294 = vpow2.f32 %v2345_v40 }
 0x9ad   :  { %9551 = vmatprep.subr.mxu0 %v2402_v57  ;;  %10296 = vpow2.f32 %v2349_v11 }
 0x9ae   :  { %v12019_v36 = vpop.eup %10284  ;;  %9552 = vmatpush3.msra.mxu0 %v2402_v57  ;;  %v2398_v33 = vpop.permute.xlu0 %2397 }
 0x9af   :  { %9553 = vmatprep.subr.mxu0 %v2400_v42  ;;  %v2354_v26 = vsel %vm282_vm1, %v12019_v36, 0.0 }
 0x9b0   :  { %v12023_v58 = vpop.eup %10286  ;;  %2355 = vadd.xlane.f32.xlu1 %v2354_v26  ;;  %9554 = vmatpush3.msra.mxu0 %v2400_v42 }
 0x9b1   :  { %9555 = vmatprep.subr.mxu0 %v2398_v33  ;;  %v2351_v53 = vsel %vm282_vm1, %v12023_v58, 0.0 }
 0x9b2   :  { %v12027_v55 = vpop.eup %10288  ;;  %2352 = vadd.xlane.f32.xlu0 %v2351_v53  ;;  %9556 = vmatpush3.msra.mxu0 %v2398_v33 }
 0x9b3   :  { %v2360_v10 = vsel %vm282_vm1, %v12027_v55, 0.0 }
 0x9b4   :  { %v12039_v30 = vpop.eup %10290 }
 0x9b6   :  { %2361 = vadd.xlane.f32.xlu0 %v2360_v10 }
 0x9b8   :  { %v12043_v7 = vpop.eup %10292 }
 0x9b9   :  { %v2363_v35 = vsel %vm282_vm1, %v12043_v7, 0.0  ;;  %v12047_v25 = vpop.eup %10294 }
 0x9ba   :  { %v2366_v4 = vsel %vm282_vm1, %v12047_v25, 0.0  ;;  %v12053_v16 = vpop.eup %10296 }
 0x9bb   :  { %v2372_v44 = vsel %vm282_vm1, %v12053_v16, 0.0 }
 0x9c1   :  { %2395 = vrot.lane.b32.xlu1 %v11623_v54, %s10714_s18 }
 0x9cc   :  { %2393 = vrot.lane.b32.xlu0 %v11615_v3, %s10714_s18  ;;  %v2357_v3 = vsel %vm282_vm1, %v12039_v30, 0.0 }
 0x9df   :  { %v2323_v14 = vpop.xlane.xlu0 %2322 }
 0x9e0   :  { %v2333_v54 = vsub.f32 %v2295_v0, %v2323_v14 }
 0x9e2   :  { %v2347_v47 = vmul.f32 1.442695, %v2333_v54 }
 0x9e4   :  { %10298 = vpow2.f32 %v2347_v47 }
 0x9e5   :  { %2358 = vadd.xlane.f32.xlu1 %v2357_v3 }
 0x9e9   :  { %2364 = vadd.xlane.f32.xlu1 %v2363_v35  ;;  %v12049_v17 = vpop.f32.mrf.mxu0 }
 0x9eb   :  { %v12055_v45 = vpop.f32.mrf.mxu0 }
 0x9ed   :  { %2367 = vadd.xlane.f32.xlu1 %v2366_v4 }
 0x9f0   :  { %v12061_v0 = vpop.f32.mrf.mxu0 }
 0x9f1   :  { %v12059_v27 = vpop.eup %10298  ;;  %2373 = vadd.xlane.f32.xlu1 %v2372_v44 }
 0x9f2   :  { %v2369_v49 = vsel %vm282_vm1, %v12059_v27, 0.0  ;;  %v12065_v48 = vpop.f32.mrf.mxu0 }
 0x9f3   :  { %2370 = vadd.xlane.f32.xlu0 %v2369_v49 }
 0x9f5   :  { %v12067_v56 = vpop.f32.mrf.mxu0 }
 0x9f7   :  { %v12069_v38 = vpop.f32.mrf.mxu0 }
 0x9f9   :  { %v12071_v8 = vpop.f32.mrf.mxu0 }
 0x9fb   :  { %v12075_v62 = vpop.f32.mrf.mxu0 }
 0xa02   :  { %2833 = vrot.lane.b32.xlu1 %v12071_v8, %s10710_s19 }
 0xa06   :  { %2831 = vrot.lane.b32.xlu1 %v12075_v62, %s10710_s19 }
 0xa09   :  { %2391 = vrot.lane.b32.xlu0 %v11617_v41, %s10714_s18 }
 0xa0a   :  { %2827 = vrot.lane.b32.xlu1 %v12069_v38, %s10710_s19 }
 0xa0d   :  { %2829 = vrot.lane.b32.xlu0 %v12067_v56, %s10710_s19 }
 0xa0e   :  { %2823 = vrot.lane.b32.xlu1 %v12065_v48, %s10710_s19 }
 0xa11   :  { %2825 = vrot.lane.b32.xlu0 %v12061_v0, %s10710_s19 }
 0xa12   :  { %2819 = vrot.lane.b32.xlu1 %v12055_v45, %s10710_s19 }
 0xa15   :  { %2821 = vrot.lane.b32.xlu0 %v12049_v17, %s10710_s19 }
 0xa16   :  { %3072 = vrot.lane.b32.xlu1 %v12075_v62, %s10711_s1 }
 0xa19   :  { %3074 = vrot.lane.b32.xlu0 %v12071_v8, %s10711_s1 }
 0xa1a   :  { %3070 = vrot.lane.b32.xlu1 %v12067_v56, %s10711_s1 }
 0xa1d   :  { %3066 = vrot.lane.b32.xlu0 %v12061_v0, %s10711_s1 }
 0xa1e   :  { %3068 = vrot.lane.b32.xlu1 %v12069_v38, %s10711_s1 }
 0xa21   :  { %3062 = vrot.lane.b32.xlu0 %v12049_v17, %s10711_s1 }
 0xa22   :  { %3064 = vrot.lane.b32.xlu1 %v12065_v48, %s10711_s1 }
 0xa25   :  { %3243 = vrot.lane.b32.xlu0 %v12071_v8, %s10712_s2 }
 0xa26   :  { %3060 = vrot.lane.b32.xlu1 %v12055_v45, %s10711_s1 }
 0xa2a   :  { %3241 = vrot.lane.b32.xlu1 %v12075_v62, %s10712_s2 }
 0xa39   :  { %v2356_v41 = vpop.xlane.xlu1 %2355 }
 0xa3b   :  { %v2353_v34 = vpop.xlane.xlu0 %2352 }
 0xa3c   :  { %10300 = vrcp.f32 %v2353_v34 }
 0xa3d   :  { %v2396_v12 = vpop.permute.xlu1 %2395  ;;  %10302 = vrcp.f32 %v2356_v41 }
 0xa3e   :  { %9557 = vmatprep.subr.mxu0 %v2396_v12 }
 0xa3f   :  { %v2362_v46 = vpop.xlane.xlu0 %2361  ;;  %9558 = vmatpush3.msra.mxu0 %v2396_v12 }
 0xa43   :  { %v2394_v5 = vpop.permute.xlu0 %2393 }
 0xa44   :  { %9559 = vmatprep.subr.mxu0 %v2394_v5 }
 0xa45   :  { %9560 = vmatpush3.msra.mxu0 %v2394_v5 }
 0xa49   :  { %v10301_v50 = vpop.eup %10300 }
 0xa4a   :  { %v2383_v24 = vmul.f32 %v10301_v50, %v12023_v58  ;;  %v10303_v33 = vpop.eup %10302  ;;  %v12120_v58 = vld [vmem:[%s14487_s7 + $0x4] sm:$0xf] }
 0xa4b   :  { %v2384_v28 = vmul.f32 %v10303_v33, %v12019_v36 }
 0xa4c   :  { %9563 = vmatprep.mubr.msk.f32.mxu0 %vm282_vm1, %v2383_v24 }
 0xa6e   :  { %v2359_v22 = vpop.xlane.xlu1 %2358 }
 0xa6f   :  { %10304 = vrcp.f32 %v2359_v22 }
 0xa70   :  { %10306 = vrcp.f32 %v2362_v46 }
 0xa72   :  { %v2365_v6 = vpop.xlane.xlu1 %2364 }
 0xa73   :  { %10308 = vrcp.f32 %v2365_v6 }
 0xa76   :  { %v2368_v42 = vpop.xlane.xlu1 %2367 }
 0xa77   :  { %10310 = vrcp.f32 %v2368_v42 }
 0xa7a   :  { %v2374_v57 = vpop.xlane.xlu1 %2373 }
 0xa7b   :  { %10312 = vrcp.f32 %v2374_v57 }
 0xa7c   :  { %v2371_v26 = vpop.xlane.xlu0 %2370  ;;  %v10305_v10 = vpop.eup %10304 }
 0xa7d   :  { %10314 = vrcp.f32 %v2371_v26  ;;  %v10307_v37 = vpop.eup %10306  ;;  %v2385_v60 = vmul.f32 %v10305_v10, %v12039_v30 }
 0xa7e   :  { %v12115_v53 = vpop.permute.xlu1 %2833  ;;  %v2386_v36 = vmul.f32 %v10307_v37, %v12027_v55 }
 0xa80   :  { %v2392_v63 = vpop.permute.xlu0 %2391  ;;  %v10309_v40 = vpop.eup %10308 }
 0xa81   :  { %9561 = vmatprep.subr.mxu0 %v2392_v63  ;;  %v2387_v54 = vmul.f32 %v10309_v40, %v12043_v7 }
 0xa82   :  { %9562 = vmatpush3.msra.mxu0 %v2392_v63  ;;  %v12123_v31 = vpop.permute.xlu1 %2831 }
 0xa83   :  { %9564 = vmatmul.mubr.msk.f32.vlgmr.msra.gmra.mxu0 %vm282_vm1, %v2384_v28  ;;  %9575 = vmatprep.subr.msk.mxu0 %vm2570_vm11, %v12120_v58 }
 0xa84   :  { %v12129_v23 = vpop.permute.xlu0 %2829  ;;  %9566 = vmatprep.mubr.msk.f32.mxu0 %vm282_vm1, %v2385_v60  ;;  %9576 = vmatpush3.msk.msra.mxu0 %vm2570_vm11, %v12120_v58  ;;  %v10311_v11 = vpop.eup %10310 }
 0xa85   :  { %9603 = vmatprep.subr.msk.mxu0 %vm1745_vm10, %v12115_v53  ;;  %v2388_v3 = vmul.f32 %v10311_v11, %v12047_v25  ;;  %v10670_v11 = vld [vmem:[%s14490_s10 + $0x8] sm:$0xff] }
 0xa86   :  { %v12137_v14 = vpop.permute.xlu1 %2827 }
 0xa87   :  { %9567 = vmatmul.mubr.msk.f32.gmra.mxu0 %vm282_vm1, %v2386_v36 }
 0xa88   :  { %v12141_v30 = vpop.permute.xlu0 %2825  ;;  %9569 = vmatprep.mubr.msk.f32.mxu0 %vm282_vm1, %v2387_v54  ;;  %v10313_v47 = vpop.eup %10312 }
 0xa89   :  { %v2390_v7 = vmul.f32 %v10313_v47, %v12053_v16 }
 0xa8a   :  { %v10315_v35 = vpop.eup %10314  ;;  %v2824_v4 = vpop.permute.xlu1 %2823 }
 0xa8b   :  { %9570 = vmatmul.mubr.msk.f32.gmra.mxu0 %vm282_vm1, %v2388_v3  ;;  %v2389_v55 = vmul.f32 %v10315_v35, %v12059_v27 }
 0xa8c   :  { %v2822_v44 = vpop.permute.xlu0 %2821 }
 0xa8d   :  { %9572 = vmatprep.mubr.msk.f32.mxu0 %vm282_vm1, %v2389_v55 }
 0xa8e   :  { %v2820_v49 = vpop.permute.xlu1 %2819 }
 0xa8f   :  { %9573 = vmatmul.mubr.msk.f32.gmra.mxu0 %vm282_vm1, %v2390_v7 }
 0xa90   :  { %v3075_v41 = vpop.permute.xlu0 %3074 }
 0xa91   :  { %9631 = vmatprep.subr.mxu1 %v3075_v41 }
 0xa92   :  { %9632 = vmatpush3.msra.mxu1 %v3075_v41  ;;  %v3073_v34 = vpop.permute.xlu1 %3072  ;;  %v10673_v41 = vld [vmem:[%s14490_s10 + $0x10] sm:$0xff] }
 0xa93   :  { %9633 = vmatprep.subr.mxu1 %v3073_v34 }
 0xa94   :  { %9634 = vmatpush3.msra.mxu1 %v3073_v34  ;;  %v3067_v12 = vpop.permute.xlu0 %3066 }
 0xa96   :  { %v3071_v25 = vpop.permute.xlu1 %3070 }
 0xa97   :  { %9635 = vmatprep.subr.mxu1 %v3071_v25 }
 0xa98   :  { %9636 = vmatpush3.msra.mxu1 %v3071_v25  ;;  %v3063_v27 = vpop.permute.xlu0 %3062  ;;  %v10674_v25 = vld [vmem:[%s14490_s10 + $0x28] sm:$0xff] }
 0xa9a   :  { %v3069_v46 = vpop.permute.xlu1 %3068 }
 0xa9b   :  { %9637 = vmatprep.subr.mxu1 %v3069_v46 }
 0xa9c   :  { %9638 = vmatpush3.msra.mxu1 %v3069_v46  ;;  %v12150_v50 = vpop.permute.xlu0 %3243 }
 0xa9d   :  { %9639 = vmatprep.subr.mxu1 %v3067_v12 }
 0xa9e   :  { %9640 = vmatpush3.msra.mxu1 %v3067_v12  ;;  %v3065_v16 = vpop.permute.xlu1 %3064 }
 0xa9f   :  { %9641 = vmatprep.subr.mxu1 %v3065_v16 }
 0xaa0   :  { %9642 = vmatpush3.msra.mxu1 %v3065_v16 }
 0xaa1   :  { %9643 = vmatprep.subr.mxu1 %v3063_v27 }
 0xaa2   :  { %9644 = vmatpush3.msra.mxu1 %v3063_v27  ;;  %v3061_v5 = vpop.permute.xlu1 %3060 }
 0xaa3   :  { %9645 = vmatprep.subr.mxu1 %v3061_v5 }
 0xaa4   :  { %9646 = vmatpush3.msra.mxu1 %v3061_v5 }
 0xaa5   :  { %9659 = vmatprep.subr.msk.mxu1 %vm1745_vm10, %v12150_v50 }
 0xb43   :  { %v9565_v24 = vpop.f32.mrf.mxu0 }
 0xb45   :  { %v2505_v22 = vpop.f32.mrf.mxu0 }
 0xb46   :  { %9577 = vmatprep.mubr.msk.f32.mxu0 %vm1745_vm10, %v2505_v22 }
 0xb47   :  { %v9568_v6 = vpop.f32.mrf.mxu0  ;;  %9578 = vmatmul.mubr.msk.f32.vlgmr.msra.gmra.mxu0 %vm1745_vm10, %v9565_v24  ;;  %v10675_v24 = vld [vmem:[%s14490_s10 + $0x20] sm:$0xff] }
 0xb48   :  { %9604 = vmatpush3.xpose.msk.msra.mxu0 %vm1745_vm10, %v12115_v53 }
 0xb49   :  { %9605 = vmatprep.subr.msk.mxu0 %vm1745_vm10, %v12123_v31  ;;  %v2515_v42 = vpop.f32.mrf.mxu0 }
 0xb4a   :  { %9580 = vmatprep.mubr.msk.f32.mxu0 %vm1745_vm10, %v2515_v42 }
 0xb4b   :  { %v9571_v57 = vpop.f32.mrf.mxu0  ;;  %9581 = vmatmul.mubr.msk.f32.gmra.mxu0 %vm1745_vm10, %v9568_v6  ;;  %v10676_v6 = vld [vmem:[%s14490_s10 + $0x38] sm:$0xff] }
 0xb4c   :  { %9606 = vmatpush3.xpose.msk.msra.mxu0 %vm1745_vm10, %v12123_v31 }
 0xb4d   :  { %9607 = vmatprep.subr.msk.mxu0 %vm1745_vm10, %v12129_v23  ;;  %v2525_v26 = vpop.f32.mrf.mxu0 }
 0xb4e   :  { %9583 = vmatprep.mubr.msk.f32.mxu0 %vm1745_vm10, %v2525_v26 }
 0xb4f   :  { %v9574_v33 = vpop.f32.mrf.mxu0  ;;  %9584 = vmatmul.mubr.msk.f32.gmra.mxu0 %vm1745_vm10, %v9571_v57 }
 0xb50   :  { %9608 = vmatpush3.xpose.msk.msra.mxu0 %vm1745_vm10, %v12129_v23 }
 0xb51   :  { %9609 = vmatprep.subr.msk.mxu0 %vm1745_vm10, %v12137_v14  ;;  %v2535_v53 = vpop.f32.mrf.mxu0 }
 0xb52   :  { %9586 = vmatprep.mubr.msk.f32.mxu0 %vm1745_vm10, %v2535_v53  ;;  %v10677_v53 = vld [vmem:[%s14490_s10 + $0x30] sm:$0xff] }
 0xb53   :  { %9587 = vmatmul.mubr.msk.f32.gmra.mxu0 %vm1745_vm10, %v9574_v33 }
 0xb54   :  { %9610 = vmatpush3.xpose.msk.msra.mxu0 %vm1745_vm10, %v12137_v14  ;;  %9619 = vmatprep.mubr.msk.f32.mxu0 %vm1745_vm10, %v12055_v45 }
 0xb55   :  { %9611 = vmatprep.subr.msk.mxu0 %vm1745_vm10, %v12141_v30 }
 0xb58   :  { %9612 = vmatpush3.xpose.msk.msra.mxu0 %vm1745_vm10, %v12141_v30  ;;  %v10671_v30 = vld [vmem:[%s14490_s10] sm:$0xff] }
 0xb59   :  { %9613 = vmatprep.subr.msk.mxu0 %vm1745_vm10, %v2824_v4 }
 0xb5c   :  { %9614 = vmatpush3.xpose.msk.msra.mxu0 %vm1745_vm10, %v2824_v4  ;;  %v10672_v4 = vld [vmem:[%s14490_s10 + $0x18] sm:$0xff] }
 0xb5d   :  { %9615 = vmatprep.subr.msk.mxu0 %vm1745_vm10, %v2822_v44 }
 0xb60   :  { %9616 = vmatpush3.xpose.msk.msra.mxu0 %vm1745_vm10, %v2822_v44 }
 0xb61   :  { %9617 = vmatprep.subr.msk.mxu0 %vm1745_vm10, %v2820_v49 }
 0xb64   :  { %9618 = vmatpush3.xpose.msk.msra.mxu0 %vm1745_vm10, %v2820_v49 }
 0xb67   :  { %9620 = vmatmul.mubr.msk.f32.vlgmr.msra.gmra.mxu0 %vm1745_vm10, %v12049_v17 }
 0xb68   :  { %9622 = vmatprep.mubr.msk.f32.mxu0 %vm1745_vm10, %v12065_v48 }
 0xb6b   :  { %9623 = vmatmul.mubr.msk.f32.gmra.mxu0 %vm1745_vm10, %v12061_v0 }
 0xb6c   :  { %9625 = vmatprep.mubr.msk.f32.mxu0 %vm1745_vm10, %v12069_v38 }
 0xb6f   :  { %9626 = vmatmul.mubr.msk.f32.gmra.mxu0 %vm1745_vm10, %v12067_v56 }
 0xb70   :  { %9628 = vmatprep.mubr.msk.f32.mxu0 %vm1745_vm10, %v12075_v62 }
 0xb73   :  { %9629 = vmatmul.mubr.msk.f32.gmra.mxu0 %vm1745_vm10, %v12071_v8 }
 0xc07   :  { %v12202_v10 = vpop.f32.mrf.mxu0 }
 0xc09   :  { %v12204_v63 = vpop.f32.mrf.mxu0 }
 0xc0b   :  { %v12206_v28 = vpop.f32.mrf.mxu0 }
 0xc0d   :  { %v12208_v37 = vpop.f32.mrf.mxu0 }
 0xc0f   :  { %v12210_v31 = vpop.f32.mrf.mxu0 }
 0xc11   :  { %v12212_v60 = vpop.f32.mrf.mxu0 }
 0xc13   :  { %v12214_v40 = vpop.f32.mrf.mxu0 }
 0xc15   :  { %v12216_v23 = vpop.f32.mrf.mxu0 }
 0xc27   :  { %v9621_v36 = vpop.f32.mrf.mxu0 }
 0xc28   :  { %v2939_v14 = vadd.f32 %v10670_v11, %v9621_v36 }
 0xc29   :  { %v2933_v54 = vpop.f32.mrf.mxu0 }
 0xc2a   :  { %v2934_v47 = vadd.f32 %v10671_v30, %v2933_v54  ;;  %v2975_v3 = vsel %vm282_vm1, %v2939_v14, -inf  ;;  %v12254_v30 = vpop.permute.xlu1 %3241 }
 0xc2b   :  { %2976 = vmax.xlane.f32.xlu1 %v2975_v3  ;;  %v9624_v35 = vpop.f32.mrf.mxu0 }
 0xc2c   :  { %v2949_v55 = vadd.f32 %v10672_v4, %v9624_v35  ;;  %v2972_v44 = vsel %vm282_vm1, %v2934_v47, -inf }
 0xc2d   :  { %v2943_v7 = vpop.f32.mrf.mxu0  ;;  %2973 = vmax.xlane.f32.xlu0 %v2972_v44 }
 0xc2e   :  { %v2944_v34 = vadd.f32 %v10673_v41, %v2943_v7  ;;  %v2981_v46 = vsel %vm282_vm1, %v2949_v55, -inf }
 0xc2f   :  { %v9627_v49 = vpop.f32.mrf.mxu0 }
 0xc30   :  { %v2959_v12 = vadd.f32 %v10674_v25, %v9627_v49  ;;  %v2978_v57 = vsel %vm282_vm1, %v2944_v34, -inf }
 0xc31   :  { %v2953_v27 = vpop.f32.mrf.mxu0  ;;  %2982 = vmax.xlane.f32.xlu0 %v2981_v46 }
 0xc32   :  { %v2987_v16 = vsel %vm282_vm1, %v2959_v12, -inf  ;;  %v2954_v22 = vadd.f32 %v10675_v24, %v2953_v27 }
 0xc33   :  { %2988 = vmax.xlane.f32.xlu1 %v2987_v16  ;;  %v9630_v5 = vpop.f32.mrf.mxu0 }
 0xc34   :  { %v2969_v42 = vadd.f32 %v10676_v6, %v9630_v5  ;;  %v2984_v11 = vsel %vm282_vm1, %v2954_v22, -inf }
 0xc35   :  { %v2963_v26 = vpop.f32.mrf.mxu0  ;;  %2979 = vmax.xlane.f32.xlu0 %v2978_v57 }
 0xc36   :  { %v2993_v33 = vsel %vm282_vm1, %v2969_v42, -inf  ;;  %v2964_v36 = vadd.f32 %v10677_v53, %v2963_v26 }
 0xc37   :  { %2994 = vmax.xlane.f32.xlu1 %v2993_v33 }
 0xc38   :  { %v2990_v54 = vsel %vm282_vm1, %v2964_v36, -inf }
 0xc39   :  { %2985 = vmax.xlane.f32.xlu0 %v2984_v11 }
 0xc3d   :  { %2991 = vmax.xlane.f32.xlu0 %v2990_v54 }
 0xc48   :  { %3237 = vrot.lane.b32.xlu1 %v12069_v38, %s10712_s2 }
 0xc53   :  { %3239 = vrot.lane.b32.xlu0 %v12067_v56, %s10712_s2 }
 0xcb4   :  { %v2977_v3 = vpop.xlane.xlu1 %2976 }
 0xcb5   :  { %v2997_v35 = vsub.f32 %v2939_v14, %v2977_v3 }
 0xcb6   :  { %v2974_v4 = vpop.xlane.xlu0 %2973 }
 0xcb7   :  { %v3006_v44 = vmul.f32 1.442695, %v2997_v35  ;;  %v2996_v7 = vsub.f32 %v2934_v47, %v2974_v4 }
 0xcb9   :  { %10316 = vpow2.f32 %v3006_v44  ;;  %v3004_v49 = vmul.f32 1.442695, %v2996_v7 }
 0xcba   :  { %v2983_v16 = vpop.xlane.xlu0 %2982 }
 0xcbb   :  { %10318 = vpow2.f32 %v3004_v49  ;;  %v2999_v5 = vsub.f32 %v2949_v55, %v2983_v16 }
 0xcbc   :  { %v2989_v47 = vpop.xlane.xlu1 %2988 }
 0xcbd   :  { %v3010_v57 = vmul.f32 1.442695, %v2999_v5  ;;  %v3001_v26 = vsub.f32 %v2959_v12, %v2989_v47 }
 0xcbe   :  { %v2980_v14 = vpop.xlane.xlu0 %2979 }
 0xcbf   :  { %v2998_v6 = vsub.f32 %v2944_v34, %v2980_v14  ;;  %10320 = vpow2.f32 %v3010_v57  ;;  %v3014_v3 = vmul.f32 1.442695, %v3001_v26 }
 0xcc0   :  { %v2995_v33 = vpop.xlane.xlu1 %2994 }
 0xcc1   :  { %v3008_v53 = vmul.f32 1.442695, %v2998_v6  ;;  %v3003_v35 = vsub.f32 %v2969_v42, %v2995_v33 }
 0xcc2   :  { %v2986_v24 = vpop.xlane.xlu0 %2985 }
 0xcc3   :  { %v3000_v11 = vsub.f32 %v2954_v22, %v2986_v24  ;;  %10322 = vpow2.f32 %v3008_v53  ;;  %v3018_v7 = vmul.f32 1.442695, %v3003_v35 }
 0xcc4   :  { %10324 = vpow2.f32 %v3014_v3  ;;  %v3238_v24 = vpop.permute.xlu1 %3237 }
 0xcc5   :  { %v3012_v4 = vmul.f32 1.442695, %v3000_v11 }
 0xcc6   :  { %v12256_v41 = vpop.eup %10316  ;;  %v2992_v54 = vpop.xlane.xlu0 %2991 }
 0xcc7   :  { %v3023_v25 = vsel %vm282_vm1, %v12256_v41, 0.0  ;;  %v3002_v44 = vsub.f32 %v2964_v36, %v2992_v54  ;;  %10326 = vpow2.f32 %v3012_v4 }
 0xcc8   :  { %v12260_v46 = vpop.eup %10318  ;;  %3024 = vadd.xlane.f32.xlu1 %v3023_v25  ;;  %10328 = vpow2.f32 %v3018_v7 }
 0xcc9   :  { %v3020_v27 = vsel %vm282_vm1, %v12260_v46, 0.0  ;;  %v3016_v49 = vmul.f32 1.442695, %v3002_v44 }
 0xcca   :  { %3021 = vadd.xlane.f32.xlu0 %v3020_v27  ;;  %v3240_v6 = vpop.permute.xlu0 %3239 }
 0xccb   :  { %10330 = vpow2.f32 %v3016_v49 }
 0xccc   :  { %v12268_v55 = vpop.eup %10320 }
 0xccd   :  { %v3029_v12 = vsel %vm282_vm1, %v12268_v55, 0.0 }
 0xcd0   :  { %v12270_v34 = vpop.eup %10322 }
 0xcd1   :  { %v12274_v22 = vpop.eup %10324  ;;  %v3026_v42 = vsel %vm282_vm1, %v12270_v34, 0.0 }
 0xcd2   :  { %v3035_v25 = vsel %vm282_vm1, %v12274_v22, 0.0 }
 0xcd4   :  { %v12278_v36 = vpop.eup %10326 }
 0xcd5   :  { %v12282_v27 = vpop.eup %10328  ;;  %v3032_v16 = vsel %vm282_vm1, %v12278_v36, 0.0 }
 0xcd6   :  { %v3041_v47 = vsel %vm282_vm1, %v12282_v27, 0.0 }
 0xcd8   :  { %v12286_v14 = vpop.eup %10330 }
 0xcd9   :  { %3233 = vrot.lane.b32.xlu1 %v12065_v48, %s10712_s2  ;;  %v3038_v5 = vsel %vm282_vm1, %v12286_v14, 0.0 }
 0xce0   :  { %3235 = vrot.lane.b32.xlu0 %v12061_v0, %s10712_s2 }
 0xcfd   :  { %3030 = vadd.xlane.f32.xlu1 %v3029_v12 }
 0xcff   :  { %3027 = vadd.xlane.f32.xlu0 %v3026_v42 }
 0xd01   :  { %3036 = vadd.xlane.f32.xlu1 %v3035_v25 }
 0xd03   :  { %3033 = vadd.xlane.f32.xlu0 %v3032_v16 }
 0xd05   :  { %3042 = vadd.xlane.f32.xlu1 %v3041_v47 }
 0xd07   :  { %3039 = vadd.xlane.f32.xlu0 %v3038_v5 }
 0xd16   :  { %3229 = vrot.lane.b32.xlu1 %v12055_v45, %s10712_s2 }
 0xd1a   :  { %3215 = vrot.lane.b32.xlu1 %v12049_v17, %s10713_s15 }
 0xd1d   :  { %3231 = vrot.lane.b32.xlu0 %v12049_v17, %s10712_s2 }
 0xd1e   :  { %3219 = vrot.lane.b32.xlu1 %v12061_v0, %s10713_s15 }
 0xd21   :  { %3213 = vrot.lane.b32.xlu0 %v12055_v45, %s10713_s15 }
 0xd22   :  { %3223 = vrot.lane.b32.xlu1 %v12067_v56, %s10713_s15 }
 0xd25   :  { %3217 = vrot.lane.b32.xlu0 %v12065_v48, %s10713_s15 }
 0xd26   :  { %3227 = vrot.lane.b32.xlu1 %v12071_v8, %s10713_s15 }
 0xd29   :  { %3221 = vrot.lane.b32.xlu0 %v12069_v38, %s10713_s15 }
 0xd2d   :  { %3225 = vrot.lane.b32.xlu0 %v12075_v62, %s10713_s15 }
 0xd51   :  { %v3025_v57 = vpop.xlane.xlu1 %3024 }
 0xd52   :  { %10332 = vrcp.f32 %v3025_v57 }
 0xd53   :  { %v3022_v26 = vpop.xlane.xlu0 %3021 }
 0xd54   :  { %10334 = vrcp.f32 %v3022_v26  ;;  %v10678_v26 = vld [vmem:[%s14487_s7] sm:$0xf] }
 0xd5f   :  { %v10333_v33 = vpop.eup %10332 }
 0xd60   :  { %v3053_v54 = vmul.f32 %v10333_v33, %v12256_v41  ;;  %v3236_v41 = vpop.permute.xlu0 %3235 }
 0xd61   :  { %v10335_v53 = vpop.eup %10334 }
 0xd62   :  { %v3052_v11 = vmul.f32 %v10335_v53, %v12260_v46  ;;  %v3234_v46 = vpop.permute.xlu1 %3233 }
 0xd64   :  { %9647 = vmatprep.mubr.msk.f32.mxu1 %vm282_vm1, %v3052_v11 }
 0xd65   :  { %9648 = vmatmul.mubr.msk.f32.vlgmr.msra.gmra.mxu1 %vm282_vm1, %v3053_v54 }
 0xd66   :  { %9660 = vmatpush3.xpose.msk.msra.mxu1 %vm1745_vm10, %v12150_v50 }
 0xd67   :  { %9661 = vmatprep.subr.msk.mxu1 %vm1745_vm10, %v12254_v30 }
 0xd6a   :  { %9662 = vmatpush3.xpose.msk.msra.mxu1 %vm1745_vm10, %v12254_v30 }
 0xd6b   :  { %9663 = vmatprep.subr.msk.mxu1 %vm1745_vm10, %v3240_v6 }
 0xd6e   :  { %9664 = vmatpush3.xpose.msk.msra.mxu1 %vm1745_vm10, %v3240_v6 }
 0xd6f   :  { %9665 = vmatprep.subr.msk.mxu1 %vm1745_vm10, %v3238_v24 }
 0xd72   :  { %9666 = vmatpush3.xpose.msk.msra.mxu1 %vm1745_vm10, %v3238_v24 }
 0xd73   :  { %9667 = vmatprep.subr.msk.mxu1 %vm1745_vm10, %v3236_v41 }
 0xd76   :  { %9668 = vmatpush3.xpose.msk.msra.mxu1 %vm1745_vm10, %v3236_v41 }
 0xd77   :  { %9669 = vmatprep.subr.msk.mxu1 %vm1745_vm10, %v3234_v46 }
 0xd7a   :  { %9670 = vmatpush3.xpose.msk.msra.mxu1 %vm1745_vm10, %v3234_v46  ;;  %v12359_v46 = vpop.f32.mrf.mxu1 }
 0xd86   :  { %v3031_v50 = vpop.xlane.xlu1 %3030 }
 0xd87   :  { %10336 = vrcp.f32 %v3031_v50  ;;  %v12361_v50 = vpop.f32.mrf.mxu1 }
 0xd88   :  { %v3028_v30 = vpop.xlane.xlu0 %3027 }
 0xd89   :  { %10338 = vrcp.f32 %v3028_v30  ;;  %v12363_v30 = vpop.f32.mrf.mxu1 }
 0xd8a   :  { %v3037_v3 = vpop.xlane.xlu1 %3036 }
 0xd8b   :  { %10340 = vrcp.f32 %v3037_v3  ;;  %v12365_v3 = vpop.f32.mrf.mxu1 }
 0xd8c   :  { %v3034_v35 = vpop.xlane.xlu0 %3033 }
 0xd8d   :  { %10342 = vrcp.f32 %v3034_v35  ;;  %v12367_v35 = vpop.f32.mrf.mxu1 }
 0xd8e   :  { %v3043_v4 = vpop.xlane.xlu1 %3042 }
 0xd8f   :  { %10344 = vrcp.f32 %v3043_v4  ;;  %v12369_v4 = vpop.f32.mrf.mxu1 }
 0xd90   :  { %v3040_v44 = vpop.xlane.xlu0 %3039 }
 0xd91   :  { %10346 = vrcp.f32 %v3040_v44  ;;  %v12371_v44 = vpop.f32.mrf.mxu1 }
 0xd92   :  { %v3230_v42 = vpop.permute.xlu1 %3229 }
 0xd94   :  { %v3232_v7 = vpop.permute.xlu0 %3231  ;;  %v10337_v49 = vpop.eup %10336 }
 0xd95   :  { %9671 = vmatprep.subr.msk.mxu1 %vm1745_vm10, %v3232_v7  ;;  %v3055_v16 = vmul.f32 %v10337_v49, %v12268_v55 }
 0xd96   :  { %v10339_v12 = vpop.eup %10338  ;;  %9672 = vmatpush3.xpose.msk.msra.mxu1 %vm1745_vm10, %v3232_v7  ;;  %v3216_v33 = vpop.permute.xlu1 %3215 }
 0xd97   :  { %9673 = vmatprep.subr.msk.mxu1 %vm1745_vm10, %v3230_v42  ;;  %v3054_v25 = vmul.f32 %v10339_v12, %v12270_v34  ;;  %v12373_v7 = vpop.f32.mrf.mxu1 }
 0xd98   :  { %v10341_v47 = vpop.eup %10340  ;;  %v3214_v6 = vpop.permute.xlu0 %3213 }
 0xd99   :  { %9650 = vmatprep.mubr.msk.f32.mxu1 %vm282_vm1, %v3054_v25  ;;  %v3057_v57 = vmul.f32 %v10341_v47, %v12274_v22 }
 0xd9a   :  { %v10343_v5 = vpop.eup %10342  ;;  %9651 = vmatmul.mubr.msk.f32.gmra.mxu1 %vm282_vm1, %v3055_v16  ;;  %v3220_v11 = vpop.permute.xlu1 %3219 }
 0xd9b   :  { %9674 = vmatpush3.xpose.msk.msra.mxu1 %vm1745_vm10, %v3230_v42  ;;  %v3056_v24 = vmul.f32 %v10343_v5, %v12278_v36 }
 0xd9c   :  { %9729 = vmatprep.subr.msk.mxu1 %vm2570_vm11, %v10678_v26  ;;  %v10345_v55 = vpop.eup %10344  ;;  %v3218_v22 = vpop.permute.xlu0 %3217 }
 0xd9d   :  { %9653 = vmatprep.mubr.msk.f32.mxu1 %vm282_vm1, %v3056_v24  ;;  %v3059_v36 = vmul.f32 %v10345_v55, %v12282_v27 }
 0xd9e   :  { %v10347_v34 = vpop.eup %10346  ;;  %9654 = vmatmul.mubr.msk.f32.gmra.mxu1 %vm282_vm1, %v3057_v57  ;;  %v10679_v57 = vld [vmem:[%s14490_s10 + $0x48] sm:$0xff] }
 0xd9f   :  { %v3058_v53 = vmul.f32 %v10347_v34, %v12286_v14  ;;  %v3224_v14 = vpop.permute.xlu1 %3223  ;;  %v10680_v34 = vld [vmem:[%s14490_s10 + $0x40] sm:$0xff] }
 0xda0   :  { %v3222_v54 = vpop.permute.xlu0 %3221 }
 0xda1   :  { %9656 = vmatprep.mubr.msk.f32.mxu1 %vm282_vm1, %v3058_v53 }
 0xda2   :  { %9657 = vmatmul.mubr.msk.f32.gmra.mxu1 %vm282_vm1, %v3059_v36 }
 0xda3   :  { %9675 = vmatprep.mubr.msk.f32.mxu1 %vm1745_vm10, %v3214_v6  ;;  %v3228_v41 = vpop.permute.xlu1 %3227 }
 0xda4   :  { %v3226_v27 = vpop.permute.xlu0 %3225 }
 0xda6   :  { %9676 = vmatmul.mubr.msk.f32.vlgmr.msra.gmra.mxu1 %vm1745_vm10, %v3216_v33 }
 0xda7   :  { %9678 = vmatprep.mubr.msk.f32.mxu1 %vm1745_vm10, %v3218_v22  ;;  %9730 = vmatpush3.msk.msra.mxu1 %vm2570_vm11, %v10678_v26  ;;  %v10681_v22 = vld [vmem:[%s14490_s10 + $0x58] sm:$0xff] }
 0xdaa   :  { %9679 = vmatmul.mubr.msk.f32.gmra.mxu1 %vm1745_vm10, %v3220_v11 }
 0xdab   :  { %9681 = vmatprep.mubr.msk.f32.mxu1 %vm1745_vm10, %v3222_v54 }
 0xdae   :  { %9682 = vmatmul.mubr.msk.f32.gmra.mxu1 %vm1745_vm10, %v3224_v14 }
 0xdaf   :  { %9684 = vmatprep.mubr.msk.f32.mxu1 %vm1745_vm10, %v3226_v27 }
 0xdb2   :  { %9685 = vmatmul.mubr.msk.f32.gmra.mxu1 %vm1745_vm10, %v3228_v41  ;;  %v10682_v41 = vld [vmem:[%s14490_s10 + $0x50] sm:$0xff] }
 0xe25   :  { %v9649_v49 = vpop.f32.mrf.mxu1 }
 0xe27   :  { %v3174_v12 = vpop.f32.mrf.mxu1 }
 0xe28   :  { %9731 = vmatprep.mubr.msk.f32.mxu1 %vm1745_vm10, %v3174_v12  ;;  %v10683_v12 = vld [vmem:[%s14490_s10 + $0x68] sm:$0xff] }
 0xe29   :  { %9732 = vmatmul.mubr.msk.f32.vlgmr.msra.gmra.mxu1 %vm1745_vm10, %v9649_v49 }
 0xe5a   :  { %v9652_v42 = vpop.f32.mrf.mxu1 }
 0xe5c   :  { %v3184_v25 = vpop.f32.mrf.mxu1 }
 0xe5d   :  { %9734 = vmatprep.mubr.msk.f32.mxu1 %vm1745_vm10, %v3184_v25 }
 0xe5e   :  { %v9655_v16 = vpop.f32.mrf.mxu1  ;;  %9735 = vmatmul.mubr.msk.f32.gmra.mxu1 %vm1745_vm10, %v9652_v42 }
 0xe60   :  { %v3194_v47 = vpop.f32.mrf.mxu1 }
 0xe61   :  { %9737 = vmatprep.mubr.msk.f32.mxu1 %vm1745_vm10, %v3194_v47 }
 0xe62   :  { %v9658_v5 = vpop.f32.mrf.mxu1  ;;  %9738 = vmatmul.mubr.msk.f32.gmra.mxu1 %vm1745_vm10, %v9655_v16 }
 0xe64   :  { %v3204_v24 = vpop.f32.mrf.mxu1 }
 0xe65   :  { %9740 = vmatprep.mubr.msk.f32.mxu1 %vm1745_vm10, %v3204_v24  ;;  %v10684_v24 = vld [vmem:[%s14490_s10 + $0x60] sm:$0xff] }
 0xe66   :  { %v9677_v6 = vpop.f32.mrf.mxu1  ;;  %9741 = vmatmul.mubr.msk.f32.gmra.mxu1 %vm1745_vm10, %v9658_v5 }
 0xe67   :  { %v3349_v26 = vadd.f32 %v10679_v57, %v9677_v6  ;;  %v10685_v57 = vld [vmem:[%s14490_s10 + $0x78] sm:$0xff] }
 0xe68   :  { %v3343_v55 = vpop.f32.mrf.mxu1 }
 0xe69   :  { %v3344_v33 = vadd.f32 %v10680_v34, %v3343_v55  ;;  %v3385_v53 = vsel %vm282_vm1, %v3349_v26, -inf }
 0xe6a   :  { %3386 = vmax.xlane.f32.xlu1 %v3385_v53  ;;  %v9680_v36 = vpop.f32.mrf.mxu1 }
 0xe6b   :  { %v3359_v11 = vadd.f32 %v10681_v22, %v9680_v36  ;;  %v3382_v54 = vsel %vm282_vm1, %v3344_v33, -inf }
 0xe6c   :  { %3383 = vmax.xlane.f32.xlu0 %v3382_v54  ;;  %v3353_v14 = vpop.f32.mrf.mxu1 }
 0xe6d   :  { %v3354_v49 = vadd.f32 %v10682_v41, %v3353_v14  ;;  %v3391_v25 = vsel %vm282_vm1, %v3359_v11, -inf }
 0xe6e   :  { %v9683_v27 = vpop.f32.mrf.mxu1 }
 0xe6f   :  { %v3369_v42 = vadd.f32 %v10683_v12, %v9683_v27  ;;  %v3388_v34 = vsel %vm282_vm1, %v3354_v49, -inf }
 0xe70   :  { %3392 = vmax.xlane.f32.xlu0 %v3391_v25  ;;  %v3363_v16 = vpop.f32.mrf.mxu1 }
 0xe71   :  { %v3397_v47 = vsel %vm282_vm1, %v3369_v42, -inf  ;;  %v3364_v6 = vadd.f32 %v10684_v24, %v3363_v16 }
 0xe72   :  { %3398 = vmax.xlane.f32.xlu1 %v3397_v47  ;;  %v9686_v5 = vpop.f32.mrf.mxu1 }
 0xe73   :  { %v3379_v55 = vadd.f32 %v10685_v57, %v9686_v5  ;;  %v3394_v54 = vsel %vm282_vm1, %v3364_v6, -inf }
 0xe74   :  { %3389 = vmax.xlane.f32.xlu0 %v3388_v34  ;;  %v3373_v53 = vpop.f32.mrf.mxu1 }
 0xe75   :  { %v3403_v36 = vsel %vm282_vm1, %v3379_v55, -inf  ;;  %v3374_v22 = vadd.f32 %v12012_v20, %v3373_v53 }
 0xe76   :  { %3404 = vmax.xlane.f32.xlu1 %v3403_v36 }
 0xe77   :  { %v3400_v14 = vsel %vm282_vm1, %v3374_v22, -inf }
 0xe78   :  { %3395 = vmax.xlane.f32.xlu0 %v3394_v54 }
 0xe7c   :  { %3401 = vmax.xlane.f32.xlu0 %v3400_v14 }
 0xe87   :  { %3482 = vrot.lane.b32.xlu1 %v12075_v62, %s10714_s18 }
 0xe8b   :  { %3480 = vrot.lane.b32.xlu1 %v12067_v56, %s10714_s18 }
 0xe8f   :  { %3478 = vrot.lane.b32.xlu1 %v12069_v38, %s10714_s18 }
 0xe92   :  { %3484 = vrot.lane.b32.xlu0 %v12071_v8, %s10714_s18 }
 0xe93   :  { %3474 = vrot.lane.b32.xlu1 %v12065_v48, %s10714_s18 }
 0xe96   :  { %3476 = vrot.lane.b32.xlu0 %v12061_v0, %s10714_s18 }
 0xef3   :  { %v3387_v20 = vpop.xlane.xlu1 %3386 }
 0xef4   :  { %v3407_v27 = vsub.f32 %v3349_v26, %v3387_v20 }
 0xef5   :  { %v3384_v41 = vpop.xlane.xlu0 %3383 }
 0xef6   :  { %v3416_v12 = vmul.f32 1.442695, %v3407_v27  ;;  %v3406_v62 = vsub.f32 %v3344_v33, %v3384_v41 }
 0xef8   :  { %10348 = vpow2.f32 %v3416_v12  ;;  %v3414_v25 = vmul.f32 1.442695, %v3406_v62 }
 0xef9   :  { %v3393_v56 = vpop.xlane.xlu0 %3392 }
 0xefa   :  { %10350 = vpow2.f32 %v3414_v25  ;;  %v3409_v16 = vsub.f32 %v3359_v11, %v3393_v56 }
 0xefb   :  { %v3399_v38 = vpop.xlane.xlu1 %3398 }
 0xefc   :  { %v3420_v47 = vmul.f32 1.442695, %v3409_v16  ;;  %v3411_v5 = vsub.f32 %v3369_v42, %v3399_v38 }
 0xefd   :  { %v3390_v8 = vpop.xlane.xlu0 %3389 }
 0xefe   :  { %10352 = vpow2.f32 %v3420_v47  ;;  %v3424_v24 = vmul.f32 1.442695, %v3411_v5  ;;  %v3408_v48 = vsub.f32 %v3354_v49, %v3390_v8 }
 0xeff   :  { %v3405_v57 = vpop.xlane.xlu1 %3404 }
 0xf00   :  { %10354 = vpow2.f32 %v3424_v24  ;;  %v3418_v0 = vmul.f32 1.442695, %v3408_v48  ;;  %v3413_v34 = vsub.f32 %v3379_v55, %v3405_v57 }
 0xf01   :  { %v3396_v26 = vpop.xlane.xlu0 %3395 }
 0xf02   :  { %10356 = vpow2.f32 %v3418_v0  ;;  %v3428_v53 = vmul.f32 1.442695, %v3413_v34  ;;  %v3410_v33 = vsub.f32 %v3364_v6, %v3396_v26  ;;  %v2778_v26 = vadd.f32 %v12359_v46, %v12202_v10 }
 0xf03   :  { %v3483_v36 = vpop.permute.xlu1 %3482 }
 0xf04   :  { %v3422_v54 = vmul.f32 1.442695, %v3410_v33  ;;  %10358 = vpow2.f32 %v3428_v53  ;;  %v12466_v53 = vld [vmem:[%s14484_s4 + $0x5] ss:$0 sm:$0xff]  ;;  %v2773_v33 = vadd.f32 %v12361_v50, %v12204_v63  ;;  %v2788_v50 = vadd.f32 %v12363_v30, %v12206_v28 }
 0xf05   :  { %v12425_v14 = vpop.eup %10348  ;;  %v3402_v11 = vpop.xlane.xlu0 %3401 }
 0xf06   :  { %10360 = vpow2.f32 %v3422_v54  ;;  %v3412_v42 = vsub.f32 %v3374_v22, %v3402_v11  ;;  %v3433_v20 = vsel %vm282_vm1, %v12425_v14, 0.0  ;;  %v2798_v54 = vadd.f32 %v12367_v35, %v12210_v31 }
 0xf07   :  { %v12429_v49 = vpop.eup %10350  ;;  %3434 = vadd.xlane.f32.xlu1 %v3433_v20  ;;  %v3481_v55 = vpop.permute.xlu1 %3480  ;;  %v2808_v11 = vadd.f32 %v12371_v44, %v12214_v40 }
 0xf08   :  { %v3426_v27 = vmul.f32 1.442695, %v3412_v42  ;;  %v3430_v41 = vsel %vm282_vm1, %v12429_v49, 0.0  ;;  %v3890_v46 = vadd.f32 %v12466_v53, %v2798_v54  ;;  %v2803_v42 = vadd.f32 %v12373_v7, %v12216_v23 }
 0xf09   :  { %3431 = vadd.xlane.f32.xlu0 %v3430_v41  ;;  %v3485_v6 = vpop.permute.xlu0 %3484 }
 0xf0a   :  { %10362 = vpow2.f32 %v3426_v27  ;;  %9687 = vmatprep.subr.mxu0 %v3485_v6  ;;  %v12489_v35 = vadd.f32 %v3890_v46, %v11472_v19  ;;  %v3891_v20 = vadd.f32 %v12466_v53, %v2803_v42 }
 0xf0b   :  { %v12433_v12 = vpop.eup %10352  ;;  %9688 = vmatpush3.msra.mxu0 %v3485_v6  ;;  %v3479_v25 = vpop.permute.xlu1 %3478 }
 0xf0c   :  { %9689 = vmatprep.subr.mxu0 %v3483_v36  ;;  %v3439_v22 = vsel %vm282_vm1, %v12433_v12, 0.0  ;;  %v3932_v30 = vsel %vm1073_vm6, %v12489_v35, 0.0  ;;  %v12524_v27 = vadd.f32 %v3891_v20, %v11484_v51 }
 0xf0d   :  { %v12437_v62 = vpop.eup %10354  ;;  %3440 = vadd.xlane.f32.xlu1 %v3439_v22  ;;  %9690 = vmatpush3.msra.mxu0 %v3483_v36  ;;  %v3477_v5 = vpop.permute.xlu0 %3476  ;;  %v3886_v36 = vadd.f32 %v12466_v53, %v2778_v26 }
 0xf0e   :  { %9691 = vmatprep.subr.mxu0 %v3481_v55  ;;  %v3445_v38 = vsel %vm282_vm1, %v12437_v62, 0.0  ;;  %v3935_v7 = vsel %vm1073_vm6, %v12524_v27, 0.0 }
 0xf0f   :  { %v12439_v56 = vpop.eup %10356  ;;  %9692 = vmatpush3.msra.mxu0 %v3481_v55  ;;  %v3475_v24 = vpop.permute.xlu1 %3474  ;;  %v12477_v10 = vadd.f32 %v3886_v36, %v11463_v61 }
 0xf10   :  { %9693 = vmatprep.subr.mxu0 %v3479_v25  ;;  %v3436_v16 = vsel %vm282_vm1, %v12439_v56, 0.0 }
 0xf11   :  { %3437 = vadd.xlane.f32.xlu0 %v3436_v16  ;;  %3446 = vadd.xlane.f32.xlu1 %v3445_v38  ;;  %v12445_v47 = vpop.eup %10358  ;;  %v3920_v61 = vsel %vm1073_vm6, %v12477_v10, 0.0 }
 0xf12   :  { %9694 = vmatpush3.msra.mxu0 %v3479_v25  ;;  %v3451_v57 = vsel %vm282_vm1, %v12445_v47, 0.0 }
 0xf13   :  { %v12447_v8 = vpop.eup %10360  ;;  %9695 = vmatprep.subr.mxu0 %v3477_v5 }
 0xf14   :  { %9696 = vmatpush3.msra.mxu0 %v3477_v5  ;;  %v3442_v48 = vsel %vm282_vm1, %v12447_v8, 0.0 }
 0xf15   :  { %9697 = vmatprep.subr.mxu0 %v3475_v24  ;;  %3443 = vadd.xlane.f32.xlu0 %v3442_v48 }
 0xf16   :  { %3452 = vadd.xlane.f32.xlu1 %v3451_v57  ;;  %9698 = vmatpush3.msra.mxu0 %v3475_v24 }
 0xf17   :  { %v12453_v0 = vpop.eup %10362 }
 0xf18   :  { %v3448_v34 = vsel %vm282_vm1, %v12453_v0, 0.0 }
 0xf19   :  { %3449 = vadd.xlane.f32.xlu0 %v3448_v34 }
 0xf27   :  { %3470 = vrot.lane.b32.xlu1 %v12055_v45, %s10714_s18  ;;  %v3885_v45 = vadd.f32 %v12466_v53, %v2773_v33 }
 0xf29   :  { %v12483_v63 = vadd.f32 %v3885_v45, %v11453_v18  ;;  %v2793_v18 = vadd.f32 %v12369_v4, %v12212_v60 }
 0xf2b   :  { %v3917_v28 = vsel %vm1073_vm6, %v12483_v63, 0.0 }
 0xf2f   :  { %3472 = vrot.lane.b32.xlu0 %v12049_v17, %s10714_s18  ;;  %v2783_v17 = vadd.f32 %v12365_v3, %v12208_v37  ;;  %v3892_v37 = vadd.f32 %v12466_v53, %v2808_v11  ;;  %v3888_v3 = vadd.f32 %v12466_v53, %v2788_v50 }
 0xf31   :  { %v3887_v31 = vadd.f32 %v12466_v53, %v2783_v17  ;;  %v12503_v19 = vadd.f32 %v3892_v37, %v11482_v9  ;;  %v12508_v44 = vadd.f32 %v3888_v3, %v11461_v59 }
 0xf33   :  { %v12496_v40 = vadd.f32 %v3887_v31, %v11451_v52  ;;  %v3889_v52 = vadd.f32 %v12466_v53, %v2793_v18  ;;  %v3938_v9 = vsel %vm1073_vm6, %v12503_v19, 0.0  ;;  %v3926_v59 = vsel %vm1073_vm6, %v12508_v44, 0.0 }
 0xf35   :  { %v3923_v60 = vsel %vm1073_vm6, %v12496_v40, 0.0  ;;  %v12518_v4 = vadd.f32 %v3889_v52, %v11474_v43 }
 0xf37   :  { %v3929_v23 = vsel %vm1073_vm6, %v12518_v4, 0.0 }
 0xf4b   :  { %3921 = vadd.xlane.f32.xlu1 %v3920_v61 }
 0xf4e   :  { %3918 = vadd.xlane.f32.xlu0 %v3917_v28 }
 0xf4f   :  { %3933 = vadd.xlane.f32.xlu1 %v3932_v30 }
 0xf52   :  { %3924 = vadd.xlane.f32.xlu0 %v3923_v60 }
 0xf53   :  { %3939 = vadd.xlane.f32.xlu1 %v3938_v9 }
 0xf56   :  { %3927 = vadd.xlane.f32.xlu0 %v3926_v59 }
 0xf5a   :  { %3930 = vadd.xlane.f32.xlu0 %v3929_v23 }
 0xf5e   :  { %3936 = vadd.xlane.f32.xlu0 %v3935_v7 }
 0xf90   :  { %v3435_v55 = vpop.xlane.xlu1 %3434 }
 0xf92   :  { %v3432_v43 = vpop.xlane.xlu0 %3431 }
 0xf93   :  { %10364 = vrcp.f32 %v3432_v43 }
 0xf94   :  { %10366 = vrcp.f32 %v3435_v55 }
 0xf96   :  { %v3441_v41 = vpop.xlane.xlu1 %3440 }
 0xf9a   :  { %v3438_v6 = vpop.xlane.xlu0 %3437  ;;  %v3447_v22 = vpop.xlane.xlu1 %3446 }
 0xf9b   :  { %10368 = vrcp.f32 %v3438_v6 }
 0xf9c   :  { %10370 = vrcp.f32 %v3441_v41 }
 0xf9e   :  { %v3444_v25 = vpop.xlane.xlu0 %3443 }
 0xf9f   :  { %10372 = vrcp.f32 %v3444_v25  ;;  %v3453_v38 = vpop.xlane.xlu1 %3452 }
 0xfa0   :  { %v10365_v51 = vpop.eup %10364  ;;  %10374 = vrcp.f32 %v3447_v22 }
 0xfa1   :  { %v3462_v16 = vmul.f32 %v10365_v51, %v12429_v49  ;;  %v10367_v24 = vpop.eup %10366 }
 0xfa2   :  { %v3450_v5 = vpop.xlane.xlu0 %3449  ;;  %v3463_v26 = vmul.f32 %v10367_v24, %v12425_v14 }
 0xfa3   :  { %10376 = vrcp.f32 %v3450_v5  ;;  %9703 = vmatprep.mubr.msk.f32.mxu0 %vm282_vm1, %v3462_v16  ;;  %v3471_v34 = vpop.permute.xlu1 %3470 }
 0xfa4   :  { %10378 = vrcp.f32 %v3453_v38 }
 0xfa6   :  { %v3473_v48 = vpop.permute.xlu0 %3472 }
 0xfa7   :  { %9699 = vmatprep.subr.mxu0 %v3473_v48 }
 0xfa8   :  { %v10369_v57 = vpop.eup %10368  ;;  %9700 = vmatpush3.msra.mxu0 %v3473_v48 }
 0xfa9   :  { %9701 = vmatprep.subr.mxu0 %v3471_v34  ;;  %v3464_v33 = vmul.f32 %v10369_v57, %v12439_v56  ;;  %v10371_v36 = vpop.eup %10370 }
 0xfaa   :  { %9702 = vmatpush3.msra.mxu0 %v3471_v34  ;;  %v3465_v54 = vmul.f32 %v10371_v36, %v12433_v12 }
 0xfab   :  { %9704 = vmatmul.mubr.msk.f32.vlgmr.msra.gmra.mxu0 %vm282_vm1, %v3463_v26  ;;  %9715 = vmatprep.subr.msk.mxu0 %vm2570_vm11, %v12120_v58 }
 0xfac   :  { %v10373_v49 = vpop.eup %10372  ;;  %9706 = vmatprep.mubr.msk.f32.mxu0 %vm282_vm1, %v3464_v33  ;;  %9716 = vmatpush3.msk.msra.mxu0 %vm2570_vm11, %v12120_v58 }
 0xfad   :  { %v3466_v14 = vmul.f32 %v10373_v49, %v12447_v8  ;;  %v10375_v45 = vpop.eup %10374 }
 0xfae   :  { %v3467_v17 = vmul.f32 %v10375_v45, %v12437_v62 }
 0xfaf   :  { %9707 = vmatmul.mubr.msk.f32.gmra.mxu0 %vm282_vm1, %v3465_v54 }
 0xfb0   :  { %v10377_v56 = vpop.eup %10376  ;;  %9709 = vmatprep.mubr.msk.f32.mxu0 %vm282_vm1, %v3466_v14  ;;  %v4165_v14 = vld [vmem:[%s14488_s8] sm:$0xff] }
 0xfb1   :  { %v3468_v46 = vmul.f32 %v10377_v56, %v12453_v0  ;;  %v10379_v11 = vpop.eup %10378  ;;  %9743 = vmatprep.subr.mxu0 %v4165_v14 }
 0xfb2   :  { %v3469_v58 = vmul.f32 %v10379_v11, %v12445_v47 }
 0xfb3   :  { %9710 = vmatmul.mubr.msk.f32.gmra.mxu0 %vm282_vm1, %v3467_v17 }
 0xfb4   :  { %9712 = vmatprep.mubr.msk.f32.mxu0 %vm282_vm1, %v3468_v46 }
 0xfb7   :  { %9713 = vmatmul.mubr.msk.f32.gmra.mxu0 %vm282_vm1, %v3469_v58 }
 0xfd4   :  { %v3922_v12 = vpop.xlane.xlu1 %3921 }
 0xfd5   :  { %v3966_v8 = vmul.f32 0.125, %v3922_v12 }
 0xfd7   :  { %v12551_v50 = vsub.f32 %v12477_v10, %v3966_v8  ;;  %v3919_v31 = vpop.xlane.xlu0 %3918 }
 0xfd8   :  { %v3965_v37 = vmul.f32 0.125, %v3919_v31  ;;  %v3934_v61 = vpop.xlane.xlu1 %3933 }
 0xfd9   :  { %v3998_v62 = vmul.f32 %v12551_v50, %v12551_v50  ;;  %v3970_v30 = vmul.f32 0.125, %v3934_v61 }
 0xfda   :  { %v12556_v0 = vsub.f32 %v12483_v63, %v3965_v37 }
 0xfdb   :  { %v3925_v3 = vpop.xlane.xlu0 %3924  ;;  %v4016_v18 = vsel %vm1073_vm6, %v3998_v62, 0.0  ;;  %v12568_v23 = vsub.f32 %v12489_v35, %v3970_v30 }
 0xfdc   :  { %v3967_v47 = vmul.f32 0.125, %v3925_v3  ;;  %4017 = vadd.xlane.f32.xlu1 %v4016_v18  ;;  %v3997_v28 = vmul.f32 %v12556_v0, %v12556_v0  ;;  %v3940_v60 = vpop.xlane.xlu1 %3939 }
 0xfdd   :  { %v3972_v7 = vmul.f32 0.125, %v3940_v60  ;;  %v4002_v38 = vmul.f32 %v12568_v23, %v12568_v23 }
 0xfde   :  { %v12562_v52 = vsub.f32 %v12496_v40, %v3967_v47  ;;  %v4013_v42 = vsel %vm1073_vm6, %v3997_v28, 0.0 }
 0xfdf   :  { %4014 = vadd.xlane.f32.xlu0 %v4013_v42  ;;  %v3928_v9 = vpop.xlane.xlu0 %3927  ;;  %v12577_v25 = vsub.f32 %v12503_v19, %v3972_v7  ;;  %v4028_v26 = vsel %vm1073_vm6, %v4002_v38, 0.0 }
 0xfe0   :  { %v3968_v20 = vmul.f32 0.125, %v3928_v9  ;;  %v3999_v59 = vmul.f32 %v12562_v52, %v12562_v52 }
 0xfe1   :  { %v4004_v33 = vmul.f32 %v12577_v25, %v12577_v25 }
 0xfe2   :  { %v12571_v55 = vsub.f32 %v12508_v44, %v3968_v20  ;;  %v4019_v43 = vsel %vm1073_vm6, %v3999_v59, 0.0 }
 0xfe3   :  { %4020 = vadd.xlane.f32.xlu0 %v4019_v43  ;;  %v3931_v41 = vpop.xlane.xlu0 %3930  ;;  %v4034_v54 = vsel %vm1073_vm6, %v4004_v33, 0.0 }
 0xfe4   :  { %v3969_v6 = vmul.f32 0.125, %v3931_v41  ;;  %v4000_v22 = vmul.f32 %v12571_v55, %v12571_v55 }
 0xfe6   :  { %v12580_v51 = vsub.f32 %v12518_v4, %v3969_v6  ;;  %v4022_v16 = vsel %vm1073_vm6, %v4000_v22, 0.0 }
 0xfe7   :  { %v3937_v5 = vpop.xlane.xlu0 %3936  ;;  %4023 = vadd.xlane.f32.xlu1 %v4022_v16 }
 0xfe8   :  { %v3971_v24 = vmul.f32 0.125, %v3937_v5  ;;  %v4001_v48 = vmul.f32 %v12580_v51, %v12580_v51  ;;  %v12611_v5 = vld [vmem:[%s14484_s4 + $0x6] ss:$0 sm:$0xff] }
 0xfea   :  { %v12588_v57 = vsub.f32 %v12524_v27, %v3971_v24  ;;  %v4025_v34 = vsel %vm1073_vm6, %v4001_v48, 0.0 }
 0xfeb   :  { %4026 = vadd.xlane.f32.xlu0 %v4025_v34  ;;  %4029 = vadd.xlane.f32.xlu1 %v4028_v26 }
 0xfec   :  { %v4003_v36 = vmul.f32 %v12588_v57, %v12588_v57 }
 0xfee   :  { %v4031_v49 = vsel %vm1073_vm6, %v4003_v36, 0.0 }
 0xfef   :  { %4032 = vadd.xlane.f32.xlu0 %v4031_v49  ;;  %4035 = vadd.xlane.f32.xlu1 %v4034_v54  ;;  %v12620_v54 = vld [vmem:[%s14484_s4 + $0x7] ss:$0 sm:$0xff] }
0x1065   :  { %v4018_v45 = vpop.xlane.xlu1 %4017 }
0x1066   :  { %v4062_v56 = vmul.f32 0.125, %v4018_v45 }
0x1068   :  { %v4078_v17 = vadd.f32 1e-05, %v4062_v56  ;;  %v4015_v46 = vpop.xlane.xlu0 %4014 }
0x1069   :  { %v4061_v11 = vmul.f32 0.125, %v4015_v46 }
0x106a   :  { %10380 = vrsqrt.f32 %v4078_v17 }
0x106b   :  { %v4077_v58 = vadd.f32 1e-05, %v4061_v11  ;;  %v9705_v12 = vpop.f32.mrf.mxu0 }
0x106c   :  { %v4021_v8 = vpop.xlane.xlu0 %4020 }
0x106d   :  { %10382 = vrsqrt.f32 %v4077_v58  ;;  %v4063_v31 = vmul.f32 0.125, %v4021_v8  ;;  %v3584_v37 = vpop.f32.mrf.mxu0 }
0x106e   :  { %9717 = vmatprep.mubr.msk.f32.mxu0 %vm1745_vm10, %v3584_v37 }
0x106f   :  { %v4079_v61 = vadd.f32 1e-05, %v4063_v31  ;;  %v9708_v62 = vpop.f32.mrf.mxu0  ;;  %9718 = vmatmul.mubr.msk.f32.vlgmr.msra.gmra.mxu0 %vm1745_vm10, %v9705_v12 }
0x1070   :  { %v4024_v3 = vpop.xlane.xlu1 %4023  ;;  %9744 = vmatpush3.msra.mxu0 %v4165_v14 }
0x1071   :  { %10384 = vrsqrt.f32 %v4079_v61  ;;  %v4064_v18 = vmul.f32 0.125, %v4024_v3  ;;  %v3594_v47 = vpop.f32.mrf.mxu0 }
0x1072   :  { %9720 = vmatprep.mubr.msk.f32.mxu0 %vm1745_vm10, %v3594_v47 }
0x1073   :  { %v4080_v28 = vadd.f32 1e-05, %v4064_v18  ;;  %v9711_v30 = vpop.f32.mrf.mxu0  ;;  %9721 = vmatmul.mubr.msk.f32.gmra.mxu0 %vm1745_vm10, %v9708_v62 }
0x1074   :  { %v4027_v42 = vpop.xlane.xlu0 %4026  ;;  %v4030_v60 = vpop.xlane.xlu1 %4029 }
0x1075   :  { %10386 = vrsqrt.f32 %v4080_v28  ;;  %v4065_v9 = vmul.f32 0.125, %v4027_v42  ;;  %v4066_v20 = vmul.f32 0.125, %v4030_v60  ;;  %v3604_v59 = vpop.f32.mrf.mxu0 }
0x1076   :  { %9723 = vmatprep.mubr.msk.f32.mxu0 %vm1745_vm10, %v3604_v59  ;;  %v4508_v59 = vld [vmem:[%s14489_s9 + $0x8] sm:$0xff] }
0x1077   :  { %v10381_v7 = vpop.eup %10380  ;;  %v4081_v43 = vadd.f32 1e-05, %v4065_v9  ;;  %v4082_v41 = vadd.f32 1e-05, %v4066_v20  ;;  %v9714_v6 = vpop.f32.mrf.mxu0  ;;  %9724 = vmatmul.mubr.msk.f32.gmra.mxu0 %vm1745_vm10, %v9711_v30 }
0x1078   :  { %v4110_v22 = vmul.f32 %v10381_v7, %v12551_v50  ;;  %v4033_v16 = vpop.xlane.xlu0 %4032  ;;  %v4036_v38 = vpop.xlane.xlu1 %4035  ;;  %v4507_v7 = vld [vmem:[%s14489_s9] sm:$0xff] }
0x1079   :  { %10388 = vrsqrt.f32 %v4081_v43  ;;  %v4067_v24 = vmul.f32 0.125, %v4033_v16  ;;  %v4068_v48 = vmul.f32 0.125, %v4036_v38  ;;  %v3614_v34 = vpop.f32.mrf.mxu0  ;;  %v9733_v43 = vpop.f32.mrf.mxu1 }
0x107a   :  { %v10383_v26 = vpop.eup %10382  ;;  %10390 = vrsqrt.f32 %v4082_v41  ;;  %9726 = vmatprep.mubr.msk.f32.mxu0 %vm1745_vm10, %v3614_v34  ;;  %v4130_v49 = vmul.f32 %v12611_v5, %v4110_v22 }
0x107b   :  { %v4083_v33 = vadd.f32 1e-05, %v4067_v24  ;;  %v4084_v36 = vadd.f32 1e-05, %v4068_v48  ;;  %9727 = vmatmul.mubr.msk.f32.gmra.mxu0 %vm1745_vm10, %v9714_v6  ;;  %v4109_v50 = vmul.f32 %v10383_v26, %v12556_v0  ;;  %v3842_v41 = vpop.f32.mrf.mxu1 }
0x107c   :  { %v4150_v46 = vadd.f32 %v12620_v54, %v4130_v49 }
0x107d   :  { %10392 = vrsqrt.f32 %v4083_v33  ;;  %v4129_v14 = vmul.f32 %v12611_v5, %v4109_v50  ;;  %v9736_v6 = vpop.f32.mrf.mxu1 }
0x107e   :  { %v10385_v45 = vpop.eup %10384  ;;  %10394 = vrsqrt.f32 %v4084_v36 }
0x107f   :  { %v4149_v56 = vadd.f32 %v12620_v54, %v4129_v14  ;;  %v4111_v17 = vmul.f32 %v10385_v45, %v12562_v52  ;;  %v3852_v22 = vpop.f32.mrf.mxu1 }
0x1081   :  { %9745 = vmatprep.mubr.msk.f32.mxu0 %vm1073_vm6, %v4149_v56  ;;  %v4131_v0 = vmul.f32 %v12611_v5, %v4111_v17  ;;  %v9739_v24 = vpop.f32.mrf.mxu1 }
0x1082   :  { %v10387_v11 = vpop.eup %10386  ;;  %9746 = vmatmul.mubr.msk.f32.vlgmr.msra.gmra.mxu0 %vm1073_vm6, %v4150_v46 }
0x1083   :  { %v4151_v58 = vadd.f32 %v12620_v54, %v4131_v0  ;;  %v4112_v12 = vmul.f32 %v10387_v11, %v12571_v55  ;;  %v3862_v14 = vpop.f32.mrf.mxu1 }
0x1085   :  { %9748 = vmatprep.mubr.msk.f32.mxu0 %vm1073_vm6, %v4151_v58  ;;  %v4132_v8 = vmul.f32 %v12611_v5, %v4112_v12 }
0x1086   :  { %v10389_v31 = vpop.eup %10388 }
0x1087   :  { %v10391_v37 = vpop.eup %10390  ;;  %v4152_v52 = vadd.f32 %v12620_v54, %v4132_v8  ;;  %v4113_v61 = vmul.f32 %v10389_v31, %v12580_v51  ;;  %v9742_v31 = vpop.f32.mrf.mxu1 }
0x1088   :  { %v4114_v62 = vmul.f32 %v10391_v37, %v12568_v23 }
0x1089   :  { %9749 = vmatmul.mubr.msk.f32.gmra.mxu0 %vm1073_vm6, %v4152_v52  ;;  %v4133_v3 = vmul.f32 %v12611_v5, %v4113_v61 }
0x108a   :  { %v10393_v18 = vpop.eup %10392  ;;  %v4134_v47 = vmul.f32 %v12611_v5, %v4114_v62 }
0x108b   :  { %v10395_v55 = vpop.eup %10394  ;;  %v4153_v28 = vadd.f32 %v12620_v54, %v4133_v3  ;;  %v4115_v30 = vmul.f32 %v10393_v18, %v12588_v57  ;;  %v4509_v57 = vld [vmem:[%s14489_s9 + $0x10] sm:$0xff] }
0x108c   :  { %v4154_v42 = vadd.f32 %v12620_v54, %v4134_v47  ;;  %v4116_v60 = vmul.f32 %v10395_v55, %v12577_v25  ;;  %v4510_v25 = vld [vmem:[%s14489_s9 + $0x18] sm:$0xff] }
0x108d   :  { %9751 = vmatprep.mubr.msk.f32.mxu0 %vm1073_vm6, %v4153_v28  ;;  %v4135_v23 = vmul.f32 %v12611_v5, %v4115_v30  ;;  %9769 = vmatprep.subr.mxu1 %v4510_v25  ;;  %v3872_v28 = vpop.f32.mrf.mxu1 }
0x108e   :  { %9752 = vmatmul.mubr.msk.f32.gmra.mxu0 %vm1073_vm6, %v4154_v42  ;;  %v4136_v51 = vmul.f32 %v12611_v5, %v4116_v60  ;;  %9770 = vmatpush3.msra.mxu1 %v4510_v25 }
0x108f   :  { %v4155_v9 = vadd.f32 %v12620_v54, %v4135_v23  ;;  %9771 = vmatprep.subr.mxu1 %v4509_v57 }
0x1090   :  { %v4156_v20 = vadd.f32 %v12620_v54, %v4136_v51  ;;  %9772 = vmatpush3.msra.mxu1 %v4509_v57 }
0x1091   :  { %9754 = vmatprep.mubr.msk.f32.mxu0 %vm1073_vm6, %v4155_v9  ;;  %9773 = vmatprep.subr.mxu1 %v4508_v59 }
0x1092   :  { %9755 = vmatmul.mubr.msk.f32.gmra.mxu0 %vm1073_vm6, %v4156_v20  ;;  %9774 = vmatpush3.msra.mxu1 %v4508_v59 }
0x1093   :  { %9775 = vmatprep.subr.mxu1 %v4507_v7 }
0x1094   :  { %9776 = vmatpush3.msra.mxu1 %v4507_v7 }
0x112f   :  { %v9719_v16 = vpop.f32.mrf.mxu0 }
0x1130   :  { %v3848_v38 = vadd.f32 %v9733_v43, %v9719_v16 }
0x1131   :  { %v3713_v48 = vpop.f32.mrf.mxu0 }
0x1132   :  { %v3894_v34 = vadd.f32 %v12466_v53, %v3848_v38  ;;  %v3843_v26 = vadd.f32 %v3842_v41, %v3713_v48 }
0x1133   :  { %v9722_v33 = vpop.f32.mrf.mxu0 }
0x1134   :  { %v12665_v36 = vadd.f32 %v3894_v34, %v11502_v1  ;;  %v3893_v50 = vadd.f32 %v12466_v53, %v3843_v26  ;;  %v3858_v49 = vadd.f32 %v9736_v6, %v9722_v33 }
0x1135   :  { %v3723_v45 = vpop.f32.mrf.mxu0 }
0x1136   :  { %v12669_v56 = vadd.f32 %v3893_v50, %v11504_v13  ;;  %v3896_v17 = vadd.f32 %v12466_v53, %v3858_v49  ;;  %v3853_v46 = vadd.f32 %v3852_v22, %v3723_v45  ;;  %v3944_v0 = vsel %vm1073_vm6, %v12665_v36, 0.0 }
0x1137   :  { %v9725_v11 = vpop.f32.mrf.mxu0  ;;  %3945 = vadd.xlane.f32.xlu1 %v3944_v0 }
0x1138   :  { %v12675_v58 = vadd.f32 %v3896_v17, %v11519_v21  ;;  %v3895_v1 = vadd.f32 %v12466_v53, %v3853_v46  ;;  %v3868_v12 = vadd.f32 %v9739_v24, %v9725_v11  ;;  %v3941_v8 = vsel %vm1073_vm6, %v12669_v56, 0.0 }
0x1139   :  { %3942 = vadd.xlane.f32.xlu0 %v3941_v8  ;;  %v3733_v13 = vpop.f32.mrf.mxu0 }
0x113a   :  { %v12681_v37 = vadd.f32 %v3895_v1, %v11509_v15  ;;  %v3898_v52 = vadd.f32 %v12466_v53, %v3868_v12  ;;  %v3863_v61 = vadd.f32 %v3862_v14, %v3733_v13  ;;  %v3950_v62 = vsel %vm1073_vm6, %v12675_v58, 0.0 }
0x113b   :  { %v9728_v21 = vpop.f32.mrf.mxu0  ;;  %3951 = vadd.xlane.f32.xlu1 %v3950_v62 }
0x113c   :  { %v12687_v3 = vadd.f32 %v3898_v52, %v11507_v2  ;;  %v3897_v18 = vadd.f32 %v12466_v53, %v3863_v61  ;;  %v3878_v47 = vadd.f32 %v9742_v31, %v9728_v21  ;;  %v3947_v55 = vsel %vm1073_vm6, %v12681_v37, 0.0 }
0x113d   :  { %3948 = vadd.xlane.f32.xlu0 %v3947_v55  ;;  %v3743_v15 = vpop.f32.mrf.mxu0 }
0x113e   :  { %v12693_v30 = vadd.f32 %v3897_v18, %v11521_v29  ;;  %v3900_v42 = vadd.f32 %v12466_v53, %v3878_v47  ;;  %v3873_v60 = vadd.f32 %v3872_v28, %v3743_v15  ;;  %v3956_v23 = vsel %vm1073_vm6, %v12687_v3, 0.0  ;;  %v12707_v29 = vld [vmem:[%s14484_s4 + $0x8] ss:$0 sm:$0xff] }
0x113f   :  { %3957 = vadd.xlane.f32.xlu1 %v3956_v23 }
0x1140   :  { %v12699_v2 = vadd.f32 %v3900_v42, %v11514_v39  ;;  %v3899_v51 = vadd.f32 %v12466_v53, %v3873_v60  ;;  %v3953_v9 = vsel %vm1073_vm6, %v12693_v30, 0.0 }
0x1141   :  { %3954 = vadd.xlane.f32.xlu0 %v3953_v9 }
0x1142   :  { %v12710_v20 = vadd.f32 %v3899_v51, %v11523_v32  ;;  %v9747_v25 = vpop.f32.mrf.mxu0  ;;  %v3962_v57 = vsel %vm1073_vm6, %v12699_v2, 0.0 }
0x1143   :  { %v12715_v39 = vadd.f32 %v9747_v25, %v12707_v29  ;;  %3963 = vadd.xlane.f32.xlu1 %v3962_v57 }
0x1144   :  { %v4284_v53 = vpop.f32.mrf.mxu0  ;;  %v3959_v59 = vsel %vm1073_vm6, %v12710_v20, 0.0 }
0x1145   :  { %v4380_v7 = vmul.f32 0.044715, %v12715_v39  ;;  %v4285_v43 = vadd.f32 %v12707_v29, %v4284_v53  ;;  %3960 = vadd.xlane.f32.xlu0 %v3959_v59 }
0x1147   :  { %v4396_v32 = vmul.f32 %v4380_v7, %v12715_v39  ;;  %v4379_v41 = vmul.f32 0.044715, %v4285_v43 }
0x1149   :  { %v4412_v6 = vmul.f32 %v4396_v32, %v12715_v39  ;;  %v4395_v22 = vmul.f32 %v4379_v41, %v4285_v43  ;;  %v9750_v16 = vpop.f32.mrf.mxu0 }
0x114a   :  { %v12724_v38 = vadd.f32 %v9750_v16, %v12707_v29 }
0x114b   :  { %v4428_v24 = vadd.f32 %v4412_v6, %v12715_v39  ;;  %v4411_v48 = vmul.f32 %v4395_v22, %v4285_v43  ;;  %v4294_v34 = vpop.f32.mrf.mxu0 }
0x114c   :  { %v4382_v26 = vmul.f32 0.044715, %v12724_v38  ;;  %v4295_v33 = vadd.f32 %v12707_v29, %v4294_v34 }
0x114d   :  { %v4444_v50 = vmul.f32 0.7978846, %v4428_v24  ;;  %v4427_v49 = vadd.f32 %v4411_v48, %v4285_v43 }
0x114e   :  { %v4398_v14 = vmul.f32 %v4382_v26, %v12724_v38  ;;  %v4381_v45 = vmul.f32 0.044715, %v4295_v33  ;;  %v9753_v17 = vpop.f32.mrf.mxu0 }
0x114f   :  { %10396 = vtanh.f32 %v4444_v50  ;;  %v12731_v46 = vadd.f32 %v9753_v17, %v12707_v29  ;;  %v4443_v0 = vmul.f32 0.7978846, %v4427_v49  ;;  %v4363_v49 = vmul.f32 0.5, %v4285_v43 }
0x1150   :  { %v4414_v11 = vmul.f32 %v4398_v14, %v12724_v38  ;;  %v4397_v1 = vmul.f32 %v4381_v45, %v4295_v33  ;;  %v4304_v12 = vpop.f32.mrf.mxu0  ;;  %v4364_v17 = vmul.f32 0.5, %v12715_v39 }
0x1151   :  { %v4384_v8 = vmul.f32 0.044715, %v12731_v46  ;;  %v4305_v31 = vadd.f32 %v12707_v29, %v4304_v12  ;;  %10398 = vtanh.f32 %v4443_v0 }
0x1152   :  { %v4430_v13 = vadd.f32 %v4414_v11, %v12724_v38  ;;  %v4413_v52 = vmul.f32 %v4397_v1, %v4295_v33  ;;  %v9756_v61 = vpop.f32.mrf.mxu0 }
0x1153   :  { %v4400_v62 = vmul.f32 %v4384_v8, %v12731_v46  ;;  %v4383_v21 = vmul.f32 0.044715, %v4305_v31  ;;  %v12739_v18 = vadd.f32 %v9756_v61, %v12707_v29  ;;  %v4366_v61 = vmul.f32 0.5, %v12724_v38 }
0x1154   :  { %v4429_v47 = vadd.f32 %v4413_v52, %v4295_v33  ;;  %v4314_v55 = vpop.f32.mrf.mxu0  ;;  %v4446_v28 = vmul.f32 0.7978846, %v4430_v13  ;;  %v4365_v13 = vmul.f32 0.5, %v4295_v33 }
0x1155   :  { %v4416_v15 = vmul.f32 %v4400_v62, %v12731_v46  ;;  %v4399_v42 = vmul.f32 %v4383_v21, %v4305_v31  ;;  %v4386_v60 = vmul.f32 0.044715, %v12739_v18  ;;  %v4315_v23 = vadd.f32 %v12707_v29, %v4314_v55 }
0x1156   :  { %v4445_v51 = vmul.f32 0.7978846, %v4429_v47  ;;  %10400 = vtanh.f32 %v4446_v28  ;;  %v4367_v55 = vmul.f32 0.5, %v4305_v31 }
0x1157   :  { %v4432_v9 = vadd.f32 %v4416_v15, %v12731_v46  ;;  %v4415_v25 = vmul.f32 %v4399_v42, %v4305_v31  ;;  %v4402_v57 = vmul.f32 %v4386_v60, %v12739_v18  ;;  %v4385_v53 = vmul.f32 0.044715, %v4315_v23 }
0x1158   :  { %10402 = vtanh.f32 %v4445_v51  ;;  %v4368_v42 = vmul.f32 0.5, %v12731_v46  ;;  %v4369_v38 = vmul.f32 0.5, %v4315_v23 }
0x1159   :  { %v4431_v59 = vadd.f32 %v4415_v25, %v4305_v31  ;;  %v4418_v7 = vmul.f32 %v4402_v57, %v12739_v18  ;;  %v4401_v32 = vmul.f32 %v4385_v53, %v4315_v23  ;;  %v4448_v41 = vmul.f32 0.7978846, %v4432_v9 }
0x115a   :  { %v4370_v57 = vmul.f32 0.5, %v12739_v18 }
0x115b   :  { %v4434_v6 = vadd.f32 %v4418_v7, %v12739_v18  ;;  %v4417_v22 = vmul.f32 %v4401_v32, %v4315_v23  ;;  %v4447_v16 = vmul.f32 0.7978846, %v4431_v59  ;;  %10404 = vtanh.f32 %v4448_v41 }
0x115c   :  { %v10397_v24 = vpop.eup %10396 }
0x115d   :  { %v4433_v48 = vadd.f32 %v4417_v22, %v4315_v23  ;;  %10406 = vtanh.f32 %v4447_v16  ;;  %v4450_v34 = vmul.f32 0.7978846, %v4434_v6  ;;  %v4476_v50 = vadd.f32 1.0, %v10397_v24 }
0x115e   :  { %v10399_v26 = vpop.eup %10398 }
0x115f   :  { %v4475_v14 = vadd.f32 1.0, %v10399_v26  ;;  %v4449_v45 = vmul.f32 0.7978846, %v4433_v48  ;;  %10408 = vtanh.f32 %v4450_v34  ;;  %v4492_v11 = vmul.f32 %v4476_v50, %v4364_v17 }
0x1161   :  { %v4491_v0 = vmul.f32 %v4475_v14, %v4363_v49  ;;  %10410 = vtanh.f32 %v4449_v45 }
0x1163   :  { %v10401_v1 = vpop.eup %10400  ;;  %9777 = vmatprep.mubr.msk.f32.mxu1 %vm680_vm3, %v4491_v0 }
0x1164   :  { %9778 = vmatmul.mubr.msk.f32.vlgmr.msra.gmra.mxu1 %vm680_vm3, %v4492_v11  ;;  %v4478_v8 = vadd.f32 1.0, %v10401_v1 }
0x1165   :  { %v10403_v12 = vpop.eup %10402 }
0x1166   :  { %v4477_v52 = vadd.f32 1.0, %v10403_v12  ;;  %v4494_v21 = vmul.f32 %v4478_v8, %v4366_v61 }
0x1168   :  { %v10405_v43 = vpop.eup %10404  ;;  %v4493_v62 = vmul.f32 %v4477_v52, %v4365_v13 }
0x1169   :  { %v4480_v39 = vadd.f32 1.0, %v10405_v43 }
0x116a   :  { %v10407_v47 = vpop.eup %10406  ;;  %9780 = vmatprep.mubr.msk.f32.mxu1 %vm680_vm3, %v4493_v62 }
0x116b   :  { %9781 = vmatmul.mubr.msk.f32.gmra.mxu1 %vm680_vm3, %v4494_v21  ;;  %v4479_v28 = vadd.f32 1.0, %v10407_v47  ;;  %v4496_v33 = vmul.f32 %v4480_v39, %v4368_v42 }
0x116c   :  { %v10409_v15 = vpop.eup %10408 }
0x116d   :  { %v4495_v60 = vmul.f32 %v4479_v28, %v4367_v55  ;;  %v4482_v9 = vadd.f32 1.0, %v10409_v15 }
0x116e   :  { %v10411_v51 = vpop.eup %10410 }
0x116f   :  { %9783 = vmatprep.mubr.msk.f32.mxu1 %vm680_vm3, %v4495_v60  ;;  %v4481_v25 = vadd.f32 1.0, %v10411_v51  ;;  %v4498_v59 = vmul.f32 %v4482_v9, %v4370_v57 }
0x1170   :  { %9784 = vmatmul.mubr.msk.f32.gmra.mxu1 %vm680_vm3, %v4496_v33 }
0x1171   :  { %v4497_v53 = vmul.f32 %v4481_v25, %v4369_v38  ;;  %v12811_v38 = vld [vmem:[%s14484_s4 + $0x9] ss:$0 sm:$0xff] }
0x1173   :  { %9786 = vmatprep.mubr.msk.f32.mxu1 %vm680_vm3, %v4497_v53 }
0x1174   :  { %9787 = vmatmul.mubr.msk.f32.gmra.mxu1 %vm680_vm3, %v4498_v59 }
0x11c0   :  { %v3946_v31 = vpop.xlane.xlu1 %3945 }
0x11c1   :  { %v3974_v46 = vmul.f32 0.125, %v3946_v31 }
0x11c2   :  { %v3943_v7 = vpop.xlane.xlu0 %3942 }
0x11c3   :  { %v12761_v32 = vsub.f32 %v12665_v36, %v3974_v46  ;;  %v3973_v41 = vmul.f32 0.125, %v3943_v7 }
0x11c4   :  { %v3952_v6 = vpop.xlane.xlu1 %3951 }
0x11c5   :  { %v12764_v23 = vsub.f32 %v12669_v56, %v3973_v41  ;;  %v3976_v22 = vmul.f32 0.125, %v3952_v6  ;;  %v4006_v18 = vmul.f32 %v12761_v32, %v12761_v32 }
0x11c6   :  { %v3949_v16 = vpop.xlane.xlu0 %3948 }
0x11c7   :  { %v12769_v24 = vsub.f32 %v12675_v58, %v3976_v22  ;;  %v3975_v48 = vmul.f32 0.125, %v3949_v16  ;;  %v4040_v34 = vsel %vm1073_vm6, %v4006_v18, 0.0  ;;  %v4005_v26 = vmul.f32 %v12764_v23, %v12764_v23 }
0x11c8   :  { %4041 = vadd.xlane.f32.xlu1 %v4040_v34  ;;  %v3958_v50 = vpop.xlane.xlu1 %3957 }
0x11c9   :  { %v12775_v49 = vsub.f32 %v12681_v37, %v3975_v48  ;;  %v3978_v14 = vmul.f32 0.125, %v3958_v50  ;;  %v4037_v45 = vsel %vm1073_vm6, %v4005_v26, 0.0  ;;  %v4008_v17 = vmul.f32 %v12769_v24, %v12769_v24 }
0x11ca   :  { %v3955_v0 = vpop.xlane.xlu0 %3954  ;;  %4038 = vadd.xlane.f32.xlu0 %v4037_v45 }
0x11cb   :  { %v12781_v11 = vsub.f32 %v12687_v3, %v3978_v14  ;;  %v3977_v1 = vmul.f32 0.125, %v3955_v0  ;;  %v4046_v12 = vsel %vm1073_vm6, %v4008_v17, 0.0  ;;  %v4007_v8 = vmul.f32 %v12775_v49, %v12775_v49 }
0x11cc   :  { %4047 = vadd.xlane.f32.xlu1 %v4046_v12  ;;  %v3964_v13 = vpop.xlane.xlu1 %3963 }
0x11cd   :  { %v12787_v52 = vsub.f32 %v12693_v30, %v3977_v1  ;;  %v3980_v61 = vmul.f32 0.125, %v3964_v13  ;;  %v4043_v43 = vsel %vm1073_vm6, %v4007_v8, 0.0  ;;  %v4010_v62 = vmul.f32 %v12781_v11, %v12781_v11 }
0x11ce   :  { %4044 = vadd.xlane.f32.xlu0 %v4043_v43  ;;  %v3961_v21 = vpop.xlane.xlu0 %3960 }
0x11cf   :  { %v12793_v47 = vsub.f32 %v12699_v2, %v3980_v61  ;;  %v3979_v39 = vmul.f32 0.125, %v3961_v21  ;;  %v4052_v55 = vsel %vm1073_vm6, %v4010_v62, 0.0  ;;  %v4009_v28 = vmul.f32 %v12787_v52, %v12787_v52 }
0x11d0   :  { %4053 = vadd.xlane.f32.xlu1 %v4052_v55 }
0x11d1   :  { %v12799_v15 = vsub.f32 %v12710_v20, %v3979_v39  ;;  %v4049_v42 = vsel %vm1073_vm6, %v4009_v28, 0.0  ;;  %v4012_v60 = vmul.f32 %v12793_v47, %v12793_v47 }
0x11d2   :  { %4050 = vadd.xlane.f32.xlu0 %v4049_v42 }
0x11d3   :  { %v4058_v51 = vsel %vm1073_vm6, %v4012_v60, 0.0  ;;  %v4011_v33 = vmul.f32 %v12799_v15, %v12799_v15 }
0x11d4   :  { %4059 = vadd.xlane.f32.xlu1 %v4058_v51 }
0x11d5   :  { %v4055_v9 = vsel %vm1073_vm6, %v4011_v33, 0.0 }
0x11d6   :  { %4056 = vadd.xlane.f32.xlu0 %v4055_v9 }
0x1224   :  { %v9779_v25 = vpop.f32.mrf.mxu1 }
0x1225   :  { %v4635_v57 = vadd.f32 %v9779_v25, %v12811_v38 }
0x1226   :  { %v4629_v53 = vpop.f32.mrf.mxu1 }
0x1227   :  { %v12815_v59 = vadd.f32 %v4635_v57, %v12477_v10  ;;  %v4630_v31 = vadd.f32 %v12811_v38, %v4629_v53 }
0x1229   :  { %v12819_v46 = vadd.f32 %v4630_v31, %v12483_v63  ;;  %v4734_v7 = vsel %vm1073_vm6, %v12815_v59, 0.0 }
0x122a   :  { %4735 = vadd.xlane.f32.xlu1 %v4734_v7 }
0x122b   :  { %v9782_v41 = vpop.f32.mrf.mxu1  ;;  %v4731_v6 = vsel %vm1073_vm6, %v12819_v46, 0.0 }
0x122c   :  { %v4645_v22 = vadd.f32 %v9782_v41, %v12811_v38  ;;  %4732 = vadd.xlane.f32.xlu0 %v4731_v6 }
0x122d   :  { %v4639_v18 = vpop.f32.mrf.mxu1 }
0x122e   :  { %v12827_v10 = vadd.f32 %v4645_v22, %v12508_v44  ;;  %v4640_v16 = vadd.f32 %v12811_v38, %v4639_v18 }
0x1230   :  { %v12831_v63 = vadd.f32 %v4640_v16, %v12496_v40  ;;  %v9785_v48 = vpop.f32.mrf.mxu1  ;;  %v4740_v34 = vsel %vm1073_vm6, %v12827_v10, 0.0 }
0x1231   :  { %v4655_v26 = vadd.f32 %v9785_v48, %v12811_v38  ;;  %4741 = vadd.xlane.f32.xlu1 %v4740_v34 }
0x1232   :  { %v4649_v50 = vpop.f32.mrf.mxu1  ;;  %v4737_v14 = vsel %vm1073_vm6, %v12831_v63, 0.0 }
0x1233   :  { %v12839_v45 = vadd.f32 %v4655_v26, %v12489_v35  ;;  %v4650_v44 = vadd.f32 %v12811_v38, %v4649_v50  ;;  %4738 = vadd.xlane.f32.xlu0 %v4737_v14 }
0x1234   :  { %v9788_v17 = vpop.f32.mrf.mxu1 }
0x1235   :  { %v12843_v40 = vadd.f32 %v4650_v44, %v12518_v4  ;;  %v4665_v0 = vadd.f32 %v9788_v17, %v12811_v38  ;;  %v4746_v1 = vsel %vm1073_vm6, %v12839_v45, 0.0 }
0x1236   :  { %v4659_v12 = vpop.f32.mrf.mxu1  ;;  %4747 = vadd.xlane.f32.xlu1 %v4746_v1 }
0x1237   :  { %v12849_v8 = vadd.f32 %v4665_v0, %v12503_v19  ;;  %v4660_v35 = vadd.f32 %v12811_v38, %v4659_v12  ;;  %v4743_v13 = vsel %vm1073_vm6, %v12843_v40, 0.0 }
0x1238   :  { %4744 = vadd.xlane.f32.xlu0 %v4743_v13 }
0x1239   :  { %v12855_v61 = vadd.f32 %v4660_v35, %v12524_v27  ;;  %v4752_v4 = vsel %vm1073_vm6, %v12849_v8, 0.0 }
0x123a   :  { %4753 = vadd.xlane.f32.xlu1 %v4752_v4 }
0x123b   :  { %v4749_v43 = vsel %vm1073_vm6, %v12855_v61, 0.0 }
0x123c   :  { %4750 = vadd.xlane.f32.xlu0 %v4749_v43 }
0x1251   :  { %v4042_v62 = vpop.xlane.xlu1 %4041 }
0x1252   :  { %v4070_v19 = vmul.f32 0.125, %v4042_v62 }
0x1253   :  { %v4039_v21 = vpop.xlane.xlu0 %4038 }
0x1254   :  { %v4086_v39 = vadd.f32 1e-05, %v4070_v19  ;;  %v4069_v55 = vmul.f32 0.125, %v4039_v21 }
0x1255   :  { %v4048_v28 = vpop.xlane.xlu1 %4047 }
0x1256   :  { %10412 = vrsqrt.f32 %v4086_v39  ;;  %v4085_v42 = vadd.f32 1e-05, %v4069_v55  ;;  %v4072_v60 = vmul.f32 0.125, %v4048_v28 }
0x1257   :  { %v4045_v51 = vpop.xlane.xlu0 %4044 }
0x1258   :  { %10414 = vrsqrt.f32 %v4085_v42  ;;  %v4088_v27 = vadd.f32 1e-05, %v4072_v60  ;;  %v4071_v33 = vmul.f32 0.125, %v4045_v51 }
0x1259   :  { %v4054_v9 = vpop.xlane.xlu1 %4053 }
0x125a   :  { %10416 = vrsqrt.f32 %v4088_v27  ;;  %v4087_v25 = vadd.f32 1e-05, %v4071_v33  ;;  %v4074_v57 = vmul.f32 0.125, %v4054_v9 }
0x125b   :  { %v4051_v53 = vpop.xlane.xlu0 %4050 }
0x125c   :  { %10418 = vrsqrt.f32 %v4087_v25  ;;  %v4090_v31 = vadd.f32 1e-05, %v4074_v57  ;;  %v4073_v7 = vmul.f32 0.125, %v4051_v53 }
0x125d   :  { %v4060_v41 = vpop.xlane.xlu1 %4059 }
0x125e   :  { %10420 = vrsqrt.f32 %v4090_v31  ;;  %v4089_v6 = vadd.f32 1e-05, %v4073_v7  ;;  %v4076_v22 = vmul.f32 0.125, %v4060_v41 }
0x125f   :  { %v4057_v18 = vpop.xlane.xlu0 %4056 }
0x1260   :  { %10422 = vrsqrt.f32 %v4089_v6  ;;  %v4092_v16 = vadd.f32 1e-05, %v4076_v22  ;;  %v4075_v48 = vmul.f32 0.125, %v4057_v18 }
0x1262   :  { %10424 = vrsqrt.f32 %v4092_v16  ;;  %v4091_v34 = vadd.f32 1e-05, %v4075_v48 }
0x1263   :  { %v10413_v26 = vpop.eup %10412 }
0x1264   :  { %10426 = vrsqrt.f32 %v4091_v34  ;;  %v4118_v50 = vmul.f32 %v10413_v26, %v12761_v32 }
0x1265   :  { %v10415_v14 = vpop.eup %10414 }
0x1266   :  { %v4117_v44 = vmul.f32 %v10415_v14, %v12764_v23  ;;  %v4138_v0 = vmul.f32 %v12611_v5, %v4118_v50 }
0x1267   :  { %v10417_v17 = vpop.eup %10416 }
0x1268   :  { %v4137_v1 = vmul.f32 %v12611_v5, %v4117_v44  ;;  %v4120_v12 = vmul.f32 %v10417_v17, %v12769_v24  ;;  %v4158_v62 = vadd.f32 %v12620_v54, %v4138_v0 }
0x1269   :  { %v10419_v35 = vpop.eup %10418 }
0x126a   :  { %v4157_v13 = vadd.f32 %v12620_v54, %v4137_v1  ;;  %v4119_v4 = vmul.f32 %v10419_v35, %v12775_v49  ;;  %v4140_v32 = vmul.f32 %v12611_v5, %v4120_v12 }
0x126b   :  { %v10421_v43 = vpop.eup %10420 }
0x126c   :  { %9757 = vmatprep.mubr.msk.f32.mxu0 %vm1073_vm6, %v4157_v13  ;;  %v4139_v23 = vmul.f32 %v12611_v5, %v4119_v4  ;;  %v4122_v19 = vmul.f32 %v10421_v43, %v12781_v11  ;;  %v4160_v49 = vadd.f32 %v12620_v54, %v4140_v32 }
0x126d   :  { %v10423_v21 = vpop.eup %10422  ;;  %9758 = vmatmul.mubr.msk.f32.gmra.mxu0 %vm1073_vm6, %v4158_v62 }
0x126e   :  { %v4159_v24 = vadd.f32 %v12620_v54, %v4139_v23  ;;  %v4121_v39 = vmul.f32 %v10423_v21, %v12787_v52  ;;  %v4142_v28 = vmul.f32 %v12611_v5, %v4122_v19 }
0x126f   :  { %v10425_v55 = vpop.eup %10424 }
0x1270   :  { %9760 = vmatprep.mubr.msk.f32.mxu0 %vm1073_vm6, %v4159_v24  ;;  %v4141_v42 = vmul.f32 %v12611_v5, %v4121_v39  ;;  %v4124_v60 = vmul.f32 %v10425_v55, %v12793_v47  ;;  %v4162_v52 = vadd.f32 %v12620_v54, %v4142_v28 }
0x1271   :  { %v10427_v51 = vpop.eup %10426  ;;  %9761 = vmatmul.mubr.msk.f32.gmra.mxu0 %vm1073_vm6, %v4160_v49 }
0x1272   :  { %v4161_v11 = vadd.f32 %v12620_v54, %v4141_v42  ;;  %v4123_v27 = vmul.f32 %v10427_v51, %v12799_v15  ;;  %v4144_v33 = vmul.f32 %v12611_v5, %v4124_v60 }
0x1274   :  { %9763 = vmatprep.mubr.msk.f32.mxu0 %vm1073_vm6, %v4161_v11  ;;  %v4143_v9 = vmul.f32 %v12611_v5, %v4123_v27  ;;  %v4164_v47 = vadd.f32 %v12620_v54, %v4144_v33  ;;  %v8566_v27 = vld [vmem:[%s14486_s6 + $0x8] sm:$0xff] }
0x1275   :  { %9764 = vmatmul.mubr.msk.f32.gmra.mxu0 %vm1073_vm6, %v4162_v52  ;;  %9801 = vmatprep.subr.mxu0 %v8566_v27 }
0x1276   :  { %v4163_v25 = vadd.f32 %v12620_v54, %v4143_v9  ;;  %9802 = vmatpush3.msra.mxu0 %v8566_v27 }
0x1278   :  { %9766 = vmatprep.mubr.msk.f32.mxu0 %vm1073_vm6, %v4163_v25 }
0x1279   :  { %9767 = vmatmul.mubr.msk.f32.gmra.mxu0 %vm1073_vm6, %v4164_v47 }
0x12b3   :  { %v4736_v57 = vpop.xlane.xlu1 %4735 }
0x12b4   :  { %v4780_v15 = vmul.f32 0.125, %v4736_v57 }
0x12b5   :  { %v4733_v53 = vpop.xlane.xlu0 %4732 }
0x12b6   :  { %v12894_v31 = vsub.f32 %v12815_v59, %v4780_v15  ;;  %v4779_v7 = vmul.f32 0.125, %v4733_v53 }
0x12b8   :  { %v12897_v41 = vsub.f32 %v12819_v46, %v4779_v7  ;;  %v4812_v5 = vmul.f32 %v12894_v31, %v12894_v31 }
0x12ba   :  { %v4742_v6 = vpop.xlane.xlu1 %4741  ;;  %v4830_v54 = vsel %vm1073_vm6, %v4812_v5, 0.0  ;;  %v4811_v22 = vmul.f32 %v12897_v41, %v12897_v41 }
0x12bb   :  { %v4782_v18 = vmul.f32 0.125, %v4742_v6  ;;  %4831 = vadd.xlane.f32.xlu1 %v4830_v54 }
0x12bc   :  { %v4739_v16 = vpop.xlane.xlu0 %4738  ;;  %v4827_v48 = vsel %vm1073_vm6, %v4811_v22, 0.0 }
0x12bd   :  { %v12906_v34 = vsub.f32 %v12827_v10, %v4782_v18  ;;  %v4781_v26 = vmul.f32 0.125, %v4739_v16  ;;  %4828 = vadd.xlane.f32.xlu0 %v4827_v48 }
0x12bf   :  { %v12909_v50 = vsub.f32 %v12831_v63, %v4781_v26  ;;  %v4748_v14 = vpop.xlane.xlu1 %4747  ;;  %v4814_v44 = vmul.f32 %v12906_v34, %v12906_v34 }
0x12c0   :  { %v4784_v17 = vmul.f32 0.125, %v4748_v14 }
0x12c1   :  { %v4745_v0 = vpop.xlane.xlu0 %4744  ;;  %v4836_v1 = vsel %vm1073_vm6, %v4814_v44, 0.0  ;;  %v4813_v12 = vmul.f32 %v12909_v50, %v12909_v50 }
0x12c2   :  { %v12917_v35 = vsub.f32 %v12839_v45, %v4784_v17  ;;  %v4783_v13 = vmul.f32 0.125, %v4745_v0  ;;  %4837 = vadd.xlane.f32.xlu1 %v4836_v1 }
0x12c3   :  { %v4754_v4 = vpop.xlane.xlu1 %4753  ;;  %v4833_v43 = vsel %vm1073_vm6, %v4813_v12, 0.0 }
0x12c4   :  { %v12921_v62 = vsub.f32 %v12843_v40, %v4783_v13  ;;  %v4786_v32 = vmul.f32 0.125, %v4754_v4  ;;  %4834 = vadd.xlane.f32.xlu0 %v4833_v43  ;;  %v4816_v23 = vmul.f32 %v12917_v35, %v12917_v35 }
0x12c5   :  { %v4751_v19 = vpop.xlane.xlu0 %4750 }
0x12c6   :  { %v12926_v21 = vsub.f32 %v12849_v8, %v4786_v32  ;;  %v4785_v24 = vmul.f32 0.125, %v4751_v19  ;;  %v4842_v39 = vsel %vm1073_vm6, %v4816_v23, 0.0  ;;  %v4815_v55 = vmul.f32 %v12921_v62, %v12921_v62 }
0x12c7   :  { %4843 = vadd.xlane.f32.xlu1 %v4842_v39 }
0x12c8   :  { %v12932_v49 = vsub.f32 %v12855_v61, %v4785_v24  ;;  %v4839_v28 = vsel %vm1073_vm6, %v4815_v55, 0.0  ;;  %v4818_v42 = vmul.f32 %v12926_v21, %v12926_v21 }
0x12c9   :  { %4840 = vadd.xlane.f32.xlu0 %v4839_v28 }
0x12ca   :  { %v4848_v60 = vsel %vm1073_vm6, %v4818_v42, 0.0  ;;  %v4817_v51 = vmul.f32 %v12932_v49, %v12932_v49 }
0x12cb   :  { %4849 = vadd.xlane.f32.xlu1 %v4848_v60 }
0x12cc   :  { %v4845_v11 = vsel %vm1073_vm6, %v4817_v51, 0.0 }
0x12cd   :  { %4846 = vadd.xlane.f32.xlu0 %v4845_v11 }
0x132d   :  { %v9759_v52 = vpop.f32.mrf.mxu0 }
0x132e   :  { %v12945_v33 = vadd.f32 %v9759_v52, %v12707_v29 }
0x132f   :  { %v4324_v9 = vpop.f32.mrf.mxu0 }
0x1330   :  { %v4388_v25 = vmul.f32 0.044715, %v12945_v33  ;;  %v12949_v47 = vadd.f32 %v12707_v29, %v4324_v9 }
0x1331   :  { %v9762_v57 = vpop.f32.mrf.mxu0 }
0x1332   :  { %v4404_v15 = vmul.f32 %v4388_v25, %v12945_v33  ;;  %v4387_v53 = vmul.f32 0.044715, %v12949_v47  ;;  %v12954_v7 = vadd.f32 %v9762_v57, %v12707_v29 }
0x1333   :  { %v4334_v5 = vpop.f32.mrf.mxu0 }
0x1334   :  { %v4420_v6 = vmul.f32 %v4404_v15, %v12945_v33  ;;  %v4403_v54 = vmul.f32 %v4387_v53, %v12949_v47  ;;  %v4390_v22 = vmul.f32 0.044715, %v12954_v7  ;;  %v12960_v18 = vadd.f32 %v12707_v29, %v4334_v5 }
0x1335   :  { %v9765_v16 = vpop.f32.mrf.mxu0 }
0x1336   :  { %v4436_v48 = vadd.f32 %v4420_v6, %v12945_v33  ;;  %v4419_v26 = vmul.f32 %v4403_v54, %v12949_v47  ;;  %v4406_v14 = vmul.f32 %v4390_v22, %v12954_v7  ;;  %v4389_v44 = vmul.f32 0.044715, %v12960_v18 }
0x1337   :  { %v12967_v17 = vadd.f32 %v9765_v16, %v12707_v29  ;;  %v4344_v0 = vpop.f32.mrf.mxu0 }
0x1338   :  { %v4435_v1 = vadd.f32 %v4419_v26, %v12949_v47  ;;  %v4422_v12 = vmul.f32 %v4406_v14, %v12954_v7  ;;  %v4405_v13 = vmul.f32 %v4389_v44, %v12960_v18  ;;  %v12973_v4 = vadd.f32 %v12707_v29, %v4344_v0 }
0x1339   :  { %v4392_v43 = vmul.f32 0.044715, %v12967_v17  ;;  %v9768_v32 = vpop.f32.mrf.mxu0  ;;  %v4452_v23 = vmul.f32 0.7978846, %v4436_v48 }
0x133a   :  { %v4438_v19 = vadd.f32 %v4422_v12, %v12954_v7  ;;  %v4421_v24 = vmul.f32 %v4405_v13, %v12960_v18  ;;  %v4391_v39 = vmul.f32 0.044715, %v12973_v4  ;;  %v12980_v55 = vadd.f32 %v9768_v32, %v12707_v29 }
0x133b   :  { %v4408_v28 = vmul.f32 %v4392_v43, %v12967_v17  ;;  %v4354_v42 = vpop.f32.mrf.mxu0  ;;  %v4451_v60 = vmul.f32 0.7978846, %v4435_v1  ;;  %10428 = vtanh.f32 %v4452_v23 }
0x133c   :  { %v4437_v51 = vadd.f32 %v4421_v24, %v12960_v18  ;;  %v4407_v11 = vmul.f32 %v4391_v39, %v12973_v4  ;;  %v4394_v27 = vmul.f32 0.044715, %v12980_v55  ;;  %v12987_v52 = vadd.f32 %v12707_v29, %v4354_v42 }
0x133d   :  { %v4424_v9 = vmul.f32 %v4408_v28, %v12967_v17  ;;  %10430 = vtanh.f32 %v4451_v60  ;;  %v4454_v25 = vmul.f32 0.7978846, %v4438_v19  ;;  %v4371_v60 = vmul.f32 0.5, %v12949_v47 }
0x133e   :  { %v4423_v57 = vmul.f32 %v4407_v11, %v12973_v4  ;;  %v4410_v15 = vmul.f32 %v4394_v27, %v12980_v55  ;;  %v4393_v53 = vmul.f32 0.044715, %v12987_v52  ;;  %v4453_v5 = vmul.f32 0.7978846, %v4437_v51 }
0x133f   :  { %v4440_v6 = vadd.f32 %v4424_v9, %v12967_v17  ;;  %10432 = vtanh.f32 %v4454_v25  ;;  %v4372_v11 = vmul.f32 0.5, %v12945_v33 }
0x1340   :  { %v4439_v54 = vadd.f32 %v4423_v57, %v12973_v4  ;;  %v4426_v22 = vmul.f32 %v4410_v15, %v12980_v55  ;;  %v4409_v29 = vmul.f32 %v4393_v53, %v12987_v52  ;;  %10434 = vtanh.f32 %v4453_v5 }
0x1341   :  { %v4456_v16 = vmul.f32 0.7978846, %v4440_v6  ;;  %v4373_v5 = vmul.f32 0.5, %v12960_v18 }
0x1342   :  { %v4442_v48 = vadd.f32 %v4426_v22, %v12980_v55  ;;  %v4425_v26 = vmul.f32 %v4409_v29, %v12987_v52  ;;  %v4455_v14 = vmul.f32 0.7978846, %v4439_v54 }
0x1343   :  { %10436 = vtanh.f32 %v4456_v16 }
0x1344   :  { %v4441_v44 = vadd.f32 %v4425_v26, %v12987_v52  ;;  %v4832_v0 = vpop.xlane.xlu1 %4831  ;;  %10438 = vtanh.f32 %v4455_v14  ;;  %v4458_v1 = vmul.f32 0.7978846, %v4442_v48  ;;  %v4374_v26 = vmul.f32 0.5, %v12954_v7 }
0x1345   :  { %v4876_v12 = vmul.f32 0.125, %v4832_v0  ;;  %v4375_v0 = vmul.f32 0.5, %v12973_v4  ;;  %v4376_v7 = vmul.f32 0.5, %v12967_v17 }
0x1346   :  { %v4829_v13 = vpop.xlane.xlu0 %4828  ;;  %v4457_v43 = vmul.f32 0.7978846, %v4441_v44  ;;  %10440 = vtanh.f32 %v4458_v1 }
0x1347   :  { %v4892_v32 = vadd.f32 1e-05, %v4876_v12  ;;  %v4875_v23 = vmul.f32 0.125, %v4829_v13 }
0x1348   :  { %v10429_v19 = vpop.eup %10428  ;;  %10442 = vtanh.f32 %v4457_v43 }
0x1349   :  { %10444 = vrsqrt.f32 %v4892_v32  ;;  %v4891_v24 = vadd.f32 1e-05, %v4875_v23  ;;  %v4484_v39 = vadd.f32 1.0, %v10429_v19 }
0x134a   :  { %v10431_v28 = vpop.eup %10430 }
0x134b   :  { %10446 = vrsqrt.f32 %v4891_v24  ;;  %v4838_v42 = vpop.xlane.xlu1 %4837  ;;  %v4483_v51 = vadd.f32 1.0, %v10431_v28  ;;  %v4500_v53 = vmul.f32 %v4484_v39, %v4372_v11  ;;  %v4377_v11 = vmul.f32 0.5, %v12987_v52 }
0x134c   :  { %v10433_v27 = vpop.eup %10432  ;;  %v4878_v9 = vmul.f32 0.125, %v4838_v42 }
0x134d   :  { %v10435_v25 = vpop.eup %10434  ;;  %v4835_v57 = vpop.xlane.xlu0 %4834  ;;  %v4499_v15 = vmul.f32 %v4483_v51, %v4371_v60  ;;  %v4486_v29 = vadd.f32 1.0, %v10433_v27 }
0x134e   :  { %v4894_v6 = vadd.f32 1e-05, %v4878_v9  ;;  %v4877_v54 = vmul.f32 0.125, %v4835_v57  ;;  %v4485_v22 = vadd.f32 1.0, %v10435_v25  ;;  %v13015_v25 = vld [vmem:[%s14484_s4 + $0xa] ss:$0 sm:$0xff] }
0x134f   :  { %9789 = vmatprep.mubr.msk.f32.mxu1 %vm680_vm3, %v4499_v15  ;;  %v4502_v1 = vmul.f32 %v4486_v29, %v4374_v26 }
0x1350   :  { %v10437_v16 = vpop.eup %10436  ;;  %10448 = vrsqrt.f32 %v4894_v6  ;;  %v4893_v47 = vadd.f32 1e-05, %v4877_v54  ;;  %9790 = vmatmul.mubr.msk.f32.gmra.mxu1 %vm680_vm3, %v4500_v53  ;;  %v4844_v33 = vpop.xlane.xlu1 %4843  ;;  %v4501_v48 = vmul.f32 %v4485_v22, %v4373_v5  ;;  %v4378_v6 = vmul.f32 0.5, %v12980_v55 }
0x1351   :  { %v10439_v14 = vpop.eup %10438  ;;  %v4880_v44 = vmul.f32 0.125, %v4844_v33  ;;  %v4488_v13 = vadd.f32 1.0, %v10437_v16 }
0x1352   :  { %10450 = vrsqrt.f32 %v4893_v47  ;;  %v4841_v18 = vpop.xlane.xlu0 %4840  ;;  %9792 = vmatprep.mubr.msk.f32.mxu1 %vm680_vm3, %v4501_v48  ;;  %v4487_v12 = vadd.f32 1.0, %v10439_v14 }
0x1353   :  { %v10441_v43 = vpop.eup %10440  ;;  %v4896_v32 = vadd.f32 1e-05, %v4880_v44  ;;  %v4879_v23 = vmul.f32 0.125, %v4841_v18  ;;  %v4504_v51 = vmul.f32 %v4488_v13, %v4376_v7 }
0x1354   :  { %9793 = vmatmul.mubr.msk.f32.gmra.mxu1 %vm680_vm3, %v4502_v1  ;;  %v4850_v19 = vpop.xlane.xlu1 %4849  ;;  %v4503_v24 = vmul.f32 %v4487_v12, %v4375_v0  ;;  %v4490_v9 = vadd.f32 1.0, %v10441_v43 }
0x1355   :  { %v10443_v39 = vpop.eup %10442  ;;  %10452 = vrsqrt.f32 %v4896_v32  ;;  %v4895_v28 = vadd.f32 1e-05, %v4879_v23  ;;  %v4882_v4 = vmul.f32 0.125, %v4850_v19 }
0x1356   :  { %v10445_v42 = vpop.eup %10444  ;;  %v4847_v60 = vpop.xlane.xlu0 %4846  ;;  %9795 = vmatprep.mubr.msk.f32.mxu1 %vm680_vm3, %v4503_v24  ;;  %v4489_v27 = vadd.f32 1.0, %v10443_v39  ;;  %v4506_v29 = vmul.f32 %v4490_v9, %v4378_v6 }
0x1357   :  { %v4924_v17 = vmul.f32 %v10445_v42, %v12894_v31  ;;  %10454 = vrsqrt.f32 %v4895_v28  ;;  %v4898_v57 = vadd.f32 1e-05, %v4882_v4  ;;  %v4881_v15 = vmul.f32 0.125, %v4847_v60  ;;  %v13026_v31 = vld [vmem:[%s14484_s4 + $0xb] ss:$0 sm:$0xff] }
0x1358   :  { %v10447_v53 = vpop.eup %10446  ;;  %9796 = vmatmul.mubr.msk.f32.gmra.mxu1 %vm680_vm3, %v4504_v51  ;;  %v4505_v5 = vmul.f32 %v4489_v27, %v4377_v11 }
0x1359   :  { %10456 = vrsqrt.f32 %v4898_v57  ;;  %v4897_v52 = vadd.f32 1e-05, %v4881_v15  ;;  %v4923_v54 = vmul.f32 %v10447_v53, %v12897_v41  ;;  %v4944_v22 = vmul.f32 %v13015_v25, %v4924_v17 }
0x135a   :  { %9798 = vmatprep.mubr.msk.f32.mxu1 %vm680_vm3, %v4505_v5 }
0x135b   :  { %10458 = vrsqrt.f32 %v4897_v52  ;;  %v4943_v16 = vmul.f32 %v13015_v25, %v4923_v54  ;;  %v4964_v41 = vadd.f32 %v13026_v31, %v4944_v22 }
0x135c   :  { %9799 = vmatmul.mubr.msk.f32.gmra.mxu1 %vm680_vm3, %v4506_v29 }
0x135d   :  { %v10449_v55 = vpop.eup %10448  ;;  %v4963_v47 = vadd.f32 %v13026_v31, %v4943_v16 }
0x135e   :  { %v4926_v33 = vmul.f32 %v10449_v55, %v12906_v34 }
0x135f   :  { %v10451_v48 = vpop.eup %10450  ;;  %9803 = vmatprep.mubr.msk.f32.mxu0 %vm1073_vm6, %v4963_v47 }
0x1360   :  { %9804 = vmatmul.mubr.msk.f32.vlgmr.msra.gmra.mxu0 %vm1073_vm6, %v4964_v41  ;;  %v4925_v26 = vmul.f32 %v10451_v48, %v12909_v50  ;;  %v4946_v14 = vmul.f32 %v13015_v25, %v4926_v33 }
0x1362   :  { %v10453_v44 = vpop.eup %10452  ;;  %v4945_v0 = vmul.f32 %v13015_v25, %v4925_v26  ;;  %v4966_v13 = vadd.f32 %v13026_v31, %v4946_v14 }
0x1363   :  { %v4928_v18 = vmul.f32 %v10453_v44, %v12917_v35 }
0x1364   :  { %v10455_v1 = vpop.eup %10454  ;;  %v4965_v12 = vadd.f32 %v13026_v31, %v4945_v0 }
0x1365   :  { %v4927_v34 = vmul.f32 %v10455_v1, %v12921_v62  ;;  %v4948_v32 = vmul.f32 %v13015_v25, %v4928_v18 }
0x1366   :  { %v10457_v43 = vpop.eup %10456  ;;  %9806 = vmatprep.mubr.msk.f32.mxu0 %vm1073_vm6, %v4965_v12 }
0x1367   :  { %9807 = vmatmul.mubr.msk.f32.gmra.mxu0 %vm1073_vm6, %v4966_v13  ;;  %v4947_v50 = vmul.f32 %v13015_v25, %v4927_v34  ;;  %v4930_v23 = vmul.f32 %v10457_v43, %v12926_v21  ;;  %v4968_v7 = vadd.f32 %v13026_v31, %v4948_v32 }
0x1368   :  { %v10459_v19 = vpop.eup %10458 }
0x1369   :  { %v4967_v35 = vadd.f32 %v13026_v31, %v4947_v50  ;;  %v4929_v24 = vmul.f32 %v10459_v19, %v12932_v49  ;;  %v4950_v62 = vmul.f32 %v13015_v25, %v4930_v23 }
0x136b   :  { %9809 = vmatprep.mubr.msk.f32.mxu0 %vm1073_vm6, %v4967_v35  ;;  %v4949_v39 = vmul.f32 %v13015_v25, %v4929_v24  ;;  %v4970_v4 = vadd.f32 %v13026_v31, %v4950_v62 }
0x136c   :  { %9810 = vmatmul.mubr.msk.f32.gmra.mxu0 %vm1073_vm6, %v4968_v7 }
0x136d   :  { %v4969_v28 = vadd.f32 %v13026_v31, %v4949_v39 }
0x136f   :  { %9812 = vmatprep.mubr.msk.f32.mxu0 %vm1073_vm6, %v4969_v28 }
0x1370   :  { %9813 = vmatmul.mubr.msk.f32.gmra.mxu0 %vm1073_vm6, %v4970_v4 }
0x1410   :  { %v9791_v21 = vpop.f32.mrf.mxu1 }
0x1411   :  { %v4675_v49 = vadd.f32 %v9791_v21, %v12811_v38 }
0x1412   :  { %v4669_v42 = vpop.f32.mrf.mxu1 }
0x1413   :  { %v13060_v60 = vadd.f32 %v4675_v49, %v12665_v36  ;;  %v4670_v51 = vadd.f32 %v12811_v38, %v4669_v42 }
0x1414   :  { %v9794_v11 = vpop.f32.mrf.mxu1 }
0x1415   :  { %v13064_v27 = vadd.f32 %v4670_v51, %v12669_v56  ;;  %v4685_v9 = vadd.f32 %v9794_v11, %v12811_v38  ;;  %v4758_v17 = vsel %vm1073_vm6, %v13060_v60, 0.0 }
0x1416   :  { %v4679_v57 = vpop.f32.mrf.mxu1  ;;  %4759 = vadd.xlane.f32.xlu1 %v4758_v17 }
0x1417   :  { %v13070_v15 = vadd.f32 %v4685_v9, %v12675_v58  ;;  %v4680_v53 = vadd.f32 %v12811_v38, %v4679_v57  ;;  %v4755_v36 = vsel %vm1073_vm6, %v13064_v27, 0.0 }
0x1418   :  { %4756 = vadd.xlane.f32.xlu0 %v4755_v36  ;;  %v9797_v5 = vpop.f32.mrf.mxu1 }
0x1419   :  { %v13076_v56 = vadd.f32 %v4680_v53, %v12681_v37  ;;  %v4695_v6 = vadd.f32 %v9797_v5, %v12811_v38  ;;  %v4764_v52 = vsel %vm1073_vm6, %v13070_v15, 0.0 }
0x141a   :  { %v4689_v54 = vpop.f32.mrf.mxu1  ;;  %4765 = vadd.xlane.f32.xlu1 %v4764_v52 }
0x141b   :  { %v13082_v58 = vadd.f32 %v4695_v6, %v12687_v3  ;;  %v4761_v22 = vsel %vm1073_vm6, %v13076_v56, 0.0  ;;  %v4690_v0 = vadd.f32 %v12811_v38, %v4689_v54 }
0x141c   :  { %4762 = vadd.xlane.f32.xlu0 %v4761_v22  ;;  %v9800_v29 = vpop.f32.mrf.mxu1 }
0x141d   :  { %v4705_v16 = vadd.f32 %v9800_v29, %v12811_v38  ;;  %v4770_v37 = vsel %vm1073_vm6, %v13082_v58, 0.0  ;;  %v13128_v18 = vadd.f32 %v4690_v0, %v12693_v30 }
0x141e   :  { %4771 = vadd.xlane.f32.xlu1 %v4770_v37  ;;  %v4699_v12 = vpop.f32.mrf.mxu1 }
0x141f   :  { %v13090_v55 = vadd.f32 %v4705_v16, %v12699_v2  ;;  %14497 = vst [vmem:[#allocation6_spill] sm:$0xff] %v13128_v18  ;;  %v4767_v1 = vsel %vm1073_vm6, %v13128_v18, 0.0  ;;  %v4700_v13 = vadd.f32 %v12811_v38, %v4699_v12 }
0x1420   :  { %v13092_v47 = vpop.f32.mrf.mxu0 }
0x1421   :  { %14496 = vst [vmem:[#allocation5_spill] sm:$0xff] %v13090_v55  ;;  %v4776_v3 = vsel %vm1073_vm6, %v13090_v55, 0.0  ;;  %v13136_v34 = vadd.f32 %v4700_v13, %v12710_v20 }
0x1422   :  { %4777 = vadd.xlane.f32.xlu1 %v4776_v3  ;;  %v13096_v41 = vpop.f32.mrf.mxu0 }
0x1423   :  { %9843 = vmatprep.mubr.msk.f32.mxu1 %vm1745_vm10, %v13096_v41  ;;  %14498 = vst [vmem:[#allocation7_spill] sm:$0xff] %v13136_v34  ;;  %v4773_v43 = vsel %vm1073_vm6, %v13136_v34, 0.0 }
0x1427   :  { %v13100_v33 = vpop.f32.mrf.mxu0 }
0x1429   :  { %v13102_v48 = vpop.f32.mrf.mxu0 }
0x142c   :  { %v13104_v26 = vpop.f32.mrf.mxu0 }
0x142e   :  { %v13110_v2 = vpop.f32.mrf.mxu0 }
0x1430   :  { %v13116_v14 = vpop.f32.mrf.mxu0 }
0x1432   :  { %5193 = vrot.lane.b32.xlu0 %v13092_v47, %s10710_s19  ;;  %v13120_v44 = vpop.f32.mrf.mxu0 }
0x1433   :  { %5622 = vrot.lane.b32.xlu1 %v13104_v26, %s10712_s2 }
0x1437   :  { %5199 = vrot.lane.b32.xlu1 %v13110_v2, %s10710_s19 }
0x143b   :  { %5620 = vrot.lane.b32.xlu1 %v13110_v2, %s10712_s2 }
0x143f   :  { %5626 = vrot.lane.b32.xlu1 %v13116_v14, %s10712_s2 }
0x1443   :  { %5203 = vrot.lane.b32.xlu1 %v13120_v44, %s10710_s19 }
0x1447   :  { %5624 = vrot.lane.b32.xlu1 %v13120_v44, %s10712_s2 }
0x1451   :  { %4768 = vadd.xlane.f32.xlu0 %v4767_v1 }
0x1467   :  { %5197 = vrot.lane.b32.xlu0 %v13100_v33, %s10710_s19 }
0x1486   :  { %4774 = vadd.xlane.f32.xlu0 %v4773_v43 }
0x149c   :  { %5191 = vrot.lane.b32.xlu0 %v13096_v41, %s10710_s19 }
0x149f   :  { %v4760_v30 = vpop.xlane.xlu1 %4759 }
0x14a0   :  { %v4788_v32 = vmul.f32 0.125, %v4760_v30  ;;  %5195 = vrot.lane.b32.xlu0 %v13102_v48, %s10710_s19 }
0x14a1   :  { %v4757_v11 = vpop.xlane.xlu0 %4756 }
0x14a2   :  { %v13145_v50 = vsub.f32 %v13060_v60, %v4788_v32  ;;  %v4787_v17 = vmul.f32 0.125, %v4757_v11 }
0x14a3   :  { %v4766_v23 = vpop.xlane.xlu1 %4765 }
0x14a4   :  { %v4790_v38 = vmul.f32 0.125, %v4766_v23  ;;  %5201 = vrot.lane.b32.xlu0 %v13104_v26, %s10710_s19  ;;  %v4820_v20 = vmul.f32 %v13145_v50, %v13145_v50  ;;  %v13171_v36 = vsub.f32 %v13064_v27, %v4787_v17 }
0x14a5   :  { %v4763_v57 = vpop.xlane.xlu0 %4762 }
0x14a6   :  { %v13152_v19 = vsub.f32 %v13070_v15, %v4790_v38  ;;  %v4854_v35 = vsel %vm1073_vm6, %v4820_v20, 0.0  ;;  %v4789_v5 = vmul.f32 0.125, %v4763_v57  ;;  %v4819_v54 = vmul.f32 %v13171_v36, %v13171_v36 }
0x14a7   :  { %4855 = vadd.xlane.f32.xlu1 %v4854_v35  ;;  %v4772_v24 = vpop.xlane.xlu1 %4771 }
0x14a8   :  { %v4792_v7 = vmul.f32 0.125, %v4772_v24  ;;  %5205 = vrot.lane.b32.xlu0 %v13116_v14, %s10710_s19  ;;  %v4822_v62 = vmul.f32 %v13152_v19, %v13152_v19  ;;  %v13174_v52 = vsub.f32 %v13076_v56, %v4789_v5  ;;  %v4851_v29 = vsel %vm1073_vm6, %v4819_v54, 0.0 }
0x14a9   :  { %v5194_v3 = vpop.permute.xlu0 %5193 }
0x14aa   :  { %v13160_v39 = vsub.f32 %v13082_v58, %v4792_v7  ;;  %v4860_v28 = vsel %vm1073_vm6, %v4822_v62, 0.0  ;;  %v4821_v16 = vmul.f32 %v13174_v52, %v13174_v52 }
0x14ab   :  { %4861 = vadd.xlane.f32.xlu1 %v4860_v28  ;;  %v4778_v4 = vpop.xlane.xlu1 %4777 }
0x14ac   :  { %v4824_v21 = vmul.f32 %v13160_v39, %v13160_v39  ;;  %v4857_v37 = vsel %vm1073_vm6, %v4821_v16, 0.0  ;;  %v4794_v0 = vmul.f32 0.125, %v4778_v4 }
0x14ae   :  { %v4866_v49 = vsel %vm1073_vm6, %v4824_v21, 0.0  ;;  %v13189_v13 = vsub.f32 %v13090_v55, %v4794_v0 }
0x14af   :  { %4867 = vadd.xlane.f32.xlu1 %v4866_v49  ;;  %v5623_v42 = vpop.permute.xlu1 %5622 }
0x14b0   :  { %v4826_v23 = vmul.f32 %v13189_v13, %v13189_v13 }
0x14b2   :  { %v4872_v38 = vsel %vm1073_vm6, %v4826_v23, 0.0 }
0x14b3   :  { %v13166_v51 = vpop.permute.xlu1 %5199 }
0x14b7   :  { %v5621_v9 = vpop.permute.xlu1 %5620 }
0x14bb   :  { %v5627_v53 = vpop.permute.xlu1 %5626 }
0x14bc   :  { %9883 = vmatprep.subr.msk.mxu0 %vm1745_vm10, %v5627_v53 }
0x14bd   :  { %9884 = vmatpush3.xpose.msk.msra.mxu0 %vm1745_vm10, %v5627_v53 }
0x14bf   :  { %v5204_v6 = vpop.permute.xlu1 %5203 }
0x14c3   :  { %v5625_v22 = vpop.permute.xlu1 %5624 }
0x14c4   :  { %9885 = vmatprep.subr.msk.mxu0 %vm1745_vm10, %v5625_v22 }
0x14c5   :  { %9886 = vmatpush3.xpose.msk.msra.mxu0 %vm1745_vm10, %v5625_v22 }
0x14c6   :  { %9887 = vmatprep.subr.msk.mxu0 %vm1745_vm10, %v5623_v42 }
0x14c7   :  { %4852 = vadd.xlane.f32.xlu0 %v4851_v29 }
0x14c9   :  { %9888 = vmatpush3.xpose.msk.msra.mxu0 %vm1745_vm10, %v5623_v42 }
0x14ca   :  { %9889 = vmatprep.subr.msk.mxu0 %vm1745_vm10, %v5621_v9 }
0x14cb   :  { %4858 = vadd.xlane.f32.xlu0 %v4857_v37 }
0x14cd   :  { %9890 = vmatpush3.xpose.msk.msra.mxu0 %vm1745_vm10, %v5621_v9 }
0x14da   :  { %v4769_v1 = vpop.xlane.xlu0 %4768 }
0x14db   :  { %v4791_v12 = vmul.f32 0.125, %v4769_v1 }
0x14dd   :  { %v13192_v43 = vsub.f32 %v13128_v18, %v4791_v12 }
0x14de   :  { %v5198_v20 = vpop.permute.xlu0 %5197 }
0x14df   :  { %v4823_v30 = vmul.f32 %v13192_v43, %v13192_v43 }
0x14e1   :  { %v4863_v32 = vsel %vm1073_vm6, %v4823_v30, 0.0 }
0x14e2   :  { %4864 = vadd.xlane.f32.xlu1 %v4863_v32 }
0x14e6   :  { %4873 = vadd.xlane.f32.xlu1 %v4872_v38 }
0x14f7   :  { %5616 = vrot.lane.b32.xlu1 %v13102_v48, %s10712_s2 }
0x14fb   :  { %5612 = vrot.lane.b32.xlu1 %v13096_v41, %s10712_s2 }
0x14ff   :  { %5598 = vrot.lane.b32.xlu1 %v13092_v47, %s10713_s15 }
0x1503   :  { %5602 = vrot.lane.b32.xlu1 %v13100_v33, %s10713_s15 }
0x1507   :  { %5606 = vrot.lane.b32.xlu1 %v13104_v26, %s10713_s15 }
0x150b   :  { %5610 = vrot.lane.b32.xlu1 %v13116_v14, %s10713_s15 }
0x150f   :  { %v4775_v35 = vpop.xlane.xlu0 %4774  ;;  %5444 = vrot.lane.b32.xlu1 %v13120_v44, %s10711_s1 }
0x1510   :  { %v4793_v24 = vmul.f32 0.125, %v4775_v35 }
0x1512   :  { %v13215_v7 = vsub.f32 %v13136_v34, %v4793_v24 }
0x1513   :  { %v5192_v62 = vpop.permute.xlu0 %5191  ;;  %5440 = vrot.lane.b32.xlu1 %v13110_v2, %s10711_s1 }
0x1514   :  { %v4825_v28 = vmul.f32 %v13215_v7, %v13215_v7 }
0x1516   :  { %v4869_v4 = vsel %vm1073_vm6, %v4825_v28, 0.0 }
0x1517   :  { %v5196_v21 = vpop.permute.xlu0 %5195  ;;  %4870 = vadd.xlane.f32.xlu0 %v4869_v4  ;;  %5436 = vrot.lane.b32.xlu1 %v13102_v48, %s10711_s1 }
0x151b   :  { %v5202_v49 = vpop.permute.xlu0 %5201  ;;  %5434 = vrot.lane.b32.xlu1 %v13092_v47, %s10711_s1 }
0x151f   :  { %v5206_v42 = vpop.permute.xlu0 %5205  ;;  %5432 = vrot.lane.b32.xlu1 %v13096_v41, %s10711_s1 }
0x1520   :  { %9827 = vmatprep.subr.msk.mxu1 %vm1745_vm10, %v5206_v42 }
0x1521   :  { %9828 = vmatpush3.xpose.msk.msra.mxu1 %vm1745_vm10, %v5206_v42 }
0x1522   :  { %9829 = vmatprep.subr.msk.mxu1 %vm1745_vm10, %v5204_v6 }
0x1525   :  { %9830 = vmatpush3.xpose.msk.msra.mxu1 %vm1745_vm10, %v5204_v6 }
0x1526   :  { %9831 = vmatprep.subr.msk.mxu1 %vm1745_vm10, %v5202_v49 }
0x1529   :  { %9832 = vmatpush3.xpose.msk.msra.mxu1 %vm1745_vm10, %v5202_v49 }
0x152a   :  { %9833 = vmatprep.subr.msk.mxu1 %vm1745_vm10, %v13166_v51 }
0x152d   :  { %5618 = vrot.lane.b32.xlu0 %v13100_v33, %s10712_s2  ;;  %9834 = vmatpush3.xpose.msk.msra.mxu1 %vm1745_vm10, %v13166_v51 }
0x152e   :  { %9835 = vmatprep.subr.msk.mxu1 %vm1745_vm10, %v5198_v20 }
0x1530   :  { %v4856_v51 = vpop.xlane.xlu1 %4855 }
0x1531   :  { %5614 = vrot.lane.b32.xlu0 %v13092_v47, %s10712_s2  ;;  %9836 = vmatpush3.xpose.msk.msra.mxu1 %vm1745_vm10, %v5198_v20  ;;  %v4884_v11 = vmul.f32 0.125, %v4856_v51 }
0x1532   :  { %9837 = vmatprep.subr.msk.mxu1 %vm1745_vm10, %v5196_v21 }
0x1533   :  { %v4900_v17 = vadd.f32 1e-05, %v4884_v11 }
0x1534   :  { %v4862_v9 = vpop.xlane.xlu1 %4861 }
0x1535   :  { %5596 = vrot.lane.b32.xlu0 %v13096_v41, %s10713_s15  ;;  %9838 = vmatpush3.xpose.msk.msra.mxu1 %vm1745_vm10, %v5196_v21  ;;  %v4886_v57 = vmul.f32 0.125, %v4862_v9  ;;  %10460 = vrsqrt.f32 %v4900_v17 }
0x1536   :  { %9839 = vmatprep.subr.msk.mxu1 %vm1745_vm10, %v5194_v3 }
0x1537   :  { %v4902_v53 = vadd.f32 1e-05, %v4886_v57 }
0x1539   :  { %5600 = vrot.lane.b32.xlu0 %v13102_v48, %s10713_s15  ;;  %9840 = vmatpush3.xpose.msk.msra.mxu1 %vm1745_vm10, %v5194_v3  ;;  %10462 = vrsqrt.f32 %v4902_v53  ;;  %v4868_v3 = vpop.xlane.xlu1 %4867 }
0x153a   :  { %9841 = vmatprep.subr.msk.mxu1 %vm1745_vm10, %v5192_v62  ;;  %v4888_v30 = vmul.f32 0.125, %v4868_v3 }
0x153c   :  { %v4904_v35 = vadd.f32 1e-05, %v4888_v30 }
0x153d   :  { %5604 = vrot.lane.b32.xlu0 %v13110_v2, %s10713_s15  ;;  %9842 = vmatpush3.xpose.msk.msra.mxu1 %vm1745_vm10, %v5192_v62 }
0x1540   :  { %9844 = vmatmul.mubr.msk.f32.vlgmr.msra.gmra.mxu1 %vm1745_vm10, %v13092_v47 }
0x1541   :  { %5608 = vrot.lane.b32.xlu0 %v13120_v44, %s10713_s15  ;;  %9846 = vmatprep.mubr.msk.f32.mxu1 %vm1745_vm10, %v13102_v48 }
0x1542   :  { %v10461_v37 = vpop.eup %10460 }
0x1543   :  { %v4932_v0 = vmul.f32 %v10461_v37, %v13145_v50 }
0x1544   :  { %9847 = vmatmul.mubr.msk.f32.gmra.mxu1 %vm1745_vm10, %v13100_v33 }
0x1545   :  { %5446 = vrot.lane.b32.xlu0 %v13116_v14, %s10711_s1  ;;  %9849 = vmatprep.mubr.msk.f32.mxu1 %vm1745_vm10, %v13110_v2  ;;  %v4952_v23 = vmul.f32 %v13015_v25, %v4932_v0 }
0x1546   :  { %v10463_v1 = vpop.eup %10462 }
0x1547   :  { %v4972_v28 = vadd.f32 %v13026_v31, %v4952_v23 }
0x1548   :  { %9850 = vmatmul.mubr.msk.f32.gmra.mxu1 %vm1745_vm10, %v13104_v26 }
0x1549   :  { %5442 = vrot.lane.b32.xlu0 %v13104_v26, %s10711_s1  ;;  %9852 = vmatprep.mubr.msk.f32.mxu1 %vm1745_vm10, %v13120_v44 }
0x154c   :  { %9853 = vmatmul.mubr.msk.f32.gmra.mxu1 %vm1745_vm10, %v13116_v14 }
0x154d   :  { %5438 = vrot.lane.b32.xlu0 %v13100_v33, %s10711_s1 }
0x1550   :  { %v4853_v5 = vpop.xlane.xlu0 %4852 }
0x1551   :  { %v4883_v6 = vmul.f32 0.125, %v4853_v5  ;;  %5867 = vrot.lane.b32.xlu0 %v13116_v14, %s10714_s18  ;;  %v4934_v14 = vmul.f32 %v10463_v1, %v13152_v19 }
0x1553   :  { %v4899_v54 = vadd.f32 1e-05, %v4883_v6  ;;  %v4954_v50 = vmul.f32 %v13015_v25, %v4934_v14 }
0x1554   :  { %v4859_v22 = vpop.xlane.xlu0 %4858 }
0x1555   :  { %10464 = vrsqrt.f32 %v4899_v54  ;;  %v4885_v29 = vmul.f32 0.125, %v4859_v22  ;;  %v4974_v49 = vadd.f32 %v13026_v31, %v4954_v50 }
0x1557   :  { %v4901_v16 = vadd.f32 1e-05, %v4885_v29 }
0x1559   :  { %10466 = vrsqrt.f32 %v4901_v16 }
0x155a   :  { %10468 = vrsqrt.f32 %v4904_v35 }
0x1562   :  { %v10465_v12 = vpop.eup %10464 }
0x1563   :  { %v4931_v32 = vmul.f32 %v10465_v12, %v13171_v36 }
0x1565   :  { %v4951_v38 = vmul.f32 %v13015_v25, %v4931_v32 }
0x1566   :  { %v10467_v20 = vpop.eup %10466 }
0x1567   :  { %v4971_v24 = vadd.f32 %v13026_v31, %v4951_v38  ;;  %v4933_v62 = vmul.f32 %v10467_v20, %v13174_v52  ;;  %v10469_v42 = vpop.eup %10468 }
0x1568   :  { %v4936_v51 = vmul.f32 %v10469_v42, %v13160_v39 }
0x1569   :  { %9815 = vmatprep.mubr.msk.f32.mxu0 %vm1073_vm6, %v4971_v24  ;;  %v4953_v36 = vmul.f32 %v13015_v25, %v4933_v62 }
0x156a   :  { %9816 = vmatmul.mubr.msk.f32.gmra.mxu0 %vm1073_vm6, %v4972_v28  ;;  %v4956_v17 = vmul.f32 %v13015_v25, %v4936_v51 }
0x156b   :  { %v4865_v19 = vpop.xlane.xlu1 %4864  ;;  %v4973_v4 = vadd.f32 %v13026_v31, %v4953_v36 }
0x156c   :  { %v4887_v21 = vmul.f32 0.125, %v4865_v19  ;;  %v4976_v5 = vadd.f32 %v13026_v31, %v4956_v17  ;;  %v13339_v17 = vld [vmem:[%s14490_s10 + $0x80] sm:$0xff] }
0x156d   :  { %9818 = vmatprep.mubr.msk.f32.mxu0 %vm1073_vm6, %v4973_v4 }
0x156e   :  { %v4903_v52 = vadd.f32 1e-05, %v4887_v21  ;;  %9819 = vmatmul.mubr.msk.f32.gmra.mxu0 %vm1073_vm6, %v4974_v49 }
0x156f   :  { %v4874_v6 = vpop.xlane.xlu1 %4873 }
0x1570   :  { %10470 = vrsqrt.f32 %v4903_v52  ;;  %v4890_v29 = vmul.f32 0.125, %v4874_v6 }
0x1572   :  { %v4906_v16 = vadd.f32 1e-05, %v4890_v29 }
0x1573   :  { %v5617_v54 = vpop.permute.xlu1 %5616 }
0x1574   :  { %10472 = vrsqrt.f32 %v4906_v16 }
0x1577   :  { %v5613_v22 = vpop.permute.xlu1 %5612 }
0x157b   :  { %v5599_v39 = vpop.permute.xlu1 %5598 }
0x157d   :  { %v10471_v11 = vpop.eup %10470 }
0x157e   :  { %v4935_v9 = vmul.f32 %v10471_v11, %v13192_v43  ;;  %v13334_v11 = vld [vmem:[%s14490_s10 + $0x88] sm:$0xff] }
0x157f   :  { %v5603_v43 = vpop.permute.xlu1 %5602 }
0x1580   :  { %v4955_v57 = vmul.f32 %v13015_v25, %v4935_v9 }
0x1581   :  { %v10473_v14 = vpop.eup %10472 }
0x1582   :  { %v4975_v53 = vadd.f32 %v13026_v31, %v4955_v57  ;;  %v4938_v20 = vmul.f32 %v10473_v14, %v13189_v13 }
0x1583   :  { %v5607_v12 = vpop.permute.xlu1 %5606 }
0x1584   :  { %9821 = vmatprep.mubr.msk.f32.mxu0 %vm1073_vm6, %v4975_v53  ;;  %v4958_v50 = vmul.f32 %v13015_v25, %v4938_v20 }
0x1585   :  { %9822 = vmatmul.mubr.msk.f32.gmra.mxu0 %vm1073_vm6, %v4976_v5  ;;  %v13345_v5 = vld [vmem:[%s14490_s10 + $0x98] sm:$0xff] }
0x1586   :  { %v4978_v49 = vadd.f32 %v13026_v31, %v4958_v50 }
0x1587   :  { %v5611_v32 = vpop.permute.xlu1 %5610 }
0x158b   :  { %v5445_v24 = vpop.permute.xlu1 %5444 }
0x158f   :  { %v5441_v4 = vpop.permute.xlu1 %5440 }
0x15a0   :  { %v4871_v37 = vpop.xlane.xlu0 %4870 }
0x15a1   :  { %v4889_v3 = vmul.f32 0.125, %v4871_v37  ;;  %v13359_v37 = vld [vmem:[%s14490_s10 + $0xa8] sm:$0xff] }
0x15a3   :  { %v4905_v0 = vadd.f32 1e-05, %v4889_v3 }
0x15a4   :  { %v5619_v1 = vpop.permute.xlu0 %5618 }
0x15a5   :  { %10474 = vrsqrt.f32 %v4905_v0  ;;  %9891 = vmatprep.subr.msk.mxu0 %vm1745_vm10, %v5619_v1 }
0x15a6   :  { %9892 = vmatpush3.xpose.msk.msra.mxu0 %vm1745_vm10, %v5619_v1 }
0x15a7   :  { %9893 = vmatprep.subr.msk.mxu0 %vm1745_vm10, %v5617_v54 }
0x15a8   :  { %v5615_v30 = vpop.permute.xlu0 %5614 }
0x15aa   :  { %9894 = vmatpush3.xpose.msk.msra.mxu0 %vm1745_vm10, %v5617_v54 }
0x15ab   :  { %9895 = vmatprep.subr.msk.mxu0 %vm1745_vm10, %v5615_v30 }
0x15ac   :  { %v5597_v23 = vpop.permute.xlu0 %5596 }
0x15ae   :  { %9896 = vmatpush3.xpose.msk.msra.mxu0 %vm1745_vm10, %v5615_v30 }
0x15af   :  { %9897 = vmatprep.subr.msk.mxu0 %vm1745_vm10, %v5613_v22 }
0x15b0   :  { %v5601_v38 = vpop.permute.xlu0 %5600 }
0x15b2   :  { %v10475_v35 = vpop.eup %10474  ;;  %9898 = vmatpush3.xpose.msk.msra.mxu0 %vm1745_vm10, %v5613_v22 }
0x15b3   :  { %v4937_v62 = vmul.f32 %v10475_v35, %v13215_v7  ;;  %v5437_v7 = vpop.permute.xlu1 %5436 }
0x15b4   :  { %v5605_v28 = vpop.permute.xlu0 %5604 }
0x15b5   :  { %v4957_v36 = vmul.f32 %v13015_v25, %v4937_v62 }
0x15b7   :  { %v4977_v19 = vadd.f32 %v13026_v31, %v4957_v36  ;;  %v5435_v31 = vpop.permute.xlu1 %5434 }
0x15b8   :  { %v5609_v21 = vpop.permute.xlu0 %5608 }
0x15b9   :  { %9824 = vmatprep.mubr.msk.f32.mxu0 %vm1073_vm6, %v4977_v19 }
0x15ba   :  { %9825 = vmatmul.mubr.msk.f32.gmra.mxu0 %vm1073_vm6, %v4978_v49 }
0x15bb   :  { %9899 = vmatprep.mubr.msk.f32.mxu0 %vm1745_vm10, %v5597_v23  ;;  %v5433_v42 = vpop.permute.xlu1 %5432  ;;  %v13372_v23 = vld [vmem:[%s14490_s10 + $0xb8] sm:$0xff] }
0x15bc   :  { %v5447_v13 = vpop.permute.xlu0 %5446 }
0x15bd   :  { %9855 = vmatprep.subr.mxu1 %v5447_v13 }
0x15be   :  { %9856 = vmatpush3.msra.mxu1 %v5447_v13  ;;  %9900 = vmatmul.mubr.msk.f32.vlgmr.msra.gmra.mxu0 %vm1745_vm10, %v5599_v39 }
0x15bf   :  { %9857 = vmatprep.subr.mxu1 %v5445_v24  ;;  %9902 = vmatprep.mubr.msk.f32.mxu0 %vm1745_vm10, %v5601_v38 }
0x15c0   :  { %v5443_v25 = vpop.permute.xlu0 %5442  ;;  %9858 = vmatpush3.msra.mxu1 %v5445_v24 }
0x15c1   :  { %9859 = vmatprep.subr.mxu1 %v5443_v25 }
0x15c2   :  { %9860 = vmatpush3.msra.mxu1 %v5443_v25  ;;  %9903 = vmatmul.mubr.msk.f32.gmra.mxu0 %vm1745_vm10, %v5603_v43  ;;  %v13354_v43 = vld [vmem:[%s14490_s10 + $0x90] sm:$0xff] }
0x15c3   :  { %9861 = vmatprep.subr.mxu1 %v5441_v4  ;;  %9905 = vmatprep.mubr.msk.f32.mxu0 %vm1745_vm10, %v5605_v28  ;;  %v13381_v28 = vld [vmem:[%s14490_s10 + $0xb0] sm:$0xff] }
0x15c4   :  { %v5439_v52 = vpop.permute.xlu0 %5438  ;;  %9862 = vmatpush3.msra.mxu1 %v5441_v4 }
0x15c5   :  { %9863 = vmatprep.subr.mxu1 %v5439_v52 }
0x15c6   :  { %9864 = vmatpush3.msra.mxu1 %v5439_v52  ;;  %9906 = vmatmul.mubr.msk.f32.gmra.mxu0 %vm1745_vm10, %v5607_v12 }
0x15c7   :  { %9865 = vmatprep.subr.mxu1 %v5437_v7  ;;  %9908 = vmatprep.mubr.msk.f32.mxu0 %vm1745_vm10, %v5609_v21 }
0x15c8   :  { %9866 = vmatpush3.msra.mxu1 %v5437_v7  ;;  %v13328_v51 = vpop.permute.xlu0 %5867 }
0x15c9   :  { %9867 = vmatprep.subr.mxu1 %v5435_v31 }
0x15ca   :  { %9868 = vmatpush3.msra.mxu1 %v5435_v31  ;;  %9909 = vmatmul.mubr.msk.f32.gmra.mxu0 %vm1745_vm10, %v5611_v32  ;;  %v13367_v32 = vld [vmem:[%s14490_s10 + $0xa0] sm:$0xff] }
0x15cb   :  { %9869 = vmatprep.subr.mxu1 %v5433_v42 }
0x15cc   :  { %9870 = vmatpush3.msra.mxu1 %v5433_v42 }
0x15cd   :  { %9911 = vmatprep.subr.mxu1 %v13328_v51 }
0x1600   :  { %v9845_v9 = vpop.f32.mrf.mxu1 }
0x1601   :  { %v5311_v57 = vadd.f32 %v9845_v9, %v13334_v11 }
0x1602   :  { %v5305_v53 = vpop.f32.mrf.mxu1 }
0x1603   :  { %v5306_v6 = vadd.f32 %v13339_v17, %v5305_v53  ;;  %v5347_v54 = vsel %vm282_vm1, %v5311_v57, -inf }
0x1604   :  { %5348 = vmax.xlane.f32.xlu1 %v5347_v54  ;;  %v9848_v22 = vpop.f32.mrf.mxu1 }
0x1605   :  { %v5321_v29 = vadd.f32 %v9848_v22, %v13345_v5  ;;  %v5344_v39 = vsel %vm282_vm1, %v5306_v6, -inf }
0x1606   :  { %v5315_v16 = vpop.f32.mrf.mxu1  ;;  %5345 = vmax.xlane.f32.xlu0 %v5344_v39 }
0x1607   :  { %v5316_v0 = vadd.f32 %v13354_v43, %v5315_v16  ;;  %v5353_v12 = vsel %vm282_vm1, %v5321_v29, -inf }
0x1608   :  { %v9851_v3 = vpop.f32.mrf.mxu1 }
0x1609   :  { %v5331_v1 = vadd.f32 %v9851_v3, %v13359_v37  ;;  %v5350_v24 = vsel %vm282_vm1, %v5316_v0, -inf }
0x160a   :  { %v5325_v30 = vpop.f32.mrf.mxu1  ;;  %5354 = vmax.xlane.f32.xlu0 %v5353_v12 }
0x160b   :  { %v5359_v14 = vsel %vm282_vm1, %v5331_v1, -inf  ;;  %v5326_v20 = vadd.f32 %v13367_v32, %v5325_v30 }
0x160c   :  { %5360 = vmax.xlane.f32.xlu1 %v5359_v14  ;;  %v9854_v38 = vpop.f32.mrf.mxu1 }
0x160d   :  { %v5341_v35 = vadd.f32 %v9854_v38, %v13372_v23  ;;  %v5356_v19 = vsel %vm282_vm1, %v5326_v20, -inf }
0x160e   :  { %v5335_v62 = vpop.f32.mrf.mxu1  ;;  %5351 = vmax.xlane.f32.xlu0 %v5350_v24 }
0x160f   :  { %v5365_v50 = vsel %vm282_vm1, %v5341_v35, -inf  ;;  %v13385_v36 = vadd.f32 %v13381_v28, %v5335_v62 }
0x1610   :  { %5366 = vmax.xlane.f32.xlu1 %v5365_v50 }
0x1611   :  { %v5362_v4 = vsel %vm282_vm1, %v13385_v36, -inf }
0x1612   :  { %5357 = vmax.xlane.f32.xlu0 %v5356_v19 }
0x1616   :  { %5363 = vmax.xlane.f32.xlu0 %v5362_v4 }
0x162a   :  { %v13390_v21 = vpop.f32.mrf.mxu0 }
0x162c   :  { %v13392_v49 = vpop.f32.mrf.mxu0 }
0x162e   :  { %v13394_v13 = vpop.f32.mrf.mxu0 }
0x1630   :  { %v13396_v7 = vpop.f32.mrf.mxu0 }
0x1645   :  { %v13398_v25 = vpop.f32.mrf.mxu0 }
0x1647   :  { %v13400_v54 = vpop.f32.mrf.mxu0 }
0x167a   :  { %v13402_v39 = vpop.f32.mrf.mxu0 }
0x167c   :  { %v13404_v14 = vpop.f32.mrf.mxu0 }
0x167e   :  { %v9901_v50 = vpop.f32.mrf.mxu0 }
0x168d   :  { %v5349_v31 = vpop.xlane.xlu1 %5348 }
0x168e   :  { %v5369_v52 = vsub.f32 %v5311_v57, %v5349_v31  ;;  %v8617_v31 = vld [vmem:[%s14490_s10 + $0xc8] sm:$0xff] }
0x168f   :  { %v5346_v42 = vpop.xlane.xlu0 %5345 }
0x1690   :  { %v5378_v9 = vmul.f32 1.442695, %v5369_v52  ;;  %v5368_v53 = vsub.f32 %v5306_v6, %v5346_v42 }
0x1692   :  { %10476 = vpow2.f32 %v5378_v9  ;;  %v5376_v22 = vmul.f32 1.442695, %v5368_v53  ;;  %v5726_v9 = vpop.f32.mrf.mxu0 }
0x1693   :  { %v5355_v16 = vpop.xlane.xlu0 %5354 }
0x1694   :  { %10478 = vpow2.f32 %v5376_v22  ;;  %v5371_v3 = vsub.f32 %v5321_v29, %v5355_v16 }
0x1695   :  { %v5361_v12 = vpop.xlane.xlu1 %5360 }
0x1696   :  { %v5382_v30 = vmul.f32 1.442695, %v5371_v3  ;;  %v5373_v24 = vsub.f32 %v5331_v1, %v5361_v12  ;;  %v8616_v1 = vld [vmem:[%s14490_s10 + $0xc0] sm:$0xff]  ;;  %v9904_v12 = vpop.f32.mrf.mxu0 }
0x1697   :  { %v5352_v38 = vpop.xlane.xlu0 %5351  ;;  %v13420_v16 = vadd.f32 %v8616_v1, %v5726_v9 }
0x1698   :  { %10480 = vpow2.f32 %v5382_v30  ;;  %v5370_v57 = vsub.f32 %v5316_v0, %v5352_v38  ;;  %v5386_v19 = vmul.f32 1.442695, %v5373_v24  ;;  %v13414_v0 = vadd.f32 %v9901_v50, %v8617_v31  ;;  %v8618_v50 = vld [vmem:[%s14490_s10 + $0xd0] sm:$0xff] }
0x1699   :  { %v5367_v52 = vpop.xlane.xlu1 %5366 }
0x169a   :  { %v5380_v62 = vmul.f32 1.442695, %v5370_v57  ;;  %v5375_v53 = vsub.f32 %v5341_v35, %v5367_v52  ;;  %v5768_v38 = vsel %vm282_vm1, %v13414_v0, -inf  ;;  %v8619_v35 = vld [vmem:[%s14490_s10 + $0xd8] sm:$0xff]  ;;  %v5765_v57 = vsel %vm282_vm1, %v13420_v16, -inf }
0x169b   :  { %v5358_v6 = vpop.xlane.xlu0 %5357 }
0x169c   :  { %10482 = vpow2.f32 %v5380_v62  ;;  %v5372_v4 = vsub.f32 %v5326_v20, %v5358_v6  ;;  %v5390_v30 = vmul.f32 1.442695, %v5375_v53  ;;  %v5736_v62 = vpop.f32.mrf.mxu0  ;;  %v13436_v6 = vadd.f32 %v9904_v12, %v8619_v35  ;;  %v8621_v53 = vld [vmem:[%s14490_s10 + $0xe8] sm:$0xff] }
0x169d   :  { %10484 = vpow2.f32 %v5386_v19  ;;  %v13442_v31 = vadd.f32 %v8618_v50, %v5736_v62 }
0x169e   :  { %v5384_v29 = vmul.f32 1.442695, %v5372_v4  ;;  %v5774_v9 = vsel %vm282_vm1, %v13436_v6, -inf }
0x169f   :  { %v13409_v42 = vpop.eup %10476 }
0x16a0   :  { %v5395_v20 = vsel %vm282_vm1, %v13409_v42, 0.0  ;;  %10486 = vpow2.f32 %v5384_v29  ;;  %v9907_v29 = vpop.f32.mrf.mxu0 }
0x16a1   :  { %v13418_v22 = vpop.eup %10478  ;;  %5396 = vadd.xlane.f32.xlu1 %v5395_v20  ;;  %10488 = vpow2.f32 %v5390_v30  ;;  %v5771_v20 = vsel %vm282_vm1, %v13442_v31, -inf  ;;  %v8620_v30 = vld [vmem:[%s14490_s10 + $0xe0] sm:$0xff] }
0x16a2   :  { %v5392_v3 = vsel %vm282_vm1, %v13418_v22, 0.0  ;;  %v5746_v12 = vpop.f32.mrf.mxu0 }
0x16a3   :  { %5393 = vadd.xlane.f32.xlu0 %v5392_v3 }
0x16a5   :  { %v13426_v24 = vpop.eup %10480  ;;  %5769 = vmax.xlane.f32.xlu1 %v5768_v38  ;;  %v13460_v38 = vadd.f32 %v9907_v29, %v8621_v53  ;;  %v9910_v29 = vpop.f32.mrf.mxu0 }
0x16a6   :  { %v5401_v19 = vsel %vm282_vm1, %v13426_v24, 0.0 }
0x16a7   :  { %5766 = vmax.xlane.f32.xlu0 %v5765_v57  ;;  %v13464_v57 = vadd.f32 %v8620_v30, %v5746_v12  ;;  %v5780_v50 = vsel %vm282_vm1, %v13460_v38, -inf  ;;  %v5364_v30 = vpop.xlane.xlu0 %5363 }
0x16a9   :  { %v13440_v4 = vpop.eup %10482  ;;  %5402 = vadd.xlane.f32.xlu1 %v5401_v19 }
0x16aa   :  { %v5398_v52 = vsel %vm282_vm1, %v13440_v4, 0.0  ;;  %v13448_v1 = vpop.eup %10484 }
0x16ab   :  { %5399 = vadd.xlane.f32.xlu0 %v5398_v52  ;;  %v5407_v35 = vsel %vm282_vm1, %v13448_v1, 0.0  ;;  %v8623_v52 = vld [vmem:[%s14490_s10 + $0xf8] sm:$0xff] }
0x16ac   :  { %v13477_v53 = vadd.f32 %v9910_v29, %v8623_v52  ;;  %v5756_v52 = vpop.f32.mrf.mxu0 }
0x16ad   :  { %5775 = vmax.xlane.f32.xlu1 %v5774_v9  ;;  %v13455_v3 = vpop.eup %10486  ;;  %v5777_v9 = vsel %vm282_vm1, %v13464_v57, -inf }
0x16ae   :  { %v5404_v62 = vsel %vm282_vm1, %v13455_v3, 0.0  ;;  %v13470_v19 = vpop.eup %10488  ;;  %v5786_v12 = vsel %vm282_vm1, %v13477_v53, -inf }
0x16af   :  { %5772 = vmax.xlane.f32.xlu0 %v5771_v20  ;;  %v5413_v20 = vsel %vm282_vm1, %v13470_v19, 0.0 }
0x16b1   :  { %5408 = vadd.xlane.f32.xlu1 %v5407_v35  ;;  %v5374_v35 = vsub.f32 %v13385_v36, %v5364_v30 }
0x16b3   :  { %5405 = vadd.xlane.f32.xlu0 %v5404_v62  ;;  %v5388_v62 = vmul.f32 1.442695, %v5374_v35 }
0x16b5   :  { %5781 = vmax.xlane.f32.xlu1 %v5780_v50  ;;  %10490 = vpow2.f32 %v5388_v62 }
0x16b7   :  { %5778 = vmax.xlane.f32.xlu0 %v5777_v9 }
0x16b9   :  { %5414 = vadd.xlane.f32.xlu1 %v5413_v20 }
0x16bd   :  { %5787 = vmax.xlane.f32.xlu1 %v5786_v12 }
0x16c2   :  { %v13492_v50 = vpop.eup %10490 }
0x16cd   :  { %5863 = vrot.lane.b32.xlu0 %v13104_v26, %s10714_s18  ;;  %v8622_v26 = vld [vmem:[%s14490_s10 + $0xf0] sm:$0xff] }
0x16ce   :  { %5865 = vrot.lane.b32.xlu1 %v13120_v44, %s10714_s18  ;;  %v13497_v29 = vadd.f32 %v8622_v26, %v5756_v52 }
0x16d1   :  { %5861 = vrot.lane.b32.xlu0 %v13110_v2, %s10714_s18  ;;  %v5410_v2 = vsel %vm282_vm1, %v13492_v50, 0.0 }
0x16d5   :  { %5859 = vrot.lane.b32.xlu0 %v13100_v33, %s10714_s18  ;;  %v5783_v33 = vsel %vm282_vm1, %v13497_v29, -inf }
0x16f4   :  { %5411 = vadd.xlane.f32.xlu0 %v5410_v2 }
0x16f8   :  { %5784 = vmax.xlane.f32.xlu0 %v5783_v33 }
0x172a   :  { %v5397_v44 = vpop.xlane.xlu1 %5396 }
0x172b   :  { %10492 = vrcp.f32 %v5397_v44 }
0x172c   :  { %v5394_v36 = vpop.xlane.xlu0 %5393 }
0x172d   :  { %10494 = vrcp.f32 %v5394_v36 }
0x172e   :  { %v5770_v9 = vpop.xlane.xlu1 %5769 }
0x172f   :  { %v5790_v20 = vsub.f32 %v13414_v0, %v5770_v9 }
0x1730   :  { %v5767_v12 = vpop.xlane.xlu0 %5766 }
0x1731   :  { %v5799_v30 = vmul.f32 1.442695, %v5790_v20  ;;  %v5789_v35 = vsub.f32 %v13420_v16, %v5767_v12 }
0x1732   :  { %v5403_v62 = vpop.xlane.xlu1 %5402 }
0x1733   :  { %10496 = vpow2.f32 %v5799_v30  ;;  %v5797_v52 = vmul.f32 1.442695, %v5789_v35 }
0x1734   :  { %10498 = vrcp.f32 %v5403_v62  ;;  %v5400_v26 = vpop.xlane.xlu0 %5399 }
0x1735   :  { %10500 = vpow2.f32 %v5797_v52 }
0x1736   :  { %10502 = vrcp.f32 %v5400_v26  ;;  %v5776_v2 = vpop.xlane.xlu1 %5775 }
0x1737   :  { %v5792_v33 = vsub.f32 %v13436_v6, %v5776_v2 }
0x1738   :  { %v5773_v44 = vpop.xlane.xlu0 %5772  ;;  %v10493_v34 = vpop.eup %10492 }
0x1739   :  { %v5803_v36 = vmul.f32 1.442695, %v5792_v33  ;;  %v5425_v16 = vmul.f32 %v10493_v34, %v13409_v42 }
0x173a   :  { %v10495_v55 = vpop.eup %10494  ;;  %v5409_v18 = vpop.xlane.xlu1 %5408 }
0x173b   :  { %10504 = vpow2.f32 %v5803_v36  ;;  %v5424_v0 = vmul.f32 %v10495_v55, %v13418_v22 }
0x173c   :  { %v5406_v9 = vpop.xlane.xlu0 %5405  ;;  %10506 = vrcp.f32 %v5409_v18 }
0x173d   :  { %9871 = vmatprep.mubr.msk.f32.mxu1 %vm282_vm1, %v5424_v0  ;;  %10508 = vrcp.f32 %v5406_v9 }
0x173e   :  { %9872 = vmatmul.mubr.msk.f32.vlgmr.msra.gmra.mxu1 %vm282_vm1, %v5425_v16  ;;  %v5782_v20 = vpop.xlane.xlu1 %5781 }
0x173f   :  { %9912 = vmatpush3.msra.mxu1 %v13328_v51 }
0x1740   :  { %v13511_v6 = vpop.eup %10496  ;;  %v5779_v12 = vpop.xlane.xlu0 %5778 }
0x1741   :  { %v10499_v30 = vpop.eup %10498  ;;  %v5816_v35 = vsel %vm282_vm1, %v13511_v6, 0.0 }
0x1742   :  { %v13515_v55 = vpop.eup %10500  ;;  %5817 = vadd.xlane.f32.xlu0 %v5816_v35  ;;  %v5415_v34 = vpop.xlane.xlu1 %5414  ;;  %v5427_v51 = vmul.f32 %v10499_v30, %v13426_v24  ;;  %v5791_v30 = vsub.f32 %v13442_v31, %v5773_v44  ;;  %v5794_v35 = vsub.f32 %v13460_v38, %v5782_v20 }
0x1743   :  { %v10503_v18 = vpop.eup %10502  ;;  %v5813_v42 = vsel %vm282_vm1, %v13515_v55, 0.0 }
0x1744   :  { %v5864_v22 = vpop.permute.xlu0 %5863  ;;  %5814 = vadd.xlane.f32.xlu1 %v5813_v42  ;;  %v5426_v62 = vmul.f32 %v10503_v18, %v13440_v4  ;;  %v5807_v42 = vmul.f32 1.442695, %v5794_v35 }
0x1746   :  { %9874 = vmatprep.mubr.msk.f32.mxu1 %vm282_vm1, %v5426_v62  ;;  %v5788_v52 = vpop.xlane.xlu1 %5787 }
0x1747   :  { %9875 = vmatmul.mubr.msk.f32.gmra.mxu1 %vm282_vm1, %v5427_v51 }
0x1748   :  { %v13523_v26 = vpop.eup %10504  ;;  %v5862_v36 = vpop.permute.xlu0 %5861 }
0x1749   :  { %v5822_v2 = vsel %vm282_vm1, %v13523_v26, 0.0  ;;  %v10507_v33 = vpop.eup %10506 }
0x174a   :  { %5823 = vadd.xlane.f32.xlu0 %v5822_v2  ;;  %v5866_v0 = vpop.permute.xlu1 %5865  ;;  %v10509_v16 = vpop.eup %10508  ;;  %v5429_v24 = vmul.f32 %v10507_v33, %v13448_v1  ;;  %v5793_v1 = vsub.f32 %v13464_v57, %v5779_v12 }
0x174b   :  { %9913 = vmatprep.subr.mxu1 %v5866_v0  ;;  %v5428_v4 = vmul.f32 %v10509_v16, %v13455_v3  ;;  %v5801_v3 = vmul.f32 1.442695, %v5791_v30 }
0x174c   :  { %9914 = vmatpush3.msra.mxu1 %v5866_v0  ;;  %v5860_v9 = vpop.permute.xlu0 %5859  ;;  %v5805_v18 = vmul.f32 1.442695, %v5793_v1 }
0x174d   :  { %9915 = vmatprep.subr.mxu1 %v5864_v22  ;;  %9877 = vmatprep.mubr.msk.f32.mxu1 %vm282_vm1, %v5428_v4  ;;  %10510 = vpow2.f32 %v5801_v3 }
0x174e   :  { %9916 = vmatpush3.msra.mxu1 %v5864_v22  ;;  %10512 = vpow2.f32 %v5805_v18  ;;  %v5796_v22 = vsub.f32 %v13477_v53, %v5788_v52 }
0x174f   :  { %9878 = vmatmul.mubr.msk.f32.gmra.mxu1 %vm282_vm1, %v5429_v24  ;;  %9917 = vmatprep.subr.mxu1 %v5862_v36  ;;  %10514 = vpow2.f32 %v5807_v42 }
0x1750   :  { %9918 = vmatpush3.msra.mxu1 %v5862_v36  ;;  %v5811_v62 = vmul.f32 1.442695, %v5796_v22 }
0x1751   :  { %9919 = vmatprep.subr.mxu1 %v5860_v9 }
0x1752   :  { %9920 = vmatpush3.msra.mxu1 %v5860_v9  ;;  %10516 = vpow2.f32 %v5811_v62 }
0x1753   :  { %10518 = vrcp.f32 %v5415_v34 }
0x1755   :  { %5857 = vrot.lane.b32.xlu1 %v13102_v48, %s10714_s18 }
0x175a   :  { %v13539_v48 = vpop.eup %10510 }
0x175b   :  { %v5819_v31 = vsel %vm282_vm1, %v13539_v48, 0.0 }
0x1760   :  { %5855 = vrot.lane.b32.xlu0 %v13092_v47, %s10714_s18  ;;  %v13543_v47 = vpop.eup %10512 }
0x1761   :  { %v5825_v57 = vsel %vm282_vm1, %v13543_v47, 0.0  ;;  %v13547_v38 = vpop.eup %10514 }
0x1762   :  { %v5828_v53 = vsel %vm282_vm1, %v13547_v38, 0.0  ;;  %v13551_v20 = vpop.eup %10516 }
0x1763   :  { %v5834_v2 = vsel %vm282_vm1, %v13551_v20, 0.0  ;;  %v10519_v33 = vpop.eup %10518 }
0x1764   :  { %v5431_v0 = vmul.f32 %v10519_v33, %v13470_v19 }
0x1779   :  { %5820 = vadd.xlane.f32.xlu1 %v5819_v31 }
0x177d   :  { %v5412_v44 = vpop.xlane.xlu0 %5411  ;;  %5826 = vadd.xlane.f32.xlu1 %v5825_v57 }
0x177e   :  { %10520 = vrcp.f32 %v5412_v44 }
0x1781   :  { %v5785_v12 = vpop.xlane.xlu0 %5784  ;;  %5829 = vadd.xlane.f32.xlu1 %v5828_v53 }
0x1782   :  { %v5795_v51 = vsub.f32 %v13497_v29, %v5785_v12  ;;  %v8648_v29 = vld [vmem:[%s14487_s7 + $0xc] sm:$0xf] }
0x1783   :  { %9939 = vmatprep.subr.msk.mxu0 %vm2570_vm11, %v8648_v29 }
0x1784   :  { %v5809_v52 = vmul.f32 1.442695, %v5795_v51  ;;  %9940 = vmatpush3.msk.msra.mxu0 %vm2570_vm11, %v8648_v29  ;;  %v13622_v51 = vld [vmem:[%s14487_s7 + $0x8] sm:$0xf] }
0x1785   :  { %5835 = vadd.xlane.f32.xlu1 %v5834_v2 }
0x1786   :  { %10522 = vpow2.f32 %v5809_v52 }
0x178b   :  { %v10521_v34 = vpop.eup %10520 }
0x178c   :  { %v5430_v36 = vmul.f32 %v10521_v34, %v13492_v50 }
0x178e   :  { %9880 = vmatprep.mubr.msk.f32.mxu1 %vm282_vm1, %v5430_v36 }
0x178f   :  { %9881 = vmatmul.mubr.msk.f32.gmra.mxu1 %vm282_vm1, %v5431_v0 }
0x1793   :  { %v13564_v16 = vpop.eup %10522 }
0x1794   :  { %v5831_v4 = vsel %vm282_vm1, %v13564_v16, 0.0 }
0x1795   :  { %5832 = vadd.xlane.f32.xlu0 %v5831_v4 }
0x1796   :  { %6294 = vrot.lane.b32.xlu1 %v13402_v39, %s10710_s19 }
0x179a   :  { %6292 = vrot.lane.b32.xlu1 %v13404_v14, %s10710_s19 }
0x179e   :  { %6288 = vrot.lane.b32.xlu1 %v13400_v54, %s10710_s19 }
0x17a2   :  { %6284 = vrot.lane.b32.xlu1 %v13396_v7, %s10710_s19 }
0x17a6   :  { %6280 = vrot.lane.b32.xlu1 %v13392_v49, %s10710_s19 }
0x17aa   :  { %6533 = vrot.lane.b32.xlu1 %v13404_v14, %s10711_s1 }
0x17ab   :  { %5853 = vrot.lane.b32.xlu0 %v13096_v41, %s10714_s18 }
0x17ae   :  { %6531 = vrot.lane.b32.xlu1 %v13398_v25, %s10711_s1 }
0x17af   :  { %6290 = vrot.lane.b32.xlu0 %v13398_v25, %s10710_s19 }
0x17b2   :  { %6529 = vrot.lane.b32.xlu1 %v13400_v54, %s10711_s1 }
0x17b3   :  { %6286 = vrot.lane.b32.xlu0 %v13394_v13, %s10710_s19 }
0x17b6   :  { %6525 = vrot.lane.b32.xlu1 %v13396_v7, %s10711_s1 }
0x17b7   :  { %6282 = vrot.lane.b32.xlu0 %v13390_v21, %s10710_s19 }
0x17ba   :  { %6521 = vrot.lane.b32.xlu1 %v13392_v49, %s10711_s1 }
0x17bb   :  { %6535 = vrot.lane.b32.xlu0 %v13402_v39, %s10711_s1 }
0x17be   :  { %6702 = vrot.lane.b32.xlu1 %v13404_v14, %s10712_s2 }
0x17bf   :  { %6527 = vrot.lane.b32.xlu0 %v13394_v13, %s10711_s1 }
0x17c3   :  { %6523 = vrot.lane.b32.xlu0 %v13390_v21, %s10711_s1 }
0x17c7   :  { %6704 = vrot.lane.b32.xlu0 %v13402_v39, %s10712_s2 }
0x17cb   :  { %v5818_v19 = vpop.xlane.xlu0 %5817 }
0x17cd   :  { %v5815_v41 = vpop.xlane.xlu1 %5814 }
0x17ce   :  { %10524 = vrcp.f32 %v5815_v41 }
0x17cf   :  { %10526 = vrcp.f32 %v5818_v19 }
0x17d1   :  { %v5858_v50 = vpop.permute.xlu1 %5857 }
0x17d2   :  { %9921 = vmatprep.subr.mxu1 %v5858_v50 }
0x17d3   :  { %v5824_v24 = vpop.xlane.xlu0 %5823  ;;  %9922 = vmatpush3.msra.mxu1 %v5858_v50 }
0x17d7   :  { %v5856_v9 = vpop.permute.xlu0 %5855 }
0x17d8   :  { %9923 = vmatprep.subr.mxu1 %v5856_v9 }
0x17d9   :  { %9924 = vmatpush3.msra.mxu1 %v5856_v9 }
0x17db   :  { %v10525_v30 = vpop.eup %10524 }
0x17dc   :  { %v5845_v3 = vmul.f32 %v10525_v30, %v13515_v55  ;;  %v10527_v44 = vpop.eup %10526 }
0x17dd   :  { %v5846_v52 = vmul.f32 %v10527_v44, %v13511_v6 }
0x17de   :  { %9927 = vmatprep.mubr.msk.f32.mxu1 %vm282_vm1, %v5845_v3 }
0x17fe   :  { %v9873_v41 = vpop.f32.mrf.mxu1 }
0x1800   :  { %v5546_v30 = vpop.f32.mrf.mxu1 }
0x1802   :  { %v5821_v1 = vpop.xlane.xlu1 %5820 }
0x1803   :  { %10528 = vrcp.f32 %v5821_v1 }
0x1804   :  { %10530 = vrcp.f32 %v5824_v24 }
0x1806   :  { %v5827_v35 = vpop.xlane.xlu1 %5826 }
0x1807   :  { %10532 = vrcp.f32 %v5827_v35 }
0x180a   :  { %v5830_v18 = vpop.xlane.xlu1 %5829 }
0x180b   :  { %10534 = vrcp.f32 %v5830_v18 }
0x180e   :  { %v5836_v42 = vpop.xlane.xlu1 %5835 }
0x180f   :  { %10536 = vrcp.f32 %v5836_v42 }
0x1810   :  { %v10529_v53 = vpop.eup %10528 }
0x1811   :  { %v10531_v2 = vpop.eup %10530  ;;  %v5847_v34 = vmul.f32 %v10529_v53, %v13539_v48 }
0x1812   :  { %v13609_v22 = vpop.permute.xlu1 %6294  ;;  %v5848_v6 = vmul.f32 %v10531_v2, %v13523_v26 }
0x1813   :  { %9967 = vmatprep.subr.msk.mxu0 %vm1745_vm10, %v13609_v22 }
0x1814   :  { %v10533_v36 = vpop.eup %10532 }
0x1815   :  { %v5849_v4 = vmul.f32 %v10533_v36, %v13543_v47  ;;  %v9876_v47 = vpop.f32.mrf.mxu1 }
0x1816   :  { %v13613_v62 = vpop.permute.xlu1 %6292 }
0x1818   :  { %v10535_v29 = vpop.eup %10534 }
0x1819   :  { %v5850_v24 = vmul.f32 %v10535_v29, %v13547_v38  ;;  %v5556_v38 = vpop.f32.mrf.mxu1 }
0x181a   :  { %v13615_v31 = vpop.permute.xlu1 %6288 }
0x181b   :  { %v9879_v42 = vpop.f32.mrf.mxu1 }
0x181c   :  { %v10537_v50 = vpop.eup %10536 }
0x181d   :  { %v5852_v1 = vmul.f32 %v10537_v50, %v13551_v20  ;;  %v5566_v44 = vpop.f32.mrf.mxu1 }
0x181e   :  { %v5833_v55 = vpop.xlane.xlu0 %5832  ;;  %v13617_v57 = vpop.permute.xlu1 %6284 }
0x181f   :  { %10538 = vrcp.f32 %v5833_v55 }
0x1822   :  { %v5854_v12 = vpop.permute.xlu0 %5853  ;;  %v13625_v33 = vpop.permute.xlu1 %6280 }
0x1823   :  { %9925 = vmatprep.subr.mxu1 %v5854_v12 }
0x1824   :  { %9926 = vmatpush3.msra.mxu1 %v5854_v12 }
0x1825   :  { %9928 = vmatmul.mubr.msk.f32.vlgmr.msra.gmra.mxu1 %vm282_vm1, %v5846_v52  ;;  %9953 = vmatprep.subr.msk.mxu1 %vm2570_vm11, %v13622_v51 }
0x1826   :  { %v13631_v0 = vpop.permute.xlu0 %6290  ;;  %9930 = vmatprep.mubr.msk.f32.mxu1 %vm282_vm1, %v5847_v34  ;;  %9954 = vmatpush3.msk.msra.mxu1 %vm2570_vm11, %v13622_v51  ;;  %v6534_v48 = vpop.permute.xlu1 %6533 }
0x1829   :  { %9931 = vmatmul.mubr.msk.f32.gmra.mxu1 %vm282_vm1, %v5848_v6 }
0x182a   :  { %v13639_v19 = vpop.permute.xlu0 %6286  ;;  %9933 = vmatprep.mubr.msk.f32.mxu1 %vm282_vm1, %v5849_v4  ;;  %v6532_v35 = vpop.permute.xlu1 %6531 }
0x182c   :  { %v10539_v9 = vpop.eup %10538 }
0x182d   :  { %9934 = vmatmul.mubr.msk.f32.gmra.mxu1 %vm282_vm1, %v5850_v24  ;;  %v5851_v26 = vmul.f32 %v10539_v9, %v13564_v16 }
0x182e   :  { %v13645_v3 = vpop.permute.xlu0 %6282  ;;  %v6530_v55 = vpop.permute.xlu1 %6529 }
0x182f   :  { %9936 = vmatprep.mubr.msk.f32.mxu1 %vm282_vm1, %v5851_v26 }
0x1831   :  { %9937 = vmatmul.mubr.msk.f32.gmra.mxu1 %vm282_vm1, %v5852_v1 }
0x1832   :  { %v6536_v18 = vpop.permute.xlu0 %6535  ;;  %9955 = vmatprep.mubr.msk.f32.mxu1 %vm1745_vm10, %v5546_v30  ;;  %v6526_v20 = vpop.permute.xlu1 %6525 }
0x1833   :  { %9995 = vmatprep.subr.mxu1 %v6536_v18 }
0x1835   :  { %9956 = vmatmul.mubr.msk.f32.vlgmr.msra.gmra.mxu1 %vm1745_vm10, %v9873_v41 }
0x1836   :  { %9996 = vmatpush3.msra.mxu1 %v6536_v18  ;;  %9958 = vmatprep.mubr.msk.f32.mxu1 %vm1745_vm10, %v5556_v38  ;;  %v6528_v16 = vpop.permute.xlu0 %6527  ;;  %v6522_v12 = vpop.permute.xlu1 %6521 }
0x1837   :  { %9997 = vmatprep.subr.mxu1 %v6534_v48 }
0x1838   :  { %9998 = vmatpush3.msra.mxu1 %v6534_v48 }
0x1839   :  { %9999 = vmatprep.subr.mxu1 %v6532_v35  ;;  %9959 = vmatmul.mubr.msk.f32.gmra.mxu1 %vm1745_vm10, %v9876_v47 }
0x183a   :  { %10000 = vmatpush3.msra.mxu1 %v6532_v35  ;;  %9961 = vmatprep.mubr.msk.f32.mxu1 %vm1745_vm10, %v5566_v44  ;;  %v6524_v53 = vpop.permute.xlu0 %6523 }
0x183b   :  { %10001 = vmatprep.subr.mxu1 %v6530_v55 }
0x183c   :  { %10002 = vmatpush3.msra.mxu1 %v6530_v55 }
0x183d   :  { %10003 = vmatprep.subr.mxu1 %v6528_v16  ;;  %9962 = vmatmul.mubr.msk.f32.gmra.mxu1 %vm1745_vm10, %v9879_v42 }
0x183e   :  { %10004 = vmatpush3.msra.mxu1 %v6528_v16  ;;  %v13656_v52 = vpop.permute.xlu0 %6704 }
0x183f   :  { %10005 = vmatprep.subr.mxu1 %v6526_v20 }
0x1840   :  { %10006 = vmatpush3.msra.mxu1 %v6526_v20 }
0x1841   :  { %10007 = vmatprep.subr.mxu1 %v6524_v53 }
0x1842   :  { %10008 = vmatpush3.msra.mxu1 %v6524_v53 }
0x1843   :  { %10009 = vmatprep.subr.mxu1 %v6522_v12 }
0x1844   :  { %10010 = vmatpush3.msra.mxu1 %v6522_v12 }
0x1845   :  { %10023 = vmatprep.subr.msk.mxu1 %vm1745_vm10, %v13656_v52 }
0x184f   :  { %v9882_v2 = vpop.f32.mrf.mxu1 }
0x1851   :  { %v5576_v34 = vpop.f32.mrf.mxu1 }
0x1852   :  { %9964 = vmatprep.mubr.msk.f32.mxu1 %vm1745_vm10, %v5576_v34 }
0x1853   :  { %9965 = vmatmul.mubr.msk.f32.gmra.mxu1 %vm1745_vm10, %v9882_v2 }
0x18e5   :  { %v9929_v36 = vpop.f32.mrf.mxu1 }
0x18e7   :  { %v5967_v6 = vpop.f32.mrf.mxu1 }
0x18e8   :  { %9941 = vmatprep.mubr.msk.f32.mxu0 %vm1745_vm10, %v5967_v6 }
0x18e9   :  { %v9932_v29 = vpop.f32.mrf.mxu1  ;;  %9942 = vmatmul.mubr.msk.f32.vlgmr.msra.gmra.mxu0 %vm1745_vm10, %v9929_v36 }
0x18ea   :  { %9968 = vmatpush3.xpose.msk.msra.mxu0 %vm1745_vm10, %v13609_v22 }
0x18eb   :  { %9969 = vmatprep.subr.msk.mxu0 %vm1745_vm10, %v13613_v62  ;;  %v5977_v4 = vpop.f32.mrf.mxu1 }
0x18ec   :  { %9944 = vmatprep.mubr.msk.f32.mxu0 %vm1745_vm10, %v5977_v4 }
0x18ed   :  { %v9935_v41 = vpop.f32.mrf.mxu1  ;;  %9945 = vmatmul.mubr.msk.f32.gmra.mxu0 %vm1745_vm10, %v9932_v29 }
0x18ee   :  { %9970 = vmatpush3.xpose.msk.msra.mxu0 %vm1745_vm10, %v13613_v62 }
0x18ef   :  { %9971 = vmatprep.subr.msk.mxu0 %vm1745_vm10, %v13631_v0  ;;  %v5987_v48 = vpop.f32.mrf.mxu1 }
0x18f0   :  { %9947 = vmatprep.mubr.msk.f32.mxu0 %vm1745_vm10, %v5987_v48 }
0x18f1   :  { %v9938_v50 = vpop.f32.mrf.mxu1  ;;  %9948 = vmatmul.mubr.msk.f32.gmra.mxu0 %vm1745_vm10, %v9935_v41 }
0x18f2   :  { %9972 = vmatpush3.xpose.msk.msra.mxu0 %vm1745_vm10, %v13631_v0 }
0x18f3   :  { %9973 = vmatprep.subr.msk.mxu0 %vm1745_vm10, %v13615_v31  ;;  %v5997_v22 = vpop.f32.mrf.mxu1 }
0x18f4   :  { %9950 = vmatprep.mubr.msk.f32.mxu0 %vm1745_vm10, %v5997_v22 }
0x18f5   :  { %9951 = vmatmul.mubr.msk.f32.gmra.mxu0 %vm1745_vm10, %v9938_v50 }
0x18f6   :  { %9974 = vmatpush3.xpose.msk.msra.mxu0 %vm1745_vm10, %v13615_v31  ;;  %9983 = vmatprep.mubr.msk.f32.mxu0 %vm1745_vm10, %v13392_v49 }
0x18f7   :  { %9975 = vmatprep.subr.msk.mxu0 %vm1745_vm10, %v13639_v19 }
0x18fa   :  { %9976 = vmatpush3.xpose.msk.msra.mxu0 %vm1745_vm10, %v13639_v19 }
0x18fb   :  { %9977 = vmatprep.subr.msk.mxu0 %vm1745_vm10, %v13617_v57 }
0x18fe   :  { %9978 = vmatpush3.xpose.msk.msra.mxu0 %vm1745_vm10, %v13617_v57 }
0x18ff   :  { %9979 = vmatprep.subr.msk.mxu0 %vm1745_vm10, %v13645_v3 }
0x1902   :  { %9980 = vmatpush3.xpose.msk.msra.mxu0 %vm1745_vm10, %v13645_v3 }
0x1903   :  { %9981 = vmatprep.subr.msk.mxu0 %vm1745_vm10, %v13625_v33 }
0x1906   :  { %9982 = vmatpush3.xpose.msk.msra.mxu0 %vm1745_vm10, %v13625_v33 }
0x1909   :  { %9984 = vmatmul.mubr.msk.f32.vlgmr.msra.gmra.mxu0 %vm1745_vm10, %v13390_v21 }
0x190a   :  { %9986 = vmatprep.mubr.msk.f32.mxu0 %vm1745_vm10, %v13396_v7 }
0x190d   :  { %9987 = vmatmul.mubr.msk.f32.gmra.mxu0 %vm1745_vm10, %v13394_v13 }
0x190e   :  { %9989 = vmatprep.mubr.msk.f32.mxu0 %vm1745_vm10, %v13400_v54 }
0x1911   :  { %9990 = vmatmul.mubr.msk.f32.gmra.mxu0 %vm1745_vm10, %v13398_v25 }
0x1912   :  { %9992 = vmatprep.mubr.msk.f32.mxu0 %vm1745_vm10, %v13404_v14 }
0x1915   :  { %9993 = vmatmul.mubr.msk.f32.gmra.mxu0 %vm1745_vm10, %v13402_v39 }
0x19a9   :  { %v13716_v62 = vpop.f32.mrf.mxu0 }
0x19ab   :  { %v13718_v31 = vpop.f32.mrf.mxu0 }
0x19ad   :  { %v13720_v57 = vpop.f32.mrf.mxu0 }
0x19af   :  { %v13722_v33 = vpop.f32.mrf.mxu0 }
0x19b1   :  { %v13724_v0 = vpop.f32.mrf.mxu0 }
0x19b3   :  { %v13726_v19 = vpop.f32.mrf.mxu0 }
0x19b5   :  { %v13728_v24 = vpop.f32.mrf.mxu0 }
0x19b7   :  { %v13730_v9 = vpop.f32.mrf.mxu0 }
0x19c9   :  { %v9985_v30 = vpop.f32.mrf.mxu0 }
0x19ca   :  { %v6400_v26 = vadd.f32 %v9985_v30, %v13334_v11 }
0x19cb   :  { %v6394_v3 = vpop.f32.mrf.mxu0 }
0x19cc   :  { %v6395_v47 = vadd.f32 %v13339_v17, %v6394_v3  ;;  %v6436_v1 = vsel %vm282_vm1, %v6400_v26, -inf }
0x19cd   :  { %6437 = vmax.xlane.f32.xlu1 %v6436_v1  ;;  %v9988_v35 = vpop.f32.mrf.mxu0 }
0x19ce   :  { %v6410_v18 = vadd.f32 %v9988_v35, %v13345_v5  ;;  %v6433_v38 = vsel %vm282_vm1, %v6395_v47, -inf }
0x19cf   :  { %v6404_v42 = vpop.f32.mrf.mxu0  ;;  %6434 = vmax.xlane.f32.xlu0 %v6433_v38 }
0x19d0   :  { %v6405_v16 = vadd.f32 %v13354_v43, %v6404_v42  ;;  %v6442_v11 = vsel %vm282_vm1, %v6410_v18, -inf }
0x19d1   :  { %v9991_v55 = vpop.f32.mrf.mxu0 }
0x19d2   :  { %v6420_v44 = vadd.f32 %v9991_v55, %v13359_v37  ;;  %v6439_v2 = vsel %vm282_vm1, %v6405_v16, -inf }
0x19d3   :  { %v6414_v20 = vpop.f32.mrf.mxu0  ;;  %6443 = vmax.xlane.f32.xlu0 %v6442_v11 }
0x19d4   :  { %v6448_v17 = vsel %vm282_vm1, %v6420_v44, -inf  ;;  %v6415_v12 = vadd.f32 %v13367_v32, %v6414_v20  ;;  %v13752_v32 = vpop.permute.xlu1 %6702 }
0x19d5   :  { %6449 = vmax.xlane.f32.xlu1 %v6448_v17  ;;  %v9994_v53 = vpop.f32.mrf.mxu0 }
0x19d6   :  { %v6430_v5 = vadd.f32 %v9994_v53, %v13372_v23  ;;  %v6445_v36 = vsel %vm282_vm1, %v6415_v12, -inf }
0x19d7   :  { %v6424_v34 = vpop.f32.mrf.mxu0  ;;  %6440 = vmax.xlane.f32.xlu0 %v6439_v2 }
0x19d8   :  { %v6454_v43 = vsel %vm282_vm1, %v6430_v5, -inf  ;;  %v6425_v37 = vadd.f32 %v13381_v28, %v6424_v34 }
0x19d9   :  { %6455 = vmax.xlane.f32.xlu1 %v6454_v43 }
0x19da   :  { %v6451_v6 = vsel %vm282_vm1, %v6425_v37, -inf }
0x19db   :  { %6446 = vmax.xlane.f32.xlu0 %v6445_v36 }
0x19df   :  { %6452 = vmax.xlane.f32.xlu0 %v6451_v6 }
0x19ea   :  { %6698 = vrot.lane.b32.xlu1 %v13400_v54, %s10712_s2 }
0x19f5   :  { %6700 = vrot.lane.b32.xlu0 %v13398_v25, %s10712_s2 }
0x1a56   :  { %v6438_v23 = vpop.xlane.xlu1 %6437 }
0x1a57   :  { %v6458_v29 = vsub.f32 %v6400_v26, %v6438_v23 }
0x1a58   :  { %v6435_v4 = vpop.xlane.xlu0 %6434 }
0x1a59   :  { %v6467_v41 = vmul.f32 1.442695, %v6458_v29  ;;  %v6457_v48 = vsub.f32 %v6395_v47, %v6435_v4 }
0x1a5b   :  { %10540 = vpow2.f32 %v6467_v41  ;;  %v6465_v28 = vmul.f32 1.442695, %v6457_v48 }
0x1a5c   :  { %v6444_v1 = vpop.xlane.xlu0 %6443 }
0x1a5d   :  { %10542 = vpow2.f32 %v6465_v28  ;;  %v6460_v35 = vsub.f32 %v6410_v18, %v6444_v1 }
0x1a5e   :  { %v6450_v47 = vpop.xlane.xlu1 %6449 }
0x1a5f   :  { %v6471_v55 = vmul.f32 1.442695, %v6460_v35  ;;  %v6462_v11 = vsub.f32 %v6420_v44, %v6450_v47 }
0x1a60   :  { %v6441_v26 = vpop.xlane.xlu0 %6440 }
0x1a61   :  { %v6459_v42 = vsub.f32 %v6405_v16, %v6441_v26  ;;  %10544 = vpow2.f32 %v6471_v55  ;;  %v6475_v34 = vmul.f32 1.442695, %v6462_v11 }
0x1a62   :  { %v6456_v20 = vpop.xlane.xlu1 %6455 }
0x1a63   :  { %v6469_v17 = vmul.f32 1.442695, %v6459_v42  ;;  %v6464_v43 = vsub.f32 %v6430_v5, %v6456_v20 }
0x1a64   :  { %v6447_v38 = vpop.xlane.xlu0 %6446 }
0x1a65   :  { %v6461_v53 = vsub.f32 %v6415_v12, %v6447_v38  ;;  %10546 = vpow2.f32 %v6469_v17  ;;  %v6479_v23 = vmul.f32 1.442695, %v6464_v43 }
0x1a66   :  { %10548 = vpow2.f32 %v6475_v34  ;;  %v6699_v1 = vpop.permute.xlu1 %6698 }
0x1a67   :  { %v6473_v36 = vmul.f32 1.442695, %v6461_v53 }
0x1a68   :  { %v13754_v50 = vpop.eup %10540  ;;  %v6453_v2 = vpop.xlane.xlu0 %6452 }
0x1a69   :  { %v6484_v22 = vsel %vm282_vm1, %v13754_v50, 0.0  ;;  %v6463_v6 = vsub.f32 %v6425_v37, %v6453_v2  ;;  %10550 = vpow2.f32 %v6473_v36 }
0x1a6a   :  { %v13758_v30 = vpop.eup %10542  ;;  %6485 = vadd.xlane.f32.xlu1 %v6484_v22  ;;  %10552 = vpow2.f32 %v6479_v23 }
0x1a6b   :  { %v6481_v3 = vsel %vm282_vm1, %v13758_v30, 0.0  ;;  %v6477_v29 = vmul.f32 1.442695, %v6463_v6 }
0x1a6c   :  { %6482 = vadd.xlane.f32.xlu0 %v6481_v3  ;;  %v6701_v26 = vpop.permute.xlu0 %6700 }
0x1a6d   :  { %10554 = vpow2.f32 %v6477_v29 }
0x1a6e   :  { %v13766_v18 = vpop.eup %10544 }
0x1a6f   :  { %v6490_v44 = vsel %vm282_vm1, %v13766_v18, 0.0 }
0x1a72   :  { %v13768_v16 = vpop.eup %10546 }
0x1a73   :  { %v13772_v12 = vpop.eup %10548  ;;  %v6487_v5 = vsel %vm282_vm1, %v13768_v16, 0.0 }
0x1a74   :  { %v6496_v4 = vsel %vm282_vm1, %v13772_v12, 0.0 }
0x1a76   :  { %v13776_v37 = vpop.eup %10550 }
0x1a77   :  { %v13780_v41 = vpop.eup %10552  ;;  %v6493_v48 = vsel %vm282_vm1, %v13776_v37, 0.0 }
0x1a78   :  { %v6502_v22 = vsel %vm282_vm1, %v13780_v41, 0.0 }
0x1a7a   :  { %v13784_v28 = vpop.eup %10554 }
0x1a7b   :  { %6694 = vrot.lane.b32.xlu1 %v13396_v7, %s10712_s2  ;;  %v6499_v3 = vsel %vm282_vm1, %v13784_v28, 0.0 }
0x1a82   :  { %6696 = vrot.lane.b32.xlu0 %v13394_v13, %s10712_s2 }
0x1a9f   :  { %6491 = vadd.xlane.f32.xlu1 %v6490_v44 }
0x1aa1   :  { %6488 = vadd.xlane.f32.xlu0 %v6487_v5 }
0x1aa3   :  { %6497 = vadd.xlane.f32.xlu1 %v6496_v4 }
0x1aa5   :  { %6494 = vadd.xlane.f32.xlu0 %v6493_v48 }
0x1aa7   :  { %6503 = vadd.xlane.f32.xlu1 %v6502_v22 }
0x1aa9   :  { %6500 = vadd.xlane.f32.xlu0 %v6499_v3 }
0x1ab8   :  { %6690 = vrot.lane.b32.xlu1 %v13392_v49, %s10712_s2 }
0x1abc   :  { %6676 = vrot.lane.b32.xlu1 %v13390_v21, %s10713_s15 }
0x1abf   :  { %6692 = vrot.lane.b32.xlu0 %v13390_v21, %s10712_s2 }
0x1ac0   :  { %6680 = vrot.lane.b32.xlu1 %v13394_v13, %s10713_s15 }
0x1ac3   :  { %6674 = vrot.lane.b32.xlu0 %v13392_v49, %s10713_s15 }
0x1ac4   :  { %6684 = vrot.lane.b32.xlu1 %v13398_v25, %s10713_s15 }
0x1ac7   :  { %6678 = vrot.lane.b32.xlu0 %v13396_v7, %s10713_s15 }
0x1ac8   :  { %6688 = vrot.lane.b32.xlu1 %v13402_v39, %s10713_s15 }
0x1acb   :  { %6682 = vrot.lane.b32.xlu0 %v13400_v54, %s10713_s15 }
0x1acf   :  { %6686 = vrot.lane.b32.xlu0 %v13404_v14, %s10713_s15 }
0x1af3   :  { %v6486_v47 = vpop.xlane.xlu1 %6485 }
0x1af4   :  { %10556 = vrcp.f32 %v6486_v47 }
0x1af5   :  { %v6483_v35 = vpop.xlane.xlu0 %6482 }
0x1af6   :  { %10558 = vrcp.f32 %v6483_v35 }
0x1b01   :  { %v10557_v38 = vpop.eup %10556 }
0x1b02   :  { %v6514_v11 = vmul.f32 %v10557_v38, %v13754_v50  ;;  %v6697_v50 = vpop.permute.xlu0 %6696  ;;  %v13856_v38 = vpop.f32.mrf.mxu1 }
0x1b03   :  { %v10559_v42 = vpop.eup %10558 }
0x1b04   :  { %v6513_v55 = vmul.f32 %v10559_v42, %v13758_v30  ;;  %v6695_v30 = vpop.permute.xlu1 %6694  ;;  %v13858_v42 = vpop.f32.mrf.mxu1 }
0x1b06   :  { %10011 = vmatprep.mubr.msk.f32.mxu1 %vm282_vm1, %v6513_v55  ;;  %v13860_v55 = vpop.f32.mrf.mxu1 }
0x1b07   :  { %10012 = vmatmul.mubr.msk.f32.vlgmr.msra.gmra.mxu1 %vm282_vm1, %v6514_v11 }
0x1b08   :  { %10024 = vmatpush3.xpose.msk.msra.mxu1 %vm1745_vm10, %v13656_v52 }
0x1b09   :  { %10025 = vmatprep.subr.msk.mxu1 %vm1745_vm10, %v13752_v32 }
0x1b0c   :  { %10026 = vmatpush3.xpose.msk.msra.mxu1 %vm1745_vm10, %v13752_v32 }
0x1b0d   :  { %10027 = vmatprep.subr.msk.mxu1 %vm1745_vm10, %v6701_v26 }
0x1b10   :  { %10028 = vmatpush3.xpose.msk.msra.mxu1 %vm1745_vm10, %v6701_v26 }
0x1b11   :  { %10029 = vmatprep.subr.msk.mxu1 %vm1745_vm10, %v6699_v1 }
0x1b14   :  { %10030 = vmatpush3.xpose.msk.msra.mxu1 %vm1745_vm10, %v6699_v1 }
0x1b15   :  { %10031 = vmatprep.subr.msk.mxu1 %vm1745_vm10, %v6697_v50 }
0x1b18   :  { %10032 = vmatpush3.xpose.msk.msra.mxu1 %vm1745_vm10, %v6697_v50 }
0x1b19   :  { %10033 = vmatprep.subr.msk.mxu1 %vm1745_vm10, %v6695_v30 }
0x1b1c   :  { %10034 = vmatpush3.xpose.msk.msra.mxu1 %vm1745_vm10, %v6695_v30 }
0x1b28   :  { %v6492_v52 = vpop.xlane.xlu1 %6491 }
0x1b29   :  { %10560 = vrcp.f32 %v6492_v52 }
0x1b2a   :  { %v6489_v32 = vpop.xlane.xlu0 %6488 }
0x1b2b   :  { %10562 = vrcp.f32 %v6489_v32 }
0x1b2c   :  { %v6498_v20 = vpop.xlane.xlu1 %6497 }
0x1b2d   :  { %10564 = vrcp.f32 %v6498_v20 }
0x1b2e   :  { %v6495_v17 = vpop.xlane.xlu0 %6494 }
0x1b2f   :  { %10566 = vrcp.f32 %v6495_v17 }
0x1b30   :  { %v6504_v53 = vpop.xlane.xlu1 %6503 }
0x1b31   :  { %10568 = vrcp.f32 %v6504_v53 }
0x1b32   :  { %v6501_v2 = vpop.xlane.xlu0 %6500 }
0x1b33   :  { %10570 = vrcp.f32 %v6501_v2 }
0x1b34   :  { %v6691_v6 = vpop.permute.xlu1 %6690 }
0x1b36   :  { %v6693_v34 = vpop.permute.xlu0 %6692  ;;  %v10561_v43 = vpop.eup %10560 }
0x1b37   :  { %10035 = vmatprep.subr.msk.mxu1 %vm1745_vm10, %v6693_v34  ;;  %v6516_v29 = vmul.f32 %v10561_v43, %v13766_v18 }
0x1b38   :  { %v10563_v36 = vpop.eup %10562  ;;  %10036 = vmatpush3.xpose.msk.msra.mxu1 %vm1745_vm10, %v6693_v34 }
0x1b39   :  { %10037 = vmatprep.subr.msk.mxu1 %vm1745_vm10, %v6691_v6  ;;  %v6515_v23 = vmul.f32 %v10563_v36, %v13768_v16  ;;  %v6677_v16 = vpop.permute.xlu1 %6676 }
0x1b3a   :  { %v10565_v44 = vpop.eup %10564  ;;  %v6675_v48 = vpop.permute.xlu0 %6674 }
0x1b3b   :  { %10014 = vmatprep.mubr.msk.f32.mxu1 %vm282_vm1, %v6515_v23  ;;  %v6518_v22 = vmul.f32 %v10565_v44, %v13772_v12  ;;  %v10686_v23 = vld [vmem:[%s14490_s10 + $0xc8] sm:$0xff] }
0x1b3c   :  { %v10567_v5 = vpop.eup %10566  ;;  %10015 = vmatmul.mubr.msk.f32.gmra.mxu1 %vm282_vm1, %v6516_v29 }
0x1b3d   :  { %10038 = vmatpush3.xpose.msk.msra.mxu1 %vm1745_vm10, %v6691_v6  ;;  %v6517_v4 = vmul.f32 %v10567_v5, %v13776_v37  ;;  %v6681_v12 = vpop.permute.xlu1 %6680  ;;  %v10687_v5 = vld [vmem:[%s14490_s10 + $0xc0] sm:$0xff] }
0x1b3e   :  { %10093 = vmatprep.subr.msk.mxu1 %vm2570_vm11, %v13622_v51  ;;  %v10569_v3 = vpop.eup %10568  ;;  %v6679_v37 = vpop.permute.xlu0 %6678 }
0x1b3f   :  { %10017 = vmatprep.mubr.msk.f32.mxu1 %vm282_vm1, %v6517_v4  ;;  %v6520_v26 = vmul.f32 %v10569_v3, %v13780_v41  ;;  %v10688_v3 = vld [vmem:[%s14490_s10 + $0xd8] sm:$0xff] }
0x1b40   :  { %v10571_v18 = vpop.eup %10570  ;;  %10018 = vmatmul.mubr.msk.f32.gmra.mxu1 %vm282_vm1, %v6518_v22 }
0x1b41   :  { %v6519_v1 = vmul.f32 %v10571_v18, %v13784_v28  ;;  %v6685_v28 = vpop.permute.xlu1 %6684 }
0x1b42   :  { %v6683_v47 = vpop.permute.xlu0 %6682 }
0x1b43   :  { %10020 = vmatprep.mubr.msk.f32.mxu1 %vm282_vm1, %v6519_v1 }
0x1b44   :  { %10021 = vmatmul.mubr.msk.f32.gmra.mxu1 %vm282_vm1, %v6520_v26 }
0x1b45   :  { %10039 = vmatprep.mubr.msk.f32.mxu1 %vm1745_vm10, %v6675_v48  ;;  %v6689_v35 = vpop.permute.xlu1 %6688 }
0x1b46   :  { %v6687_v41 = vpop.permute.xlu0 %6686 }
0x1b48   :  { %10040 = vmatmul.mubr.msk.f32.vlgmr.msra.gmra.mxu1 %vm1745_vm10, %v6677_v16 }
0x1b49   :  { %10042 = vmatprep.mubr.msk.f32.mxu1 %vm1745_vm10, %v6679_v37  ;;  %10094 = vmatpush3.msk.msra.mxu1 %vm2570_vm11, %v13622_v51  ;;  %v13862_v51 = vpop.f32.mrf.mxu1  ;;  %v10689_v37 = vld [vmem:[%s14490_s10 + $0xd0] sm:$0xff] }
0x1b4b   :  { %v13864_v11 = vpop.f32.mrf.mxu1 }
0x1b4c   :  { %10043 = vmatmul.mubr.msk.f32.gmra.mxu1 %vm1745_vm10, %v6681_v12 }
0x1b4d   :  { %10045 = vmatprep.mubr.msk.f32.mxu1 %vm1745_vm10, %v6683_v47  ;;  %v13866_v50 = vpop.f32.mrf.mxu1  ;;  %v10690_v47 = vld [vmem:[%s14490_s10 + $0xe8] sm:$0xff] }
0x1b4f   :  { %v13868_v30 = vpop.f32.mrf.mxu1 }
0x1b50   :  { %10046 = vmatmul.mubr.msk.f32.gmra.mxu1 %vm1745_vm10, %v6685_v28 }
0x1b51   :  { %10048 = vmatprep.mubr.msk.f32.mxu1 %vm1745_vm10, %v6687_v41  ;;  %v13870_v52 = vpop.f32.mrf.mxu1 }
0x1b54   :  { %10049 = vmatmul.mubr.msk.f32.gmra.mxu1 %vm1745_vm10, %v6689_v35 }
0x1bc7   :  { %v10013_v32 = vpop.f32.mrf.mxu1 }
0x1bc9   :  { %v6635_v20 = vpop.f32.mrf.mxu1 }
0x1bca   :  { %10095 = vmatprep.mubr.msk.f32.mxu1 %vm1745_vm10, %v6635_v20 }
0x1bcb   :  { %10096 = vmatmul.mubr.msk.f32.vlgmr.msra.gmra.mxu1 %vm1745_vm10, %v10013_v32 }
0x1bfc   :  { %v10016_v17 = vpop.f32.mrf.mxu1 }
0x1bfe   :  { %v6645_v53 = vpop.f32.mrf.mxu1 }
0x1bff   :  { %10098 = vmatprep.mubr.msk.f32.mxu1 %vm1745_vm10, %v6645_v53 }
0x1c00   :  { %v10019_v2 = vpop.f32.mrf.mxu1  ;;  %10099 = vmatmul.mubr.msk.f32.gmra.mxu1 %vm1745_vm10, %v10016_v17  ;;  %v10691_v17 = vld [vmem:[%s14490_s10 + $0xe0] sm:$0xff] }
0x1c02   :  { %v6655_v34 = vpop.f32.mrf.mxu1 }
0x1c03   :  { %10101 = vmatprep.mubr.msk.f32.mxu1 %vm1745_vm10, %v6655_v34 }
0x1c04   :  { %v10022_v43 = vpop.f32.mrf.mxu1  ;;  %10102 = vmatmul.mubr.msk.f32.gmra.mxu1 %vm1745_vm10, %v10019_v2  ;;  %v10692_v2 = vld [vmem:[%s14490_s10 + $0xf8] sm:$0xff] }
0x1c06   :  { %v6665_v36 = vpop.f32.mrf.mxu1 }
0x1c07   :  { %10104 = vmatprep.mubr.msk.f32.mxu1 %vm1745_vm10, %v6665_v36 }
0x1c08   :  { %v10041_v6 = vpop.f32.mrf.mxu1  ;;  %10105 = vmatmul.mubr.msk.f32.gmra.mxu1 %vm1745_vm10, %v10022_v43 }
0x1c09   :  { %v6810_v29 = vadd.f32 %v10686_v23, %v10041_v6  ;;  %v10693_v23 = vld [vmem:[%s14490_s10 + $0xf0] sm:$0xff] }
0x1c0a   :  { %v6804_v44 = vpop.f32.mrf.mxu1 }
0x1c0b   :  { %v6805_v4 = vadd.f32 %v10687_v5, %v6804_v44  ;;  %v6846_v48 = vsel %vm282_vm1, %v6810_v29, -inf }
0x1c0c   :  { %6847 = vmax.xlane.f32.xlu1 %v6846_v48  ;;  %v10044_v22 = vpop.f32.mrf.mxu1 }
0x1c0d   :  { %v6820_v18 = vadd.f32 %v10688_v3, %v10044_v22  ;;  %v6843_v16 = vsel %vm282_vm1, %v6805_v4, -inf }
0x1c0e   :  { %6844 = vmax.xlane.f32.xlu0 %v6843_v16  ;;  %v6814_v1 = vpop.f32.mrf.mxu1 }
0x1c0f   :  { %v6815_v12 = vadd.f32 %v10689_v37, %v6814_v1  ;;  %v6852_v41 = vsel %vm282_vm1, %v6820_v18, -inf }
0x1c10   :  { %v10047_v26 = vpop.f32.mrf.mxu1 }
0x1c11   :  { %v6830_v28 = vadd.f32 %v10690_v47, %v10047_v26  ;;  %v6849_v43 = vsel %vm282_vm1, %v6815_v12, -inf }
0x1c12   :  { %6853 = vmax.xlane.f32.xlu0 %v6852_v41  ;;  %v6824_v35 = vpop.f32.mrf.mxu1 }
0x1c13   :  { %v6858_v32 = vsel %vm282_vm1, %v6830_v28, -inf  ;;  %v6825_v53 = vadd.f32 %v10691_v17, %v6824_v35 }
0x1c14   :  { %6859 = vmax.xlane.f32.xlu1 %v6858_v32  ;;  %v10050_v20 = vpop.f32.mrf.mxu1 }
0x1c15   :  { %v6840_v34 = vadd.f32 %v10692_v2, %v10050_v20  ;;  %v6855_v5 = vsel %vm282_vm1, %v6825_v53, -inf }
0x1c16   :  { %6850 = vmax.xlane.f32.xlu0 %v6849_v43  ;;  %v6834_v36 = vpop.f32.mrf.mxu1 }
0x1c17   :  { %v6864_v6 = vsel %vm282_vm1, %v6840_v34, -inf  ;;  %v6835_v44 = vadd.f32 %v10693_v23, %v6834_v36 }
0x1c18   :  { %6865 = vmax.xlane.f32.xlu1 %v6864_v6 }
0x1c19   :  { %v6861_v48 = vsel %vm282_vm1, %v6835_v44, -inf }
0x1c1a   :  { %6856 = vmax.xlane.f32.xlu0 %v6855_v5 }
0x1c1e   :  { %6862 = vmax.xlane.f32.xlu0 %v6861_v48 }
0x1c29   :  { %6943 = vrot.lane.b32.xlu1 %v13404_v14, %s10714_s18 }
0x1c2d   :  { %6941 = vrot.lane.b32.xlu1 %v13398_v25, %s10714_s18 }
0x1c31   :  { %6939 = vrot.lane.b32.xlu1 %v13400_v54, %s10714_s18 }
0x1c34   :  { %6945 = vrot.lane.b32.xlu0 %v13402_v39, %s10714_s18 }
0x1c35   :  { %6935 = vrot.lane.b32.xlu1 %v13396_v7, %s10714_s18 }
0x1c38   :  { %6937 = vrot.lane.b32.xlu0 %v13394_v13, %s10714_s18 }
0x1c95   :  { %v6848_v22 = vpop.xlane.xlu1 %6847 }
0x1c96   :  { %v6868_v3 = vsub.f32 %v6810_v29, %v6848_v22 }
0x1c97   :  { %v6845_v16 = vpop.xlane.xlu0 %6844 }
0x1c98   :  { %v6877_v1 = vmul.f32 1.442695, %v6868_v3  ;;  %v6867_v14 = vsub.f32 %v6805_v4, %v6845_v16 }
0x1c9a   :  { %10572 = vpow2.f32 %v6877_v1  ;;  %v6875_v26 = vmul.f32 1.442695, %v6867_v14 }
0x1c9b   :  { %v6854_v25 = vpop.xlane.xlu0 %6853 }
0x1c9c   :  { %10574 = vpow2.f32 %v6875_v26  ;;  %v6870_v37 = vsub.f32 %v6820_v18, %v6854_v25 }
0x1c9d   :  { %v6860_v54 = vpop.xlane.xlu1 %6859 }
0x1c9e   :  { %v6881_v47 = vmul.f32 1.442695, %v6870_v37  ;;  %v6872_v41 = vsub.f32 %v6830_v28, %v6860_v54 }
0x1c9f   :  { %v6851_v39 = vpop.xlane.xlu0 %6850 }
0x1ca0   :  { %10576 = vpow2.f32 %v6881_v47  ;;  %v6885_v35 = vmul.f32 1.442695, %v6872_v41  ;;  %v6869_v7 = vsub.f32 %v6815_v12, %v6851_v39 }
0x1ca1   :  { %v6866_v32 = vpop.xlane.xlu1 %6865 }
0x1ca2   :  { %10578 = vpow2.f32 %v6885_v35  ;;  %v6879_v13 = vmul.f32 1.442695, %v6869_v7  ;;  %v6874_v20 = vsub.f32 %v6840_v34, %v6866_v32  ;;  %v6239_v7 = vadd.f32 %v13856_v38, %v13716_v62  ;;  %v13965_v32 = vld [vmem:[%s14484_s4 + $0xc] ss:$0 sm:$0xff] }
0x1ca3   :  { %v6857_v29 = vpop.xlane.xlu0 %6856 }
0x1ca4   :  { %10580 = vpow2.f32 %v6879_v13  ;;  %v6889_v17 = vmul.f32 1.442695, %v6874_v20  ;;  %v6871_v4 = vsub.f32 %v6825_v53, %v6857_v29  ;;  %v6234_v13 = vadd.f32 %v13858_v42, %v13718_v31 }
0x1ca5   :  { %v6944_v2 = vpop.permute.xlu1 %6943  ;;  %v7347_v20 = vadd.f32 %v13965_v32, %v6239_v7  ;;  %v6259_v29 = vadd.f32 %v13864_v11, %v13724_v0  ;;  %v6249_v42 = vadd.f32 %v13860_v55, %v13720_v57 }
0x1ca6   :  { %v6883_v43 = vmul.f32 1.442695, %v6871_v4  ;;  %10582 = vpow2.f32 %v6889_v17  ;;  %v6269_v17 = vadd.f32 %v13868_v30, %v13728_v24  ;;  %v6264_v4 = vadd.f32 %v13870_v52, %v13730_v9 }
0x1ca7   :  { %v13924_v36 = vpop.eup %10572  ;;  %v6863_v18 = vpop.xlane.xlu0 %6862  ;;  %v13976_v62 = vadd.f32 %v7347_v20, %v12815_v59  ;;  %v7351_v38 = vadd.f32 %v13965_v32, %v6259_v29 }
0x1ca8   :  { %10584 = vpow2.f32 %v6883_v43  ;;  %v6873_v28 = vsub.f32 %v6835_v44, %v6863_v18  ;;  %v6894_v6 = vsel %vm282_vm1, %v13924_v36, 0.0 }
0x1ca9   :  { %v13928_v12 = vpop.eup %10574  ;;  %6895 = vadd.xlane.f32.xlu1 %v6894_v6  ;;  %v6942_v34 = vpop.permute.xlu1 %6941  ;;  %v13988_v11 = vadd.f32 %v7351_v38, %v12839_v45  ;;  %v7381_v59 = vsel %vm1073_vm6, %v13976_v62, 0.0 }
0x1caa   :  { %v6887_v23 = vmul.f32 1.442695, %v6873_v28  ;;  %v6891_v5 = vsel %vm282_vm1, %v13928_v12, 0.0 }
0x1cab   :  { %6892 = vadd.xlane.f32.xlu0 %v6891_v5  ;;  %v6946_v53 = vpop.permute.xlu0 %6945  ;;  %v7393_v55 = vsel %vm1073_vm6, %v13988_v11, 0.0 }
0x1cac   :  { %10586 = vpow2.f32 %v6887_v23  ;;  %10051 = vmatprep.subr.mxu0 %v6946_v53 }
0x1cad   :  { %v13932_v48 = vpop.eup %10576  ;;  %10052 = vmatpush3.msra.mxu0 %v6946_v53  ;;  %v6940_v3 = vpop.permute.xlu1 %6939 }
0x1cae   :  { %10053 = vmatprep.subr.mxu0 %v6944_v2  ;;  %v6900_v44 = vsel %vm282_vm1, %v13932_v48, 0.0 }
0x1caf   :  { %v13936_v22 = vpop.eup %10578  ;;  %6901 = vadd.xlane.f32.xlu1 %v6900_v44  ;;  %10054 = vmatpush3.msra.mxu0 %v6944_v2  ;;  %v6938_v25 = vpop.permute.xlu0 %6937  ;;  %v7352_v2 = vadd.f32 %v13965_v32, %v6264_v4 }
0x1cb0   :  { %10055 = vmatprep.subr.mxu0 %v6942_v34  ;;  %v6906_v14 = vsel %vm282_vm1, %v13936_v22, 0.0 }
0x1cb1   :  { %v13938_v16 = vpop.eup %10580  ;;  %10056 = vmatpush3.msra.mxu0 %v6942_v34  ;;  %v6936_v54 = vpop.permute.xlu1 %6935  ;;  %v14023_v43 = vadd.f32 %v7352_v2, %v12855_v61 }
0x1cb2   :  { %10057 = vmatprep.subr.mxu0 %v6940_v3  ;;  %v6897_v1 = vsel %vm282_vm1, %v13938_v16, 0.0 }
0x1cb3   :  { %6898 = vadd.xlane.f32.xlu0 %v6897_v1  ;;  %6907 = vadd.xlane.f32.xlu1 %v6906_v14  ;;  %v13944_v26 = vpop.eup %10582  ;;  %v7396_v52 = vsel %vm1073_vm6, %v14023_v43, 0.0 }
0x1cb4   :  { %10058 = vmatpush3.msra.mxu0 %v6940_v3  ;;  %v6912_v41 = vsel %vm282_vm1, %v13944_v26, 0.0 }
0x1cb5   :  { %v13946_v37 = vpop.eup %10584  ;;  %10059 = vmatprep.subr.mxu0 %v6938_v25 }
0x1cb6   :  { %10060 = vmatpush3.msra.mxu0 %v6938_v25  ;;  %v6903_v47 = vsel %vm282_vm1, %v13946_v37, 0.0 }
0x1cb7   :  { %10061 = vmatprep.subr.mxu0 %v6936_v54  ;;  %6904 = vadd.xlane.f32.xlu0 %v6903_v47 }
0x1cb8   :  { %6913 = vadd.xlane.f32.xlu1 %v6912_v41  ;;  %10062 = vmatpush3.msra.mxu0 %v6936_v54 }
0x1cb9   :  { %v13952_v39 = vpop.eup %10586 }
0x1cba   :  { %v6909_v35 = vsel %vm282_vm1, %v13952_v39, 0.0 }
0x1cbb   :  { %6910 = vadd.xlane.f32.xlu0 %v6909_v35 }
0x1cc9   :  { %6931 = vrot.lane.b32.xlu1 %v13392_v49, %s10714_s18  ;;  %v7346_v49 = vadd.f32 %v13965_v32, %v6234_v13 }
0x1ccb   :  { %v13982_v31 = vadd.f32 %v7346_v49, %v12819_v46  ;;  %v6254_v46 = vadd.f32 %v13866_v50, %v13726_v19 }
0x1ccd   :  { %v7378_v57 = vsel %vm1073_vm6, %v13982_v31, 0.0 }
0x1cd1   :  { %6933 = vrot.lane.b32.xlu0 %v13390_v21, %s10714_s18  ;;  %v6244_v21 = vadd.f32 %v13862_v51, %v13722_v33  ;;  %v7353_v33 = vadd.f32 %v13965_v32, %v6269_v17  ;;  %v7349_v51 = vadd.f32 %v13965_v32, %v6249_v42 }
0x1cd3   :  { %v7348_v0 = vadd.f32 %v13965_v32, %v6244_v21  ;;  %v14002_v45 = vadd.f32 %v7353_v33, %v12849_v8  ;;  %v14007_v30 = vadd.f32 %v7349_v51, %v12827_v10 }
0x1cd5   :  { %v13995_v24 = vadd.f32 %v7348_v0, %v12831_v63  ;;  %v7350_v63 = vadd.f32 %v13965_v32, %v6254_v46  ;;  %v7399_v8 = vsel %vm1073_vm6, %v14002_v45, 0.0  ;;  %v7387_v10 = vsel %vm1073_vm6, %v14007_v30, 0.0  ;;  %v10097_v0 = vpop.f32.mrf.mxu1 }
0x1cd7   :  { %v7384_v19 = vsel %vm1073_vm6, %v13995_v24, 0.0  ;;  %v14017_v50 = vadd.f32 %v7350_v63, %v12843_v40  ;;  %v7303_v33 = vpop.f32.mrf.mxu1 }
0x1cd9   :  { %v7390_v9 = vsel %vm1073_vm6, %v14017_v50, 0.0 }
0x1ced   :  { %7382 = vadd.xlane.f32.xlu1 %v7381_v59  ;;  %v10100_v59 = vpop.f32.mrf.mxu1 }
0x1cef   :  { %v7313_v51 = vpop.f32.mrf.mxu1 }
0x1cf0   :  { %7379 = vadd.xlane.f32.xlu0 %v7378_v57 }
0x1cf1   :  { %7394 = vadd.xlane.f32.xlu1 %v7393_v55  ;;  %v10103_v55 = vpop.f32.mrf.mxu1 }
0x1cf4   :  { %7385 = vadd.xlane.f32.xlu0 %v7384_v19 }
0x1cf5   :  { %7400 = vadd.xlane.f32.xlu1 %v7399_v8 }
0x1cf8   :  { %7388 = vadd.xlane.f32.xlu0 %v7387_v10 }
0x1cfc   :  { %7391 = vadd.xlane.f32.xlu0 %v7390_v9  ;;  %v7323_v9 = vpop.f32.mrf.mxu1 }
0x1d00   :  { %7397 = vadd.xlane.f32.xlu0 %v7396_v52 }
0x1d32   :  { %v6896_v18 = vpop.xlane.xlu1 %6895 }
0x1d34   :  { %v6893_v40 = vpop.xlane.xlu0 %6892 }
0x1d35   :  { %10588 = vrcp.f32 %v6893_v40 }
0x1d36   :  { %10590 = vrcp.f32 %v6896_v18 }
0x1d38   :  { %v6902_v28 = vpop.xlane.xlu1 %6901 }
0x1d3c   :  { %v6899_v6 = vpop.xlane.xlu0 %6898  ;;  %v6908_v23 = vpop.xlane.xlu1 %6907 }
0x1d3d   :  { %10592 = vrcp.f32 %v6899_v6 }
0x1d3e   :  { %10594 = vrcp.f32 %v6902_v28 }
0x1d40   :  { %v6905_v34 = vpop.xlane.xlu0 %6904 }
0x1d41   :  { %10596 = vrcp.f32 %v6905_v34  ;;  %v6914_v53 = vpop.xlane.xlu1 %6913 }
0x1d42   :  { %v10589_v61 = vpop.eup %10588  ;;  %10598 = vrcp.f32 %v6908_v23 }
0x1d43   :  { %v6923_v5 = vmul.f32 %v10589_v61, %v13928_v12  ;;  %v10591_v3 = vpop.eup %10590  ;;  %v10694_v12 = vld [vmem:[%s14487_s7 + $0xc] sm:$0xf] }
0x1d44   :  { %v6911_v44 = vpop.xlane.xlu0 %6910  ;;  %v6924_v54 = vmul.f32 %v10591_v3, %v13924_v36 }
0x1d45   :  { %10600 = vrcp.f32 %v6911_v44  ;;  %10067 = vmatprep.mubr.msk.f32.mxu0 %vm282_vm1, %v6923_v5  ;;  %v6932_v25 = vpop.permute.xlu1 %6931  ;;  %v10106_v44 = vpop.f32.mrf.mxu1 }
0x1d46   :  { %10602 = vrcp.f32 %v6914_v53 }
0x1d48   :  { %v6934_v1 = vpop.permute.xlu0 %6933 }
0x1d49   :  { %10063 = vmatprep.subr.mxu0 %v6934_v1 }
0x1d4a   :  { %v10593_v14 = vpop.eup %10592  ;;  %10064 = vmatpush3.msra.mxu0 %v6934_v1 }
0x1d4b   :  { %10065 = vmatprep.subr.mxu0 %v6932_v25  ;;  %v6925_v47 = vmul.f32 %v10593_v14, %v13938_v16  ;;  %v10595_v41 = vpop.eup %10594 }
0x1d4c   :  { %10066 = vmatpush3.msra.mxu0 %v6932_v25  ;;  %v6926_v36 = vmul.f32 %v10595_v41, %v13932_v48 }
0x1d4d   :  { %10068 = vmatmul.mubr.msk.f32.vlgmr.msra.gmra.mxu0 %vm282_vm1, %v6924_v54  ;;  %10079 = vmatprep.subr.msk.mxu0 %vm2570_vm11, %v10694_v12 }
0x1d4e   :  { %v10597_v35 = vpop.eup %10596  ;;  %10070 = vmatprep.mubr.msk.f32.mxu0 %vm282_vm1, %v6925_v47  ;;  %10080 = vmatpush3.msk.msra.mxu0 %vm2570_vm11, %v10694_v12 }
0x1d4f   :  { %v6927_v7 = vmul.f32 %v10597_v35, %v13946_v37  ;;  %v10599_v16 = vpop.eup %10598 }
0x1d50   :  { %v6928_v20 = vmul.f32 %v10599_v16, %v13936_v22 }
0x1d51   :  { %10071 = vmatmul.mubr.msk.f32.gmra.mxu0 %vm282_vm1, %v6926_v36 }
0x1d52   :  { %v10601_v13 = vpop.eup %10600  ;;  %10073 = vmatprep.mubr.msk.f32.mxu0 %vm282_vm1, %v6927_v7  ;;  %v7333_v7 = vpop.f32.mrf.mxu1 }
0x1d53   :  { %v6929_v29 = vmul.f32 %v10601_v13, %v13952_v39  ;;  %v10603_v49 = vpop.eup %10602 }
0x1d54   :  { %v6930_v21 = vmul.f32 %v10603_v49, %v13944_v26 }
0x1d55   :  { %10074 = vmatmul.mubr.msk.f32.gmra.mxu0 %vm282_vm1, %v6928_v20 }
0x1d56   :  { %10076 = vmatprep.mubr.msk.f32.mxu0 %vm282_vm1, %v6929_v29 }
0x1d59   :  { %10077 = vmatmul.mubr.msk.f32.gmra.mxu0 %vm282_vm1, %v6930_v21  ;;  %vm10716_vm1 = vmmov 0  }
0x1d76   :  { %v7383_v6 = vpop.xlane.xlu1 %7382 }
0x1d79   :  { %v7380_v46 = vpop.xlane.xlu0 %7379 }
0x1d7a   :  { %v7426_v35 = vmul.f32 0.125, %v7380_v46  ;;  %v7395_v49 = vpop.xlane.xlu1 %7394 }
0x1d7b   :  { %v7431_v46 = vmul.f32 0.125, %v7395_v49 }
0x1d7d   :  { %v7386_v2 = vpop.xlane.xlu0 %7385 }
0x1d81   :  { %v7389_v25 = vpop.xlane.xlu0 %7388 }
0x1d82   :  { %v7429_v21 = vmul.f32 0.125, %v7389_v25 }
0x1e0d   :  { %v10069_v48 = vpop.f32.mrf.mxu0 }
0x1e0f   :  { %v7045_v37 = vpop.f32.mrf.mxu0 }
0x1e10   :  { %10081 = vmatprep.mubr.msk.f32.mxu0 %vm1745_vm10, %v7045_v37  ;;  %v14499_v37 = vld [vmem:[#allocation6_spill] sm:$0xff] }
0x1e11   :  { %v10072_v38 = vpop.f32.mrf.mxu0  ;;  %10082 = vmatmul.mubr.msk.f32.vlgmr.msra.gmra.mxu0 %vm1745_vm10, %v10069_v48 }
0x1e13   :  { %v7055_v17 = vpop.f32.mrf.mxu0 }
0x1e14   :  { %10084 = vmatprep.mubr.msk.f32.mxu0 %vm1745_vm10, %v7055_v17 }
0x1e15   :  { %v10075_v22 = vpop.f32.mrf.mxu0  ;;  %10085 = vmatmul.mubr.msk.f32.gmra.mxu0 %vm1745_vm10, %v10072_v38 }
0x1e17   :  { %v7065_v39 = vpop.f32.mrf.mxu0 }
0x1e18   :  { %10087 = vmatprep.mubr.msk.f32.mxu0 %vm1745_vm10, %v7065_v39  ;;  %v14097_v39 = vsub.f32 %v13982_v31, %v7426_v35 }
0x1e19   :  { %v10078_v42 = vpop.f32.mrf.mxu0  ;;  %10088 = vmatmul.mubr.msk.f32.gmra.mxu0 %vm1745_vm10, %v10075_v22 }
0x1e1b   :  { %v7075_v26 = vpop.f32.mrf.mxu0 }
0x1e1c   :  { %10090 = vmatprep.mubr.msk.f32.mxu0 %vm1745_vm10, %v7075_v26  ;;  %v7428_v26 = vmul.f32 0.125, %v7386_v2 }
0x1e1d   :  { %10091 = vmatmul.mubr.msk.f32.gmra.mxu0 %vm1745_vm10, %v10078_v42  ;;  %v7392_v42 = vpop.xlane.xlu0 %7391 }
0x1e1e   :  { %v7430_v2 = vmul.f32 0.125, %v7392_v42 }
0x1ed1   :  { %v10083_v57 = vpop.f32.mrf.mxu0 }
0x1ed2   :  { %v7309_v63 = vadd.f32 %v10097_v0, %v10083_v57  ;;  %v14500_v0 = vld [vmem:[#allocation5_spill] sm:$0xff]  ;;  %v14106_v57 = vsub.f32 %v14007_v30, %v7429_v21 }
0x1ed3   :  { %v7174_v4 = vpop.f32.mrf.mxu0 }
0x1ed4   :  { %v7355_v19 = vadd.f32 %v13965_v32, %v7309_v63  ;;  %v7304_v8 = vadd.f32 %v7303_v33, %v7174_v4 }
0x1ed5   :  { %v10086_v10 = vpop.f32.mrf.mxu0 }
0x1ed6   :  { %v14060_v52 = vadd.f32 %v7355_v19, %v13060_v60  ;;  %v7354_v18 = vadd.f32 %v13965_v32, %v7304_v8  ;;  %v7319_v40 = vadd.f32 %v10100_v59, %v10086_v10  ;;  %v7401_v8 = vpop.xlane.xlu1 %7400 }
0x1ed7   :  { %v7184_v28 = vpop.f32.mrf.mxu0 }
0x1ed8   :  { %v14064_v23 = vadd.f32 %v7354_v18, %v13064_v27  ;;  %v7357_v34 = vadd.f32 %v13965_v32, %v7319_v40  ;;  %v7314_v61 = vadd.f32 %v7313_v51, %v7184_v28  ;;  %v7405_v5 = vsel %vm1073_vm6, %v14060_v52, 0.0  ;;  %v7398_v18 = vpop.xlane.xlu0 %7397 }
0x1ed9   :  { %7406 = vadd.xlane.f32.xlu1 %v7405_v5  ;;  %v10089_v53 = vpop.f32.mrf.mxu0  ;;  %v7427_v27 = vmul.f32 0.125, %v7383_v6  ;;  %v14123_v40 = vsub.f32 %v13988_v11, %v7431_v46  ;;  %v7433_v28 = vmul.f32 0.125, %v7401_v8  ;;  %v7432_v5 = vmul.f32 0.125, %v7398_v18 }
0x1eda   :  { %v14070_v60 = vadd.f32 %v7357_v34, %v13070_v15  ;;  %v7356_v3 = vadd.f32 %v13965_v32, %v7314_v61  ;;  %v7329_v1 = vadd.f32 %v10103_v55, %v10089_v53  ;;  %v7402_v14 = vsel %vm1073_vm6, %v14064_v23, 0.0  ;;  %v14501_v55 = vld [vmem:[#allocation7_spill] sm:$0xff] }
0x1edb   :  { %7403 = vadd.xlane.f32.xlu0 %v7402_v14  ;;  %v7194_v54 = vpop.f32.mrf.mxu0  ;;  %v14088_v29 = vsub.f32 %v13976_v62, %v7427_v27  ;;  %v7461_v34 = vmul.f32 %v14106_v57, %v14106_v57  ;;  %v14129_v61 = vsub.f32 %v14017_v50, %v7430_v2  ;;  %v7463_v14 = vmul.f32 %v14123_v40, %v14123_v40 }
0x1edc   :  { %v14076_v47 = vadd.f32 %v7356_v3, %v13076_v56  ;;  %v7359_v41 = vadd.f32 %v13965_v32, %v7329_v1  ;;  %v7324_v12 = vadd.f32 %v7323_v9, %v7194_v54  ;;  %v7411_v15 = vsel %vm1073_vm6, %v14070_v60, 0.0 }
0x1edd   :  { %7412 = vadd.xlane.f32.xlu1 %v7411_v15  ;;  %v10092_v36 = vpop.f32.mrf.mxu0  ;;  %v7459_v19 = vmul.f32 %v14088_v29, %v14088_v29  ;;  %v7458_v9 = vmul.f32 %v14097_v39, %v14097_v39  ;;  %v14135_v3 = vsub.f32 %v14002_v45, %v7433_v28  ;;  %v7483_v1 = vsel %vm1073_vm6, %v7461_v34, 0.0 }
0x1ede   :  { %v14082_v16 = vadd.f32 %v7359_v41, %v13082_v58  ;;  %v7358_v13 = vadd.f32 %v13965_v32, %v7324_v12  ;;  %v7339_v20 = vadd.f32 %v10106_v44, %v10092_v36  ;;  %v7408_v56 = vsel %vm1073_vm6, %v14076_v47, 0.0 }
0x1edf   :  { %7409 = vadd.xlane.f32.xlu0 %v7408_v56  ;;  %v7204_v48 = vpop.f32.mrf.mxu0  ;;  %v7477_v6 = vsel %vm1073_vm6, %v7459_v19, 0.0  ;;  %v7474_v53 = vsel %vm1073_vm6, %v7458_v9, 0.0  ;;  %v14141_v27 = vsub.f32 %v14023_v43, %v7432_v5  ;;  %v7462_v54 = vmul.f32 %v14129_v61, %v14129_v61 }
0x1ee0   :  { %v14091_v38 = vadd.f32 %v7358_v13, %v14499_v37  ;;  %v7361_v17 = vadd.f32 %v13965_v32, %v7339_v20  ;;  %v7334_v58 = vadd.f32 %v7333_v7, %v7204_v48  ;;  %v7417_v22 = vsel %vm1073_vm6, %v14082_v16, 0.0  ;;  %v8736_v13 = vld [vmem:[%s14488_s8 + $0x8] sm:$0xff] }
0x1ee1   :  { %7418 = vadd.xlane.f32.xlu1 %v7417_v22  ;;  %v7489_v41 = vsel %vm1073_vm6, %v7463_v14, 0.0  ;;  %v7465_v12 = vmul.f32 %v14135_v3, %v14135_v3  ;;  %v7486_v15 = vsel %vm1073_vm6, %v7462_v54, 0.0  ;;  %v7464_v35 = vmul.f32 %v14141_v27, %v14141_v27  ;;  %10107 = vmatprep.subr.mxu0 %v8736_v13 }
0x1ee2   :  { %v14100_v33 = vadd.f32 %v7361_v17, %v14500_v0  ;;  %v7360_v59 = vadd.f32 %v13965_v32, %v7334_v58  ;;  %v7414_v51 = vsel %vm1073_vm6, %v14091_v38, 0.0  ;;  %v14116_v32 = vsub.f32 %v13995_v24, %v7428_v26  ;;  %10108 = vmatpush3.msra.mxu0 %v8736_v13 }
0x1ee3   :  { %7415 = vadd.xlane.f32.xlu0 %v7414_v51  ;;  %v7495_v36 = vsel %vm1073_vm6, %v7465_v12, 0.0  ;;  %v7492_v7 = vsel %vm1073_vm6, %v7464_v35, 0.0 }
0x1ee4   :  { %v14109_v63 = vadd.f32 %v7360_v59, %v14501_v55  ;;  %v7423_v4 = vsel %vm1073_vm6, %v14100_v33, 0.0  ;;  %v7460_v44 = vmul.f32 %v14116_v32, %v14116_v32 }
0x1ee5   :  { %7424 = vadd.xlane.f32.xlu1 %v7423_v4 }
0x1ee6   :  { %v7420_v10 = vsel %vm1073_vm6, %v14109_v63, 0.0  ;;  %v7480_v25 = vsel %vm1073_vm6, %v7460_v44, 0.0 }
0x1ee7   :  { %7421 = vadd.xlane.f32.xlu0 %v7420_v10 }
0x1ee9   :  { %7478 = vadd.xlane.f32.xlu1 %v7477_v6 }
0x1eeb   :  { %7475 = vadd.xlane.f32.xlu0 %v7474_v53 }
0x1eed   :  { %7484 = vadd.xlane.f32.xlu1 %v7483_v1 }
0x1eef   :  { %7481 = vadd.xlane.f32.xlu0 %v7480_v25 }
0x1ef1   :  { %7490 = vadd.xlane.f32.xlu1 %v7489_v41 }
0x1ef3   :  { %7487 = vadd.xlane.f32.xlu0 %v7486_v15 }
0x1ef5   :  { %7496 = vadd.xlane.f32.xlu1 %v7495_v36 }
0x1ef7   :  { %7493 = vadd.xlane.f32.xlu0 %v7492_v7 }
0x1f62   :  { %v7407_v20 = vpop.xlane.xlu1 %7406 }
0x1f63   :  { %v7435_v56 = vmul.f32 0.125, %v7407_v20 }
0x1f64   :  { %v7404_v49 = vpop.xlane.xlu0 %7403 }
0x1f65   :  { %v14158_v21 = vsub.f32 %v14060_v52, %v7435_v56  ;;  %v7434_v48 = vmul.f32 0.125, %v7404_v49 }
0x1f66   :  { %v7413_v37 = vpop.xlane.xlu1 %7412 }
0x1f67   :  { %v14161_v17 = vsub.f32 %v14064_v23, %v7434_v48  ;;  %v7437_v58 = vmul.f32 0.125, %v7413_v37  ;;  %v7467_v22 = vmul.f32 %v14158_v21, %v14158_v21 }
0x1f68   :  { %v7410_v42 = vpop.xlane.xlu0 %7409 }
0x1f69   :  { %v14166_v26 = vsub.f32 %v14070_v60, %v7437_v58  ;;  %v7436_v0 = vmul.f32 0.125, %v7410_v42  ;;  %v7501_v59 = vsel %vm1073_vm6, %v7467_v22, 0.0  ;;  %v7466_v51 = vmul.f32 %v14161_v17, %v14161_v17 }
0x1f6a   :  { %7502 = vadd.xlane.f32.xlu1 %v7501_v59  ;;  %v7419_v46 = vpop.xlane.xlu1 %7418 }
0x1f6b   :  { %v14172_v55 = vsub.f32 %v14076_v47, %v7436_v0  ;;  %v7439_v4 = vmul.f32 0.125, %v7419_v46  ;;  %v7498_v19 = vsel %vm1073_vm6, %v7466_v51, 0.0  ;;  %v7469_v8 = vmul.f32 %v14166_v26, %v14166_v26 }
0x1f6c   :  { %v7416_v2 = vpop.xlane.xlu0 %7415  ;;  %7499 = vadd.xlane.f32.xlu0 %v7498_v19 }
0x1f6d   :  { %v14178_v10 = vsub.f32 %v14082_v16, %v7439_v4  ;;  %v7438_v9 = vmul.f32 0.125, %v7416_v2  ;;  %v7507_v18 = vsel %vm1073_vm6, %v7469_v8, 0.0  ;;  %v7468_v28 = vmul.f32 %v14172_v55, %v14172_v55 }
0x1f6e   :  { %7508 = vadd.xlane.f32.xlu1 %v7507_v18  ;;  %v7425_v6 = vpop.xlane.xlu1 %7424 }
0x1f6f   :  { %v14184_v34 = vsub.f32 %v14091_v38, %v7438_v9  ;;  %v7441_v5 = vmul.f32 0.125, %v7425_v6  ;;  %v7504_v53 = vsel %vm1073_vm6, %v7468_v28, 0.0  ;;  %v7471_v44 = vmul.f32 %v14178_v10, %v14178_v10 }
0x1f70   :  { %7505 = vadd.xlane.f32.xlu0 %v7504_v53  ;;  %v7422_v1 = vpop.xlane.xlu0 %7421 }
0x1f71   :  { %v14190_v14 = vsub.f32 %v14100_v33, %v7441_v5  ;;  %v7440_v25 = vmul.f32 0.125, %v7422_v1  ;;  %v7513_v54 = vsel %vm1073_vm6, %v7471_v44, 0.0  ;;  %v7470_v41 = vmul.f32 %v14184_v34, %v14184_v34 }
0x1f72   :  { %7514 = vadd.xlane.f32.xlu1 %v7513_v54  ;;  %v7479_v12 = vpop.xlane.xlu1 %7478  ;;  %v14208_v54 = vld [vmem:[%s14484_s4 + $0xd] ss:$0 sm:$0xff] }
0x1f73   :  { %v14196_v15 = vsub.f32 %v14109_v63, %v7440_v25  ;;  %v7523_v35 = vmul.f32 0.125, %v7479_v12  ;;  %v7510_v36 = vsel %vm1073_vm6, %v7470_v41, 0.0  ;;  %v7473_v7 = vmul.f32 %v14190_v14, %v14190_v14 }
0x1f74   :  { %7511 = vadd.xlane.f32.xlu0 %v7510_v36  ;;  %v7476_v13 = vpop.xlane.xlu0 %7475 }
0x1f75   :  { %v7539_v20 = vadd.f32 1e-05, %v7523_v35  ;;  %v7522_v56 = vmul.f32 0.125, %v7476_v13  ;;  %v7519_v49 = vsel %vm1073_vm6, %v7473_v7, 0.0  ;;  %v7472_v48 = vmul.f32 %v14196_v15, %v14196_v15  ;;  %v14216_v13 = vld [vmem:[%s14484_s4 + $0xe] ss:$0 sm:$0xff] }
0x1f76   :  { %7520 = vadd.xlane.f32.xlu1 %v7519_v49  ;;  %v7485_v37 = vpop.xlane.xlu1 %7484 }
0x1f77   :  { %10604 = vrsqrt.f32 %v7539_v20  ;;  %v7538_v58 = vadd.f32 1e-05, %v7522_v56  ;;  %v7525_v22 = vmul.f32 0.125, %v7485_v37  ;;  %v7516_v42 = vsel %vm1073_vm6, %v7472_v48, 0.0 }
0x1f78   :  { %7517 = vadd.xlane.f32.xlu0 %v7516_v42  ;;  %v7482_v0 = vpop.xlane.xlu0 %7481 }
0x1f79   :  { %10606 = vrsqrt.f32 %v7538_v58  ;;  %v7541_v59 = vadd.f32 1e-05, %v7525_v22  ;;  %v7524_v51 = vmul.f32 0.125, %v7482_v0 }
0x1f7a   :  { %v7491_v46 = vpop.xlane.xlu1 %7490 }
0x1f7b   :  { %10608 = vrsqrt.f32 %v7541_v59  ;;  %v7540_v4 = vadd.f32 1e-05, %v7524_v51  ;;  %v7527_v19 = vmul.f32 0.125, %v7491_v46 }
0x1f7c   :  { %v7488_v8 = vpop.xlane.xlu0 %7487 }
0x1f7d   :  { %10610 = vrsqrt.f32 %v7540_v4  ;;  %v7543_v2 = vadd.f32 1e-05, %v7527_v19  ;;  %v7526_v9 = vmul.f32 0.125, %v7488_v8 }
0x1f7e   :  { %v7497_v18 = vpop.xlane.xlu1 %7496 }
0x1f7f   :  { %10612 = vrsqrt.f32 %v7543_v2  ;;  %v7542_v28 = vadd.f32 1e-05, %v7526_v9  ;;  %v7529_v6 = vmul.f32 0.125, %v7497_v18 }
0x1f80   :  { %v7494_v5 = vpop.xlane.xlu0 %7493 }
0x1f81   :  { %10614 = vrsqrt.f32 %v7542_v28  ;;  %v7545_v53 = vadd.f32 1e-05, %v7529_v6  ;;  %v7528_v44 = vmul.f32 0.125, %v7494_v5  ;;  %v8756_v6 = vld [vmem:[%s14489_s9 + $0x30] sm:$0xff]  ;;  %v8755_v5 = vld [vmem:[%s14489_s9 + $0x28] sm:$0xff] }
0x1f83   :  { %10616 = vrsqrt.f32 %v7545_v53  ;;  %v7544_v1 = vadd.f32 1e-05, %v7528_v44  ;;  %v8754_v53 = vld [vmem:[%s14489_s9 + $0x20] sm:$0xff] }
0x1f84   :  { %v10605_v25 = vpop.eup %10604 }
0x1f85   :  { %v7571_v41 = vmul.f32 %v10605_v25, %v14088_v29  ;;  %10618 = vrsqrt.f32 %v7544_v1 }
0x1f86   :  { %v10607_v12 = vpop.eup %10606 }
0x1f87   :  { %v7570_v35 = vmul.f32 %v10607_v12, %v14097_v39  ;;  %v7591_v7 = vmul.f32 %v14208_v54, %v7571_v41 }
0x1f88   :  { %v10609_v36 = vpop.eup %10608 }
0x1f89   :  { %v7573_v20 = vmul.f32 %v10609_v36, %v14106_v57  ;;  %v7590_v56 = vmul.f32 %v14208_v54, %v7570_v35  ;;  %v7611_v39 = vadd.f32 %v14216_v13, %v7591_v7 }
0x1f8a   :  { %v10611_v49 = vpop.eup %10610 }
0x1f8b   :  { %v7610_v48 = vadd.f32 %v14216_v13, %v7590_v56  ;;  %v7572_v29 = vmul.f32 %v10611_v49, %v14116_v32  ;;  %v7593_v58 = vmul.f32 %v14208_v54, %v7573_v20 }
0x1f8c   :  { %v10613_v37 = vpop.eup %10612 }
0x1f8d   :  { %v7575_v22 = vmul.f32 %v10613_v37, %v14123_v40  ;;  %10109 = vmatprep.mubr.msk.f32.mxu0 %vm1073_vm6, %v7610_v48  ;;  %v7592_v42 = vmul.f32 %v14208_v54, %v7572_v29  ;;  %v7613_v32 = vadd.f32 %v14216_v13, %v7593_v58 }
0x1f8e   :  { %v10615_v0 = vpop.eup %10614  ;;  %10110 = vmatmul.mubr.msk.f32.vlgmr.msra.gmra.mxu0 %vm1073_vm6, %v7611_v39 }
0x1f8f   :  { %v7612_v57 = vadd.f32 %v14216_v13, %v7592_v42  ;;  %v7574_v59 = vmul.f32 %v10615_v0, %v14129_v61  ;;  %v7595_v46 = vmul.f32 %v14208_v54, %v7575_v22 }
0x1f90   :  { %v10617_v51 = vpop.eup %10616 }
0x1f91   :  { %v7577_v4 = vmul.f32 %v10617_v51, %v14135_v3  ;;  %10112 = vmatprep.mubr.msk.f32.mxu0 %vm1073_vm6, %v7612_v57  ;;  %v7594_v40 = vmul.f32 %v14208_v54, %v7574_v59  ;;  %v7615_v61 = vadd.f32 %v14216_v13, %v7595_v46 }
0x1f92   :  { %v10619_v19 = vpop.eup %10618  ;;  %10113 = vmatmul.mubr.msk.f32.gmra.mxu0 %vm1073_vm6, %v7613_v32 }
0x1f93   :  { %v7614_v8 = vadd.f32 %v14216_v13, %v7594_v40  ;;  %v7576_v2 = vmul.f32 %v10619_v19, %v14141_v27  ;;  %v7597_v9 = vmul.f32 %v14208_v54, %v7577_v4  ;;  %v8757_v27 = vld [vmem:[%s14489_s9 + $0x38] sm:$0xff] }
0x1f94   :  { %10133 = vmatprep.subr.mxu1 %v8757_v27 }
0x1f95   :  { %10115 = vmatprep.mubr.msk.f32.mxu0 %vm1073_vm6, %v7614_v8  ;;  %v7596_v18 = vmul.f32 %v14208_v54, %v7576_v2  ;;  %v7617_v28 = vadd.f32 %v14216_v13, %v7597_v9  ;;  %10134 = vmatpush3.msra.mxu1 %v8757_v27 }
0x1f96   :  { %10116 = vmatmul.mubr.msk.f32.gmra.mxu0 %vm1073_vm6, %v7615_v61  ;;  %10135 = vmatprep.subr.mxu1 %v8756_v6 }
0x1f97   :  { %v7616_v3 = vadd.f32 %v14216_v13, %v7596_v18  ;;  %10136 = vmatpush3.msra.mxu1 %v8756_v6 }
0x1f98   :  { %10137 = vmatprep.subr.mxu1 %v8755_v5 }
0x1f99   :  { %10118 = vmatprep.mubr.msk.f32.mxu0 %vm1073_vm6, %v7616_v3  ;;  %10138 = vmatpush3.msra.mxu1 %v8755_v5 }
0x1f9a   :  { %10119 = vmatmul.mubr.msk.f32.gmra.mxu0 %vm1073_vm6, %v7617_v28  ;;  %10139 = vmatprep.subr.mxu1 %v8754_v53 }
0x1f9b   :  { %10140 = vmatpush3.msra.mxu1 %v8754_v53 }
0x1ff3   :  { %v7503_v44 = vpop.xlane.xlu1 %7502 }
0x1ff4   :  { %v7531_v1 = vmul.f32 0.125, %v7503_v44 }
0x1ff5   :  { %v7500_v25 = vpop.xlane.xlu0 %7499 }
0x1ff6   :  { %v7547_v41 = vadd.f32 1e-05, %v7531_v1  ;;  %v7530_v12 = vmul.f32 0.125, %v7500_v25 }
0x1ff7   :  { %v7509_v35 = vpop.xlane.xlu1 %7508 }
0x1ff8   :  { %10620 = vrsqrt.f32 %v7547_v41  ;;  %v7546_v36 = vadd.f32 1e-05, %v7530_v12  ;;  %v7533_v7 = vmul.f32 0.125, %v7509_v35 }
0x1ff9   :  { %v7506_v20 = vpop.xlane.xlu0 %7505 }
0x1ffa   :  { %10622 = vrsqrt.f32 %v7546_v36  ;;  %v7549_v56 = vadd.f32 1e-05, %v7533_v7  ;;  %v7532_v49 = vmul.f32 0.125, %v7506_v20 }
0x1ffb   :  { %v7515_v48 = vpop.xlane.xlu1 %7514 }
0x1ffc   :  { %10624 = vrsqrt.f32 %v7549_v56  ;;  %v7548_v29 = vadd.f32 1e-05, %v7532_v49  ;;  %v7535_v37 = vmul.f32 0.125, %v7515_v48 }
0x1ffd   :  { %v7512_v39 = vpop.xlane.xlu0 %7511 }
0x1ffe   :  { %10626 = vrsqrt.f32 %v7548_v29  ;;  %v7551_v58 = vadd.f32 1e-05, %v7535_v37  ;;  %v7534_v22 = vmul.f32 0.125, %v7512_v39 }
0x1fff   :  { %v7521_v42 = vpop.xlane.xlu1 %7520 }
0x2000   :  { %10628 = vrsqrt.f32 %v7551_v58  ;;  %v7550_v0 = vadd.f32 1e-05, %v7534_v22  ;;  %v7537_v57 = vmul.f32 0.125, %v7521_v42 }
0x2001   :  { %v7518_v59 = vpop.xlane.xlu0 %7517 }
0x2002   :  { %10630 = vrsqrt.f32 %v7550_v0  ;;  %v7553_v51 = vadd.f32 1e-05, %v7537_v57  ;;  %v7536_v32 = vmul.f32 0.125, %v7518_v59 }
0x2004   :  { %10632 = vrsqrt.f32 %v7553_v51  ;;  %v7552_v46 = vadd.f32 1e-05, %v7536_v32 }
0x2005   :  { %v10621_v4 = vpop.eup %10620 }
0x2006   :  { %v7579_v40 = vmul.f32 %v10621_v4, %v14158_v21  ;;  %10634 = vrsqrt.f32 %v7552_v46 }
0x2007   :  { %v10623_v19 = vpop.eup %10622 }
0x2008   :  { %v7578_v8 = vmul.f32 %v10623_v19, %v14161_v17  ;;  %v7599_v61 = vmul.f32 %v14208_v54, %v7579_v40 }
0x2009   :  { %v10625_v2 = vpop.eup %10624 }
0x200a   :  { %v7581_v9 = vmul.f32 %v10625_v2, %v14166_v26  ;;  %v7598_v18 = vmul.f32 %v14208_v54, %v7578_v8  ;;  %v7619_v5 = vadd.f32 %v14216_v13, %v7599_v61 }
0x200b   :  { %v10627_v3 = vpop.eup %10626 }
0x200c   :  { %v7618_v28 = vadd.f32 %v14216_v13, %v7598_v18  ;;  %v7580_v27 = vmul.f32 %v10627_v3, %v14172_v55  ;;  %v7601_v21 = vmul.f32 %v14208_v54, %v7581_v9 }
0x200d   :  { %v10629_v6 = vpop.eup %10628 }
0x200e   :  { %v7583_v53 = vmul.f32 %v10629_v6, %v14178_v10  ;;  %10121 = vmatprep.mubr.msk.f32.mxu0 %vm1073_vm6, %v7618_v28  ;;  %v7600_v17 = vmul.f32 %v14208_v54, %v7580_v27  ;;  %v7621_v55 = vadd.f32 %v14216_v13, %v7601_v21 }
0x200f   :  { %v10631_v44 = vpop.eup %10630  ;;  %10122 = vmatmul.mubr.msk.f32.gmra.mxu0 %vm1073_vm6, %v7619_v5 }
0x2010   :  { %v7620_v26 = vadd.f32 %v14216_v13, %v7600_v17  ;;  %v7582_v1 = vmul.f32 %v10631_v44, %v14184_v34  ;;  %v7603_v41 = vmul.f32 %v14208_v54, %v7583_v53 }
0x2011   :  { %v10633_v25 = vpop.eup %10632 }
0x2012   :  { %v7585_v12 = vmul.f32 %v10633_v25, %v14190_v14  ;;  %10124 = vmatprep.mubr.msk.f32.mxu0 %vm1073_vm6, %v7620_v26  ;;  %v7602_v10 = vmul.f32 %v14208_v54, %v7582_v1  ;;  %v7623_v34 = vadd.f32 %v14216_v13, %v7603_v41 }
0x2013   :  { %v10635_v35 = vpop.eup %10634  ;;  %10125 = vmatmul.mubr.msk.f32.gmra.mxu0 %vm1073_vm6, %v7621_v55 }
0x2014   :  { %v7622_v36 = vadd.f32 %v14216_v13, %v7602_v10  ;;  %v7584_v7 = vmul.f32 %v10635_v35, %v14196_v15  ;;  %v7605_v20 = vmul.f32 %v14208_v54, %v7585_v12  ;;  %v14294_v15 = vld [vmem:[%s14484_s4 + $0xf] ss:$0 sm:$0xff] }
0x2016   :  { %10127 = vmatprep.mubr.msk.f32.mxu0 %vm1073_vm6, %v7622_v36  ;;  %v7604_v56 = vmul.f32 %v14208_v54, %v7584_v7  ;;  %v7625_v49 = vadd.f32 %v14216_v13, %v7605_v20 }
0x2017   :  { %10128 = vmatmul.mubr.msk.f32.gmra.mxu0 %vm1073_vm6, %v7623_v34 }
0x2018   :  { %v7624_v14 = vadd.f32 %v14216_v13, %v7604_v56 }
0x201a   :  { %10130 = vmatprep.mubr.msk.f32.mxu0 %vm1073_vm6, %v7624_v14 }
0x201b   :  { %10131 = vmatmul.mubr.msk.f32.gmra.mxu0 %vm1073_vm6, %v7625_v49 }
0x204e   :  { %v10111_v48 = vpop.f32.mrf.mxu0 }
0x204f   :  { %v14297_v29 = vadd.f32 %v10111_v48, %v14294_v15 }
0x2050   :  { %v7746_v54 = vpop.f32.mrf.mxu0 }
0x2051   :  { %v7842_v37 = vmul.f32 0.044715, %v14297_v29  ;;  %v14301_v39 = vadd.f32 %v14294_v15, %v7746_v54 }
0x2052   :  { %v10114_v13 = vpop.f32.mrf.mxu0 }
0x2053   :  { %v7858_v58 = vmul.f32 %v7842_v37, %v14297_v29  ;;  %v7841_v22 = vmul.f32 0.044715, %v14301_v39  ;;  %v14306_v42 = vadd.f32 %v10114_v13, %v14294_v15 }
0x2054   :  { %v7756_v0 = vpop.f32.mrf.mxu0 }
0x2055   :  { %v7874_v57 = vmul.f32 %v7858_v58, %v14297_v29  ;;  %v7857_v59 = vmul.f32 %v7841_v22, %v14301_v39  ;;  %v7844_v51 = vmul.f32 0.044715, %v14306_v42  ;;  %v14312_v32 = vadd.f32 %v14294_v15, %v7756_v0 }
0x2056   :  { %v10117_v46 = vpop.f32.mrf.mxu0 }
0x2057   :  { %v7890_v4 = vadd.f32 %v7874_v57, %v14297_v29  ;;  %v7873_v40 = vmul.f32 %v7857_v59, %v14301_v39  ;;  %v7860_v19 = vmul.f32 %v7844_v51, %v14306_v42  ;;  %v14318_v8 = vadd.f32 %v10117_v46, %v14294_v15 }
0x2058   :  { %v7843_v2 = vmul.f32 0.044715, %v14312_v32  ;;  %v7766_v61 = vpop.f32.mrf.mxu0 }
0x2059   :  { %v7906_v9 = vmul.f32 0.7978846, %v7890_v4  ;;  %v7889_v18 = vadd.f32 %v7873_v40, %v14301_v39  ;;  %v7876_v3 = vmul.f32 %v7860_v19, %v14306_v42  ;;  %v7846_v27 = vmul.f32 0.044715, %v14318_v8 }
0x205a   :  { %v7859_v28 = vmul.f32 %v7843_v2, %v14312_v32  ;;  %v7767_v6 = vadd.f32 %v14294_v15, %v7766_v61  ;;  %v10120_v5 = vpop.f32.mrf.mxu0  ;;  %v7825_v19 = vmul.f32 0.5, %v14301_v39  ;;  %v7826_v61 = vmul.f32 0.5, %v14297_v29 }
0x205b   :  { %10636 = vtanh.f32 %v7906_v9  ;;  %v7892_v21 = vadd.f32 %v7876_v3, %v14306_v42  ;;  %v14328_v53 = vadd.f32 %v10120_v5, %v14294_v15  ;;  %v7905_v17 = vmul.f32 0.7978846, %v7889_v18 }
0x205c   :  { %v7875_v44 = vmul.f32 %v7859_v28, %v14312_v32  ;;  %v7862_v26 = vmul.f32 %v7846_v27, %v14318_v8  ;;  %v7845_v1 = vmul.f32 0.044715, %v7767_v6  ;;  %v7776_v25 = vpop.f32.mrf.mxu0  ;;  %v7827_v27 = vmul.f32 0.5, %v14312_v32 }
0x205d   :  { %v7908_v55 = vmul.f32 0.7978846, %v7892_v21  ;;  %v7848_v41 = vmul.f32 0.044715, %v14328_v53  ;;  %v7777_v12 = vadd.f32 %v14294_v15, %v7776_v25  ;;  %10638 = vtanh.f32 %v7905_v17 }
0x205e   :  { %v7891_v10 = vadd.f32 %v7875_v44, %v14312_v32  ;;  %v7878_v35 = vmul.f32 %v7862_v26, %v14318_v8  ;;  %v7861_v36 = vmul.f32 %v7845_v1, %v7767_v6  ;;  %v7828_v17 = vmul.f32 0.5, %v14306_v42 }
0x205f   :  { %10640 = vtanh.f32 %v7908_v55  ;;  %v7864_v7 = vmul.f32 %v7848_v41, %v14328_v53  ;;  %v7847_v34 = vmul.f32 0.044715, %v7777_v12  ;;  %v7829_v29 = vmul.f32 0.5, %v7767_v6 }
0x2060   :  { %v7894_v20 = vadd.f32 %v7878_v35, %v14318_v8  ;;  %v7877_v56 = vmul.f32 %v7861_v36, %v7767_v6  ;;  %v7907_v14 = vmul.f32 0.7978846, %v7891_v10  ;;  %v7830_v41 = vmul.f32 0.5, %v14318_v8 }
0x2061   :  { %v7880_v49 = vmul.f32 %v7864_v7, %v14328_v53  ;;  %v7863_v48 = vmul.f32 %v7847_v34, %v7777_v12  ;;  %v7831_v36 = vmul.f32 0.5, %v7777_v12  ;;  %v7832_v34 = vmul.f32 0.5, %v14328_v53 }
0x2062   :  { %v7910_v54 = vmul.f32 0.7978846, %v7894_v20  ;;  %v7893_v37 = vadd.f32 %v7877_v56, %v7767_v6  ;;  %10642 = vtanh.f32 %v7907_v14 }
0x2063   :  { %v7896_v13 = vadd.f32 %v7880_v49, %v14328_v53  ;;  %v7879_v58 = vmul.f32 %v7863_v48, %v7777_v12 }
0x2064   :  { %10644 = vtanh.f32 %v7910_v54  ;;  %v7909_v22 = vmul.f32 0.7978846, %v7893_v37 }
0x2065   :  { %v7912_v0 = vmul.f32 0.7978846, %v7896_v13  ;;  %v7895_v57 = vadd.f32 %v7879_v58, %v7777_v12 }
0x2066   :  { %10646 = vtanh.f32 %v7909_v22 }
0x2067   :  { %10648 = vtanh.f32 %v7912_v0  ;;  %v7911_v59 = vmul.f32 0.7978846, %v7895_v57 }
0x2068   :  { %v10637_v51 = vpop.eup %10636 }
0x2069   :  { %10650 = vtanh.f32 %v7911_v59  ;;  %v7938_v4 = vadd.f32 1.0, %v10637_v51 }
0x206a   :  { %v10639_v46 = vpop.eup %10638 }
0x206b   :  { %v7937_v2 = vadd.f32 1.0, %v10639_v46  ;;  %v7954_v3 = vmul.f32 %v7938_v4, %v7826_v61 }
0x206c   :  { %v10641_v40 = vpop.eup %10640 }
0x206d   :  { %v7953_v9 = vmul.f32 %v7937_v2, %v7825_v19  ;;  %v7940_v28 = vadd.f32 1.0, %v10641_v40 }
0x206f   :  { %v10643_v18 = vpop.eup %10642  ;;  %10141 = vmatprep.mubr.msk.f32.mxu1 %vm680_vm3, %v7953_v9  ;;  %v7956_v39 = vmul.f32 %v7940_v28, %v7828_v17 }
0x2070   :  { %v7939_v5 = vadd.f32 1.0, %v10643_v18  ;;  %10142 = vmatmul.mubr.msk.f32.vlgmr.msra.gmra.mxu1 %vm680_vm3, %v7954_v3 }
0x2071   :  { %v10645_v21 = vpop.eup %10644 }
0x2072   :  { %v7955_v44 = vmul.f32 %v7939_v5, %v7827_v27  ;;  %v7942_v1 = vadd.f32 1.0, %v10645_v21 }
0x2073   :  { %v10647_v26 = vpop.eup %10646 }
0x2074   :  { %v10649_v25 = vpop.eup %10648  ;;  %10144 = vmatprep.mubr.msk.f32.mxu1 %vm680_vm3, %v7955_v44  ;;  %v7941_v55 = vadd.f32 1.0, %v10647_v26  ;;  %v7958_v35 = vmul.f32 %v7942_v1, %v7830_v41 }
0x2075   :  { %10145 = vmatmul.mubr.msk.f32.gmra.mxu1 %vm680_vm3, %v7956_v39  ;;  %v7944_v7 = vadd.f32 1.0, %v10649_v25 }
0x2076   :  { %v10651_v32 = vpop.eup %10650  ;;  %v7957_v10 = vmul.f32 %v7941_v55, %v7829_v29 }
0x2077   :  { %v7943_v42 = vadd.f32 1.0, %v10651_v32  ;;  %v7960_v6 = vmul.f32 %v7944_v7, %v7832_v34 }
0x2078   :  { %10147 = vmatprep.mubr.msk.f32.mxu1 %vm680_vm3, %v7957_v10 }
0x2079   :  { %10148 = vmatmul.mubr.msk.f32.gmra.mxu1 %vm680_vm3, %v7958_v35  ;;  %v7959_v20 = vmul.f32 %v7943_v42, %v7831_v36 }
0x207b   :  { %10150 = vmatprep.mubr.msk.f32.mxu1 %vm680_vm3, %v7959_v20 }
0x207d   :  { %10151 = vmatmul.mubr.msk.f32.gmra.mxu1 %vm680_vm3, %v7960_v6 }
0x20cf   :  { %v10123_v8 = vpop.f32.mrf.mxu0 }
0x20d0   :  { %v14355_v56 = vadd.f32 %v10123_v8, %v14294_v15 }
0x20d1   :  { %v7786_v14 = vpop.f32.mrf.mxu0 }
0x20d2   :  { %v7850_v12 = vmul.f32 0.044715, %v14355_v56  ;;  %v14359_v49 = vadd.f32 %v14294_v15, %v7786_v14 }
0x20d3   :  { %v10126_v48 = vpop.f32.mrf.mxu0 }
0x20d4   :  { %v7866_v53 = vmul.f32 %v7850_v12, %v14355_v56  ;;  %v7849_v54 = vmul.f32 0.044715, %v14359_v49  ;;  %v14364_v37 = vadd.f32 %v10126_v48, %v14294_v15 }
0x20d5   :  { %v7796_v13 = vpop.f32.mrf.mxu0 }
0x20d6   :  { %v7882_v58 = vmul.f32 %v7866_v53, %v14355_v56  ;;  %v7865_v22 = vmul.f32 %v7849_v54, %v14359_v49  ;;  %v7852_v0 = vmul.f32 0.044715, %v14364_v37  ;;  %v14370_v57 = vadd.f32 %v14294_v15, %v7796_v13 }
0x20d7   :  { %v10129_v59 = vpop.f32.mrf.mxu0 }
0x20d8   :  { %v7898_v51 = vadd.f32 %v7882_v58, %v14355_v56  ;;  %v7881_v46 = vmul.f32 %v7865_v22, %v14359_v49  ;;  %v7868_v4 = vmul.f32 %v7852_v0, %v14364_v37  ;;  %v14376_v40 = vadd.f32 %v10129_v59, %v14294_v15 }
0x20d9   :  { %v7851_v19 = vmul.f32 0.044715, %v14370_v57  ;;  %v7806_v2 = vpop.f32.mrf.mxu0 }
0x20da   :  { %v7914_v61 = vmul.f32 0.7978846, %v7898_v51  ;;  %v7897_v9 = vadd.f32 %v7881_v46, %v14359_v49  ;;  %v7884_v18 = vmul.f32 %v7868_v4, %v14364_v37  ;;  %v7854_v28 = vmul.f32 0.044715, %v14376_v40 }
0x20db   :  { %v7867_v3 = vmul.f32 %v7851_v19, %v14370_v57  ;;  %v7807_v27 = vadd.f32 %v14294_v15, %v7806_v2  ;;  %v10132_v5 = vpop.f32.mrf.mxu0  ;;  %v7833_v46 = vmul.f32 0.5, %v14359_v49  ;;  %v7834_v19 = vmul.f32 0.5, %v14355_v56 }
0x20dc   :  { %10652 = vtanh.f32 %v7914_v61  ;;  %v7900_v21 = vadd.f32 %v7884_v18, %v14364_v37  ;;  %v14386_v17 = vadd.f32 %v10132_v5, %v14294_v15  ;;  %v7913_v44 = vmul.f32 0.7978846, %v7897_v9 }
0x20dd   :  { %v7883_v26 = vmul.f32 %v7867_v3, %v14370_v57  ;;  %v7870_v39 = vmul.f32 %v7854_v28, %v14376_v40  ;;  %v7853_v1 = vmul.f32 0.044715, %v7807_v27  ;;  %v7816_v25 = vpop.f32.mrf.mxu0  ;;  %v7835_v3 = vmul.f32 0.5, %v14370_v57 }
0x20de   :  { %v7916_v29 = vmul.f32 0.7978846, %v7900_v21  ;;  %v7856_v55 = vmul.f32 0.044715, %v14386_v17  ;;  %v7817_v41 = vadd.f32 %v14294_v15, %v7816_v25  ;;  %10654 = vtanh.f32 %v7913_v44 }
0x20df   :  { %v7899_v32 = vadd.f32 %v7883_v26, %v14370_v57  ;;  %v7886_v10 = vmul.f32 %v7870_v39, %v14376_v40  ;;  %v7869_v35 = vmul.f32 %v7853_v1, %v7807_v27  ;;  %v7836_v21 = vmul.f32 0.5, %v14364_v37 }
0x20e0   :  { %10656 = vtanh.f32 %v7916_v29  ;;  %v7872_v36 = vmul.f32 %v7856_v55, %v14386_v17  ;;  %v7855_v42 = vmul.f32 0.044715, %v7817_v41  ;;  %v7837_v56 = vmul.f32 0.5, %v7807_v27 }
0x20e1   :  { %v7902_v7 = vadd.f32 %v7886_v10, %v14376_v40  ;;  %v7885_v34 = vmul.f32 %v7869_v35, %v7807_v27  ;;  %v7915_v20 = vmul.f32 0.7978846, %v7899_v32  ;;  %v7838_v29 = vmul.f32 0.5, %v14376_v40 }
0x20e2   :  { %v7888_v6 = vmul.f32 %v7872_v36, %v14386_v17  ;;  %v7871_v8 = vmul.f32 %v7855_v42, %v7817_v41  ;;  %v7839_v10 = vmul.f32 0.5, %v7817_v41  ;;  %v7840_v36 = vmul.f32 0.5, %v14386_v17 }
0x20e3   :  { %v7918_v14 = vmul.f32 0.7978846, %v7902_v7  ;;  %v7901_v12 = vadd.f32 %v7885_v34, %v7807_v27  ;;  %10658 = vtanh.f32 %v7915_v20  ;;  %v10715_v40 = vmov 0.0  }
0x20e4   :  { %v7904_v15 = vadd.f32 %v7888_v6, %v14386_v17  ;;  %v7887_v48 = vmul.f32 %v7871_v8, %v7817_v41  ;;  %10165 = vmatprep.subr.mxu0 %v10715_v40  ;;  %10197 = vmatprep.mubr.msk.f32.mxu0 %vm10716_vm1, %v10715_v40 }
0x20e5   :  { %10660 = vtanh.f32 %v7918_v14  ;;  %v7917_v53 = vmul.f32 0.7978846, %v7901_v12 }
0x20e6   :  { %v7920_v54 = vmul.f32 0.7978846, %v7904_v15  ;;  %v7903_v13 = vadd.f32 %v7887_v48, %v7817_v41 }
0x20e7   :  { %10662 = vtanh.f32 %v7917_v53 }
0x20e8   :  { %10664 = vtanh.f32 %v7920_v54  ;;  %v7919_v58 = vmul.f32 0.7978846, %v7903_v13 }
0x20e9   :  { %v10653_v22 = vpop.eup %10652 }
0x20ea   :  { %10666 = vtanh.f32 %v7919_v58  ;;  %v7946_v59 = vadd.f32 1.0, %v10653_v22  ;;  %v8758_v58 = vld [vmem:[%s14484_s4 + $0x10] ss:$0 sm:$0xff] }
0x20eb   :  { %v10655_v0 = vpop.eup %10654 }
0x20ec   :  { %v7945_v4 = vadd.f32 1.0, %v10655_v0  ;;  %v7962_v9 = vmul.f32 %v7946_v59, %v7834_v19 }
0x20ed   :  { %v10657_v51 = vpop.eup %10656 }
0x20ee   :  { %v7961_v2 = vmul.f32 %v7945_v4, %v7833_v46  ;;  %v7948_v18 = vadd.f32 1.0, %v10657_v51 }
0x20f0   :  { %v10659_v61 = vpop.eup %10658  ;;  %10153 = vmatprep.mubr.msk.f32.mxu1 %vm680_vm3, %v7961_v2  ;;  %v7964_v49 = vmul.f32 %v7948_v18, %v7836_v21 }
0x20f1   :  { %v7947_v28 = vadd.f32 1.0, %v10659_v61  ;;  %10154 = vmatmul.mubr.msk.f32.gmra.mxu1 %vm680_vm3, %v7962_v9 }
0x20f2   :  { %v10661_v5 = vpop.eup %10660 }
0x20f3   :  { %v7963_v44 = vmul.f32 %v7947_v28, %v7835_v3  ;;  %v7950_v39 = vadd.f32 1.0, %v10661_v5 }
0x20f4   :  { %v10663_v26 = vpop.eup %10662 }
0x20f5   :  { %v10665_v1 = vpop.eup %10664  ;;  %10156 = vmatprep.mubr.msk.f32.mxu1 %vm680_vm3, %v7963_v44  ;;  %v7949_v25 = vadd.f32 1.0, %v10663_v26  ;;  %v7966_v32 = vmul.f32 %v7950_v39, %v7838_v29 }
0x20f6   :  { %10157 = vmatmul.mubr.msk.f32.gmra.mxu1 %vm680_vm3, %v7964_v49  ;;  %v7952_v35 = vadd.f32 1.0, %v10665_v1 }
0x20f7   :  { %v10667_v57 = vpop.eup %10666  ;;  %v7965_v55 = vmul.f32 %v7949_v25, %v7837_v56 }
0x20f8   :  { %v7951_v37 = vadd.f32 1.0, %v10667_v57  ;;  %v7968_v27 = vmul.f32 %v7952_v35, %v7840_v36 }
0x20f9   :  { %10159 = vmatprep.mubr.msk.f32.mxu1 %vm680_vm3, %v7965_v55 }
0x20fa   :  { %10160 = vmatmul.mubr.msk.f32.gmra.mxu1 %vm680_vm3, %v7966_v32  ;;  %v7967_v42 = vmul.f32 %v7951_v37, %v7839_v10 }
0x20fc   :  { %10162 = vmatprep.mubr.msk.f32.mxu1 %vm680_vm3, %v7967_v42 }
0x20fe   :  { %10163 = vmatmul.mubr.msk.f32.gmra.mxu1 %vm680_vm3, %v7968_v27 }
0x2130   :  { %v14414_v41 = vpop.f32.mrf.mxu1 }
0x2132   :  { %v14416_v7 = vpop.f32.mrf.mxu1 }
0x2133   :  { %v8093_v56 = vadd.f32 %v8758_v58, %v14416_v7 }
0x2135   :  { %v10146_v34 = vpop.f32.mrf.mxu1 }
0x2137   :  { %v14418_v17 = vpop.f32.mrf.mxu1 }
0x2138   :  { %v8103_v39 = vadd.f32 %v8758_v58, %v14418_v17 }
0x2139   :  { %v10149_v20 = vpop.f32.mrf.mxu1 }
0x213a   :  { %v8173_v1 = vadd.f32 %v8103_v39, %v13995_v24  ;;  %v8187_v24 = vld [vmem:[%s14491_s11] sm:$0xff] }
0x213b   :  { %v8112_v6 = vpop.f32.mrf.mxu1 }
0x213c   :  { %v8113_v26 = vadd.f32 %v8758_v58, %v8112_v6 }
0x213d   :  { %v10152_v8 = vpop.f32.mrf.mxu1 }
0x213e   :  { %v8175_v49 = vadd.f32 %v8113_v26, %v14017_v50 }
0x213f   :  { %v8122_v14 = vpop.f32.mrf.mxu1 }
0x2140   :  { %v8123_v21 = vadd.f32 %v8758_v58, %v8122_v14 }
0x2142   :  { %v8177_v44 = vadd.f32 %v8123_v21, %v14023_v43 }
0x21b1   :  { %v10155_v12 = vpop.f32.mrf.mxu1 }
0x21b3   :  { %v8132_v15 = vpop.f32.mrf.mxu1 }
0x21b4   :  { %v8133_v28 = vadd.f32 %v8758_v58, %v8132_v15 }
0x21b6   :  { %v10158_v48 = vpop.f32.mrf.mxu1  ;;  %v8179_v5 = vadd.f32 %v8133_v28, %v14064_v23 }
0x21b8   :  { %v8142_v53 = vpop.f32.mrf.mxu1 }
0x21b9   :  { %v8143_v18 = vadd.f32 %v8758_v58, %v8142_v53 }
0x21ba   :  { %v10161_v54 = vpop.f32.mrf.mxu1 }
0x21bb   :  { %v8158_v4 = vadd.f32 %v10161_v54, %v8758_v58  ;;  %v8181_v3 = vadd.f32 %v8143_v18, %v14076_v47 }
0x21bc   :  { %v8152_v13 = vpop.f32.mrf.mxu1 }
0x21bd   :  { %v8184_v2 = vadd.f32 %v8158_v4, %v14082_v16  ;;  %v8153_v61 = vadd.f32 %v8758_v58, %v8152_v13  ;;  %v8138_v16 = vadd.f32 %v10155_v12, %v8758_v58 }
0x21be   :  { %v10164_v22 = vpop.f32.mrf.mxu1 }
0x21bf   :  { %v8168_v0 = vadd.f32 %v10164_v22, %v8758_v58  ;;  %v8183_v9 = vadd.f32 %v8153_v61, %v14091_v38  ;;  %v8180_v38 = vadd.f32 %v8138_v16, %v14060_v52  ;;  %v8118_v52 = vadd.f32 %v10149_v20, %v8758_v58 }
0x21c0   :  { %v8162_v59 = vpop.f32.mrf.mxu1 }
0x21c1   :  { %v8186_v51 = vadd.f32 %v8168_v0, %v14100_v33  ;;  %v8163_v46 = vadd.f32 %v8758_v58, %v8162_v59  ;;  %v8148_v33 = vadd.f32 %v10158_v48, %v8758_v58  ;;  %v8176_v23 = vadd.f32 %v8118_v52, %v13988_v11 }
0x21c2   :  { %v8098_v11 = vadd.f32 %v14414_v41, %v8758_v58 }
0x21c3   :  { %10166 = vmatpush3.xpose.msk.msra.mxu0 %vm1073_vm6, %v8186_v51  ;;  %v8185_v19 = vadd.f32 %v8163_v46, %v14109_v63  ;;  %v8182_v63 = vadd.f32 %v8148_v33, %v14070_v60  ;;  %v8128_v60 = vadd.f32 %v10152_v8, %v8758_v58 }
0x21c4   :  { %10167 = vmatprep.subr.mxu0 %v10715_v40  ;;  %v8172_v50 = vadd.f32 %v8098_v11, %v13976_v62 }
0x21c5   :  { %v8178_v47 = vadd.f32 %v8128_v60, %v14002_v45  ;;  %v8108_v45 = vadd.f32 %v10146_v34, %v8758_v58 }
0x21c7   :  { %10168 = vmatpush3.xpose.msk.msra.mxu0 %vm1073_vm6, %v8185_v19  ;;  %v8174_v43 = vadd.f32 %v8108_v45, %v14007_v30  ;;  %v8171_v30 = vadd.f32 %v8093_v56, %v13982_v31 }
0x21c8   :  { %10169 = vmatprep.subr.mxu0 %v10715_v40 }
0x21cb   :  { %10170 = vmatpush3.xpose.msk.msra.mxu0 %vm1073_vm6, %v8184_v2 }
0x21cc   :  { %10171 = vmatprep.subr.mxu0 %v10715_v40 }
0x21cf   :  { %10172 = vmatpush3.xpose.msk.msra.mxu0 %vm1073_vm6, %v8183_v9 }
0x21d0   :  { %10173 = vmatprep.subr.mxu0 %v10715_v40 }
0x21d3   :  { %10174 = vmatpush3.xpose.msk.msra.mxu0 %vm1073_vm6, %v8182_v63 }
0x21d4   :  { %10175 = vmatprep.subr.mxu0 %v10715_v40 }
0x21d7   :  { %10176 = vmatpush3.xpose.msk.msra.mxu0 %vm1073_vm6, %v8181_v3 }
0x21d8   :  { %10177 = vmatprep.subr.mxu0 %v10715_v40 }
0x21db   :  { %10178 = vmatpush3.xpose.msk.msra.mxu0 %vm1073_vm6, %v8180_v38 }
0x21dc   :  { %10179 = vmatprep.subr.mxu0 %v10715_v40 }
0x21df   :  { %10180 = vmatpush3.xpose.msk.msra.mxu0 %vm1073_vm6, %v8179_v5 }
0x21e0   :  { %10181 = vmatprep.subr.mxu0 %v10715_v40 }
0x21e3   :  { %10182 = vmatpush3.xpose.msk.msra.mxu0 %vm1073_vm6, %v8178_v47 }
0x21e4   :  { %10183 = vmatprep.subr.mxu0 %v10715_v40 }
0x21e7   :  { %10184 = vmatpush3.xpose.msk.msra.mxu0 %vm1073_vm6, %v8177_v44 }
0x21e8   :  { %10185 = vmatprep.subr.mxu0 %v10715_v40 }
0x21eb   :  { %10186 = vmatpush3.xpose.msk.msra.mxu0 %vm1073_vm6, %v8176_v23 }
0x21ec   :  { %10187 = vmatprep.subr.mxu0 %v10715_v40 }
0x21ef   :  { %10188 = vmatpush3.xpose.msk.msra.mxu0 %vm1073_vm6, %v8175_v49 }
0x21f0   :  { %10189 = vmatprep.subr.mxu0 %v10715_v40 }
0x21f3   :  { %10190 = vmatpush3.xpose.msk.msra.mxu0 %vm1073_vm6, %v8174_v43 }
0x21f4   :  { %10191 = vmatprep.subr.mxu0 %v10715_v40 }
0x21f7   :  { %10192 = vmatpush3.xpose.msk.msra.mxu0 %vm1073_vm6, %v8173_v1 }
0x21f8   :  { %10193 = vmatprep.subr.mxu0 %v10715_v40 }
0x21fb   :  { %10194 = vmatpush3.xpose.msk.msra.mxu0 %vm1073_vm6, %v8172_v50 }
0x21fc   :  { %10195 = vmatprep.subr.mxu0 %v10715_v40 }
0x21ff   :  { %10196 = vmatpush3.xpose.msk.msra.mxu0 %vm1073_vm6, %v8171_v30 }
0x2202   :  { %10198 = vmatmul.mubr.msk.f32.vlgmr.msra.gmra.mxu0 %vm1073_vm6, %v8187_v24 }
0x22c2   :  { %v8305_v25 = vpop.f32.mrf.mxu0 }
0x22c3   :  { %8309 = vst [vmem:[%s14492_s12] sm:$0xff] %v8305_v25 }
0x22c4   :  { %v10199_v62 = vpop.f32.mrf.mxu0 }
0x22c5   :  { %8314 = vsyncpa [#allocation3], 1 }

</bundles_post_ra>
